<compile_context>
chip_gen: v5e
topology: v5e:2x2
jax: 0.10.0
libtpu: 0.0.40
codegen_flags: <defaults>
</compile_context>

<pallas_src>
import functools
from typing import Dict, Optional

import numpy as np
import jax
import jax.numpy as jnp
from jax.experimental import pallas as pl
from jax.experimental.pallas import tpu as pltpu


_TI_MAX = 512          # sublane (row) tile
_TJ_MAX = 2048         # lane (comparison-column) tile
_PAD_SENTINEL = float(np.finfo(np.float32).max)   # > any real logit


def _round_up(x: int, m: int) -> int:
    return ((x + m - 1) // m) * m


def _metrics_kernel(npos_ref,                                   # scalar prefetch (SMEM)
                    lg_col_ref, y_col_ref, lg_row_ref, y_row_ref,
                    auroc_ref, auprc_ref,
                    row_a, row_b, row_e, acc_auroc, acc_ap,
                    *, n_i: int, n_j: int, n_valid: float):
    """Tiled per-class AUROC + AUPRC.

    Grid = (class, i_block, j_block); j (reduction over comparison columns)
    is innermost.

    npos_ref   : (C,) int32 in SMEM — per-class positive count (prefetched)
    lg_col_ref : (1, TI, 1) logits for rows i of this class (sublane axis)
    y_col_ref  : (1, TI, 1) labels for rows i (float 0/1, padded with 0)
    lg_row_ref : (1, 1, TJ) logits for cols j (lane axis; padding = f32 max)
    y_row_ref  : (1, 1, TJ) labels for cols j
    auroc_ref  : (1, 1, 1)  output (written on the last grid step per class)
    auprc_ref  : (1, 1, 1)  output
    row_*      : (TI, 1)    per-row partial sums (accumulated over j blocks)
    acc_*      : (1, 1)     per-class scalar accumulators
    """
    ci = pl.program_id(0)
    ib = pl.program_id(1)
    jb = pl.program_id(2)

    # -------- per-class init --------
    @pl.when(jnp.logical_and(ib == 0, jb == 0))
    def _init_class():
        acc_auroc[...] = jnp.zeros_like(acc_auroc)
        acc_ap[...] = jnp.zeros_like(acc_ap)

    # -------- per-i-block init (start of each j sweep) --------
    @pl.when(jb == 0)
    def _init_rows():
        row_a[...] = jnp.zeros_like(row_a)
        row_b[...] = jnp.zeros_like(row_b)
        row_e[...] = jnp.zeros_like(row_e)

    s_col = lg_col_ref[0]        # (TI, 1)  raw logits (sigmoid is monotone)
    y_col = y_col_ref[0]         # (TI, 1)
    s_row = lg_row_ref[0]        # (1, TJ)
    y_row = y_row_ref[0]         # (1, TJ)

    one_minus_y = 1.0 - y_row    # (1, TJ) — tiny, computed once per block

    # Pairwise comparison block (TI, TJ); only three row sums are kept.
    # Padded columns carry the f32-max sentinel, so gt/eq are False against
    # every real sample and padding contributes nothing.
    gt_f = (s_col > s_row).astype(jnp.float32)          # 0/1
    eq_w = jnp.where(s_col == s_row, one_minus_y, 0.0)  # (1-y_j) on ties

    row_a[...] += jnp.sum(gt_f, axis=1, keepdims=True)           # sum_j gt
    row_b[...] += jnp.sum(gt_f * y_row, axis=1, keepdims=True)   # sum_j y_j*gt
    row_e[...] += jnp.sum(eq_w, axis=1, keepdims=True)           # sum_j (1-y_j)*eq

    # -------- finalize this i-block after the full j sweep --------
    @pl.when(jb == n_j - 1)
    def _finish_rows():
        n_pos = npos_ref[ci].astype(jnp.float32)
        a = row_a[...]                       # sum_j [s_i > s_j]
        b = row_b[...]                       # sum_j y_j [s_i > s_j]
        e = row_e[...]                       # sum_j (1-y_j) [s_i == s_j]

        # AUROC (Mann-Whitney): sum_i y_i * sum_j (1-y_j)*(gt + 0.5*eq)
        r = (a - b) + 0.5 * e
        acc_auroc[...] += jnp.sum(y_col * r, keepdims=True)

        # AP: precision at each positive's threshold (>=  ==  1 - gt).
        tp = n_pos - b                          # sum_j y_j [s_j >= s_i]
        tot = jnp.maximum(n_valid - a, 1.0)     # sum_j [s_j >= s_i]  (>= 1)
        acc_ap[...] += jnp.sum(y_col * (tp / tot), keepdims=True)

    # -------- final per-class write --------
    @pl.when(jnp.logical_and(ib == n_i - 1, jb == n_j - 1))
    def _finish_class():
        n_pos = npos_ref[ci].astype(jnp.float32)
        n_neg = n_valid - n_pos
        denom = n_pos * n_neg
        auroc_ref[0] = jnp.where(denom > 0.0,
                                 acc_auroc[...] / jnp.maximum(denom, 1.0),
                                 jnp.nan)
        auprc_ref[0] = jnp.where(n_pos > 0.0,
                                 acc_ap[...] / jnp.maximum(n_pos, 1.0),
                                 jnp.nan)


def _run_metrics_kernel(logits: jnp.ndarray, labels: jnp.ndarray):
    """logits, labels: (M, C).  Returns (auroc[C], auprc[C]) float32."""
    m, c = logits.shape

    # Tile selection: both TI and TJ divide the padded sample count.
    # TI*TJ = 1M f32 pairwise elements per step (fits v7x 64 MiB VMEM with
    # several materialized temporaries; review-recommended 512x2048 point).
    m_pad = _round_up(max(m, 1), 512)
    if m_pad > _TJ_MAX:
        m_pad = _round_up(m_pad, _TJ_MAX)
        tj = _TJ_MAX
    else:
        tj = m_pad
    ti = min(_TI_MAX, m_pad)
    assert m_pad % ti == 0 and m_pad % tj == 0
    n_i = m_pad // ti
    n_j = m_pad // tj

    lg = jnp.transpose(logits).astype(jnp.float32)     # (C, M)
    yy = jnp.transpose(labels).astype(jnp.float32)     # (C, M)
    if m_pad != m:
        pad = m_pad - m
        # Sentinel padding: no real logit compares > or == against it.
        lg = jnp.pad(lg, ((0, 0), (0, pad)), constant_values=_PAD_SENTINEL)
        yy = jnp.pad(yy, ((0, 0), (0, pad)))           # labels padded with 0

    # Per-class positive counts, computed once in XLA and prefetched to SMEM.
    npos = jnp.sum(yy, axis=1).astype(jnp.int32)       # (C,)

    lg_row = lg.reshape(c, 1, m_pad)
    y_row = yy.reshape(c, 1, m_pad)
    lg_col = lg.reshape(c, m_pad, 1)
    y_col = yy.reshape(c, m_pad, 1)

    kernel = functools.partial(_metrics_kernel, n_i=n_i, n_j=n_j,
                               n_valid=float(m))

    auroc, auprc = pl.pallas_call(
        kernel,
        out_shape=(jax.ShapeDtypeStruct((c, 1, 1), jnp.float32),
                   jax.ShapeDtypeStruct((c, 1, 1), jnp.float32)),
        grid_spec=pltpu.PrefetchScalarGridSpec(
            num_scalar_prefetch=1,          # npos -> SMEM
            grid=(c, n_i, n_j),
            in_specs=[
                pl.BlockSpec((1, ti, 1), lambda ci, ib, jb, npos: (ci, ib, 0)),
                pl.BlockSpec((1, ti, 1), lambda ci, ib, jb, npos: (ci, ib, 0)),
                pl.BlockSpec((1, 1, tj), lambda ci, ib, jb, npos: (ci, 0, jb)),
                pl.BlockSpec((1, 1, tj), lambda ci, ib, jb, npos: (ci, 0, jb)),
            ],
            out_specs=[
                pl.BlockSpec((1, 1, 1), lambda ci, ib, jb, npos: (ci, 0, 0)),
                pl.BlockSpec((1, 1, 1), lambda ci, ib, jb, npos: (ci, 0, 0)),
            ],
            scratch_shapes=[
                pltpu.VMEM((ti, 1), jnp.float32),   # row_a
                pltpu.VMEM((ti, 1), jnp.float32),   # row_b
                pltpu.VMEM((ti, 1), jnp.float32),   # row_e
                pltpu.VMEM((1, 1), jnp.float32),    # acc_auroc
                pltpu.VMEM((1, 1), jnp.float32),    # acc_ap
            ],
        ),
        compiler_params=pltpu.CompilerParams(
            # TODO(synk): pltpu.CORE_PARALLEL on the class axis for v7x.
            dimension_semantics=("parallel", "arbitrary", "arbitrary"),
            vmem_limit_bytes=48 * 1024 * 1024,
        ),
    )(npos, lg_col, y_col, lg_row, y_row)
    return auroc.reshape(c), auprc.reshape(c)


class ClassificationMetricsPallas:
    """JAX/Pallas re-implementation of gloria ClassificationMetrics.

    Stateful accumulation (lists of batches, loss sum) stays in Python; the
    metric math (per-class AUROC / AUPRC) runs in the Pallas kernel.
    """

    def __init__(self, num_classes: Optional[int] = None, split: str = "val"):
        self.split = split
        self.num_classes = num_classes
        self.reset()

    def reset(self):
        self.logits_list = []
        self.labels_list = []
        self.loss_sum = 0.0
        self.num_batches = 0

    def update(self, preds, targets, loss=None):
        self.logits_list.append(jnp.asarray(preds))
        self.labels_list.append(jnp.asarray(targets))
        if loss is not None:
            self.loss_sum += float(loss)
        self.num_batches += 1
        if self.num_classes is None and targets.ndim > 1:
            self.num_classes = int(targets.shape[1])

    def compute(self) -> Dict[str, float]:
        if not self.logits_list or self.num_classes is None:
            return {f"{self.split}_loss": 0.0}
        logits_cat = jnp.concatenate(self.logits_list, axis=0).astype(jnp.float32)
        labels_cat = jnp.concatenate(self.labels_list, axis=0).astype(jnp.float32)

        auroc, auprc = _run_metrics_kernel(logits_cat, labels_cat)
        auroc = jax.block_until_ready(auroc)
        auprc = jax.block_until_ready(auprc)
        auroc_list = np.asarray(auroc).tolist()
        auprc_list = np.asarray(auprc).tolist()

        # TODO(synk): nan/zero-filtered class mean + dict assembly is host-side
        # scalar glue (no tensor hot path), kept in plain numpy like the original.
        mean_auprc = float(np.mean([x for x in auprc_list
                                    if not np.isnan(x) and x != 0.0]))
        mean_auroc = float(np.mean([x for x in auroc_list
                                    if not np.isnan(x) and x != 0.0]))
        mean_loss = self.loss_sum / self.num_batches if self.num_batches > 0 else 0.0

        metrics = {
            f"{self.split}_loss": mean_loss,
            f"{self.split}_mean_auroc": mean_auroc,
            f"{self.split}_mean_auprc": mean_auprc,
        }
        for i, (a, p) in enumerate(zip(auroc_list, auprc_list)):
            metrics[f"{self.split}_auroc_class_{i}"] = float(a)
            metrics[f"{self.split}_auprc_class_{i}"] = float(p)
        return metrics

    def __call__(self, preds, targets, loss=None, compute_metrics=False):
        self.update(preds, targets, loss)
        if compute_metrics:
            return self.compute()
        return None


def _reference_metrics(logits: np.ndarray, labels: np.ndarray):
    """Pure-numpy float64 reference (same math) for validating the kernel."""
    probs = 1.0 / (1.0 + np.exp(-logits.astype(np.float64)))
    m, c = logits.shape
    aurocs, aps = [], []
    for k in range(c):
        s = probs[:, k]
        y = labels[:, k].astype(np.float64)
        npos = y.sum()
        nneg = m - npos
        gt = (s[:, None] > s[None, :]).astype(np.float64)
        eq = (s[:, None] == s[None, :]).astype(np.float64)
        auroc = np.sum(y[:, None] * (1.0 - y[None, :]) * (gt + 0.5 * eq)) / (npos * nneg)
        ge = (s[None, :] >= s[:, None]).astype(np.float64)   # [i, j] = s_j >= s_i
        tp = (y[None, :] * ge).sum(axis=1)
        tot = ge.sum(axis=1)
        ap = np.sum(y * (tp / tot)) / npos
        aurocs.append(auroc)
        aps.append(ap)
    return np.array(aurocs), np.array(aps)


if __name__ == "__main__":
    key = jax.random.PRNGKey(0)
    batch, num_classes, num_batches = 8, 4, 2

    metric = ClassificationMetricsPallas(num_classes=num_classes, split="val")

    all_logits, all_labels = [], []
    for b in range(num_batches):
        key, k1, k2, k3 = jax.random.split(key, 4)
        logits = jax.random.normal(k1, (batch, num_classes), dtype=jnp.float32)
        labels = (jax.random.uniform(k2, (batch, num_classes)) > 0.5).astype(jnp.int32)
        # guarantee every class has at least one positive and one negative
        labels = labels.at[0, :].set(1).at[1, :].set(0)
        loss = jnp.mean(jnp.abs(logits)) + 0.1 * b
        metric(logits, labels, loss=loss, compute_metrics=False)
        all_logits.append(np.asarray(logits))
        all_labels.append(np.asarray(labels))

    metrics = metric.compute()   # runs the Pallas kernel (blocked inside)

    # validate kernel output against the numpy reference
    ref_auroc, ref_auprc = _reference_metrics(
        np.concatenate(all_logits, axis=0), np.concatenate(all_labels, axis=0))
    got_auroc = np.array([metrics[f"val_auroc_class_{i}"] for i in range(num_classes)])
    got_auprc = np.array([metrics[f"val_auprc_class_{i}"] for i in range(num_classes)])
    np.testing.assert_allclose(got_auroc, ref_auroc, rtol=1e-5, atol=1e-5)
    np.testing.assert_allclose(got_auprc, ref_auprc, rtol=1e-5, atol=1e-5)
    assert np.isclose(metrics["val_loss"],
                      (float(jnp.mean(jnp.abs(jnp.asarray(all_logits[0])))) +
                       float(jnp.mean(jnp.abs(jnp.asarray(all_logits[1])))) + 0.1)
                      / num_batches, rtol=1e-5)

    print("KERNEL_OK")
</pallas_src>

<mosaic_0001>
module attributes {stable_mosaic.version = 11 : i64} {
  func.func @_metrics_kernel(%arg0: i32, %arg1: i32, %arg2: i32, %arg3: memref<4xi32, #tpu.memory_space<smem>>, %arg4: memref<1x512x1xf32, #tpu.memory_space<vmem>>, %arg5: memref<1x512x1xf32, #tpu.memory_space<vmem>>, %arg6: memref<1x1x512xf32, #tpu.memory_space<vmem>>, %arg7: memref<1x1x512xf32, #tpu.memory_space<vmem>>, %arg8: memref<1x1x1xf32, #tpu.memory_space<vmem>>, %arg9: memref<1x1x1xf32, #tpu.memory_space<vmem>>, %arg10: memref<512x1xf32, #tpu.memory_space<vmem>>, %arg11: memref<512x1xf32, #tpu.memory_space<vmem>>, %arg12: memref<512x1xf32, #tpu.memory_space<vmem>>, %arg13: memref<1x1xf32, #tpu.memory_space<vmem>>, %arg14: memref<1x1xf32, #tpu.memory_space<vmem>>) attributes {dimension_semantics = [#tpu.dimension_semantics<parallel>, #tpu.dimension_semantics<arbitrary>, #tpu.dimension_semantics<arbitrary>], iteration_bounds = array<i64: 4, 1, 1>, scalar_prefetch = 1 : i64, scratch_operands = 5 : i64, tpu.core_type = #tpu.core_type<tc>, window_params = [{transform_indices = @transform_0, window_bounds = array<i64: 1, 512, 1>}, {transform_indices = @transform_1, window_bounds = array<i64: 1, 512, 1>}, {transform_indices = @transform_2, window_bounds = array<i64: 1, 1, 512>}, {transform_indices = @transform_3, window_bounds = array<i64: 1, 1, 512>}, {transform_indices = @transform_4, window_bounds = array<i64: 1, 1, 1>}, {transform_indices = @transform_5, window_bounds = array<i64: 1, 1, 1>}]} {
    %c0_i32 = arith.constant 0 : i32
    %0 = arith.cmpi eq, %arg1, %c0_i32 : i32
    %c0_i32_0 = arith.constant 0 : i32
    %1 = arith.cmpi eq, %arg2, %c0_i32_0 : i32
    %2 = arith.andi %0, %1 : i1
    %3 = arith.extui %2 : i1 to i32
    %c0_i32_1 = arith.constant 0 : i32
    %4 = arith.cmpi ne, %3, %c0_i32_1 : i32
    scf.if %4 {
      %cst_36 = arith.constant 0.000000e+00 : f32
      %55 = vector.broadcast %cst_36 : f32 to vector<1x1xf32>
      %c0_37 = arith.constant 0 : index
      %c0_38 = arith.constant 0 : index
      %56 = vector.load %arg13[%c0_37, %c0_38] : memref<1x1xf32, #tpu.memory_space<vmem>>, vector<1x1xf32>
      tpu.vector_store %arg13[%c0_37, %c0_38], %55 {strides = array<i32>} : memref<1x1xf32, #tpu.memory_space<vmem>>, vector<1x1xf32>,
      %cst_39 = arith.constant 0.000000e+00 : f32
      %57 = vector.broadcast %cst_39 : f32 to vector<1x1xf32>
      %c0_40 = arith.constant 0 : index
      %c0_41 = arith.constant 0 : index
      %58 = vector.load %arg14[%c0_40, %c0_41] : memref<1x1xf32, #tpu.memory_space<vmem>>, vector<1x1xf32>
      tpu.vector_store %arg14[%c0_40, %c0_41], %57 {strides = array<i32>} : memref<1x1xf32, #tpu.memory_space<vmem>>, vector<1x1xf32>,
    } else {
    }
    %c0_i32_2 = arith.constant 0 : i32
    %5 = arith.cmpi eq, %arg2, %c0_i32_2 : i32
    %6 = arith.extui %5 : i1 to i32
    %c0_i32_3 = arith.constant 0 : i32
    %7 = arith.cmpi ne, %6, %c0_i32_3 : i32
    scf.if %7 {
      %cst_36 = arith.constant 0.000000e+00 : f32
      %55 = vector.broadcast %cst_36 : f32 to vector<512x1xf32>
      %c0_37 = arith.constant 0 : index
      %c0_38 = arith.constant 0 : index
      %56 = vector.load %arg10[%c0_37, %c0_38] : memref<512x1xf32, #tpu.memory_space<vmem>>, vector<512x1xf32>
      tpu.vector_store %arg10[%c0_37, %c0_38], %55 {strides = array<i32>} : memref<512x1xf32, #tpu.memory_space<vmem>>, vector<512x1xf32>,
      %cst_39 = arith.constant 0.000000e+00 : f32
      %57 = vector.broadcast %cst_39 : f32 to vector<512x1xf32>
      %c0_40 = arith.constant 0 : index
      %c0_41 = arith.constant 0 : index
      %58 = vector.load %arg11[%c0_40, %c0_41] : memref<512x1xf32, #tpu.memory_space<vmem>>, vector<512x1xf32>
      tpu.vector_store %arg11[%c0_40, %c0_41], %57 {strides = array<i32>} : memref<512x1xf32, #tpu.memory_space<vmem>>, vector<512x1xf32>,
      %cst_42 = arith.constant 0.000000e+00 : f32
      %59 = vector.broadcast %cst_42 : f32 to vector<512x1xf32>
      %c0_43 = arith.constant 0 : index
      %c0_44 = arith.constant 0 : index
      %60 = vector.load %arg12[%c0_43, %c0_44] : memref<512x1xf32, #tpu.memory_space<vmem>>, vector<512x1xf32>
      tpu.vector_store %arg12[%c0_43, %c0_44], %59 {strides = array<i32>} : memref<512x1xf32, #tpu.memory_space<vmem>>, vector<512x1xf32>,
    } else {
    }
    %c0 = arith.constant 0 : index
    %c0_4 = arith.constant 0 : index
    %c0_5 = arith.constant 0 : index
    %8 = vector.load %arg4[%c0, %c0_4, %c0_5] : memref<1x512x1xf32, #tpu.memory_space<vmem>>, vector<1x512x1xf32>
    %9 = vector.shape_cast %8 : vector<1x512x1xf32> to vector<512x1xf32>
    %c0_6 = arith.constant 0 : index
    %c0_7 = arith.constant 0 : index
    %c0_8 = arith.constant 0 : index
    %10 = vector.load %arg5[%c0_6, %c0_7, %c0_8] : memref<1x512x1xf32, #tpu.memory_space<vmem>>, vector<1x512x1xf32>
    %11 = vector.shape_cast %10 : vector<1x512x1xf32> to vector<512x1xf32>
    %c0_9 = arith.constant 0 : index
    %c0_10 = arith.constant 0 : index
    %c0_11 = arith.constant 0 : index
    %12 = vector.load %arg6[%c0_9, %c0_10, %c0_11] : memref<1x1x512xf32, #tpu.memory_space<vmem>>, vector<1x1x512xf32>
    %13 = vector.shape_cast %12 : vector<1x1x512xf32> to vector<1x512xf32>
    %c0_12 = arith.constant 0 : index
    %c0_13 = arith.constant 0 : index
    %c0_14 = arith.constant 0 : index
    %14 = vector.load %arg7[%c0_12, %c0_13, %c0_14] : memref<1x1x512xf32, #tpu.memory_space<vmem>>, vector<1x1x512xf32>
    %15 = vector.shape_cast %14 : vector<1x1x512xf32> to vector<1x512xf32>
    %cst = arith.constant 1.000000e+00 : f32
    %16 = vector.broadcast %cst : f32 to vector<1x512xf32>
    %17 = arith.subf %16, %15 : vector<1x512xf32>
    %18 = vector.broadcast %9 : vector<512x1xf32> to vector<512x512xf32>
    %19 = vector.broadcast %13 : vector<1x512xf32> to vector<512x512xf32>
    %20 = arith.cmpf ogt, %18, %19 : vector<512x512xf32>
    %21 = arith.extui %20 : vector<512x512xi1> to vector<512x512xi32>
    %22 = arith.sitofp %21 : vector<512x512xi32> to vector<512x512xf32>
    %23 = vector.broadcast %9 : vector<512x1xf32> to vector<512x512xf32>
    %24 = vector.broadcast %13 : vector<1x512xf32> to vector<512x512xf32>
    %25 = arith.cmpf oeq, %23, %24 : vector<512x512xf32>
    %cst_15 = arith.constant 0.000000e+00 : f32
    %26 = vector.shape_cast %17 : vector<1x512xf32> to vector<1x512xf32>
    %27 = vector.broadcast %26 : vector<1x512xf32> to vector<512x512xf32>
    %28 = vector.broadcast %cst_15 : f32 to vector<512x512xf32>
    %29 = arith.select %25, %27, %28 : vector<512x512xi1>, vector<512x512xf32>
    %c0_16 = arith.constant 0 : index
    %c0_17 = arith.constant 0 : index
    %30 = vector.load %arg10[%c0_16, %c0_17] : memref<512x1xf32, #tpu.memory_space<vmem>>, vector<512x1xf32>
    %cst_18 = arith.constant dense<0.000000e+00> : vector<512xf32>
    %31 = vector.multi_reduction <add>, %22, %cst_18 [1] : vector<512x512xf32> to vector<512xf32>
    %32 = vector.shape_cast %31 : vector<512xf32> to vector<512x1xf32>
    %33 = arith.addf %30, %32 : vector<512x1xf32>
    %c0_19 = arith.constant 0 : index
    %c0_20 = arith.constant 0 : index
    %34 = vector.load %arg10[%c0_19, %c0_20] : memref<512x1xf32, #tpu.memory_space<vmem>>, vector<512x1xf32>
    tpu.vector_store %arg10[%c0_19, %c0_20], %33 {strides = array<i32>} : memref<512x1xf32, #tpu.memory_space<vmem>>, vector<512x1xf32>,
    %c0_21 = arith.constant 0 : index
    %c0_22 = arith.constant 0 : index
    %35 = vector.load %arg11[%c0_21, %c0_22] : memref<512x1xf32, #tpu.memory_space<vmem>>, vector<512x1xf32>
    %36 = vector.broadcast %15 : vector<1x512xf32> to vector<512x512xf32>
    %37 = arith.mulf %22, %36 : vector<512x512xf32>
    %cst_23 = arith.constant dense<0.000000e+00> : vector<512xf32>
    %38 = vector.multi_reduction <add>, %37, %cst_23 [1] : vector<512x512xf32> to vector<512xf32>
    %39 = vector.shape_cast %38 : vector<512xf32> to vector<512x1xf32>
    %40 = arith.addf %35, %39 : vector<512x1xf32>
    %c0_24 = arith.constant 0 : index
    %c0_25 = arith.constant 0 : index
    %41 = vector.load %arg11[%c0_24, %c0_25] : memref<512x1xf32, #tpu.memory_space<vmem>>, vector<512x1xf32>
    tpu.vector_store %arg11[%c0_24, %c0_25], %40 {strides = array<i32>} : memref<512x1xf32, #tpu.memory_space<vmem>>, vector<512x1xf32>,
    %c0_26 = arith.constant 0 : index
    %c0_27 = arith.constant 0 : index
    %42 = vector.load %arg12[%c0_26, %c0_27] : memref<512x1xf32, #tpu.memory_space<vmem>>, vector<512x1xf32>
    %cst_28 = arith.constant dense<0.000000e+00> : vector<512xf32>
    %43 = vector.multi_reduction <add>, %29, %cst_28 [1] : vector<512x512xf32> to vector<512xf32>
    %44 = vector.shape_cast %43 : vector<512xf32> to vector<512x1xf32>
    %45 = arith.addf %42, %44 : vector<512x1xf32>
    %c0_29 = arith.constant 0 : index
    %c0_30 = arith.constant 0 : index
    %46 = vector.load %arg12[%c0_29, %c0_30] : memref<512x1xf32, #tpu.memory_space<vmem>>, vector<512x1xf32>
    tpu.vector_store %arg12[%c0_29, %c0_30], %45 {strides = array<i32>} : memref<512x1xf32, #tpu.memory_space<vmem>>, vector<512x1xf32>,
    %c0_i32_31 = arith.constant 0 : i32
    %47 = arith.cmpi eq, %arg2, %c0_i32_31 : i32
    %48 = arith.extui %47 : i1 to i32
    %c0_i32_32 = arith.constant 0 : i32
    %49 = arith.cmpi ne, %48, %c0_i32_32 : i32
    scf.if %49 {
      %55 = arith.index_cast %arg0 : i32 to index
      %56 = memref.load %arg3[%55] : memref<4xi32, #tpu.memory_space<smem>>
      %57 = arith.sitofp %56 : i32 to f32
      %c0_36 = arith.constant 0 : index
      %c0_37 = arith.constant 0 : index
      %58 = vector.load %arg10[%c0_36, %c0_37] : memref<512x1xf32, #tpu.memory_space<vmem>>, vector<512x1xf32>
      %c0_38 = arith.constant 0 : index
      %c0_39 = arith.constant 0 : index
      %59 = vector.load %arg11[%c0_38, %c0_39] : memref<512x1xf32, #tpu.memory_space<vmem>>, vector<512x1xf32>
      %c0_40 = arith.constant 0 : index
      %c0_41 = arith.constant 0 : index
      %60 = vector.load %arg12[%c0_40, %c0_41] : memref<512x1xf32, #tpu.memory_space<vmem>>, vector<512x1xf32>
      %61 = arith.subf %58, %59 : vector<512x1xf32>
      %cst_42 = arith.constant 5.000000e-01 : f32
      %62 = vector.broadcast %cst_42 : f32 to vector<512x1xf32>
      %63 = arith.mulf %62, %60 : vector<512x1xf32>
      %64 = arith.addf %61, %63 : vector<512x1xf32>
      %c0_43 = arith.constant 0 : index
      %c0_44 = arith.constant 0 : index
      %65 = vector.load %arg13[%c0_43, %c0_44] : memref<1x1xf32, #tpu.memory_space<vmem>>, vector<1x1xf32>
      %66 = arith.mulf %11, %64 : vector<512x1xf32>
      %67 = vector.shape_cast %66 : vector<512x1xf32> to vector<1x512x1xf32>
      %cst_45 = arith.constant dense<0.000000e+00> : vector<1xf32>
      %68 = vector.multi_reduction <add>, %67, %cst_45 [1, 2] : vector<1x512x1xf32> to vector<1xf32>
      %69 = vector.shape_cast %68 : vector<1xf32> to vector<1x1x1xf32>
      %70 = vector.extract %69[0, 0, 0] : f32 from vector<1x1x1xf32>
      %71 = vector.broadcast %70 : f32 to vector<1x1xf32>
      %72 = arith.addf %65, %71 : vector<1x1xf32>
      %c0_46 = arith.constant 0 : index
      %c0_47 = arith.constant 0 : index
      %73 = vector.load %arg13[%c0_46, %c0_47] : memref<1x1xf32, #tpu.memory_space<vmem>>, vector<1x1xf32>
      tpu.vector_store %arg13[%c0_46, %c0_47], %72 {strides = array<i32>} : memref<1x1xf32, #tpu.memory_space<vmem>>, vector<1x1xf32>,
      %74 = vector.broadcast %57 : f32 to vector<512x1xf32>
      %75 = arith.subf %74, %59 : vector<512x1xf32>
      %cst_48 = arith.constant 1.600000e+01 : f32
      %76 = vector.broadcast %cst_48 : f32 to vector<512x1xf32>
      %77 = arith.subf %76, %58 : vector<512x1xf32>
      %cst_49 = arith.constant 1.000000e+00 : f32
      %78 = vector.broadcast %cst_49 : f32 to vector<512x1xf32>
      %79 = arith.maximumf %77, %78 : vector<512x1xf32>
      %c0_50 = arith.constant 0 : index
      %c0_51 = arith.constant 0 : index
      %80 = vector.load %arg14[%c0_50, %c0_51] : memref<1x1xf32, #tpu.memory_space<vmem>>, vector<1x1xf32>
      %81 = arith.divf %75, %79 : vector<512x1xf32>
      %82 = arith.mulf %11, %81 : vector<512x1xf32>
      %83 = vector.shape_cast %82 : vector<512x1xf32> to vector<1x512x1xf32>
      %cst_52 = arith.constant dense<0.000000e+00> : vector<1xf32>
      %84 = vector.multi_reduction <add>, %83, %cst_52 [1, 2] : vector<1x512x1xf32> to vector<1xf32>
      %85 = vector.shape_cast %84 : vector<1xf32> to vector<1x1x1xf32>
      %86 = vector.extract %85[0, 0, 0] : f32 from vector<1x1x1xf32>
      %87 = vector.broadcast %86 : f32 to vector<1x1xf32>
      %88 = arith.addf %80, %87 : vector<1x1xf32>
      %c0_53 = arith.constant 0 : index
      %c0_54 = arith.constant 0 : index
      %89 = vector.load %arg14[%c0_53, %c0_54] : memref<1x1xf32, #tpu.memory_space<vmem>>, vector<1x1xf32>
      tpu.vector_store %arg14[%c0_53, %c0_54], %88 {strides = array<i32>} : memref<1x1xf32, #tpu.memory_space<vmem>>, vector<1x1xf32>,
    } else {
    }
    %c0_i32_33 = arith.constant 0 : i32
    %50 = arith.cmpi eq, %arg1, %c0_i32_33 : i32
    %c0_i32_34 = arith.constant 0 : i32
    %51 = arith.cmpi eq, %arg2, %c0_i32_34 : i32
    %52 = arith.andi %50, %51 : i1
    %53 = arith.extui %52 : i1 to i32
    %c0_i32_35 = arith.constant 0 : i32
    %54 = arith.cmpi ne, %53, %c0_i32_35 : i32
    scf.if %54 {
      %55 = arith.index_cast %arg0 : i32 to index
      %56 = memref.load %arg3[%55] : memref<4xi32, #tpu.memory_space<smem>>
      %57 = arith.sitofp %56 : i32 to f32
      %cst_36 = arith.constant 1.600000e+01 : f32
      %58 = arith.subf %cst_36, %57 : f32
      %59 = arith.mulf %57, %58 : f32
      %cst_37 = arith.constant 0.000000e+00 : f32
      %60 = arith.cmpf ogt, %59, %cst_37 : f32
      %c0_38 = arith.constant 0 : index
      %c0_39 = arith.constant 0 : index
      %61 = vector.load %arg13[%c0_38, %c0_39] : memref<1x1xf32, #tpu.memory_space<vmem>>, vector<1x1xf32>
      %cst_40 = arith.constant 1.000000e+00 : f32
      %62 = arith.maximumf %59, %cst_40 : f32
      %63 = vector.broadcast %62 : f32 to vector<1x1xf32>
      %64 = arith.divf %61, %63 : vector<1x1xf32>
      %cst_41 = arith.constant 0x7FC00000 : f32
      %65 = vector.broadcast %cst_41 : f32 to vector<1x1xf32>
      %66 = arith.select %60, %64, %65 : vector<1x1xf32>
      %c0_42 = arith.constant 0 : index
      %c0_43 = arith.constant 0 : index
      %c0_44 = arith.constant 0 : index
      %67 = vector.load %arg8[%c0_42, %c0_43, %c0_44] : memref<1x1x1xf32, #tpu.memory_space<vmem>>, vector<1x1x1xf32>
      %68 = vector.shape_cast %67 : vector<1x1x1xf32> to vector<1x1xf32>
      %69 = vector.shape_cast %66 : vector<1x1xf32> to vector<1x1x1xf32>
      tpu.vector_store %arg8[%c0_42, %c0_43, %c0_44], %69 {strides = array<i32>} : memref<1x1x1xf32, #tpu.memory_space<vmem>>, vector<1x1x1xf32>,
      %cst_45 = arith.constant 0.000000e+00 : f32
      %70 = arith.cmpf ogt, %57, %cst_45 : f32
      %c0_46 = arith.constant 0 : index
      %c0_47 = arith.constant 0 : index
      %71 = vector.load %arg14[%c0_46, %c0_47] : memref<1x1xf32, #tpu.memory_space<vmem>>, vector<1x1xf32>
      %cst_48 = arith.constant 1.000000e+00 : f32
      %72 = arith.maximumf %57, %cst_48 : f32
      %73 = vector.broadcast %72 : f32 to vector<1x1xf32>
      %74 = arith.divf %71, %73 : vector<1x1xf32>
      %cst_49 = arith.constant 0x7FC00000 : f32
      %75 = vector.broadcast %cst_49 : f32 to vector<1x1xf32>
      %76 = arith.select %70, %74, %75 : vector<1x1xf32>
      %c0_50 = arith.constant 0 : index
      %c0_51 = arith.constant 0 : index
      %c0_52 = arith.constant 0 : index
      %77 = vector.load %arg9[%c0_50, %c0_51, %c0_52] : memref<1x1x1xf32, #tpu.memory_space<vmem>>, vector<1x1x1xf32>
      %78 = vector.shape_cast %77 : vector<1x1x1xf32> to vector<1x1xf32>
      %79 = vector.shape_cast %76 : vector<1x1xf32> to vector<1x1x1xf32>
      tpu.vector_store %arg9[%c0_50, %c0_51, %c0_52], %79 {strides = array<i32>} : memref<1x1x1xf32, #tpu.memory_space<vmem>>, vector<1x1x1xf32>,
    } else {
    }
    return
  }
  func.func @transform_0(%arg0: i32, %arg1: i32, %arg2: i32, %arg3: memref<4xi32, #tpu.memory_space<smem>>) -> (i32, i32, i32) {
    %c0_i32 = arith.constant 0 : i32
    %c0_i32_0 = arith.constant 0 : i32
    return %arg0, %arg1, %c0_i32 : i32, i32, i32
  }
  func.func @transform_1(%arg0: i32, %arg1: i32, %arg2: i32, %arg3: memref<4xi32, #tpu.memory_space<smem>>) -> (i32, i32, i32) {
    %c0_i32 = arith.constant 0 : i32
    %c0_i32_0 = arith.constant 0 : i32
    return %arg0, %arg1, %c0_i32 : i32, i32, i32
  }
  func.func @transform_2(%arg0: i32, %arg1: i32, %arg2: i32, %arg3: memref<4xi32, #tpu.memory_space<smem>>) -> (i32, i32, i32) {
    %c0_i32 = arith.constant 0 : i32
    %c0_i32_0 = arith.constant 0 : i32
    return %arg0, %c0_i32, %arg2 : i32, i32, i32
  }
  func.func @transform_3(%arg0: i32, %arg1: i32, %arg2: i32, %arg3: memref<4xi32, #tpu.memory_space<smem>>) -> (i32, i32, i32) {
    %c0_i32 = arith.constant 0 : i32
    %c0_i32_0 = arith.constant 0 : i32
    return %arg0, %c0_i32, %arg2 : i32, i32, i32
  }
  func.func @transform_4(%arg0: i32, %arg1: i32, %arg2: i32, %arg3: memref<4xi32, #tpu.memory_space<smem>>) -> (i32, i32, i32) {
    %c0_i32 = arith.constant 0 : i32
    %c0_i32_0 = arith.constant 0 : i32
    %c0_i32_1 = arith.constant 0 : i32
    return %arg0, %c0_i32, %c0_i32_0 : i32, i32, i32
  }
  func.func @transform_5(%arg0: i32, %arg1: i32, %arg2: i32, %arg3: memref<4xi32, #tpu.memory_space<smem>>) -> (i32, i32, i32) {
    %c0_i32 = arith.constant 0 : i32
    %c0_i32_0 = arith.constant 0 : i32
    %c0_i32_1 = arith.constant 0 : i32
    return %arg0, %c0_i32, %c0_i32_0 : i32, i32, i32
  }
}

</mosaic_0001>

<bundles_post_ra>
// kernel: tpu_custom_call.1
= control target key start
LH: loop header
LB: loop body
LE: loop exit
PB: predicated region body
PF: predicated region fallthrough
CT: control target
= control target key end

     0   :  { %s6831_s24 = smov [#allocation8]   ;;  %s15256_s0 = inlined_call_operand.vmem [shape: s32[4], index: 0, kind: input, shape index: {}]   ;;  %s15257_s1 = inlined_call_operand.vmem [shape: f32[4,512,1], index: 1, kind: input, shape index: {}]   ;;  %s15258_s2 = inlined_call_operand.vmem [shape: f32[4,512,1], index: 2, kind: input, shape index: {}]   ;;  %s15259_s3 = inlined_call_operand.vmem [shape: f32[4,1,512], index: 3, kind: input, shape index: {}]   ;;  %s15260_s4 = inlined_call_operand.vmem [shape: f32[4,1,512], index: 4, kind: input, shape index: {}]   ;;  %s15261_s5 = inlined_call_operand.vmem [shape: f32[4,1,1], index: 5, kind: output, shape index: {0}]   ;;  %s15262_s6 = inlined_call_operand.vmem [shape: f32[4,1,1], index: 6, kind: output, shape index: {1}]  }
   0x1   :  { %s13_s23 = sshll.u32 %s15256_s0, 4  ;;  %s14_s23 = int_to_ptr.vmem [resolvable:$true] %s13_s23 }
   0x2   :  { %16 = dma.vmem_to_smem %s14_s23, 16, %s6831_s24, [#allocation7] }
   0x3   :  { %6817 = dma.done.wait [#allocation7], 16 }
   0x4   :  { %6818 = vsyncadd [#allocation7], 4294967280 }
   0x5   :  { %19 = sfence }
   0x6   :  { %s6873_s25 = smov 0   ;;  %s6875_s26 = smov 0  }
   0x7   :  { %s6877_s27 = smov 0  }
   0x8 LB: > { %s44_s0 = sadd.s32 1, %s6825_s26  ;;  %p6279_p0 = scmp.ge.s32.totalorder %s6829_s27, 1  ;;  %s6829_s27 = sphi %s6877_s27, %s25_s27   ;;  %s6825_s26 = sphi %s6875_s26, %s17166_s26   ;;  %s6821_s25 = sphi %s6873_s25, %s17165_s25  }
   0x9   : > { %p46_p1 = scmp.ge.s32.totalorder %s44_s0, 4  ;;  %p274_p2 = scmp.lt.s32.totalorder %s6829_s27, 5 }
   0xb   : > { %s17168_s0 = smov (%p46_p1, %s44_s0), 0  ;;  %p275_p3 = pnand %p6279_p0, %p274_p2 }
   0xd   : > { %278 = sbr.rel (%p275_p3) target bundleno = 1577 (0x629), region = 36 }
  0x12   : > { %p333_p4 = scmp.lt.s32.totalorder %s6821_s25, 3  ;;  %v6832_v0 = vmov 0   ;;  %s11962_s16 = sld [smem:[#allocation8 + %s6821_s25]] }
  0x13   : > { %6580 = vset.pattern.permute.xlu2 %v6832_v0  ;;  %6579 = vset.pattern.permute.xlu1 %v6832_v0  ;;  %s15217_s21 = sld [smem:[#allocation8 + %s6821_s25]] }
  0x14   : > { %6578 = vset.pattern.permute.xlu0 %v6832_v0  ;;  %s6895_s28 = scalar_select %p333_p4, %s6821_s25, 3 }
  0x16   : > { %s6544_s29 = sshll.u32 %s6895_s28, 9  ;;  %s6284_s9 = sshll.u32 %s6895_s28, 2 }
  0x17   : > { %s6903_s8 = scalar_lea.vmem %s15257_s1, %s6544_s29  ;;  %s359_s12 = scalar_lea.vmem %s15259_s3, %s6284_s9 }
  0x18   : > { %v585_v1 = vld [vmem:[%s6903_s8 + $0x20] sm:$0xff]  ;;  %v583_v2 = vld [vmem:[%s6903_s8 + $0x10] sm:$0xff]  ;;  %v586_v4 = vld [vmem:[%s6903_s8 + $0x28] sm:$0xff]  ;;  %s7032_s15 = scalar_lea.vmem %s15260_s4, %s6284_s9  ;;  %s4136_s17 = scvt.s32.f32 %s11962_s16 }
  0x19   : > { %v581_v3 = vld [vmem:[%s6903_s8] sm:$0xff]  ;;  %734 = vperm.xlu2 %6580, %v585_v1   ;;  %724 = vperm.xlu1 %6579, %v583_v2   ;;  %v584_v5 = vld [vmem:[%s6903_s8 + $0x18] sm:$0xff]  ;;  %v582_v6 = vld [vmem:[%s6903_s8 + $0x8] sm:$0xff]  ;;  %s12235_s20 = scalar_lea.vmem %s15258_s2, %s6544_s29  ;;  %s6086_s22 = scvt.s32.f32 %s15217_s21 }
  0x1a   : > { %714 = vperm.xlu0 %6578, %v581_v3   ;;  %v589_v7 = vld [vmem:[%s6903_s8 + $0x40] sm:$0xff]  ;;  %v588_v8 = vld [vmem:[%s6903_s8 + $0x38] sm:$0xff]  ;;  %v587_v9 = vld [vmem:[%s6903_s8 + $0x30] sm:$0xff]  ;;  %s6834_s29 = smov 1.0   ;;  %p6114_p6 = scmp.gt.s32.totalorder %s15217_s21, 0 }
  0x1b   : > { %v592_v10 = vld [vmem:[%s6903_s8 + $0x58] sm:$0xff]  ;;  %v591_v11 = vld [vmem:[%s6903_s8 + $0x50] sm:$0xff]  ;;  %v590_v12 = vld [vmem:[%s6903_s8 + $0x48] sm:$0xff]  ;;  %s6087_s23 = ssub.f32 16.0, %s6086_s22  ;;  %s6116_s7 = smax.f32 %s6834_s29, %s6086_s22 }
  0x1c   : > { %v595_v13 = vld [vmem:[%s6903_s8 + $0x70] sm:$0xff]  ;;  %v594_v14 = vld [vmem:[%s6903_s8 + $0x68] sm:$0xff]  ;;  %v593_v15 = vld [vmem:[%s6903_s8 + $0x60] sm:$0xff]  ;;  %s6133_s10 = scalar_select %p6114_p6, 1, 0 }
  0x1d   : > { %v598_v16 = vld [vmem:[%s6903_s8 + $0x88] sm:$0xff]  ;;  %v597_v17 = vld [vmem:[%s6903_s8 + $0x80] sm:$0xff]  ;;  %v596_v18 = vld [vmem:[%s6903_s8 + $0x78] sm:$0xff]  ;;  %s15220_s24 = smul.f32 %s6087_s23, %s6086_s22  ;;  %s372_s13 = scalar_lea.vmem %s15261_s5, %s6895_s28 }
  0x1e   : > { %v601_v19 = vld [vmem:[%s6903_s8 + $0xa0] sm:$0xff]  ;;  %v600_v20 = vld [vmem:[%s6903_s8 + $0x98] sm:$0xff]  ;;  %v599_v21 = vld [vmem:[%s6903_s8 + $0x90] sm:$0xff]  ;;  %s375_s16 = scalar_lea.vmem %s15262_s6, %s6895_s28 }
  0x1f   : > { %v604_v22 = vld [vmem:[%s6903_s8 + $0xb8] sm:$0xff]  ;;  %v603_v23 = vld [vmem:[%s6903_s8 + $0xb0] sm:$0xff]  ;;  %v602_v24 = vld [vmem:[%s6903_s8 + $0xa8] sm:$0xff]  ;;  %s6091_s30 = smax.f32 %s6834_s29, %s15220_s24  ;;  %p6089_p5 = scmp.gt.f32.partialorder %s15220_s24, 0.0 }
  0x20   : > { %v607_v25 = vld [vmem:[%s6903_s8 + $0xd0] sm:$0xff]  ;;  %v606_v26 = vld [vmem:[%s6903_s8 + $0xc8] sm:$0xff]  ;;  %v605_v27 = vld [vmem:[%s6903_s8 + $0xc0] sm:$0xff] }
  0x21   : > { %739 = vperm.xlu2 %6580, %v586_v4   ;;  %729 = vperm.xlu1 %6579, %v584_v5   ;;  %v610_v28 = vld [vmem:[%s6903_s8 + $0xe8] sm:$0xff]  ;;  %v609_v29 = vld [vmem:[%s6903_s8 + $0xe0] sm:$0xff]  ;;  %v608_v30 = vld [vmem:[%s6903_s8 + $0xd8] sm:$0xff]  ;;  %s6108_s9 = scalar_select %p6089_p5, 1, 0 }
  0x22   : > { %719 = vperm.xlu0 %6578, %v582_v6   ;;  %v613_v31 = vld [vmem:[%s6903_s8 + $0x100] sm:$0xff]  ;;  %v612_v32 = vld [vmem:[%s6903_s8 + $0xf8] sm:$0xff]  ;;  %v611_v33 = vld [vmem:[%s6903_s8 + $0xf0] sm:$0xff] }
  0x23   : > { %v616_v34 = vld [vmem:[%s6903_s8 + $0x118] sm:$0xff]  ;;  %v615_v35 = vld [vmem:[%s6903_s8 + $0x110] sm:$0xff]  ;;  %v614_v36 = vld [vmem:[%s6903_s8 + $0x108] sm:$0xff] }
  0x24   : > { %v619_v37 = vld [vmem:[%s6903_s8 + $0x130] sm:$0xff]  ;;  %v618_v38 = vld [vmem:[%s6903_s8 + $0x128] sm:$0xff]  ;;  %v617_v39 = vld [vmem:[%s6903_s8 + $0x120] sm:$0xff] }
  0x25   : > { %v622_v40 = vld [vmem:[%s6903_s8 + $0x148] sm:$0xff]  ;;  %v621_v41 = vld [vmem:[%s6903_s8 + $0x140] sm:$0xff]  ;;  %v620_v42 = vld [vmem:[%s6903_s8 + $0x138] sm:$0xff] }
  0x26   : > { %v625_v44 = vld [vmem:[%s6903_s8 + $0x160] sm:$0xff]  ;;  %v624_v45 = vld [vmem:[%s6903_s8 + $0x158] sm:$0xff]  ;;  %v623_v46 = vld [vmem:[%s6903_s8 + $0x150] sm:$0xff] }
  0x27   : > { %v628_v47 = vld [vmem:[%s6903_s8 + $0x178] sm:$0xff]  ;;  %v627_v48 = vld [vmem:[%s6903_s8 + $0x170] sm:$0xff]  ;;  %v626_v50 = vld [vmem:[%s6903_s8 + $0x168] sm:$0xff] }
  0x28   : > { %v631_v51 = vld [vmem:[%s6903_s8 + $0x190] sm:$0xff]  ;;  %v630_v52 = vld [vmem:[%s6903_s8 + $0x188] sm:$0xff]  ;;  %v629_v53 = vld [vmem:[%s6903_s8 + $0x180] sm:$0xff] }
  0x29   : > { %754 = vperm.xlu2 %6580, %v589_v7   ;;  %749 = vperm.xlu1 %6579, %v588_v8   ;;  %v634_v55 = vld [vmem:[%s6903_s8 + $0x1a8] sm:$0xff]  ;;  %v633_v56 = vld [vmem:[%s6903_s8 + $0x1a0] sm:$0xff]  ;;  %v632_v57 = vld [vmem:[%s6903_s8 + $0x198] sm:$0xff] }
  0x2a   : > { %744 = vperm.xlu0 %6578, %v587_v9   ;;  %v637_v59 = vld [vmem:[%s6903_s8 + $0x1c0] sm:$0xff]  ;;  %v636_v60 = vld [vmem:[%s6903_s8 + $0x1b8] sm:$0xff]  ;;  %v635_v61 = vld [vmem:[%s6903_s8 + $0x1b0] sm:$0xff] }
  0x2b   : > { %v640_v63 = vld [vmem:[%s6903_s8 + $0x1d8] sm:$0xff]  ;;  %v639_v0 = vld [vmem:[%s6903_s8 + $0x1d0] sm:$0xff]  ;;  %v638_v1 = vld [vmem:[%s6903_s8 + $0x1c8] sm:$0xff] }
  0x2c   : > { %v643_v4 = vld [vmem:[%s6903_s8 + $0x1f0] sm:$0xff]  ;;  %v642_v5 = vld [vmem:[%s6903_s8 + $0x1e8] sm:$0xff]  ;;  %v641_v7 = vld [vmem:[%s6903_s8 + $0x1e0] sm:$0xff] }
  0x2d   : > { %v709_v8 = vld [vmem:[%s359_s12] sm:$0xf] }
  0x31   : > { %769 = vperm.xlu2 %6580, %v592_v10   ;;  %764 = vperm.xlu1 %6579, %v591_v11   ;;  %v6992_v10 = vperm.slane %v709_v8, 0  ;;  %v6994_v11 = vperm.slane %v709_v8, 1 }
  0x32   : > { %759 = vperm.xlu0 %6578, %v590_v12  }
  0x39   : > { %784 = vperm.xlu2 %6580, %v595_v13   ;;  %779 = vperm.xlu1 %6579, %v594_v14   ;;  %v644_v13 = vld [vmem:[%s6903_s8 + $0x1f8] sm:$0xff] }
  0x3a   : > { %774 = vperm.xlu0 %6578, %v593_v15   ;;  %v7005_v15 = vperm.slane %v709_v8, 2 }
  0x41   : > { %799 = vperm.xlu2 %6580, %v598_v16   ;;  %794 = vperm.xlu1 %6579, %v597_v17   ;;  %v15313_v16 = vmov 0.0  }
  0x42   : > { %789 = vperm.xlu0 %6578, %v596_v18  }
  0x49   : > { %814 = vperm.xlu2 %6580, %v601_v19   ;;  %809 = vperm.xlu1 %6579, %v600_v20   ;;  %v7019_v20 = vperm.slane %v709_v8, 3 }
  0x4a   : > { %804 = vperm.xlu0 %6578, %v599_v21  }
  0x51   : > { %829 = vperm.xlu2 %6580, %v604_v22   ;;  %824 = vperm.xlu1 %6579, %v603_v23  }
  0x52   : > { %819 = vperm.xlu0 %6578, %v602_v24  }
  0x59   : > { %844 = vperm.xlu2 %6580, %v607_v25   ;;  %839 = vperm.xlu1 %6579, %v606_v26  }
  0x5a   : > { %834 = vperm.xlu0 %6578, %v605_v27  }
  0x61   : > { %859 = vperm.xlu2 %6580, %v610_v28   ;;  %854 = vperm.xlu1 %6579, %v609_v29   ;;  %v710_v28 = vld [vmem:[%s7032_s15] sm:$0xf] }
  0x62   : > { %849 = vperm.xlu0 %6578, %v608_v30  }
  0x69   : > { %874 = vperm.xlu2 %6580, %v613_v31   ;;  %869 = vperm.xlu1 %6579, %v612_v32   ;;  %v7063_v32 = vperm.slane %v710_v28, 0 }
  0x6a   : > { %864 = vperm.xlu0 %6578, %v611_v33   ;;  %v7065_v33 = vperm.slane %v710_v28, 1 }
  0x71   : > { %889 = vperm.xlu2 %6580, %v616_v34   ;;  %884 = vperm.xlu1 %6579, %v615_v35   ;;  %v7067_v34 = vperm.slane %v710_v28, 2  ;;  %v7071_v35 = vperm.slane %v710_v28, 3 }
  0x72   : > { %879 = vperm.xlu0 %6578, %v614_v36  }
  0x73   : > { %v6947_v43 = vpop.permute.xlu2 %734 }
  0x74   : > { %15790 = vst [vmem:[#allocation10_spill] sm:$0xff] %v6947_v43  ;;  %vm1057_vm0 = vcmp.gt.f32.partialorder %v6947_v43, %v6992_v10  ;;  %vm1058_vm1 = vcmp.gt.f32.partialorder %v6947_v43, %v6994_v11  ;;  %vm1059_vm4 = vcmp.gt.f32.partialorder %v6947_v43, %v7005_v15  ;;  %vm1060_vm7 = vcmp.gt.f32.partialorder %v6947_v43, %v7019_v20 }
  0x75   : > { %v7008_v17 = vsel %vm1057_vm0, 1.0, %v15313_v16  ;;  %v7011_v18 = vsel %vm1058_vm1, 1.0, %v15313_v16  ;;  %v7047_v26 = vsel %vm1059_vm4, 1.0, %v15313_v16  ;;  %v7078_v36 = vsel %vm1060_vm7, 1.0, %v15313_v16 }
  0x76   : > { %15801 = vst [vmem:[#allocation21_spill] sm:$0xff] %v7008_v17  ;;  %v2414_v22 = vadd.f32 %v7011_v18, %v7008_v17 }
  0x77   : > { %15802 = vst [vmem:[#allocation22_spill] sm:$0xff] %v7011_v18 }
  0x78   : > { %15808 = vst [vmem:[#allocation28_spill] sm:$0xff] %v7047_v26  ;;  %v2415_v27 = vadd.f32 %v7047_v26, %v2414_v22 }
  0x79   : > { %904 = vperm.xlu2 %6580, %v619_v37   ;;  %899 = vperm.xlu1 %6579, %v618_v38   ;;  %15811 = vst [vmem:[#allocation31_spill] sm:$0xff] %v7078_v36 }
  0x7a   : > { %894 = vperm.xlu0 %6578, %v617_v39   ;;  %v7081_v37 = vadd.f32 %v7078_v36, %v2415_v27 }
  0x7b   : > { %v6954_v49 = vpop.permute.xlu2 %739 }
  0x7c   : > { %15791 = vst [vmem:[#allocation11_spill] sm:$0xff] %v6954_v49  ;;  %vm1061_vm2 = vcmp.gt.f32.partialorder %v6954_v49, %v6992_v10  ;;  %vm1062_vm3 = vcmp.gt.f32.partialorder %v6954_v49, %v6994_v11  ;;  %vm1063_vm8 = vcmp.gt.f32.partialorder %v6954_v49, %v7005_v15  ;;  %vm1064_vm9 = vcmp.gt.f32.partialorder %v6954_v49, %v7019_v20 }
  0x7d   : > { %v7037_v24 = vsel %vm1061_vm2, 1.0, %v15313_v16  ;;  %v7040_v25 = vsel %vm1062_vm3, 1.0, %v15313_v16  ;;  %v7084_v38 = vsel %vm1063_vm8, 1.0, %v15313_v16 }
  0x7e   : > { %15806 = vst [vmem:[#allocation26_spill] sm:$0xff] %v7037_v24  ;;  %v2419_v29 = vadd.f32 %v7040_v25, %v7037_v24 }
  0x7f   : > { %15807 = vst [vmem:[#allocation27_spill] sm:$0xff] %v7040_v25 }
  0x80   : > { %15812 = vst [vmem:[#allocation32_spill] sm:$0xff] %v7084_v38 }
  0x81   : > { %919 = vperm.xlu2 %6580, %v622_v40   ;;  %914 = vperm.xlu1 %6579, %v621_v41   ;;  %v7097_v41 = vsel %vm1064_vm9, 1.0, %v15313_v16 }
  0x82   : > { %909 = vperm.xlu0 %6578, %v620_v42   ;;  %15814 = vst [vmem:[#allocation34_spill] sm:$0xff] %v7097_v41  ;;  %v2420_v42 = vadd.f32 %v7084_v38, %v2419_v29 }
  0x83   : > { %v6960_v54 = vpop.permute.xlu2 %754 }
  0x84   : > { %15792 = vst [vmem:[#allocation12_spill] sm:$0xff] %v6960_v54  ;;  %vm1073_vm5 = vcmp.gt.f32.partialorder %v6960_v54, %v6992_v10  ;;  %vm1074_vm6 = vcmp.gt.f32.partialorder %v6960_v54, %v6994_v11  ;;  %vm1075_vm12 = vcmp.gt.f32.partialorder %v6960_v54, %v7005_v15  ;;  %vm1076_vm2 = vcmp.gt.f32.partialorder %v6960_v54, %v7019_v20 }
  0x85   : > { %v7058_v30 = vsel %vm1073_vm5, 1.0, %v15313_v16  ;;  %v7061_v31 = vsel %vm1074_vm6, 1.0, %v15313_v16 }
  0x86   : > { %15809 = vst [vmem:[#allocation29_spill] sm:$0xff] %v7058_v30  ;;  %v2434_v39 = vadd.f32 %v7061_v31, %v7058_v30 }
  0x87   : > { %15810 = vst [vmem:[#allocation30_spill] sm:$0xff] %v7061_v31 }
  0x89   : > { %934 = vperm.xlu2 %6580, %v625_v44   ;;  %929 = vperm.xlu1 %6579, %v624_v45  }
  0x8a   : > { %924 = vperm.xlu0 %6578, %v623_v46  }
  0x8b   : > { %v6965_v58 = vpop.permute.xlu2 %769  ;;  %v6975_v2 = vpop.permute.xlu1 %724 }
  0x8c   : > { %15793 = vst [vmem:[#allocation13_spill] sm:$0xff] %v6965_v58  ;;  %v6977_v3 = vpop.permute.xlu0 %714  ;;  %vm1049_vm15 = vcmp.gt.f32.partialorder %v6975_v2, %v6992_v10  ;;  %vm1050_vm0 = vcmp.gt.f32.partialorder %v6975_v2, %v6994_v11  ;;  %vm1085_vm3 = vcmp.gt.f32.partialorder %v6965_v58, %v6992_v10  ;;  %vm1086_vm4 = vcmp.gt.f32.partialorder %v6965_v58, %v6994_v11 }
  0x8d   : > { %15795 = vst [vmem:[#allocation15_spill] sm:$0xff] %v6975_v2  ;;  %vm1041_vm10 = vcmp.gt.f32.partialorder %v6977_v3, %v6992_v10  ;;  %vm1042_vm11 = vcmp.gt.f32.partialorder %v6977_v3, %v6994_v11  ;;  %vm1043_vm1 = vcmp.gt.f32.partialorder %v6977_v3, %v7005_v15  ;;  %vm1051_vm5 = vcmp.gt.f32.partialorder %v6975_v2, %v7005_v15 }
  0x8e   : > { %15796 = vst [vmem:[#allocation16_spill] sm:$0xff] %v6977_v3  ;;  %v7103_v45 = vsel %vm1041_vm10, 1.0, %v15313_v16  ;;  %v7106_v46 = vsel %vm1042_vm11, 1.0, %v15313_v16  ;;  %vm1052_vm9 = vcmp.gt.f32.partialorder %v6975_v2, %v7019_v20  ;;  %vm1044_vm10 = vcmp.gt.f32.partialorder %v6977_v3, %v7019_v20 }
  0x8f   : > { %15816 = vst [vmem:[#allocation36_spill] sm:$0xff] %v7103_v45  ;;  %vm1087_vm11 = vcmp.gt.f32.partialorder %v6965_v58, %v7005_v15 }
  0x90   : > { %15817 = vst [vmem:[#allocation37_spill] sm:$0xff] %v7106_v46 }
  0x91   : > { %949 = vperm.xlu2 %6580, %v628_v47   ;;  %944 = vperm.xlu1 %6579, %v627_v48   ;;  %v7117_v47 = vsel %vm1075_vm12, 1.0, %v15313_v16 }
  0x92   : > { %939 = vperm.xlu0 %6578, %v626_v50   ;;  %15818 = vst [vmem:[#allocation38_spill] sm:$0xff] %v7117_v47 }
  0x93   : > { %v6970_v62 = vpop.permute.xlu2 %784  ;;  %v6990_v9 = vpop.permute.xlu1 %729 }
  0x94   : > { %15794 = vst [vmem:[#allocation14_spill] sm:$0xff] %v6970_v62  ;;  %v6996_v12 = vpop.permute.xlu0 %719  ;;  %vm1053_vm7 = vcmp.gt.f32.partialorder %v6990_v9, %v6992_v10  ;;  %vm1054_vm8 = vcmp.gt.f32.partialorder %v6990_v9, %v6994_v11 }
  0x95   : > { %15798 = vst [vmem:[#allocation18_spill] sm:$0xff] %v6990_v9  ;;  %vm1045_vm13 = vcmp.gt.f32.partialorder %v6996_v12, %v6992_v10  ;;  %vm1046_vm14 = vcmp.gt.f32.partialorder %v6996_v12, %v6994_v11  ;;  %vm1047_vm6 = vcmp.gt.f32.partialorder %v6996_v12, %v7005_v15  ;;  %vm1048_vm12 = vcmp.gt.f32.partialorder %v6996_v12, %v7019_v20 }
  0x96   : > { %15799 = vst [vmem:[#allocation19_spill] sm:$0xff] %v6996_v12  ;;  %v7124_v50 = vsel %vm1045_vm13, 1.0, %v15313_v16  ;;  %v7183_v8 = vsel %vm1047_vm6, 1.0, %v15313_v16  ;;  %v7194_v29 = vsel %vm1054_vm8, 1.0, %v15313_v16  ;;  %vm1098_vm6 = vcmp.gt.f32.partialorder %v6970_v62, %v6994_v11 }
  0x97   : > { %15820 = vst [vmem:[#allocation40_spill] sm:$0xff] %v7124_v50  ;;  %vm1100_vm8 = vcmp.gt.f32.partialorder %v6970_v62, %v7019_v20 }
  0x98   : > { %15829 = vst [vmem:[#allocation49_spill] sm:$0xff] %v7183_v8 }
  0x99   : > { %964 = vperm.xlu2 %6580, %v631_v51   ;;  %959 = vperm.xlu1 %6579, %v630_v52   ;;  %v7127_v51 = vsel %vm1046_vm14, 1.0, %v15313_v16  ;;  %v2435_v52 = vadd.f32 %v7117_v47, %v2434_v39  ;;  %15832 = vst [vmem:[#allocation52_spill] sm:$0xff] %v7194_v29 }
  0x9a   : > { %954 = vperm.xlu0 %6578, %v629_v53   ;;  %15821 = vst [vmem:[#allocation41_spill] sm:$0xff] %v7127_v51  ;;  %v2394_v53 = vadd.f32 %v7106_v46, %v7103_v45 }
  0x9b   : > { %v6982_v6 = vpop.permute.xlu2 %799  ;;  %v7013_v19 = vpop.permute.xlu1 %749 }
  0x9c   : > { %15797 = vst [vmem:[#allocation17_spill] sm:$0xff] %v6982_v6  ;;  %v7021_v21 = vpop.permute.xlu0 %744  ;;  %vm1069_vm13 = vcmp.gt.f32.partialorder %v7013_v19, %v6992_v10  ;;  %vm1070_vm14 = vcmp.gt.f32.partialorder %v7013_v19, %v6994_v11 }
  0x9d   : > { %15803 = vst [vmem:[#allocation23_spill] sm:$0xff] %v7013_v19  ;;  %v7232_v49 = vsel %vm1069_vm13, 1.0, %v15313_v16  ;;  %vm1068_vm13 = vcmp.gt.f32.partialorder %v7021_v21, %v7019_v20 }
  0x9e   : > { %15804 = vst [vmem:[#allocation24_spill] sm:$0xff] %v7021_v21 }
  0x9f   : > { %15839 = vst [vmem:[#allocation59_spill] sm:$0xff] %v7232_v49 }
  0xa1   : > { %979 = vperm.xlu2 %6580, %v634_v55   ;;  %974 = vperm.xlu1 %6579, %v633_v56   ;;  %v7135_v55 = vsel %vm1049_vm15, 1.0, %v15313_v16  ;;  %v7138_v56 = vsel %vm1050_vm0, 1.0, %v15313_v16  ;;  %vm1055_vm15 = vcmp.gt.f32.partialorder %v6990_v9, %v7005_v15  ;;  %vm1088_vm0 = vcmp.gt.f32.partialorder %v6965_v58, %v7019_v20 }
  0xa2   : > { %969 = vperm.xlu0 %6578, %v632_v57   ;;  %15822 = vst [vmem:[#allocation42_spill] sm:$0xff] %v7135_v55  ;;  %v7141_v57 = vadd.f32 %v7097_v41, %v2420_v42  ;;  %v7203_v42 = vsel %vm1044_vm10, 1.0, %v15313_v16  ;;  %v7241_v58 = vsel %vm1055_vm15, 1.0, %v15313_v16  ;;  %vm1110_vm15 = vcmp.gt.f32.partialorder %v6982_v6, %v6994_v11 }
  0xa3   : > { %v6999_v14 = vpop.permute.xlu2 %814  ;;  %v7090_v40 = vpop.permute.xlu1 %764  ;;  %15823 = vst [vmem:[#allocation43_spill] sm:$0xff] %v7138_v56 }
  0xa4   : > { %15800 = vst [vmem:[#allocation20_spill] sm:$0xff] %v6999_v14  ;;  %v7100_v44 = vpop.permute.xlu0 %759  ;;  %vm1082_vm10 = vcmp.gt.f32.partialorder %v7090_v40, %v6994_v11 }
  0xa5   : > { %15813 = vst [vmem:[#allocation33_spill] sm:$0xff] %v7090_v40 }
  0xa6   : > { %15815 = vst [vmem:[#allocation35_spill] sm:$0xff] %v7100_v44 }
  0xa7   : > { %15834 = vst [vmem:[#allocation54_spill] sm:$0xff] %v7203_v42 }
  0xa8   : > { %15841 = vst [vmem:[#allocation61_spill] sm:$0xff] %v7241_v58 }
  0xa9   : > { %994 = vperm.xlu2 %6580, %v637_v59   ;;  %989 = vperm.xlu1 %6579, %v636_v60   ;;  %v7144_v59 = vsel %vm1043_vm1, 1.0, %v15313_v16  ;;  %v7149_v60 = vsel %vm1076_vm2, 1.0, %v15313_v16  ;;  %vm1056_vm1 = vcmp.gt.f32.partialorder %v6990_v9, %v7019_v20  ;;  %v7235_v9 = vsel %vm1070_vm14, 1.0, %v15313_v16 }
  0xaa   : > { %984 = vperm.xlu0 %6578, %v635_v61   ;;  %15824 = vst [vmem:[#allocation44_spill] sm:$0xff] %v7144_v59  ;;  %v7152_v61 = vsel %vm1085_vm3, 1.0, %v15313_v16  ;;  %vm1065_vm2 = vcmp.gt.f32.partialorder %v7021_v21, %v6992_v10  ;;  %vm1066_vm3 = vcmp.gt.f32.partialorder %v7021_v21, %v6994_v11  ;;  %vm1109_vm14 = vcmp.gt.f32.partialorder %v6982_v6, %v6992_v10 }
  0xab   : > { %v7034_v23 = vpop.permute.xlu2 %829  ;;  %15825 = vst [vmem:[#allocation45_spill] sm:$0xff] %v7149_v60  ;;  %v7190_v27 = vpop.permute.xlu1 %779 }
  0xac   : > { %15805 = vst [vmem:[#allocation25_spill] sm:$0xff] %v7034_v23  ;;  %v7200_v39 = vpop.permute.xlu0 %774 }
  0xad   : > { %15826 = vst [vmem:[#allocation46_spill] sm:$0xff] %v7152_v61 }
  0xae   : > { %15831 = vst [vmem:[#allocation51_spill] sm:$0xff] %v7190_v27 }
  0xaf   : > { %15833 = vst [vmem:[#allocation53_spill] sm:$0xff] %v7200_v39 }
  0xb0   : > { %15840 = vst [vmem:[#allocation60_spill] sm:$0xff] %v7235_v9 }
  0xb1   : > { %1009 = vperm.xlu2 %6580, %v640_v63   ;;  %1004 = vperm.xlu1 %6579, %v639_v0   ;;  %v2399_v63 = vadd.f32 %v7127_v51, %v7124_v50  ;;  %v7161_v0 = vsel %vm1086_vm4, 1.0, %v15313_v16  ;;  %vm1071_vm4 = vcmp.gt.f32.partialorder %v7013_v19, %v7005_v15 }
  0xb2   : > { %999 = vperm.xlu0 %6578, %v638_v1   ;;  %15827 = vst [vmem:[#allocation47_spill] sm:$0xff] %v7161_v0  ;;  %v2404_v1 = vadd.f32 %v7138_v56, %v7135_v55  ;;  %v2449_v22 = vadd.f32 %v7161_v0, %v7152_v61  ;;  %v7244_v0 = vsel %vm1088_vm0, 1.0, %v15313_v16  ;;  %v7247_v61 = vsel %vm1056_vm1, 1.0, %v15313_v16 }
  0xb3   : > { %v7121_v48 = vpop.permute.xlu2 %844  ;;  %v2400_v28 = vadd.f32 %v7183_v8, %v2399_v63  ;;  %v7219_v63 = vsel %vm1052_vm9, 1.0, %v15313_v16  ;;  %15842 = vst [vmem:[#allocation62_spill] sm:$0xff] %v7244_v0  ;;  %vm1081_vm9 = vcmp.gt.f32.partialorder %v7090_v40, %v6992_v10  ;;  %vm1077_vm0 = vcmp.gt.f32.partialorder %v7100_v44, %v6992_v10 }
  0xb4   : > { %15819 = vst [vmem:[#allocation39_spill] sm:$0xff] %v7121_v48  ;;  %vm1078_vm1 = vcmp.gt.f32.partialorder %v7100_v44, %v6994_v11 }
  0xb5   : > { %15836 = vst [vmem:[#allocation56_spill] sm:$0xff] %v7219_v63 }
  0xb6   : > { %15843 = vst [vmem:[#allocation63_spill] sm:$0xff] %v7247_v61 }
  0xb9   : > { %1024 = vperm.xlu2 %6580, %v643_v4   ;;  %1019 = vperm.xlu1 %6579, %v642_v5   ;;  %v7170_v4 = vadd.f32 %v7149_v60, %v2435_v52  ;;  %v2395_v5 = vadd.f32 %v7144_v59, %v2394_v53  ;;  %v7211_v53 = vsel %vm1048_vm12, 1.0, %v15313_v16  ;;  %vm1067_vm12 = vcmp.gt.f32.partialorder %v7021_v21, %v7005_v15 }
  0xba   : > { %1014 = vperm.xlu0 %6578, %v641_v7   ;;  %v7176_v7 = vsel %vm1051_vm5, 1.0, %v15313_v16  ;;  %15835 = vst [vmem:[#allocation55_spill] sm:$0xff] %v7211_v53  ;;  %v2401_v2 = vadd.f32 %v7211_v53, %v2400_v28  ;;  %vm1097_vm5 = vcmp.gt.f32.partialorder %v6970_v62, %v6992_v10  ;;  %v7313_v21 = vsel %vm1082_vm10, 1.0, %v15313_v16 }
  0xbb   : > { %15828 = vst [vmem:[#allocation48_spill] sm:$0xff] %v7176_v7  ;;  %v2405_v52 = vadd.f32 %v7176_v7, %v2404_v1  ;;  %v7225_v1 = vsel %vm1087_vm11, 1.0, %v15313_v16  ;;  %v7227_v54 = vpop.permute.xlu2 %859  ;;  %v2396_v3 = vadd.f32 %v7203_v42, %v2395_v5  ;;  %v2429_v5 = vadd.f32 %v7235_v9, %v7232_v49 }
  0xbc   : > { %15837 = vst [vmem:[#allocation57_spill] sm:$0xff] %v7225_v1  ;;  %v2450_v12 = vadd.f32 %v7225_v1, %v2449_v22  ;;  %vm1072_vm11 = vcmp.gt.f32.partialorder %v7013_v19, %v7019_v20  ;;  %v7299_v19 = vsel %vm1098_vm6, 1.0, %v15313_v16  ;;  %v7319_v31 = vsel %vm1067_vm12, 1.0, %v15313_v16 }
  0xbd   : > { %15838 = vst [vmem:[#allocation58_spill] sm:$0xff] %v7227_v54  ;;  %v2406_v60 = vadd.f32 %v7219_v63, %v2405_v52  ;;  %v7274_v52 = vsel %vm1066_vm3, 1.0, %v15313_v16  ;;  %vm1111_vm3 = vcmp.gt.f32.partialorder %v6982_v6, %v7005_v15  ;;  %vm1084_vm6 = vcmp.gt.f32.partialorder %v7090_v40, %v7019_v20 }
  0xbe   : > { %v7264_v28 = vadd.f32 %v7244_v0, %v2450_v12  ;;  %15845 = vst [vmem:[#allocation65_spill] sm:$0xff] %v7274_v52  ;;  %v7290_v12 = vpop.permute.xlu1 %794  ;;  %v7304_v0 = vpop.permute.xlu0 %789  ;;  %vm1089_vm10 = vcmp.gt.f32.partialorder %v7200_v39, %v6992_v10  ;;  %vm1121_vm12 = vcmp.gt.f32.partialorder %v6999_v14, %v6992_v10 }
  0xbf   : > { %15848 = vst [vmem:[#allocation68_spill] sm:$0xff] %v7290_v12 }
  0xc0   : > { %15849 = vst [vmem:[#allocation69_spill] sm:$0xff] %v7299_v19 }
  0xc1   : > { %15851 = vst [vmem:[#allocation71_spill] sm:$0xff] %v7304_v0 }
  0xc2   : > { %1029 = vperm.xlu0 %6578, %v644_v13   ;;  %v7186_v13 = vsel %vm1053_vm7, 1.0, %v15313_v16  ;;  %vm1099_vm7 = vcmp.gt.f32.partialorder %v6970_v62, %v7005_v15  ;;  %15853 = vst [vmem:[#allocation73_spill] sm:$0xff] %v7313_v21  ;;  %v7358_v62 = vsel %vm1077_vm0, 1.0, %v15313_v16  ;;  %vm1096_vm0 = vcmp.gt.f32.partialorder %v7190_v27, %v7019_v20 }
  0xc3   : > { %15830 = vst [vmem:[#allocation50_spill] sm:$0xff] %v7186_v13  ;;  %v2409_v43 = vadd.f32 %v7194_v29, %v7186_v13  ;;  %v7302_v49 = vsel %vm1099_vm7, 1.0, %v15313_v16  ;;  %vm1079_vm7 = vcmp.gt.f32.partialorder %v7100_v44, %v7005_v15 }
  0xc4   : > { %15850 = vst [vmem:[#allocation70_spill] sm:$0xff] %v7302_v49 }
  0xc5   : > { %v2410_v22 = vadd.f32 %v7241_v58, %v2409_v43  ;;  %v7283_v43 = vsel %vm1071_vm4, 1.0, %v15313_v16  ;;  %15855 = vst [vmem:[#allocation75_spill] sm:$0xff] %v7319_v31  ;;  %vm1093_vm4 = vcmp.gt.f32.partialorder %v7190_v27, %v6992_v10 }
  0xc6   : > { %15846 = vst [vmem:[#allocation66_spill] sm:$0xff] %v7283_v43  ;;  %v2430_v9 = vadd.f32 %v7283_v43, %v2429_v5  ;;  %v7310_v5 = vsel %vm1081_vm9, 1.0, %v15313_v16  ;;  %v7316_v43 = vsel %vm1072_vm11, 1.0, %v15313_v16  ;;  %vm1112_vm9 = vcmp.gt.f32.partialorder %v6982_v6, %v7019_v20 }
  0xc7   : > { %v2411_v1 = vadd.f32 %v7247_v61, %v2410_v22  ;;  %15852 = vst [vmem:[#allocation72_spill] sm:$0xff] %v7310_v5  ;;  %v7325_v22 = vpop.permute.xlu2 %874  ;;  %v2444_v41 = vadd.f32 %v7313_v21, %v7310_v5  ;;  %v7361_v21 = vsel %vm1078_vm1, 1.0, %v15313_v16  ;;  %v7381_v5 = vsel %vm1111_vm3, 1.0, %v15313_v16 }
  0xc8   : > { %15854 = vst [vmem:[#allocation74_spill] sm:$0xff] %v7316_v43  ;;  %v2431_v30 = vadd.f32 %v7316_v43, %v2430_v9  ;;  %v7355_v9 = vsel %vm1110_vm15, 1.0, %v15313_v16  ;;  %v7386_v43 = vsel %vm1093_vm4, 1.0, %v15313_v16  ;;  %vm1090_vm11 = vcmp.gt.f32.partialorder %v7200_v39, %v6994_v11 }
  0xc9   : > { %15856 = vst [vmem:[#allocation76_spill] sm:$0xff] %v7325_v22  ;;  %vm1123_vm15 = vcmp.gt.f32.partialorder %v6999_v14, %v7005_v15  ;;  %vm1105_vm1 = vcmp.gt.f32.partialorder %v7290_v12, %v6992_v10  ;;  %vm1091_vm3 = vcmp.gt.f32.partialorder %v7200_v39, %v7005_v15  ;;  %vm1092_vm4 = vcmp.gt.f32.partialorder %v7200_v39, %v7019_v20 }
  0xca   : > { %15860 = vst [vmem:[#allocation80_spill] sm:$0xff] %v7355_v9 }
  0xcb   : > { %15861 = vst [vmem:[#allocation81_spill] sm:$0xff] %v7358_v62 }
  0xcc   : > { %15862 = vst [vmem:[#allocation82_spill] sm:$0xff] %v7361_v21 }
  0xcd   : > { %15864 = vst [vmem:[#allocation84_spill] sm:$0xff] %v7381_v5 }
  0xce   : > { %15865 = vst [vmem:[#allocation85_spill] sm:$0xff] %v7386_v43 }
  0xe2   : > { %2402 = vadd.xlane.f32.xlu2 %v2401_v2  ;;  %v7271_v2 = vsel %vm1065_vm2, 1.0, %v15313_v16  ;;  %vm1083_vm2 = vcmp.gt.f32.partialorder %v7090_v40, %v7005_v15  ;;  %v2439_v40 = vadd.f32 %v7361_v21, %v7358_v62  ;;  %v7405_v62 = vpop.permute.xlu0 %804 }
  0xe3   : > { %2397 = vadd.xlane.f32.xlu1 %v2396_v3  ;;  %15844 = vst [vmem:[#allocation64_spill] sm:$0xff] %v7271_v2  ;;  %v7288_v3 = vsel %vm1097_vm5, 1.0, %v15313_v16  ;;  %v2424_v47 = vadd.f32 %v7274_v52, %v7271_v2  ;;  %v7328_v52 = vsel %vm1068_vm13, 1.0, %v15313_v16  ;;  %v7338_v2 = vsel %vm1100_vm8, 1.0, %v15313_v16 }
  0xe4   : > { %15847 = vst [vmem:[#allocation67_spill] sm:$0xff] %v7288_v3  ;;  %v2464_v38 = vadd.f32 %v7299_v19, %v7288_v3  ;;  %vm1094_vm5 = vcmp.gt.f32.partialorder %v7190_v27, %v6994_v11  ;;  %vm1080_vm8 = vcmp.gt.f32.partialorder %v7100_v44, %v7019_v20  ;;  %v7393_v44 = vpop.permute.xlu1 %809  ;;  %vm1122_vm13 = vcmp.gt.f32.partialorder %v6999_v14, %v6994_v11 }
  0xe5   : > { %15857 = vst [vmem:[#allocation77_spill] sm:$0xff] %v7328_v52  ;;  %v2425_v25 = vadd.f32 %v7319_v31, %v2424_v47  ;;  %v7389_v31 = vsel %vm1094_vm5, 1.0, %v15313_v16  ;;  %v7403_v21 = vsel %vm1080_vm8, 1.0, %v15313_v16  ;;  %vm1124_vm5 = vcmp.gt.f32.partialorder %v6999_v14, %v7019_v20 }
  0xe6   : > { %15858 = vst [vmem:[#allocation78_spill] sm:$0xff] %v7338_v2  ;;  %vm1107_vm8 = vcmp.gt.f32.partialorder %v7290_v12, %v7005_v15 }
  0xe7   : > { %15866 = vst [vmem:[#allocation86_spill] sm:$0xff] %v7389_v31 }
  0xe8   : > { %15867 = vst [vmem:[#allocation87_spill] sm:$0xff] %v7393_v44 }
  0xe9   : > { %15870 = vst [vmem:[#allocation90_spill] sm:$0xff] %v7403_v21 }
  0xea   : > { %2412 = vadd.xlane.f32.xlu2 %v2411_v1  ;;  %v7352_v1 = vsel %vm1109_vm14, 1.0, %v15313_v16  ;;  %15871 = vst [vmem:[#allocation91_spill] sm:$0xff] %v7405_v62  ;;  %vm1095_vm14 = vcmp.gt.f32.partialorder %v7190_v27, %v7005_v15 }
  0xeb   : > { %2417 = vadd.xlane.f32.xlu1 %v7081_v37  ;;  %15859 = vst [vmem:[#allocation79_spill] sm:$0xff] %v7352_v1  ;;  %v7370_v37 = vsel %vm1083_vm2, 1.0, %v15313_v16  ;;  %vm1106_vm2 = vcmp.gt.f32.partialorder %v7290_v12, %v6994_v11 }
  0xec   : > { %2407 = vadd.xlane.f32.xlu0 %v2406_v60  ;;  %15863 = vst [vmem:[#allocation83_spill] sm:$0xff] %v7370_v37  ;;  %v2445_v47 = vadd.f32 %v7370_v37, %v2444_v41  ;;  %v2465_v60 = vadd.f32 %v7302_v49, %v2464_v38  ;;  %v2479_v41 = vadd.f32 %v7355_v9, %v7352_v1  ;;  %v7397_v37 = vsel %vm1084_vm6, 1.0, %v15313_v16 }
  0xed   : > { %v2426_v38 = vadd.f32 %v7328_v52, %v2425_v25  ;;  %15868 = vst [vmem:[#allocation88_spill] sm:$0xff] %v7397_v37  ;;  %v7400_v49 = vsel %vm1079_vm7, 1.0, %v15313_v16  ;;  %v2459_v25 = vadd.f32 %v7389_v31, %v7386_v43  ;;  %v15872_v9 = vmov 0.0   ;;  %v7429_v52 = vpop.permute.xlu2 %889 }
  0xee   : > { %15869 = vst [vmem:[#allocation89_spill] sm:$0xff] %v7400_v49  ;;  %v7421_v16 = vadd.f32 %v7338_v2, %v2465_v60  ;;  %v7427_v1 = vsel %vm1112_vm9, 1.0, %v15872_v9  ;;  %v2440_v19 = vadd.f32 %v7400_v49, %v2439_v40  ;;  %v2480_v3 = vadd.f32 %v7381_v5, %v2479_v41  ;;  %v7504_v49 = vpop.permute.xlu1 %824 }
  0xef   : > { %15873 = vst [vmem:[#allocation92_spill] sm:$0xff] %v7427_v1  ;;  %v7440_v60 = vsel %vm1089_vm10, 1.0, %v15872_v9  ;;  %v6366_v40 = vsel %vm1121_vm12, 1.0, %v15872_v9  ;;  %v7462_v41 = vsel %vm1095_vm14, 1.0, %v15872_v9  ;;  %vm1101_vm6 = vcmp.gt.f32.partialorder %v7304_v0, %v6992_v10 }
  0xf0   : > { %15874 = vst [vmem:[#allocation93_spill] sm:$0xff] %v7429_v52  ;;  %v2441_v6 = vadd.f32 %v7403_v21, %v2440_v19  ;;  %vm1102_vm7 = vcmp.gt.f32.partialorder %v7304_v0, %v6994_v11  ;;  %v7489_v39 = vsel %vm1106_vm2, 1.0, %v15872_v9  ;;  %v7492_v19 = vsel %vm1091_vm3, 1.0, %v15872_v9 }
  0xf1   : > { %15875 = vst [vmem:[#allocation94_spill] sm:$0xff] %v7440_v60  ;;  %v7495_v21 = vsel %vm1092_vm4, 1.0, %v15872_v9  ;;  %v7498_v31 = vadd.f32 %v7427_v1, %v2480_v3  ;;  %v6368_v43 = vsel %vm1123_vm15, 1.0, %v15872_v9  ;;  %v7512_v5 = vsel %vm1102_vm7, 1.0, %v15872_v9  ;;  %v7518_v1 = vpop.permute.xlu0 %819 }
  0xf2   : > { %2422 = vadd.xlane.f32.xlu2 %v7141_v57  ;;  %v2446_v57 = vadd.f32 %v7397_v37, %v2445_v47  ;;  %v6367_v47 = vsel %vm1122_vm13, 1.0, %v15872_v9  ;;  %15877 = vst [vmem:[#allocation96_spill] sm:$0xff] %v7462_v41  ;;  %v6369_v3 = vsel %vm1124_vm5, 1.0, %v15872_v9  ;;  %vm1117_vm9 = vcmp.gt.f32.partialorder %v7393_v44, %v6992_v10 }
  0xf3   : > { %2432 = vadd.xlane.f32.xlu1 %v2431_v30  ;;  %v7446_v30 = vsel %vm1090_vm11, 1.0, %v15872_v9  ;;  %15880 = vst [vmem:[#allocation99_spill] sm:$0xff] %v7489_v39  ;;  %v2494_v37 = vadd.f32 %v6367_v47, %v6366_v40  ;;  %vm1118_vm10 = vcmp.gt.f32.partialorder %v7393_v44, %v6994_v11  ;;  %vm1108_vm11 = vcmp.gt.f32.partialorder %v7290_v12, %v7019_v20 }
  0xf4   : > { %2427 = vadd.xlane.f32.xlu0 %v2426_v38  ;;  %15876 = vst [vmem:[#allocation95_spill] sm:$0xff] %v7446_v30  ;;  %v2460_v38 = vadd.f32 %v7462_v41, %v2459_v25  ;;  %v2454_v27 = vadd.f32 %v7446_v30, %v7440_v60  ;;  %v7483_v25 = vsel %vm1096_vm0, 1.0, %v15872_v9  ;;  %v7486_v41 = vsel %vm1105_vm1, 1.0, %v15872_v9 }
  0xf5   : > { %15878 = vst [vmem:[#allocation97_spill] sm:$0xff] %v7483_v25  ;;  %v7509_v60 = vsel %vm1101_vm6, 1.0, %v15872_v9  ;;  %v2495_v14 = vadd.f32 %v6368_v43, %v2494_v37  ;;  %vm1103_vm12 = vcmp.gt.f32.partialorder %v7304_v0, %v7005_v15  ;;  %v7550_v37 = vmul.f32 %v6369_v3, %v7071_v35 }
  0xf6   : > { %15879 = vst [vmem:[#allocation98_spill] sm:$0xff] %v7486_v41  ;;  %v2461_v30 = vadd.f32 %v7483_v25, %v2460_v38  ;;  %v2455_v2 = vadd.f32 %v7492_v19, %v2454_v27  ;;  %v7526_v38 = vmul.f32 %v6366_v40, %v7063_v32  ;;  %v7535_v27 = vpop.permute.xlu2 %904  ;;  %v7544_v40 = vmul.f32 %v6368_v43, %v7067_v34 }
  0xf7   : > { %15881 = vst [vmem:[#allocation100_spill] sm:$0xff] %v7492_v19  ;;  %v7547_v25 = vsel %vm1107_vm8, 1.0, %v15872_v9  ;;  %vm1133_vm13 = vcmp.gt.f32.partialorder %v7034_v23, %v6992_v10  ;;  %vm1134_vm14 = vcmp.gt.f32.partialorder %v7034_v23, %v6994_v11  ;;  %v6363_v43 = vsel %vm1118_vm10, 1.0, %v15872_v9 }
  0xf8   : > { %15882 = vst [vmem:[#allocation101_spill] sm:$0xff] %v7495_v21  ;;  %vm1104_vm15 = vcmp.gt.f32.partialorder %v7304_v0, %v7019_v20  ;;  %vm1135_vm0 = vcmp.gt.f32.partialorder %v7034_v23, %v7005_v15  ;;  %vm1136_vm1 = vcmp.gt.f32.partialorder %v7034_v23, %v7019_v20  ;;  %vm1119_vm2 = vcmp.gt.f32.partialorder %v7393_v44, %v7005_v15 }
  0xf9   : > { %15883 = vst [vmem:[#allocation102_spill] sm:$0xff] %v7504_v49  ;;  %vm1113_vm3 = vcmp.gt.f32.partialorder %v7405_v62, %v6992_v10  ;;  %vm1114_vm4 = vcmp.gt.f32.partialorder %v7405_v62, %v6994_v11  ;;  %vm1120_vm5 = vcmp.gt.f32.partialorder %v7393_v44, %v7019_v20  ;;  %vm1129_vm6 = vcmp.gt.f32.partialorder %v7504_v49, %v6992_v10 }
  0xfa   : > { %2437 = vadd.xlane.f32.xlu2 %v7170_v4  ;;  %15884 = vst [vmem:[#allocation103_spill] sm:$0xff] %v7509_v60  ;;  %v2474_v4 = vadd.f32 %v7489_v39, %v7486_v41  ;;  %v6362_v39 = vsel %vm1117_vm9, 1.0, %v15872_v9  ;;  %v7561_v41 = vsel %vm1108_vm11, 1.0, %v15872_v9  ;;  %vm1130_vm7 = vcmp.gt.f32.partialorder %v7504_v49, %v6994_v11 }
  0xfb   : > { %15885 = vst [vmem:[#allocation104_spill] sm:$0xff] %v7512_v5  ;;  %2447 = vadd.xlane.f32.xlu1 %v2446_v57  ;;  %v7533_v57 = vmul.f32 %v6367_v47, %v7065_v33  ;;  %v2456_v47 = vadd.f32 %v7495_v21, %v2455_v2  ;;  %v2489_v0 = vadd.f32 %v6363_v43, %v6362_v39  ;;  %v7590_v21 = vpop.permute.xlu1 %839  ;;  %v6365_v24 = vsel %vm1120_vm5, 1.0, %v15872_v9 }
  0xfc   : > { %15886 = vst [vmem:[#allocation105_spill] sm:$0xff] %v7518_v1  ;;  %2442 = vadd.xlane.f32.xlu0 %v2441_v6  ;;  %v2469_v6 = vadd.f32 %v7512_v5, %v7509_v60  ;;  %v2475_v12 = vadd.f32 %v7547_v25, %v2474_v4  ;;  %v7566_v5 = vsel %vm1103_vm12, 1.0, %v15872_v9  ;;  %v6378_v4 = vsel %vm1133_vm13, 1.0, %v15872_v9 }
  0xfd   : > { %15887 = vst [vmem:[#allocation106_spill] sm:$0xff] %v7535_v27  ;;  %v7619_v36 = vmul.f32 %v6378_v4, %v7063_v32  ;;  %vm1115_vm8 = vcmp.gt.f32.partialorder %v7405_v62, %v7005_v15  ;;  %vm1116_vm9 = vcmp.gt.f32.partialorder %v7405_v62, %v7019_v20  ;;  %v6374_v44 = vsel %vm1129_vm6, 1.0, %v15872_v9 }
  0xfe   : > { %15888 = vst [vmem:[#allocation107_spill] sm:$0xff] %v7547_v25  ;;  %v2470_v2 = vadd.f32 %v7566_v5, %v2469_v6  ;;  %v6379_v25 = vsel %vm1134_vm14, 1.0, %v15872_v9  ;;  %v2476_v6 = vadd.f32 %v7561_v41, %v2475_v12  ;;  %v6380_v12 = vsel %vm1135_vm0, 1.0, %v15872_v9  ;;  %v7621_v26 = vpop.permute.xlu2 %919 }
  0xff   : > { %15889 = vst [vmem:[#allocation108_spill] sm:$0xff] %v7561_v41  ;;  %v7614_v41 = vsel %vm1114_vm4, 1.0, %v15872_v9  ;;  %v2509_v60 = vadd.f32 %v6379_v25, %v6378_v4  ;;  %v7639_v4 = vmul.f32 %v6363_v43, %v7065_v33  ;;  %v7647_v18 = vmul.f32 %v6365_v24, %v7071_v35 }
 0x100   : > { %15890 = vst [vmem:[#allocation109_spill] sm:$0xff] %v7566_v5  ;;  %v7584_v5 = vsel %vm1104_vm15, 1.0, %v15872_v9  ;;  %vm1125_vm10 = vcmp.gt.f32.partialorder %v7518_v1, %v6992_v10  ;;  %vm1126_vm11 = vcmp.gt.f32.partialorder %v7518_v1, %v6994_v11  ;;  %v7655_v43 = vsel %vm1115_vm8, 1.0, %v15872_v9 }
 0x101   : > { %15891 = vst [vmem:[#allocation110_spill] sm:$0xff] %v7584_v5  ;;  %v2471_v19 = vadd.f32 %v7584_v5, %v2470_v2  ;;  %v7636_v2 = vmul.f32 %v6362_v39, %v7063_v32  ;;  %v2510_v39 = vadd.f32 %v6380_v12, %v2509_v60  ;;  %vm1131_vm12 = vcmp.gt.f32.partialorder %v7504_v49, %v7005_v15 }
 0x102   : > { %2452 = vadd.xlane.f32.xlu2 %v7264_v28  ;;  %v7588_v28 = vadd.f32 %v6369_v3, %v2495_v14  ;;  %15892 = vst [vmem:[#allocation111_spill] sm:$0xff] %v7590_v21  ;;  %v6381_v14 = vsel %vm1136_vm1, 1.0, %v15872_v9  ;;  %v6364_v3 = vsel %vm1119_vm2, 1.0, %v15872_v9  ;;  %v7663_v61 = vmul.f32 %v6379_v25, %v7065_v33 }
 0x103   : > { %2462 = vadd.xlane.f32.xlu1 %v2461_v30  ;;  %v7604_v30 = vpop.permute.xlu0 %834  ;;  %15895 = vst [vmem:[#allocation114_spill] sm:$0xff] %v7614_v41  ;;  %v2490_v23 = vadd.f32 %v6364_v3, %v2489_v0  ;;  %v6375_v0 = vsel %vm1130_vm7, 1.0, %v15872_v9  ;;  %v7642_v5 = vmul.f32 %v6364_v3, %v7067_v34  ;;  %v7658_v3 = vsel %vm1116_vm9, 1.0, %v15872_v9 }
 0x104   : > { %2457 = vadd.xlane.f32.xlu0 %v2456_v47  ;;  %15893 = vst [vmem:[#allocation112_spill] sm:$0xff] %v7604_v30  ;;  %v7611_v47 = vsel %vm1113_vm3, 1.0, %v15872_v9  ;;  %vm1141_vm13 = vcmp.gt.f32.partialorder %v7590_v21, %v6992_v10  ;;  %vm1142_vm14 = vcmp.gt.f32.partialorder %v7590_v21, %v6994_v11  ;;  %v6370_v60 = vsel %vm1125_vm10, 1.0, %v15872_v9 }
 0x105   : > { %15894 = vst [vmem:[#allocation113_spill] sm:$0xff] %v7611_v47  ;;  %v2484_v62 = vadd.f32 %v7614_v41, %v7611_v47  ;;  %v2504_v41 = vadd.f32 %v6375_v0, %v6374_v44  ;;  %v2491_v47 = vadd.f32 %v6365_v24, %v2490_v23  ;;  %v6371_v58 = vsel %vm1126_vm11, 1.0, %v15872_v9 }
 0x106   : > { %15896 = vst [vmem:[#allocation115_spill] sm:$0xff] %v7621_v26  ;;  %v7673_v29 = vmul.f32 %v6380_v12, %v7067_v34  ;;  %vm1132_vm15 = vcmp.gt.f32.partialorder %v7504_v49, %v7019_v20  ;;  %v7678_v23 = vsel %vm1131_vm12, 1.0, %v15872_v9  ;;  %v7680_v24 = vadd.f32 %v6381_v14, %v2510_v39  ;;  %v7713_v13 = vpop.permute.xlu2 %934 }
 0x107   : > { %15897 = vst [vmem:[#allocation116_spill] sm:$0xff] %v7655_v43  ;;  %v7683_v25 = vmul.f32 %v6381_v14, %v7071_v35  ;;  %v7692_v12 = vsel %vm1142_vm14, 1.0, %v15872_v9  ;;  %vm1145_vm0 = vcmp.gt.f32.partialorder %v7121_v48, %v6992_v10  ;;  %vm1127_vm1 = vcmp.gt.f32.partialorder %v7518_v1, %v7005_v15 }
 0x108   : > { %15898 = vst [vmem:[#allocation117_spill] sm:$0xff] %v7658_v3  ;;  %vm1128_vm2 = vcmp.gt.f32.partialorder %v7518_v1, %v7019_v20  ;;  %v2499_v14 = vadd.f32 %v6371_v58, %v6370_v60  ;;  %vm1146_vm3 = vcmp.gt.f32.partialorder %v7121_v48, %v6994_v11  ;;  %v7706_v39 = vsel %vm1132_vm15, 1.0, %v15872_v9 }
 0x109   : > { %15900 = vst [vmem:[#allocation119_spill] sm:$0xff] %v7692_v12  ;;  %vm1143_vm4 = vcmp.gt.f32.partialorder %v7590_v21, %v7005_v15  ;;  %v7716_v53 = vmul.f32 %v6375_v0, %v7065_v33  ;;  %vm1137_vm5 = vcmp.gt.f32.partialorder %v7604_v30, %v6992_v10  ;;  %vm1138_vm6 = vcmp.gt.f32.partialorder %v7604_v30, %v6994_v11 }
 0x10a   : > { %2467 = vadd.xlane.f32.xlu2 %v7421_v16  ;;  %v2485_v16 = vadd.f32 %v7655_v43, %v2484_v62  ;;  %v2505_v62 = vadd.f32 %v7678_v23, %v2504_v41  ;;  %v7709_v43 = vmul.f32 %v6374_v44, %v7063_v32  ;;  %15902 = vst [vmem:[#allocation121_spill] sm:$0xff] %v7713_v13  ;;  %v7740_v17 = vsel %vm1143_vm4, 1.0, %v15872_v9 }
 0x10b   : > { %2477 = vadd.xlane.f32.xlu1 %v2476_v6  ;;  %v7689_v6 = vsel %vm1141_vm13, 1.0, %v15872_v9  ;;  %v7696_v49 = vpop.permute.xlu0 %849  ;;  %v7733_v0 = vmul.f32 %v6370_v60, %v7063_v32  ;;  %v7737_v51 = vmul.f32 %v6371_v58, %v7065_v33  ;;  %15903 = vst [vmem:[#allocation122_spill] sm:$0xff] %v7740_v17  ;;  %vm1147_vm7 = vcmp.gt.f32.partialorder %v7121_v48, %v7005_v15 }
 0x10c   : > { %2472 = vadd.xlane.f32.xlu0 %v2471_v19  ;;  %v7685_v19 = vpop.permute.xlu1 %854  ;;  %15901 = vst [vmem:[#allocation120_spill] sm:$0xff] %v7696_v49  ;;  %v2486_v41 = vadd.f32 %v7658_v3, %v2485_v16  ;;  %v2519_v1 = vadd.f32 %v7692_v12, %v7689_v6  ;;  %v2506_v44 = vadd.f32 %v7706_v39, %v2505_v62  ;;  %v7727_v16 = vsel %vm1127_vm1, 1.0, %v15872_v9 }
 0x10d   : > { %15899 = vst [vmem:[#allocation118_spill] sm:$0xff] %v7685_v19  ;;  %v7730_v3 = vsel %vm1128_vm2, 1.0, %v15872_v9  ;;  %v2500_v8 = vadd.f32 %v7727_v16, %v2499_v14  ;;  %v7748_v62 = vsel %vm1138_vm6, 1.0, %v15872_v9  ;;  %vm1153_vm8 = vcmp.gt.f32.partialorder %v7685_v19, %v6992_v10 }
 0x10e   : > { %15905 = vst [vmem:[#allocation124_spill] sm:$0xff] %v7748_v62  ;;  %vm1154_vm9 = vcmp.gt.f32.partialorder %v7685_v19, %v6994_v11  ;;  %vm1144_vm10 = vcmp.gt.f32.partialorder %v7590_v21, %v7019_v20  ;;  %v2520_v58 = vadd.f32 %v7740_v17, %v2519_v1  ;;  %vm1139_vm11 = vcmp.gt.f32.partialorder %v7604_v30, %v7005_v15  ;;  %v7814_v13 = vpop.permute.xlu2 %949 }
 0x10f   : > { %vm1140_vm12 = vcmp.gt.f32.partialorder %v7604_v30, %v7019_v20  ;;  %v6391_v60 = vsel %vm1146_vm3, 1.0, %v15872_v9  ;;  %vm1149_vm13 = vcmp.gt.f32.partialorder %v7696_v49, %v6992_v10  ;;  %vm1150_vm14 = vcmp.gt.f32.partialorder %v7696_v49, %v6994_v11  ;;  %15915 = vst [vmem:[#allocation134_spill] sm:$0xff] %v7814_v13 }
 0x110   : > { %vm1148_vm15 = vcmp.gt.f32.partialorder %v7121_v48, %v7019_v20  ;;  %v7778_v14 = vsel %vm1153_vm8, 1.0, %v15872_v9  ;;  %v2501_v30 = vadd.f32 %v7730_v3, %v2500_v8  ;;  %v7787_v63 = vsel %vm1144_vm10, 1.0, %v15872_v9 }
 0x111   : > { %15906 = vst [vmem:[#allocation125_spill] sm:$0xff] %v7778_v14  ;;  %v7790_v50 = vsel %vm1139_vm11, 1.0, %v15872_v9  ;;  %v7793_v7 = vsel %vm1140_vm12, 1.0, %v15872_v9  ;;  %v6392_v55 = vsel %vm1147_vm7, 1.0, %v15872_v9  ;;  %v7802_v59 = vsel %vm1149_vm13, 1.0, %v15872_v9 }
 0x112   : > { %2482 = vadd.xlane.f32.xlu2 %v7498_v31  ;;  %v7745_v31 = vsel %vm1137_vm5, 1.0, %v15872_v9  ;;  %15909 = vst [vmem:[#allocation128_spill] sm:$0xff] %v7787_v63  ;;  %v7805_v8 = vsel %vm1150_vm14, 1.0, %v15872_v9  ;;  %v2521_v46 = vadd.f32 %v7787_v63, %v2520_v58  ;;  %v6393_v45 = vsel %vm1148_vm15, 1.0, %v15872_v9 }
 0x113   : > { %2492 = vadd.xlane.f32.xlu1 %v2491_v47  ;;  %15904 = vst [vmem:[#allocation123_spill] sm:$0xff] %v7745_v31  ;;  %v6390_v47 = vsel %vm1145_vm0, 1.0, %v15872_v9  ;;  %v2514_v1 = vadd.f32 %v7748_v62, %v7745_v31  ;;  %v7795_v56 = vpop.permute.xlu0 %864  ;;  %vm1155_vm0 = vcmp.gt.f32.partialorder %v7685_v19, %v7005_v15  ;;  %vm1151_vm1 = vcmp.gt.f32.partialorder %v7696_v49, %v7005_v15 }
 0x114   : > { %2487 = vadd.xlane.f32.xlu0 %v2486_v41  ;;  %v7781_v41 = vsel %vm1154_vm9, 1.0, %v15872_v9  ;;  %v7783_v21 = vpop.permute.xlu1 %869  ;;  %15910 = vst [vmem:[#allocation129_spill] sm:$0xff] %v7790_v50  ;;  %v2524_v42 = vadd.f32 %v6391_v60, %v6390_v47  ;;  %vm1157_vm2 = vcmp.gt.f32.partialorder %v7227_v54, %v6992_v10  ;;  %vm1158_vm3 = vcmp.gt.f32.partialorder %v7227_v54, %v6994_v11 }
 0x115   : > { %15907 = vst [vmem:[#allocation126_spill] sm:$0xff] %v7781_v41  ;;  %v2534_v48 = vadd.f32 %v7781_v41, %v7778_v14  ;;  %v2515_v17 = vadd.f32 %v7790_v50, %v2514_v1  ;;  %v7827_v58 = vmul.f32 %v6391_v60, %v7065_v33  ;;  %v2529_v1 = vadd.f32 %v7805_v8, %v7802_v59 }
 0x116   : > { %15908 = vst [vmem:[#allocation127_spill] sm:$0xff] %v7783_v21  ;;  %v2525_v13 = vadd.f32 %v6392_v55, %v2524_v42  ;;  %v7835_v41 = vmul.f32 %v6393_v45, %v7071_v35  ;;  %vm1156_vm4 = vcmp.gt.f32.partialorder %v7685_v19, %v7019_v20  ;;  %v7847_v60 = vsel %vm1151_vm1, 1.0, %v15872_v9 }
 0x117   : > { %15911 = vst [vmem:[#allocation130_spill] sm:$0xff] %v7793_v7  ;;  %vm1165_vm5 = vcmp.gt.f32.partialorder %v7783_v21, %v6992_v10  ;;  %vm1166_vm6 = vcmp.gt.f32.partialorder %v7783_v21, %v6994_v11  ;;  %vm1161_vm7 = vcmp.gt.f32.partialorder %v7795_v56, %v6992_v10  ;;  %vm1162_vm8 = vcmp.gt.f32.partialorder %v7795_v56, %v6994_v11 }
 0x118   : > { %15912 = vst [vmem:[#allocation131_spill] sm:$0xff] %v7795_v56  ;;  %vm1152_vm9 = vcmp.gt.f32.partialorder %v7696_v49, %v7019_v20  ;;  %vm1159_vm10 = vcmp.gt.f32.partialorder %v7227_v54, %v7005_v15  ;;  %vm1160_vm11 = vcmp.gt.f32.partialorder %v7227_v54, %v7019_v20  ;;  %v2516_v42 = vadd.f32 %v7793_v7, %v2515_v17  ;;  %v7913_v49 = vpop.permute.xlu2 %964 }
 0x119   : > { %15913 = vst [vmem:[#allocation132_spill] sm:$0xff] %v7802_v59  ;;  %v7871_v59 = vsel %vm1156_vm4, 1.0, %v15872_v9  ;;  %v7883_v17 = vsel %vm1161_vm7, 1.0, %v15872_v9  ;;  %v6404_v7 = vsel %vm1159_vm10, 1.0, %v15872_v9  ;;  %v6405_v50 = vsel %vm1160_vm11, 1.0, %v15872_v9 }
 0x11a   : > { %15914 = vst [vmem:[#allocation133_spill] sm:$0xff] %v7805_v8  ;;  %2497 = vadd.xlane.f32.xlu2 %v7588_v28  ;;  %v7824_v28 = vmul.f32 %v6390_v47, %v7063_v32  ;;  %v6402_v8 = vsel %vm1157_vm2, 1.0, %v15872_v9  ;;  %vm1169_vm12 = vcmp.gt.f32.partialorder %v7325_v22, %v6992_v10  ;;  %vm1170_vm13 = vcmp.gt.f32.partialorder %v7325_v22, %v6994_v11 }
 0x11b   : > { %2507 = vadd.xlane.f32.xlu1 %v2506_v44  ;;  %v7830_v44 = vmul.f32 %v6392_v55, %v7067_v34  ;;  %15917 = vst [vmem:[#allocation136_spill] sm:$0xff] %v7847_v60  ;;  %v6403_v55 = vsel %vm1158_vm3, 1.0, %v15872_v9  ;;  %vm1167_vm14 = vcmp.gt.f32.partialorder %v7783_v21, %v7005_v15  ;;  %vm1163_vm15 = vcmp.gt.f32.partialorder %v7795_v56, %v7005_v15 }
 0x11c   : > { %2502 = vadd.xlane.f32.xlu0 %v2501_v30  ;;  %v7843_v30 = vsel %vm1155_vm0, 1.0, %v15872_v9  ;;  %15918 = vst [vmem:[#allocation137_spill] sm:$0xff] %v7871_v59  ;;  %v2539_v14 = vadd.f32 %v6403_v55, %v6402_v8  ;;  %v7873_v63 = vpop.permute.xlu1 %884  ;;  %vm1168_vm2 = vcmp.gt.f32.partialorder %v7783_v21, %v7019_v20  ;;  %vm1164_vm3 = vcmp.gt.f32.partialorder %v7795_v56, %v7019_v20 }
 0x11d   : > { %15916 = vst [vmem:[#allocation135_spill] sm:$0xff] %v7843_v30  ;;  %v2535_v47 = vadd.f32 %v7843_v30, %v2534_v48  ;;  %v2530_v48 = vadd.f32 %v7847_v60, %v2529_v1  ;;  %v2526_v30 = vadd.f32 %v6393_v45, %v2525_v13  ;;  %v7877_v1 = vsel %vm1165_vm5, 1.0, %v15872_v9  ;;  %v7888_v13 = vpop.permute.xlu0 %879 }
 0x11e   : > { %15919 = vst [vmem:[#allocation138_spill] sm:$0xff] %v7873_v63  ;;  %v7880_v60 = vsel %vm1166_vm6, 1.0, %v15872_v9  ;;  %v7886_v45 = vsel %vm1162_vm8, 1.0, %v15872_v9  ;;  %vm1177_vm0 = vcmp.gt.f32.partialorder %v7873_v63, %v6992_v10  ;;  %vm1178_vm1 = vcmp.gt.f32.partialorder %v7873_v63, %v6994_v11 }
 0x11f   : > { %15920 = vst [vmem:[#allocation139_spill] sm:$0xff] %v7877_v1  ;;  %v2536_v19 = vadd.f32 %v7871_v59, %v2535_v47  ;;  %v7907_v47 = vmul.f32 %v6402_v8, %v7063_v32  ;;  %v2549_v54 = vadd.f32 %v7880_v60, %v7877_v1  ;;  %v2544_v8 = vadd.f32 %v7886_v45, %v7883_v17 }
 0x120   : > { %15921 = vst [vmem:[#allocation140_spill] sm:$0xff] %v7880_v60  ;;  %v7927_v59 = vmul.f32 %v6404_v7, %v7067_v34  ;;  %v7936_v60 = vsel %vm1170_vm13, 1.0, %v15872_v9  ;;  %vm1173_vm4 = vcmp.gt.f32.partialorder %v7888_v13, %v6992_v10  ;;  %vm1174_vm5 = vcmp.gt.f32.partialorder %v7888_v13, %v6994_v11  ;;  %v8007_v31 = vpop.permute.xlu2 %979 }
 0x121   : > { %15922 = vst [vmem:[#allocation141_spill] sm:$0xff] %v7883_v17  ;;  %vm1171_vm6 = vcmp.gt.f32.partialorder %v7325_v22, %v7005_v15  ;;  %v7963_v56 = vsel %vm1177_vm0, 1.0, %v15872_v9  ;;  %vm1172_vm7 = vcmp.gt.f32.partialorder %v7325_v22, %v7019_v20  ;;  %vm1181_vm8 = vcmp.gt.f32.partialorder %v7429_v52, %v6992_v10 }
 0x122   : > { %2512 = vadd.xlane.f32.xlu2 %v7680_v24  ;;  %15923 = vst [vmem:[#allocation142_spill] sm:$0xff] %v7886_v45  ;;  %v7895_v24 = vsel %vm1152_vm9, 1.0, %v15872_v9  ;;  %vm1182_vm9 = vcmp.gt.f32.partialorder %v7429_v52, %v6994_v11  ;;  %vm1179_vm10 = vcmp.gt.f32.partialorder %v7873_v63, %v7005_v15  ;;  %vm1180_vm11 = vcmp.gt.f32.partialorder %v7873_v63, %v7019_v20 }
 0x123   : > { %15924 = vst [vmem:[#allocation143_spill] sm:$0xff] %v7888_v13  ;;  %2522 = vadd.xlane.f32.xlu1 %v2521_v46  ;;  %v2531_v46 = vadd.f32 %v7895_v24, %v2530_v48  ;;  %v2540_v48 = vadd.f32 %v6404_v7, %v2539_v14  ;;  %v7945_v7 = vsel %vm1167_vm14, 1.0, %v15872_v9  ;;  %v7950_v14 = vsel %vm1163_vm15, 1.0, %v15872_v9 }
 0x124   : > { %15925 = vst [vmem:[#allocation144_spill] sm:$0xff] %v7895_v24  ;;  %2517 = vadd.xlane.f32.xlu0 %v2516_v42  ;;  %v7924_v42 = vmul.f32 %v6403_v55, %v7065_v33  ;;  %v7933_v24 = vsel %vm1169_vm12, 1.0, %v15872_v9  ;;  %v2550_v55 = vadd.f32 %v7945_v7, %v2549_v54  ;;  %v2545_v1 = vadd.f32 %v7950_v14, %v2544_v8 }
 0x125   : > { %15926 = vst [vmem:[#allocation145_spill] sm:$0xff] %v7913_v49  ;;  %v7930_v49 = vmul.f32 %v6405_v50, %v7071_v35  ;;  %v2554_v21 = vadd.f32 %v7936_v60, %v7933_v24  ;;  %v7966_v54 = vsel %vm1178_vm1, 1.0, %v15872_v9  ;;  %v2541_v8 = vadd.f32 %v6405_v50, %v2540_v48  ;;  %v7988_v50 = vpop.permute.xlu0 %894 }
 0x126   : > { %15927 = vst [vmem:[#allocation146_spill] sm:$0xff] %v7933_v24  ;;  %v7982_v24 = vsel %vm1174_vm5, 1.0, %v15872_v9  ;;  %v3272_v62 = vadd.f32 %v7533_v57, %v7526_v38  ;;  %vm1175_vm12 = vcmp.gt.f32.partialorder %v7888_v13, %v7005_v15  ;;  %v8014_v12 = vsel %vm1181_vm8, 1.0, %v15872_v9 }
 0x127   : > { %15928 = vst [vmem:[#allocation147_spill] sm:$0xff] %v7936_v60  ;;  %v7979_v60 = vsel %vm1173_vm4, 1.0, %v15872_v9  ;;  %v8026_v38 = vsel %vm1179_vm10, 1.0, %v15872_v9  ;;  %v8029_v57 = vsel %vm1180_vm11, 1.0, %v15872_v9  ;;  %vm1176_vm13 = vcmp.gt.f32.partialorder %v7888_v13, %v7019_v20 }
 0x128   : > { %15929 = vst [vmem:[#allocation148_spill] sm:$0xff] %v7945_v7  ;;  %v7969_v7 = vsel %vm1168_vm2, 1.0, %v15872_v9  ;;  %v2559_v63 = vadd.f32 %v7982_v24, %v7979_v60  ;;  %v8040_v22 = vsel %vm1175_vm12, 1.0, %v15872_v9  ;;  %vm1183_vm0 = vcmp.gt.f32.partialorder %v7429_v52, %v7005_v15 }
 0x129   : > { %15930 = vst [vmem:[#allocation149_spill] sm:$0xff] %v7950_v14  ;;  %v7972_v14 = vsel %vm1164_vm3, 1.0, %v15872_v9  ;;  %v2551_v48 = vadd.f32 %v7969_v7, %v2550_v55  ;;  %v8017_v55 = vsel %vm1182_vm9, 1.0, %v15872_v9  ;;  %vm1185_vm1 = vcmp.gt.f32.partialorder %v7988_v50, %v6992_v10 }
 0x12a   : > { %2527 = vadd.xlane.f32.xlu2 %v2526_v30  ;;  %v7976_v30 = vpop.permute.xlu1 %899  ;;  %15932 = vst [vmem:[#allocation151_spill] sm:$0xff] %v7982_v24  ;;  %v2546_v45 = vadd.f32 %v7972_v14, %v2545_v1  ;;  %v3273_v1 = vadd.f32 %v3272_v62, %v7544_v40  ;;  %v2569_v40 = vadd.f32 %v8017_v55, %v8014_v12  ;;  %vm388_vm4 = vcmask 7168  }
 0x12b   : > { %2537 = vadd.xlane.f32.xlu1 %v2536_v19  ;;  %15931 = vst [vmem:[#allocation150_spill] sm:$0xff] %v7976_v30  ;;  %v7994_v19 = vsel %vm1171_vm6, 1.0, %v15872_v9  ;;  %vm1189_vm14 = vcmp.gt.f32.partialorder %v7976_v30, %v6992_v10  ;;  %vm1190_vm15 = vcmp.gt.f32.partialorder %v7976_v30, %v6994_v11  ;;  %v2560_v24 = vadd.f32 %v8040_v22, %v2559_v63 }
 0x12c   : > { %2532 = vadd.xlane.f32.xlu0 %v2531_v46  ;;  %15933 = vst [vmem:[#allocation152_spill] sm:$0xff] %v7988_v50  ;;  %v2564_v46 = vadd.f32 %v7966_v54, %v7963_v56  ;;  %v2555_v17 = vadd.f32 %v7994_v19, %v2554_v21  ;;  %v8023_v21 = vsel %vm1172_vm7, 1.0, %v15872_v9  ;;  %v8047_v62 = vadd.f32 %v3273_v1, %v7550_v37 }
 0x12d   : > { %15934 = vst [vmem:[#allocation153_spill] sm:$0xff] %v8007_v31  ;;  %vm1186_vm2 = vcmp.gt.f32.partialorder %v7988_v50, %v6994_v11  ;;  %vm1184_vm3 = vcmp.gt.f32.partialorder %v7429_v52, %v7019_v20  ;;  %v8061_v37 = vsel %vm1190_vm15, 1.0, %v15872_v9  ;;  %v8068_v63 = vsel %vm1176_vm13, 1.0, %v15872_v9 }
 0x12e   : > { %15935 = vst [vmem:[#allocation154_spill] sm:$0xff] %v8014_v12  ;;  %v2565_v31 = vadd.f32 %v8026_v38, %v2564_v46  ;;  %v2556_v46 = vadd.f32 %v8023_v21, %v2555_v17  ;;  %vm1191_vm5 = vcmp.gt.f32.partialorder %v7976_v30, %v7005_v15  ;;  %v8084_v13 = vsel %vm1186_vm2, 1.0, %v15872_v9 }
 0x12f   : > { %15936 = vst [vmem:[#allocation155_spill] sm:$0xff] %v8017_v55  ;;  %v8090_v55 = vpop.permute.xlu0 %909  ;;  %v8096_v12 = vsel %vm1184_vm3, 1.0, %v15872_v9  ;;  %vm1193_vm6 = vcmp.gt.f32.partialorder %v7535_v27, %v6992_v10  ;;  %vm1194_vm7 = vcmp.gt.f32.partialorder %v7535_v27, %v6994_v11  ;;  %vm1192_vm8 = vcmp.gt.f32.partialorder %v7976_v30, %v7019_v20 }
 0x130   : > { %15937 = vst [vmem:[#allocation156_spill] sm:$0xff] %v8047_v62  ;;  %v2566_v17 = vadd.f32 %v8029_v57, %v2565_v31  ;;  %v8081_v31 = vsel %vm1185_vm1, 1.0, %v15872_v9  ;;  %v3287_v62 = vadd.f32 %v7663_v61, %v7619_v36  ;;  %v2561_v36 = vadd.f32 %v8068_v63, %v2560_v24 }
 0x131   : > { %15938 = vst [vmem:[#allocation157_spill] sm:$0xff] %v8061_v37  ;;  %v8113_v61 = vsel %vm1191_vm5, 1.0, %v15872_v9  ;;  %vm1187_vm9 = vcmp.gt.f32.partialorder %v7988_v50, %v7005_v15  ;;  %v2574_v24 = vadd.f32 %v8084_v13, %v8081_v31  ;;  %vm1197_vm12 = vcmp.gt.f32.partialorder %v8090_v55, %v6992_v10 }
 0x132   : > { %2542 = vadd.xlane.f32.xlu2 %v2541_v8  ;;  %v8058_v8 = vsel %vm1189_vm14, 1.0, %v15872_v9  ;;  %390 = vst.msk [vmem:[#allocation2 + $0x8] sm:$0xff] %vm388_vm4, %v15872_v9  ;;  %v3288_v52 = vadd.f32 %v3287_v62, %v7673_v29  ;;  %v8135_v62 = vsel %vm1193_vm6, 1.0, %v15872_v9  ;;  %vm1198_vm13 = vcmp.gt.f32.partialorder %v8090_v55, %v6994_v11 }
 0x133   : > { %2552 = vadd.xlane.f32.xlu1 %v2551_v48  ;;  %v8077_v48 = vpop.permute.xlu1 %914  ;;  %15940 = vst [vmem:[#allocation159_spill] sm:$0xff] %v8081_v31  ;;  %vm1188_vm14 = vcmp.gt.f32.partialorder %v7988_v50, %v7019_v20  ;;  %vm1195_vm15 = vcmp.gt.f32.partialorder %v7535_v27, %v7005_v15  ;;  %vm1199_vm3 = vcmp.gt.f32.partialorder %v8090_v55, %v7005_v15 }
 0x134   : > { %2547 = vadd.xlane.f32.xlu0 %v2546_v45  ;;  %v8071_v45 = vsel %vm1183_vm0, 1.0, %v15872_v9  ;;  %15939 = vst [vmem:[#allocation158_spill] sm:$0xff] %v8077_v48  ;;  %vm1201_vm10 = vcmp.gt.f32.partialorder %v8077_v48, %v6992_v10  ;;  %vm1202_vm11 = vcmp.gt.f32.partialorder %v8077_v48, %v6994_v11  ;;  %vm1196_vm0 = vcmp.gt.f32.partialorder %v7535_v27, %v7019_v20 }
 0x135   : > { %v2570_v1 = vadd.f32 %v8071_v45, %v2569_v40  ;;  %15941 = vst [vmem:[#allocation160_spill] sm:$0xff] %v8084_v13  ;;  %v2579_v40 = vadd.f32 %v8061_v37, %v8058_v8  ;;  %v8118_v37 = vpop.permute.xlu2 %994  ;;  %v8146_v13 = vadd.f32 %v3288_v52, %v7683_v25  ;;  %v8161_v52 = vsel %vm1187_vm9, 1.0, %v15872_v9 }
 0x136   : > { %389 = vst.msk [vmem:[#allocation2] sm:$0xff] %vm388_vm4, %v15872_v9  ;;  %v8167_v25 = vsel %vm1201_vm10, 1.0, %v15872_v9  ;;  %v3302_v27 = vadd.f32 %v7827_v58, %v7824_v28  ;;  %v8207_v30 = vsel %vm1188_vm14, 1.0, %v15872_v9  ;;  %vm1203_vm1 = vcmp.gt.f32.partialorder %v8077_v48, %v7005_v15 }
 0x137   : > { %15942 = vst [vmem:[#allocation161_spill] sm:$0xff] %v8090_v55  ;;  %v2571_v29 = vadd.f32 %v8096_v12, %v2570_v1  ;;  %v2575_v1 = vadd.f32 %v8161_v52, %v2574_v24  ;;  %v8193_v24 = vsel %vm1197_vm12, 1.0, %v15872_v9  ;;  %v8218_v28 = vsel %vm1195_vm15, 1.0, %v15872_v9  ;;  %v8228_v50 = vpop.permute.xlu0 %924 }
 0x138   : > { %391 = vst.msk [vmem:[#allocation2 + $0x10] sm:$0xff] %vm388_vm4, %v15872_v9  ;;  %v8221_v58 = vsel %vm1196_vm0, 1.0, %v15872_v9  ;;  %vm1204_vm2 = vcmp.gt.f32.partialorder %v8077_v48, %v7019_v20  ;;  %vm1205_vm5 = vcmp.gt.f32.partialorder %v7621_v26, %v6992_v10  ;;  %vm1206_vm6 = vcmp.gt.f32.partialorder %v7621_v26, %v6994_v11 }
 0x139   : > { %392 = vst.msk [vmem:[#allocation2 + $0x18] sm:$0xff] %vm388_vm4, %v15872_v9  ;;  %vm1200_vm9 = vcmp.gt.f32.partialorder %v8090_v55, %v7019_v20  ;;  %vm1209_vm10 = vcmp.gt.f32.partialorder %v8228_v50, %v6992_v10  ;;  %vm1207_vm12 = vcmp.gt.f32.partialorder %v7621_v26, %v7005_v15  ;;  %vm1211_vm14 = vcmp.gt.f32.partialorder %v8228_v50, %v7005_v15 }
 0x13a   : > { %15943 = vst [vmem:[#allocation162_spill] sm:$0xff] %v8118_v37  ;;  %2557 = vadd.xlane.f32.xlu2 %v2556_v46  ;;  %v8141_v37 = vsel %vm1194_vm7, 1.0, %v15872_v9  ;;  %v2580_v46 = vadd.f32 %v8113_v61, %v2579_v40  ;;  %vm1208_vm15 = vcmp.gt.f32.partialorder %v7621_v26, %v7019_v20 }
 0x13b   : > { %393 = vst.msk [vmem:[#allocation2 + $0x20] sm:$0xff] %vm388_vm4, %v15872_v9  ;;  %2567 = vadd.xlane.f32.xlu1 %v2566_v17  ;;  %v8173_v17 = vsel %vm1202_vm11, 1.0, %v15872_v9  ;;  %v2584_v40 = vadd.f32 %v8141_v37, %v8135_v62  ;;  %vm1210_vm11 = vcmp.gt.f32.partialorder %v8228_v50, %v6994_v11 }
 0x13c   : > { %15944 = vst [vmem:[#allocation163_spill] sm:$0xff] %v8135_v62  ;;  %2562 = vadd.xlane.f32.xlu0 %v2561_v36  ;;  %v8190_v36 = vsel %vm1192_vm8, 1.0, %v15872_v9  ;;  %v2594_v62 = vadd.f32 %v8173_v17, %v8167_v25 }
 0x13d   : > { %15945 = vst [vmem:[#allocation164_spill] sm:$0xff] %v8141_v37  ;;  %v2581_v37 = vadd.f32 %v8190_v36, %v2580_v46  ;;  %v3303_v46 = vadd.f32 %v3302_v27, %v7830_v44  ;;  %v8242_v27 = vsel %vm1203_vm1, 1.0, %v15872_v9  ;;  %vm1212_vm1 = vcmp.gt.f32.partialorder %v8228_v50, %v7019_v20 }
 0x13e   : > { %394 = vst.msk [vmem:[#allocation2 + $0x28] sm:$0xff] %vm388_vm4, %v15872_v9 }
 0x13f   : > { %15946 = vst [vmem:[#allocation165_spill] sm:$0xff] %v8146_v13  ;;  %v8196_v13 = vsel %vm1198_vm13, 1.0, %v15872_v9  ;;  %v8251_v44 = vadd.f32 %v3303_v46, %v7835_v41  ;;  %v8274_v41 = vsel %vm1199_vm3, 1.0, %v15872_v9  ;;  %v8294_v46 = vsel %vm1206_vm6, 1.0, %v15872_v9 }
 0x140   : > { %395 = vst.msk [vmem:[#allocation2 + $0x30] sm:$0xff] %vm388_vm4, %v15872_v9  ;;  %v2589_v31 = vadd.f32 %v8196_v13, %v8193_v24 }
 0x141   : > { %15947 = vst [vmem:[#allocation166_spill] sm:$0xff] %v8161_v52  ;;  %v8215_v52 = vpop.permute.xlu1 %929 }
 0x142   : > { %15948 = vst [vmem:[#allocation167_spill] sm:$0xff] %v8167_v25  ;;  %v2585_v25 = vadd.f32 %v8218_v28, %v2584_v40  ;;  %2572 = vadd.xlane.f32.xlu2 %v2571_v29  ;;  %v8259_v29 = vsel %vm1204_vm2, 1.0, %v15872_v9  ;;  %v2595_v40 = vadd.f32 %v8242_v27, %v2594_v62  ;;  %vm1213_vm7 = vcmp.gt.f32.partialorder %v8215_v52, %v6992_v10 }
 0x143   : > { %15949 = vst [vmem:[#allocation168_spill] sm:$0xff] %v8173_v17  ;;  %v2576_v17 = vadd.f32 %v8207_v30, %v2575_v1  ;;  %v8253_v1 = vpop.permute.xlu2 %1009  ;;  %2582 = vadd.xlane.f32.xlu1 %v2581_v37  ;;  %vm1214_vm8 = vcmp.gt.f32.partialorder %v8215_v52, %v6994_v11  ;;  %v2590_v62 = vadd.f32 %v8274_v41, %v2589_v31  ;;  %v8299_v48 = vsel %vm1213_vm7, 1.0, %v15872_v9 }
 0x144   : > { %396 = vst.msk [vmem:[#allocation2 + $0x38] sm:$0xff] %vm388_vm4, %v15872_v9  ;;  %v2586_v37 = vadd.f32 %v8221_v58, %v2585_v25  ;;  %v8302_v31 = vsel %vm1214_vm8, 1.0, %v15872_v9  ;;  %v3267_v25 = vadd.f32 %v7639_v4, %v7636_v2  ;;  %vm1215_vm13 = vcmp.gt.f32.partialorder %v8215_v52, %v7005_v15 }
 0x145   : > { %397 = vst.msk [vmem:[#allocation2 + $0x40] sm:$0xff] %vm388_vm4, %v15872_v9  ;;  %2577 = vadd.xlane.f32.xlu0 %v2576_v17  ;;  %v8288_v17 = vsel %vm1205_vm5, 1.0, %v15872_v9  ;;  %vm1216_vm0 = vcmp.gt.f32.partialorder %v8215_v52, %v7019_v20 }
 0x146   : > { %15950 = vst [vmem:[#allocation169_spill] sm:$0xff] %v8193_v24  ;;  %v8321_v24 = vsel %vm1210_vm11, 1.0, %v15872_v9  ;;  %v2599_v2 = vadd.f32 %v8294_v46, %v8288_v17  ;;  %v3268_v4 = vadd.f32 %v3267_v25, %v7642_v5 }
 0x147   : > { %15951 = vst [vmem:[#allocation170_spill] sm:$0xff] %v8196_v13  ;;  %v8318_v13 = vsel %vm1209_vm10, 1.0, %v15872_v9 }
 0x148   : > { %398 = vst.msk [vmem:[#allocation2 + $0x48] sm:$0xff] %vm388_vm4, %v15872_v9  ;;  %v2604_v5 = vadd.f32 %v8321_v24, %v8318_v13 }
 0x149   : > { %399 = vst.msk [vmem:[#allocation2 + $0x50] sm:$0xff] %vm388_vm4, %v15872_v9 }
 0x14a   : > { %15952 = vst [vmem:[#allocation171_spill] sm:$0xff] %v8215_v52  ;;  %2587 = vadd.xlane.f32.xlu2 %v2586_v37  ;;  %v8358_v37 = vsel %vm1207_vm12, 1.0, %v15872_v9  ;;  %v15960_v52 = vld [vmem:[#allocation119_spill] sm:$0xff] }
 0x14b   : > { %400 = vst.msk [vmem:[#allocation2 + $0x58] sm:$0xff] %vm388_vm4, %v15872_v9  ;;  %v3017_v55 = vmul.f32 %v15960_v52, %v7065_v33  ;;  %v15962_v52 = vld [vmem:[#allocation124_spill] sm:$0xff] }
 0x14c   : > { %15953 = vst [vmem:[#allocation172_spill] sm:$0xff] %v8228_v50  ;;  %v3013_v26 = vmul.f32 %v15962_v52, %v7065_v33 }
 0x14d   : > { %401 = vst.msk [vmem:[#allocation2 + $0x60] sm:$0xff] %vm388_vm4, %v15872_v9 }
 0x14e   : > { %402 = vst.msk [vmem:[#allocation2 + $0x68] sm:$0xff] %vm388_vm4, %v15872_v9 }
 0x14f   : > { %15954 = vst [vmem:[#allocation173_spill] sm:$0xff] %v8251_v44  ;;  %v3317_v44 = vadd.f32 %v7924_v42, %v7907_v47 }
 0x150   : > { %15955 = vst [vmem:[#allocation174_spill] sm:$0xff] %v8253_v1  ;;  %v2596_v1 = vadd.f32 %v8259_v29, %v2595_v40  ;;  %v2609_v40 = vadd.f32 %v8302_v31, %v8299_v48 }
 0x151   : > { %403 = vst.msk [vmem:[#allocation2 + $0x70] sm:$0xff] %vm388_vm4, %v15872_v9  ;;  %v3318_v47 = vadd.f32 %v3317_v44, %v7927_v59  ;;  %v8347_v59 = vadd.f32 %v3268_v4, %v7647_v18  ;;  %v3007_v18 = vmul.f32 %v7706_v39, %v7071_v35  ;;  %v3002_v39 = vmul.f32 %v7727_v16, %v7067_v34 }
 0x152   : > { %15956 = vst [vmem:[#allocation175_spill] sm:$0xff] %v8274_v41  ;;  %v8315_v41 = vsel %vm1200_vm9, 1.0, %v15872_v9  ;;  %2597 = vadd.xlane.f32.xlu1 %v2596_v1  ;;  %v8375_v1 = vpop.permute.xlu2 %1024  ;;  %v3277_v16 = vadd.f32 %v7737_v51, %v7733_v0 }
 0x153   : > { %404 = vst.msk [vmem:[#allocation2 + $0x78] sm:$0xff] %vm388_vm4, %v15872_v9  ;;  %v2591_v42 = vadd.f32 %v8315_v41, %v2590_v62  ;;  %v8350_v44 = vadd.f32 %v3318_v47, %v7930_v49  ;;  %v3006_v62 = vmul.f32 %v7678_v23, %v7067_v34  ;;  %v2600_v49 = vadd.f32 %v8358_v37, %v2599_v2 }
 0x154   : > { %405 = vst.msk [vmem:[#allocation2 + $0x80] sm:$0xff] %vm388_vm4, %v15872_v9  ;;  %v8371_v23 = vsel %vm1215_vm13, 1.0, %v15872_v9  ;;  %v8386_v2 = vsel %vm1211_vm14, 1.0, %v15872_v9  ;;  %v3282_v47 = vadd.f32 %v7716_v53, %v7709_v43  ;;  %v8415_v53 = vsel %vm1216_vm0, 1.0, %v15872_v9 }
 0x155   : > { %406 = vst.msk [vmem:[#allocation2 + $0x88] sm:$0xff] %vm388_vm4, %v15872_v9  ;;  %2592 = vadd.xlane.f32.xlu0 %v2591_v42  ;;  %v2610_v25 = vadd.f32 %v8371_v23, %v2609_v40  ;;  %v2605_v4 = vadd.f32 %v8386_v2, %v2604_v5  ;;  %v3003_v42 = vmul.f32 %v7730_v3, %v7071_v35  ;;  %v8409_v5 = vsel %vm1208_vm15, 1.0, %v15872_v9 }
 0x156   : > { %407 = vst.msk [vmem:[#allocation2 + $0x90] sm:$0xff] %vm388_vm4, %v15872_v9  ;;  %v3016_v40 = vmul.f32 %v7689_v6, %v7063_v32  ;;  %v2601_v51 = vadd.f32 %v8409_v5, %v2600_v49  ;;  %v3278_v43 = vadd.f32 %v3277_v16, %v3002_v39  ;;  %v3283_v3 = vadd.f32 %v3282_v47, %v3006_v62  ;;  %v15961_v6 = vld [vmem:[#allocation123_spill] sm:$0xff]  ;;  %v15965_v47 = vld [vmem:[#allocation122_spill] sm:$0xff] }
 0x157   : > { %408 = vst.msk [vmem:[#allocation2 + $0x98] sm:$0xff] %vm388_vm4, %v15872_v9  ;;  %v3012_v0 = vmul.f32 %v15961_v6, %v7063_v32  ;;  %v8428_v49 = vsel %vm1212_vm1, 1.0, %v15872_v9  ;;  %v15967_v6 = vld [vmem:[#allocation128_spill] sm:$0xff] }
 0x158   : > { %409 = vst.msk [vmem:[#allocation2 + $0xa0] sm:$0xff] %vm388_vm4, %v15872_v9  ;;  %2602 = vadd.xlane.f32.xlu2 %v2601_v51  ;;  %v2606_v62 = vadd.f32 %v8428_v49, %v2605_v4  ;;  %v8435_v39 = vadd.f32 %v3278_v43, %v3003_v42  ;;  %v8437_v16 = vadd.f32 %v3283_v3, %v3007_v18  ;;  %v15966_v42 = vld [vmem:[#allocation129_spill] sm:$0xff] }
 0x159   : > { %410 = vst.msk [vmem:[#allocation2 + $0xa8] sm:$0xff] %vm388_vm4, %v15872_v9  ;;  %v3018_v51 = vmul.f32 %v15965_v47, %v7067_v34  ;;  %v3014_v18 = vmul.f32 %v15966_v42, %v7067_v34  ;;  %v3297_v3 = vadd.f32 %v3017_v55, %v3016_v40  ;;  %v3019_v52 = vmul.f32 %v15967_v6, %v7071_v35  ;;  %v15970_v42 = vld [vmem:[#allocation126_spill] sm:$0xff]  ;;  %v15971_v55 = vld [vmem:[#allocation132_spill] sm:$0xff] }
 0x15a   : > { %15957 = vst [vmem:[#allocation176_spill] sm:$0xff] %v8347_v59  ;;  %v2403_v4 = vpop.xlane.xlu2 %2402  ;;  %v3024_v40 = vmul.f32 %v15971_v55, %v7063_v32  ;;  %v15978_v55 = vld [vmem:[#allocation121_spill] sm:$0xff]  ;;  %v16222_v59 = vld [vmem:[#allocation12_spill] sm:$0xff] }
 0x15b   : > { %15958 = vst [vmem:[#allocation177_spill] sm:$0xff] %v8350_v44  ;;  %v2611_v44 = vadd.f32 %v8415_v53, %v2610_v25  ;;  %v2331_v25 = vld [vmem:[#allocation2 + $0x8] sm:$0xff]  ;;  %vm1217_vm2 = vcmp.gt.f32.partialorder %v15978_v55, %v6992_v10  ;;  %vm1218_vm3 = vcmp.gt.f32.partialorder %v15978_v55, %v6994_v11  ;;  %vm1219_vm5 = vcmp.gt.f32.partialorder %v15978_v55, %v7005_v15 }
 0x15c   : > { %411 = vst.msk [vmem:[#allocation2 + $0xb0] sm:$0xff] %vm388_vm4, %v15872_v9  ;;  %v2715_v43 = vadd.f32 %v2403_v4, %v2331_v25  ;;  %v15969_v25 = vld [vmem:[#allocation125_spill] sm:$0xff]  ;;  %vm1220_vm6 = vcmp.gt.f32.partialorder %v15978_v55, %v7019_v20 }
 0x15d   : > { %412 = vst.msk [vmem:[#allocation2 + $0xb8] sm:$0xff] %vm388_vm4, %v15872_v9  ;;  %2612 = vadd.xlane.f32.xlu1 %v2611_v44  ;;  %2607 = vadd.xlane.f32.xlu0 %v2606_v62  ;;  %v3292_v44 = vadd.f32 %v3013_v26, %v3012_v0  ;;  %v15968_v62 = vld [vmem:[#allocation130_spill] sm:$0xff]  ;;  %v3028_v4 = vmul.f32 %v15969_v25, %v7063_v32  ;;  %v15972_v0 = vld [vmem:[#allocation133_spill] sm:$0xff]  ;;  %v15977_v25 = vld [vmem:[#allocation144_spill] sm:$0xff]  ;;  %v8537_v55 = vsel %vm1220_vm6, 1.0, %v15872_v9 }
 0x15e   : > { %15959 = vst [vmem:[#allocation178_spill] sm:$0xff] %v8375_v1  ;;  %v3015_v47 = vmul.f32 %v15968_v62, %v7071_v35  ;;  %v3029_v26 = vmul.f32 %v15970_v42, %v7065_v33  ;;  %v3025_v6 = vmul.f32 %v15972_v0, %v7065_v33  ;;  %v3027_v42 = vmul.f32 %v15977_v25, %v7071_v35 }
 0x15f   : > { %413 = vst.msk [vmem:[#allocation2 + $0xc0] sm:$0xff] %vm388_vm4, %v15872_v9  ;;  %v3293_v50 = vadd.f32 %v3292_v44, %v3014_v18 }
 0x160   : > { %414 = vst.msk [vmem:[#allocation2 + $0xc8] sm:$0xff] %vm388_vm4, %v15872_v9 }
 0x161   : > { %415 = vst.msk [vmem:[#allocation2 + $0xd0] sm:$0xff] %vm388_vm4, %v15872_v9  ;;  %v8470_v18 = vadd.f32 %v3293_v50, %v3015_v47  ;;  %v3307_v50 = vadd.f32 %v3025_v6, %v3024_v40  ;;  %v15980_v40 = vld [vmem:[#allocation142_spill] sm:$0xff]  ;;  %v8507_v6 = vsel %vm1217_vm2, 1.0, %v15872_v9 }
 0x162   : > { %416 = vst.msk [vmem:[#allocation2 + $0xd8] sm:$0xff] %vm388_vm4, %v15872_v9  ;;  %v3037_v0 = vmul.f32 %v15980_v40, %v7065_v33  ;;  %v15984_v40 = vld [vmem:[#allocation149_spill] sm:$0xff] }
 0x163   : > { %417 = vst.msk [vmem:[#allocation2 + $0xe0] sm:$0xff] %vm388_vm4, %v15872_v9 }
 0x164   : > { %418 = vst.msk [vmem:[#allocation2 + $0xe8] sm:$0xff] %vm388_vm4, %v15872_v9 }
 0x165   : > { %15963 = vst [vmem:[#allocation119_spill] sm:$0xff] %v8435_v39 }
 0x166   : > { %15964 = vst [vmem:[#allocation123_spill] sm:$0xff] %v8437_v16  ;;  %v3298_v16 = vadd.f32 %v3297_v3, %v3018_v51  ;;  %v15976_v3 = vld [vmem:[#allocation136_spill] sm:$0xff] }
 0x167   : > { %419 = vst.msk [vmem:[#allocation2 + $0xf0] sm:$0xff] %vm388_vm4, %v15872_v9  ;;  %v3026_v62 = vmul.f32 %v15976_v3, %v7067_v34 }
 0x168   : > { %420 = vst.msk [vmem:[#allocation2 + $0xf8] sm:$0xff] %vm388_vm4, %v15872_v9  ;;  %v8472_v51 = vadd.f32 %v3298_v16, %v3019_v52  ;;  %v3312_v16 = vadd.f32 %v3029_v26, %v3028_v4  ;;  %v15979_v4 = vld [vmem:[#allocation141_spill] sm:$0xff] }
 0x169   : > { %421 = vst.msk [vmem:[#allocation2 + $0x100] sm:$0xff] %vm388_vm4, %v15872_v9  ;;  %v3308_v52 = vadd.f32 %v3307_v50, %v3026_v62  ;;  %v3036_v26 = vmul.f32 %v15979_v4, %v7063_v32  ;;  %v8523_v50 = vsel %vm1219_vm5, 1.0, %v15872_v9 }
 0x16a   : > { %422 = vst.msk [vmem:[#allocation2 + $0x108] sm:$0xff] %vm388_vm4, %v15872_v9 }
 0x16b   : > { %423 = vst.msk [vmem:[#allocation2 + $0x110] sm:$0xff] %vm388_vm4, %v15872_v9 }
 0x16c   : > { %2780 = vst.msk [vmem:[#allocation2 + $0x8] sm:$0xff] %vm388_vm4, %v2715_v43  ;;  %v15975_v43 = vld [vmem:[#allocation135_spill] sm:$0xff] }
 0x16d   : > { %424 = vst.msk [vmem:[#allocation2 + $0x118] sm:$0xff] %vm388_vm4, %v15872_v9  ;;  %v3030_v44 = vmul.f32 %v15975_v43, %v7067_v34  ;;  %v8510_v43 = vsel %vm1218_vm3, 1.0, %v15872_v9 }
 0x16e   : > { %425 = vst.msk [vmem:[#allocation2 + $0x120] sm:$0xff] %vm388_vm4, %v15872_v9  ;;  %v2614_v62 = vadd.f32 %v8510_v43, %v8507_v6 }
 0x16f   : > { %15973 = vst [vmem:[#allocation124_spill] sm:$0xff] %v8470_v18  ;;  %v3313_v47 = vadd.f32 %v3312_v16, %v3030_v44  ;;  %v15981_v44 = vld [vmem:[#allocation137_spill] sm:$0xff]  ;;  %v8525_v16 = vadd.f32 %v3308_v52, %v3027_v42  ;;  %v15985_v42 = vld [vmem:[#allocation134_spill] sm:$0xff]  ;;  %v8616_v18 = vmul.f32 %v8023_v21, %v7071_v35 }
 0x170   : > { %15974 = vst [vmem:[#allocation122_spill] sm:$0xff] %v8472_v51  ;;  %v3031_v3 = vmul.f32 %v15981_v44, %v7071_v35  ;;  %v2615_v25 = vadd.f32 %v8523_v50, %v2614_v62  ;;  %v3038_v44 = vmul.f32 %v15984_v40, %v7067_v34  ;;  %v3322_v51 = vadd.f32 %v3037_v0, %v3036_v26  ;;  %v15999_v21 = vld [vmem:[#allocation145_spill] sm:$0xff] }
 0x171   : > { %426 = vst.msk [vmem:[#allocation2 + $0x128] sm:$0xff] %vm388_vm4, %v15872_v9  ;;  %vm1229_vm7 = vcmp.gt.f32.partialorder %v15985_v42, %v6992_v10  ;;  %vm1230_vm8 = vcmp.gt.f32.partialorder %v15985_v42, %v6994_v11  ;;  %vm1231_vm9 = vcmp.gt.f32.partialorder %v15985_v42, %v7005_v15  ;;  %v3039_v26 = vmul.f32 %v7972_v14, %v7071_v35 }
 0x172   : > { %427 = vst.msk [vmem:[#allocation2 + $0x130] sm:$0xff] %vm388_vm4, %v15872_v9  ;;  %v8530_v4 = vadd.f32 %v3313_v47, %v3031_v3  ;;  %v2616_v52 = vadd.f32 %v8537_v55, %v2615_v25  ;;  %v3323_v47 = vadd.f32 %v3322_v51, %v3038_v44  ;;  %v8557_v51 = vsel %vm1229_vm7, 1.0, %v15872_v9  ;;  %v15990_v25 = vld [vmem:[#allocation139_spill] sm:$0xff] }
 0x173   : > { %428 = vst.msk [vmem:[#allocation2 + $0x138] sm:$0xff] %vm388_vm4, %v15872_v9  ;;  %v8560_v0 = vsel %vm1230_vm8, 1.0, %v15872_v9  ;;  %vm1232_vm10 = vcmp.gt.f32.partialorder %v15985_v42, %v7019_v20  ;;  %v8571_v14 = vsel %vm1231_vm9, 1.0, %v15872_v9  ;;  %v8577_v40 = vmul.f32 %v15990_v25, %v7063_v32 }
 0x174   : > { %429 = vst.msk [vmem:[#allocation2 + $0x140] sm:$0xff] %vm388_vm4, %v15872_v9  ;;  %2617 = vadd.xlane.f32.xlu2 %v2616_v52  ;;  %v2629_v3 = vadd.f32 %v8560_v0, %v8557_v51  ;;  %v8573_v62 = vadd.f32 %v3323_v47, %v3039_v26  ;;  %v15991_v52 = vld [vmem:[#allocation140_spill] sm:$0xff]  ;;  %v8592_v47 = vmul.f32 %v7969_v7, %v7071_v35  ;;  %v8597_v26 = vsel %vm1232_vm10, 1.0, %v15872_v9 }
 0x175   : > { %430 = vst.msk [vmem:[#allocation2 + $0x148] sm:$0xff] %vm388_vm4, %v15872_v9  ;;  %v8584_v42 = vmul.f32 %v15991_v52, %v7065_v33  ;;  %v15995_v52 = vld [vmem:[#allocation147_spill] sm:$0xff]  ;;  %vm1241_vm11 = vcmp.gt.f32.partialorder %v15999_v21, %v6992_v10  ;;  %vm1242_vm12 = vcmp.gt.f32.partialorder %v15999_v21, %v6994_v11  ;;  %vm1243_vm13 = vcmp.gt.f32.partialorder %v15999_v21, %v7005_v15 }
 0x176   : > { %431 = vst.msk [vmem:[#allocation2 + $0x150] sm:$0xff] %vm388_vm4, %v15872_v9  ;;  %v2630_v44 = vadd.f32 %v8571_v14, %v2629_v3  ;;  %v15994_v3 = vld [vmem:[#allocation146_spill] sm:$0xff]  ;;  %vm1244_vm14 = vcmp.gt.f32.partialorder %v15999_v21, %v7019_v20 }
 0x177   : > { %432 = vst.msk [vmem:[#allocation2 + $0x158] sm:$0xff] %vm388_vm4, %v15872_v9  ;;  %v8601_v25 = vmul.f32 %v15994_v3, %v7063_v32  ;;  %v8620_v3 = vmul.f32 %v7963_v56, %v7063_v32  ;;  %v8642_v56 = vmul.f32 %v8029_v57, %v7071_v35  ;;  %v8662_v57 = vmul.f32 %v8040_v22, %v7067_v34  ;;  %v16007_v22 = vld [vmem:[#allocation155_spill] sm:$0xff] }
 0x178   : > { %433 = vst.msk [vmem:[#allocation2 + $0x160] sm:$0xff] %vm388_vm4, %v15872_v9  ;;  %v2631_v7 = vadd.f32 %v8597_v26, %v2630_v44  ;;  %v8654_v44 = vsel %vm1242_vm12, 1.0, %v15872_v9 }
 0x179   : > { %434 = vst.msk [vmem:[#allocation2 + $0x168] sm:$0xff] %vm388_vm4, %v15872_v9 }
 0x17a   : > { %435 = vst.msk [vmem:[#allocation2 + $0x170] sm:$0xff] %vm388_vm4, %v15872_v9 }
 0x17b   : > { %15982 = vst [vmem:[#allocation129_spill] sm:$0xff] %v8525_v16 }
 0x17c   : > { %436 = vst.msk [vmem:[#allocation2 + $0x178] sm:$0xff] %vm388_vm4, %v15872_v9  ;;  %2632 = vadd.xlane.f32.xlu2 %v2631_v7  ;;  %v16003_v7 = vld [vmem:[#allocation151_spill] sm:$0xff] }
 0x17d   : > { %15983 = vst [vmem:[#allocation128_spill] sm:$0xff] %v8530_v4  ;;  %v15992_v4 = vld [vmem:[#allocation148_spill] sm:$0xff] }
 0x17e   : > { %437 = vst.msk [vmem:[#allocation2 + $0x180] sm:$0xff] %vm388_vm4, %v15872_v9  ;;  %v8588_v16 = vmul.f32 %v15992_v4, %v7067_v34  ;;  %v8609_v4 = vmul.f32 %v7994_v19, %v7067_v34  ;;  %v8628_v19 = vmul.f32 %v8026_v38, %v7067_v34  ;;  %v8651_v38 = vsel %vm1241_vm11, 1.0, %v15872_v9 }
 0x17f   : > { %438 = vst.msk [vmem:[#allocation2 + $0x188] sm:$0xff] %vm388_vm4, %v15872_v9 }
 0x180   : > { %439 = vst.msk [vmem:[#allocation2 + $0x190] sm:$0xff] %vm388_vm4, %v15872_v9 }
 0x181   : > { %440 = vst.msk [vmem:[#allocation2 + $0x198] sm:$0xff] %vm388_vm4, %v15872_v9 }
 0x182   : > { %441 = vst.msk [vmem:[#allocation2 + $0x1a0] sm:$0xff] %vm388_vm4, %v15872_v9 }
 0x183   : > { %15986 = vst [vmem:[#allocation130_spill] sm:$0xff] %v8557_v51  ;;  %v16169_v51 = vld [vmem:[#allocation69_spill] sm:$0xff] }
 0x184   : > { %15987 = vst [vmem:[#allocation125_spill] sm:$0xff] %v8560_v0 }
 0x185   : > { %442 = vst.msk [vmem:[#allocation2 + $0x1a8] sm:$0xff] %vm388_vm4, %v15872_v9 }
 0x186   : > { %443 = vst.msk [vmem:[#allocation2 + $0x1b0] sm:$0xff] %vm388_vm4, %v15872_v9 }
 0x187   : > { %15988 = vst [vmem:[#allocation126_spill] sm:$0xff] %v8571_v14 }
 0x188   : > { %15989 = vst [vmem:[#allocation132_spill] sm:$0xff] %v8573_v62  ;;  %v8605_v62 = vmul.f32 %v15995_v52, %v7065_v33  ;;  %v8624_v52 = vmul.f32 %v7966_v54, %v7065_v33  ;;  %v8646_v54 = vmul.f32 %v7979_v60, %v7063_v32  ;;  %v2644_v60 = vadd.f32 %v8654_v44, %v8651_v38 }
 0x189   : > { %444 = vst.msk [vmem:[#allocation2 + $0x1b8] sm:$0xff] %vm388_vm4, %v15872_v9 }
 0x18a   : > { %445 = vst.msk [vmem:[#allocation2 + $0x1c0] sm:$0xff] %vm388_vm4, %v15872_v9 }
 0x18b   : > { %15993 = vst [vmem:[#allocation133_spill] sm:$0xff] %v8597_v26  ;;  %v8685_v26 = vsel %vm1243_vm13, 1.0, %v15872_v9 }
 0x18c   : > { %446 = vst.msk [vmem:[#allocation2 + $0x1c8] sm:$0xff] %vm388_vm4, %v15872_v9 }
 0x18d   : > { %15996 = vst [vmem:[#allocation135_spill] sm:$0xff] %v8620_v3  ;;  %v8680_v3 = vmul.f32 %v16007_v22, %v7065_v33  ;;  %v2645_v22 = vadd.f32 %v8685_v26, %v2644_v60  ;;  %v8722_v60 = vpop.permute.xlu1 %944 }
 0x18e   : > { %15997 = vst [vmem:[#allocation136_spill] sm:$0xff] %v8624_v52  ;;  %vm1225_vm3 = vcmp.gt.f32.partialorder %v8722_v60, %v6992_v10  ;;  %vm1226_vm5 = vcmp.gt.f32.partialorder %v8722_v60, %v6994_v11  ;;  %vm1227_vm6 = vcmp.gt.f32.partialorder %v8722_v60, %v7005_v15  ;;  %vm1228_vm7 = vcmp.gt.f32.partialorder %v8722_v60, %v7019_v20 }
 0x18f   : > { %15998 = vst [vmem:[#allocation144_spill] sm:$0xff] %v8628_v19  ;;  %v8658_v19 = vmul.f32 %v16003_v7, %v7065_v33  ;;  %v16006_v7 = vld [vmem:[#allocation154_spill] sm:$0xff] }
 0x190   : > { %447 = vst.msk [vmem:[#allocation2 + $0x1d0] sm:$0xff] %vm388_vm4, %v15872_v9  ;;  %v8676_v52 = vmul.f32 %v16006_v7, %v7063_v32  ;;  %v8697_v7 = vmul.f32 %v8058_v8, %v7063_v32  ;;  %v8720_v8 = vsel %vm1244_vm14, 1.0, %v15872_v9 }
 0x191   : > { %448 = vst.msk [vmem:[#allocation2 + $0x1d8] sm:$0xff] %vm388_vm4, %v15872_v9  ;;  %v2646_v21 = vadd.f32 %v8720_v8, %v2645_v22  ;;  %v8765_v22 = vpop.permute.xlu0 %939 }
 0x192   : > { %16000 = vst [vmem:[#allocation141_spill] sm:$0xff] %v8642_v56  ;;  %v8672_v56 = vmul.f32 %v8068_v63, %v7071_v35  ;;  %v8693_v63 = vmul.f32 %v8096_v12, %v7071_v35  ;;  %v8712_v12 = vmul.f32 %v8190_v36, %v7071_v35  ;;  %v16020_v36 = vld [vmem:[#allocation166_spill] sm:$0xff]  ;;  %vm1221_vm8 = vcmp.gt.f32.partialorder %v8765_v22, %v6992_v10 }
 0x193   : > { %449 = vst.msk [vmem:[#allocation2 + $0x1e0] sm:$0xff] %vm388_vm4, %v15872_v9  ;;  %2647 = vadd.xlane.f32.xlu2 %v2646_v21  ;;  %vm1222_vm9 = vcmp.gt.f32.partialorder %v8765_v22, %v6994_v11  ;;  %vm1223_vm10 = vcmp.gt.f32.partialorder %v8765_v22, %v7005_v15  ;;  %vm1224_vm11 = vcmp.gt.f32.partialorder %v8765_v22, %v7019_v20 }
 0x194   : > { %16001 = vst [vmem:[#allocation142_spill] sm:$0xff] %v8651_v38  ;;  %v16010_v38 = vld [vmem:[#allocation157_spill] sm:$0xff] }
 0x195   : > { %16002 = vst [vmem:[#allocation137_spill] sm:$0xff] %v8654_v44  ;;  %v8689_v44 = vmul.f32 %v8071_v45, %v7067_v34  ;;  %v8704_v14 = vmul.f32 %v16010_v38, %v7065_v33  ;;  %v8708_v45 = vmul.f32 %v8113_v61, %v7067_v34  ;;  %v16016_v38 = vld [vmem:[#allocation159_spill] sm:$0xff]  ;;  %v16018_v61 = vld [vmem:[#allocation160_spill] sm:$0xff] }
 0x196   : > { %16004 = vst [vmem:[#allocation149_spill] sm:$0xff] %v8662_v57 }
 0x197   : > { %450 = vst.msk [vmem:[#allocation2 + $0x1e8] sm:$0xff] %vm388_vm4, %v15872_v9 }
 0x198   : > { %16005 = vst [vmem:[#allocation139_spill] sm:$0xff] %v8672_v56  ;;  %v2973_v56 = vmul.f32 %v16169_v51, %v7065_v33 }
 0x199   : > { %451 = vst.msk [vmem:[#allocation2 + $0x1f0] sm:$0xff] %vm388_vm4, %v15872_v9 }
 0x19a   : > { %16008 = vst [vmem:[#allocation140_spill] sm:$0xff] %v8685_v26  ;;  %v16039_v26 = vld [vmem:[#allocation169_spill] sm:$0xff] }
 0x19b   : > { %16009 = vst [vmem:[#allocation148_spill] sm:$0xff] %v8697_v7  ;;  %v8741_v7 = vmul.f32 %v8207_v30, %v7071_v35  ;;  %v16028_v30 = vld [vmem:[#allocation153_spill] sm:$0xff] }
 0x19c   : > { %452 = vst.msk [vmem:[#allocation2 + $0x1f8] sm:$0xff] %vm388_vm4, %v15872_v9  ;;  %vm1253_vm15 = vcmp.gt.f32.partialorder %v16028_v30, %v6992_v10  ;;  %vm1254_vm0 = vcmp.gt.f32.partialorder %v16028_v30, %v6994_v11  ;;  %vm1255_vm1 = vcmp.gt.f32.partialorder %v16028_v30, %v7005_v15  ;;  %vm1256_vm2 = vcmp.gt.f32.partialorder %v16028_v30, %v7019_v20  ;;  %v8885_v30 = vpop.permute.xlu1 %959 }
 0x19d   : > { %16011 = vst [vmem:[#allocation146_spill] sm:$0xff] %v8704_v14  ;;  %v8726_v14 = vmul.f32 %v16016_v38, %v7063_v32  ;;  %v16023_v38 = vld [vmem:[#allocation163_spill] sm:$0xff]  ;;  %v8778_v21 = vsel %vm1253_vm15, 1.0, %v15872_v9  ;;  %vm1237_vm12 = vcmp.gt.f32.partialorder %v8885_v30, %v6992_v10  ;;  %vm1238_vm13 = vcmp.gt.f32.partialorder %v8885_v30, %v6994_v11 }
 0x19e   : > { %16012 = vst [vmem:[#allocation147_spill] sm:$0xff] %v8708_v45  ;;  %v8730_v45 = vmul.f32 %v16018_v61, %v7065_v33  ;;  %v16025_v61 = vld [vmem:[#allocation164_spill] sm:$0xff]  ;;  %vm1239_vm14 = vcmp.gt.f32.partialorder %v8885_v30, %v7005_v15  ;;  %vm1240_vm15 = vcmp.gt.f32.partialorder %v8885_v30, %v7019_v20 }
 0x19f   : > { %16013 = vst [vmem:[#allocation151_spill] sm:$0xff] %v8712_v12  ;;  %v8734_v12 = vmul.f32 %v16020_v36, %v7067_v34  ;;  %v8753_v36 = vmul.f32 %v8218_v28, %v7067_v34  ;;  %v8769_v28 = vmul.f32 %v8221_v58, %v7071_v35  ;;  %v8789_v58 = vmul.f32 %v8242_v27, %v7067_v34 }
 0x1a0   : > { %453 = vst.msk [vmem:[#allocation3] sm:$0xff] %vm388_vm4, %v15872_v9  ;;  %v8815_v27 = vsel %vm1255_vm1, 1.0, %v15872_v9 }
 0x1a1   : > { %16014 = vst [vmem:[#allocation154_spill] sm:$0xff] %v8720_v8 }
 0x1a2   : > { %16015 = vst [vmem:[#allocation155_spill] sm:$0xff] %v8722_v60 }
 0x1a3   : > { %16017 = vst [vmem:[#allocation157_spill] sm:$0xff] %v8726_v14  ;;  %v8745_v14 = vmul.f32 %v16023_v38, %v7063_v32  ;;  %v16031_v38 = vld [vmem:[#allocation167_spill] sm:$0xff] }
 0x1a4   : > { %16019 = vst [vmem:[#allocation159_spill] sm:$0xff] %v8730_v45  ;;  %v8749_v45 = vmul.f32 %v16025_v61, %v7065_v33  ;;  %v8773_v61 = vmul.f32 %v16031_v38, %v7063_v32  ;;  %v8793_v38 = vmul.f32 %v8259_v29, %v7071_v35  ;;  %v16044_v29 = vld [vmem:[#allocation175_spill] sm:$0xff] }
 0x1a5   : > { %16021 = vst [vmem:[#allocation160_spill] sm:$0xff] %v8734_v12  ;;  %v16035_v12 = vld [vmem:[#allocation168_spill] sm:$0xff] }
 0x1a6   : > { %454 = vst.msk [vmem:[#allocation3 + $0x8] sm:$0xff] %vm388_vm4, %v15872_v9  ;;  %v8785_v8 = vmul.f32 %v16035_v12, %v7065_v33  ;;  %v16041_v12 = vld [vmem:[#allocation170_spill] sm:$0xff] }
 0x1a7   : > { %16022 = vst [vmem:[#allocation166_spill] sm:$0xff] %v8741_v7  ;;  %v8781_v7 = vsel %vm1254_vm0, 1.0, %v15872_v9 }
 0x1a8   : > { %16024 = vst [vmem:[#allocation163_spill] sm:$0xff] %v8745_v14 }
 0x1a9   : > { %16026 = vst [vmem:[#allocation164_spill] sm:$0xff] %v8749_v45 }
 0x1aa   : > { %16027 = vst [vmem:[#allocation179_spill] sm:$0xff] %v8753_v36 }
 0x1ab   : > { %455 = vst.msk [vmem:[#allocation3 + $0x10] sm:$0xff] %vm388_vm4, %v15872_v9 }
 0x1ac   : > { %456 = vst.msk [vmem:[#allocation3 + $0x18] sm:$0xff] %vm388_vm4, %v15872_v9 }
 0x1ad   : > { %16029 = vst [vmem:[#allocation180_spill] sm:$0xff] %v8765_v22 }
 0x1ae   : > { %16030 = vst [vmem:[#allocation181_spill] sm:$0xff] %v8769_v28  ;;  %v8801_v28 = vmul.f32 %v16039_v26, %v7063_v32  ;;  %v8819_v26 = vmul.f32 %v16044_v29, %v7067_v34  ;;  %v8838_v29 = vmul.f32 %v8358_v37, %v7067_v34  ;;  %v8860_v37 = vmul.f32 %v8415_v53, %v7071_v35 }
 0x1af   : > { %16032 = vst [vmem:[#allocation167_spill] sm:$0xff] %v8773_v61  ;;  %v2659_v61 = vadd.f32 %v8781_v7, %v8778_v21 }
 0x1b0   : > { %457 = vst.msk [vmem:[#allocation3 + $0x20] sm:$0xff] %vm388_vm4, %v15872_v9 }
 0x1b1   : > { %16033 = vst [vmem:[#allocation182_spill] sm:$0xff] %v8778_v21 }
 0x1b2   : > { %16034 = vst [vmem:[#allocation183_spill] sm:$0xff] %v8781_v7 }
 0x1b3   : > { %16036 = vst [vmem:[#allocation168_spill] sm:$0xff] %v8785_v8  ;;  %v8805_v8 = vmul.f32 %v16041_v12, %v7065_v33  ;;  %v8823_v12 = vmul.f32 %v8315_v41, %v7071_v35  ;;  %v8842_v41 = vmul.f32 %v8409_v5, %v7071_v35  ;;  %v8880_v5 = vmul.f32 %v8386_v2, %v7067_v34  ;;  %v16063_v2 = vld [vmem:[#allocation36_spill] sm:$0xff] }
 0x1b4   : > { %16037 = vst [vmem:[#allocation184_spill] sm:$0xff] %v8789_v58  ;;  %v2660_v58 = vadd.f32 %v8815_v27, %v2659_v61  ;;  %v8852_v61 = vmul.f32 %v8302_v31, %v7065_v33  ;;  %v8872_v31 = vmul.f32 %v8318_v13, %v7063_v32  ;;  %v8902_v13 = vsel %vm1225_vm3, 1.0, %v15872_v9 }
 0x1b5   : > { %16038 = vst [vmem:[#allocation185_spill] sm:$0xff] %v8793_v38  ;;  %v8827_v38 = vmul.f32 %v8288_v17, %v7063_v32  ;;  %v8846_v17 = vmul.f32 %v8299_v48, %v7063_v32  ;;  %v8868_v48 = vsel %vm1256_vm2, 1.0, %v15872_v9 }
 0x1b6   : > { %458 = vst.msk [vmem:[#allocation3 + $0x28] sm:$0xff] %vm388_vm4, %v15872_v9  ;;  %v2661_v53 = vadd.f32 %v8868_v48, %v2660_v58  ;;  %v16064_v58 = vld [vmem:[#allocation37_spill] sm:$0xff] }
 0x1b7   : > { %16040 = vst [vmem:[#allocation169_spill] sm:$0xff] %v8801_v28  ;;  %v16073_v28 = vld [vmem:[#allocation43_spill] sm:$0xff] }
 0x1b8   : > { %16042 = vst [vmem:[#allocation170_spill] sm:$0xff] %v8805_v8  ;;  %v8834_v8 = vmul.f32 %v8294_v46, %v7065_v33  ;;  %v8856_v46 = vmul.f32 %v8371_v23, %v7067_v34  ;;  %v8876_v23 = vmul.f32 %v8321_v24, %v7065_v33  ;;  %v8905_v24 = vsel %vm1226_vm5, 1.0, %v15872_v9  ;;  %2662 = vadd.xlane.f32.xlu2 %v2661_v53  ;;  %v16066_v53 = vld [vmem:[#allocation54_spill] sm:$0xff] }
 0x1b9   : > { %459 = vst.msk [vmem:[#allocation3 + $0x30] sm:$0xff] %vm388_vm4, %v15872_v9 }
 0x1ba   : > { %16043 = vst [vmem:[#allocation186_spill] sm:$0xff] %v8815_v27 }
 0x1bb   : > { %16045 = vst [vmem:[#allocation175_spill] sm:$0xff] %v8819_v26  ;;  %v8953_v26 = vsel %vm1228_vm7, 1.0, %v15872_v9 }
 0x1bc   : > { %16046 = vst [vmem:[#allocation187_spill] sm:$0xff] %v8823_v12 }
 0x1bd   : > { %16047 = vst [vmem:[#allocation188_spill] sm:$0xff] %v8827_v38 }
 0x1be   : > { %460 = vst.msk [vmem:[#allocation3 + $0x38] sm:$0xff] %vm388_vm4, %v15872_v9 }
 0x1bf   : > { %16048 = vst [vmem:[#allocation189_spill] sm:$0xff] %v8834_v8 }
 0x1c0   : > { %16049 = vst [vmem:[#allocation190_spill] sm:$0xff] %v8838_v29 }
 0x1c1   : > { %16050 = vst [vmem:[#allocation191_spill] sm:$0xff] %v8842_v41  ;;  %v16087_v41 = vld [vmem:[#allocation50_spill] sm:$0xff] }
 0x1c2   : > { %16051 = vst [vmem:[#allocation192_spill] sm:$0xff] %v8846_v17  ;;  %v16065_v17 = vld [vmem:[#allocation44_spill] sm:$0xff]  ;;  %v2928_v29 = vmul.f32 %v16087_v41, %v7063_v32  ;;  %v9048_v41 = vsel %vm1240_vm15, 1.0, %v15872_v9 }
 0x1c3   : > { %461 = vst.msk [vmem:[#allocation3 + $0x40] sm:$0xff] %vm388_vm4, %v15872_v9 }
 0x1c4   : > { %16052 = vst [vmem:[#allocation193_spill] sm:$0xff] %v8852_v61  ;;  %v2624_v61 = vadd.f32 %v8905_v24, %v8902_v13 }
 0x1c5   : > { %16053 = vst [vmem:[#allocation194_spill] sm:$0xff] %v8856_v46  ;;  %v2917_v46 = vmul.f32 %v16064_v58, %v7065_v33  ;;  %v8928_v58 = vsel %vm1227_vm6, 1.0, %v15872_v9 }
 0x1c6   : > { %16054 = vst [vmem:[#allocation195_spill] sm:$0xff] %v8860_v37  ;;  %v8889_v37 = vmul.f32 %v8428_v49, %v7071_v35  ;;  %v2916_v49 = vmul.f32 %v16063_v2, %v7063_v32  ;;  %v8923_v2 = vpop.permute.xlu0 %954 }
 0x1c7   : > { %462 = vst.msk [vmem:[#allocation3 + $0x48] sm:$0xff] %vm388_vm4, %v15872_v9  ;;  %vm1233_vm0 = vcmp.gt.f32.partialorder %v8923_v2, %v6992_v10  ;;  %vm1234_vm1 = vcmp.gt.f32.partialorder %v8923_v2, %v6994_v11  ;;  %vm1235_vm2 = vcmp.gt.f32.partialorder %v8923_v2, %v7005_v15  ;;  %vm1236_vm3 = vcmp.gt.f32.partialorder %v8923_v2, %v7019_v20 }
 0x1c8   : > { %16055 = vst [vmem:[#allocation196_spill] sm:$0xff] %v8868_v48  ;;  %v3172_v60 = vadd.f32 %v2917_v46, %v2916_v49  ;;  %v8987_v46 = vsel %vm1224_vm11, 1.0, %v15872_v9  ;;  %v8999_v49 = vsel %vm1237_vm12, 1.0, %v15872_v9  ;;  %v9070_v8 = vsel %vm1235_vm2, 1.0, %v15872_v9 }
 0x1c9   : > { %16056 = vst [vmem:[#allocation197_spill] sm:$0xff] %v8872_v31  ;;  %v16071_v31 = vld [vmem:[#allocation42_spill] sm:$0xff] }
 0x1ca   : > { %16057 = vst [vmem:[#allocation198_spill] sm:$0xff] %v8876_v23  ;;  %v8943_v23 = vsel %vm1222_vm9, 1.0, %v15872_v9  ;;  %v2924_v12 = vmul.f32 %v16071_v31, %v7063_v32 }
 0x1cb   : > { %16058 = vst [vmem:[#allocation199_spill] sm:$0xff] %v8880_v5  ;;  %v8921_v5 = vmul.f32 %v16066_v53, %v7071_v35  ;;  %v8940_v53 = vsel %vm1221_vm8, 1.0, %v15872_v9 }
 0x1cc   : > { %463 = vst.msk [vmem:[#allocation3 + $0x50] sm:$0xff] %vm388_vm4, %v15872_v9 }
 0x1cd   : > { %16059 = vst [vmem:[#allocation200_spill] sm:$0xff] %v8885_v30 }
 0x1ce   : > { %16060 = vst [vmem:[#allocation201_spill] sm:$0xff] %v8889_v37  ;;  %v2918_v37 = vmul.f32 %v16065_v17, %v7067_v34  ;;  %v2625_v17 = vadd.f32 %v8928_v58, %v2624_v61  ;;  %v2619_v61 = vadd.f32 %v8943_v23, %v8940_v53 }
 0x1cf   : > { %464 = vst.msk [vmem:[#allocation3 + $0x58] sm:$0xff] %vm388_vm4, %v15872_v9 }
 0x1d0   : > { %465 = vst.msk [vmem:[#allocation3 + $0x60] sm:$0xff] %vm388_vm4, %v15872_v9  ;;  %v2626_v31 = vadd.f32 %v8953_v26, %v2625_v17  ;;  %v16078_v17 = vld [vmem:[#allocation21_spill] sm:$0xff]  ;;  %v3173_v21 = vadd.f32 %v3172_v60, %v2918_v37  ;;  %v9040_v60 = vpop.permute.xlu0 %969  ;;  %v9051_v37 = vsel %vm1233_vm0, 1.0, %v15872_v9 }
 0x1d1   : > { %16061 = vst [vmem:[#allocation202_spill] sm:$0xff] %v8902_v13  ;;  %v16075_v13 = vld [vmem:[#allocation48_spill] sm:$0xff]  ;;  %vm1245_vm9 = vcmp.gt.f32.partialorder %v9040_v60, %v6992_v10  ;;  %vm1247_vm11 = vcmp.gt.f32.partialorder %v9040_v60, %v7005_v15  ;;  %vm1248_vm12 = vcmp.gt.f32.partialorder %v9040_v60, %v7019_v20 }
 0x1d2   : > { %16062 = vst [vmem:[#allocation203_spill] sm:$0xff] %v8905_v24  ;;  %v8965_v24 = vsel %vm1223_vm10, 1.0, %v15872_v9  ;;  %v8969_v48 = vmul.f32 %v16075_v13, %v7067_v34  ;;  %2627 = vadd.xlane.f32.xlu1 %v2626_v31  ;;  %vm1246_vm10 = vcmp.gt.f32.partialorder %v9040_v60, %v6994_v11 }
 0x1d3   : > { %466 = vst.msk [vmem:[#allocation3 + $0x68] sm:$0xff] %vm388_vm4, %v15872_v9  ;;  %v2620_v22 = vadd.f32 %v8965_v24, %v2619_v61  ;;  %v16082_v61 = vld [vmem:[#allocation41_spill] sm:$0xff] }
 0x1d4   : > { %16067 = vst [vmem:[#allocation36_spill] sm:$0xff] %v8923_v2  ;;  %v2921_v31 = vmul.f32 %v16082_v61, %v7065_v33  ;;  %v9025_v61 = vsel %vm1239_vm14, 1.0, %v15872_v9 }
 0x1d5   : > { %467 = vst.msk [vmem:[#allocation3 + $0x70] sm:$0xff] %vm388_vm4, %v15872_v9  ;;  %v2621_v13 = vadd.f32 %v8987_v46, %v2620_v22 }
 0x1d6   : > { %16068 = vst [vmem:[#allocation37_spill] sm:$0xff] %v8928_v58  ;;  %v2925_v58 = vmul.f32 %v16073_v28, %v7065_v33  ;;  %v16076_v28 = vld [vmem:[#allocation40_spill] sm:$0xff] }
 0x1d7   : > { %468 = vst.msk [vmem:[#allocation3 + $0x78] sm:$0xff] %vm388_vm4, %v15872_v9  ;;  %2622 = vadd.xlane.f32.xlu0 %v2621_v13  ;;  %v9054_v13 = vsel %vm1234_vm1, 1.0, %v15872_v9 }
 0x1d8   : > { %16069 = vst [vmem:[#allocation44_spill] sm:$0xff] %v8940_v53  ;;  %v16077_v53 = vld [vmem:[#allocation56_spill] sm:$0xff]  ;;  %v2634_v30 = vadd.f32 %v9054_v13, %v9051_v37  ;;  %v3182_v36 = vadd.f32 %v2925_v58, %v2924_v12  ;;  %v9088_v12 = vsel %vm1236_vm3, 1.0, %v15872_v9 }
 0x1d9   : > { %16070 = vst [vmem:[#allocation54_spill] sm:$0xff] %v8943_v23  ;;  %v2920_v23 = vmul.f32 %v16076_v28, %v7063_v32  ;;  %v8978_v27 = vmul.f32 %v16077_v53, %v7071_v35  ;;  %v9002_v53 = vsel %vm1238_vm13, 1.0, %v15872_v9  ;;  %v9006_v28 = vpop.permute.xlu1 %974 }
 0x1da   : > { %469 = vst.msk [vmem:[#allocation3 + $0x80] sm:$0xff] %vm388_vm4, %v15872_v9  ;;  %v2639_v22 = vadd.f32 %v9002_v53, %v8999_v49  ;;  %vm1249_vm5 = vcmp.gt.f32.partialorder %v9006_v28, %v6992_v10  ;;  %vm1250_vm6 = vcmp.gt.f32.partialorder %v9006_v28, %v6994_v11  ;;  %vm1251_vm7 = vcmp.gt.f32.partialorder %v9006_v28, %v7005_v15 }
 0x1db   : > { %16072 = vst [vmem:[#allocation42_spill] sm:$0xff] %v8953_v26  ;;  %v8982_v26 = vmul.f32 %v16078_v17, %v7063_v32  ;;  %v16084_v17 = vld [vmem:[#allocation49_spill] sm:$0xff]  ;;  %v9093_v58 = vsel %vm1249_vm5, 1.0, %v15872_v9  ;;  %vm1252_vm8 = vcmp.gt.f32.partialorder %v9006_v28, %v7019_v20 }
 0x1dc   : > { %470 = vst.msk [vmem:[#allocation3 + $0x88] sm:$0xff] %vm388_vm4, %v15872_v9 }
 0x1dd   : > { %16074 = vst [vmem:[#allocation43_spill] sm:$0xff] %v8965_v24  ;;  %v16085_v24 = vld [vmem:[#allocation55_spill] sm:$0xff] }
 0x1de   : > { %471 = vst.msk [vmem:[#allocation3 + $0x90] sm:$0xff] %vm388_vm4, %v15872_v9  ;;  %v9020_v7 = vmul.f32 %v16085_v24, %v7071_v35  ;;  %v2640_v24 = vadd.f32 %v9025_v61, %v2639_v22 }
 0x1df   : > { %472 = vst.msk [vmem:[#allocation3 + $0x98] sm:$0xff] %vm388_vm4, %v15872_v9 }
 0x1e0   : > { %16079 = vst [vmem:[#allocation48_spill] sm:$0xff] %v8987_v46  ;;  %v9016_v46 = vmul.f32 %v16084_v17, %v7067_v34  ;;  %v2641_v17 = vadd.f32 %v9048_v41, %v2640_v24  ;;  %v16096_v24 = vld [vmem:[#allocation22_spill] sm:$0xff] }
 0x1e1   : > { %473 = vst.msk [vmem:[#allocation3 + $0xa0] sm:$0xff] %vm388_vm4, %v15872_v9 }
 0x1e2   : > { %16080 = vst [vmem:[#allocation40_spill] sm:$0xff] %v8999_v49  ;;  %2642 = vadd.xlane.f32.xlu1 %v2641_v17 }
 0x1e3   : > { %16081 = vst [vmem:[#allocation56_spill] sm:$0xff] %v9002_v53  ;;  %v16088_v53 = vld [vmem:[#allocation52_spill] sm:$0xff] }
 0x1e4   : > { %16083 = vst [vmem:[#allocation21_spill] sm:$0xff] %v9006_v28  ;;  %v2929_v49 = vmul.f32 %v16088_v53, %v7065_v33  ;;  %v16093_v53 = vld [vmem:[#allocation61_spill] sm:$0xff]  ;;  %v9162_v28 = vsel %vm1247_vm11, 1.0, %v15872_v9 }
 0x1e5   : > { %474 = vst.msk [vmem:[#allocation3 + $0xa8] sm:$0xff] %vm388_vm4, %v15872_v9  ;;  %v9058_v22 = vmul.f32 %v16093_v53, %v7067_v34  ;;  %v16095_v53 = vld [vmem:[#allocation63_spill] sm:$0xff] }
 0x1e6   : > { %475 = vst.msk [vmem:[#allocation3 + $0xb0] sm:$0xff] %vm388_vm4, %v15872_v9  ;;  %v9074_v38 = vmul.f32 %v16095_v53, %v7071_v35  ;;  %v9106_v53 = vadd.f32 %v3173_v21, %v8921_v5  ;;  %v3187_v2 = vadd.f32 %v2929_v49, %v2928_v29  ;;  %v9124_v21 = vpop.permute.xlu1 %989  ;;  %v9144_v29 = vsel %vm1245_vm9, 1.0, %v15872_v9 }
 0x1e7   : > { %16086 = vst [vmem:[#allocation41_spill] sm:$0xff] %v9025_v61  ;;  %v3177_v61 = vadd.f32 %v2921_v31, %v2920_v23  ;;  %v2635_v23 = vadd.f32 %v9070_v8, %v2634_v30  ;;  %v9096_v30 = vsel %vm1250_vm6, 1.0, %v15872_v9  ;;  %v9147_v49 = vsel %vm1246_vm10, 1.0, %v15872_v9 }
 0x1e8   : > { %476 = vst.msk [vmem:[#allocation3 + $0xb8] sm:$0xff] %vm388_vm4, %v15872_v9  ;;  %v2654_v17 = vadd.f32 %v9096_v30, %v9093_v58  ;;  %vm1261_vm15 = vcmp.gt.f32.partialorder %v9124_v21, %v6992_v10  ;;  %vm1262_vm0 = vcmp.gt.f32.partialorder %v9124_v21, %v6994_v11  ;;  %vm1263_vm1 = vcmp.gt.f32.partialorder %v9124_v21, %v7005_v15 }
 0x1e9   : > { %16089 = vst [vmem:[#allocation49_spill] sm:$0xff] %v9040_v60  ;;  %v2636_v31 = vadd.f32 %v9088_v12, %v2635_v23  ;;  %v16102_v23 = vld [vmem:[#allocation31_spill] sm:$0xff]  ;;  %vm1264_vm2 = vcmp.gt.f32.partialorder %v9124_v21, %v7019_v20 }
 0x1ea   : > { %477 = vst.msk [vmem:[#allocation3 + $0xc0] sm:$0xff] %vm388_vm4, %v15872_v9 }
 0x1eb   : > { %16090 = vst [vmem:[#allocation55_spill] sm:$0xff] %v9048_v41  ;;  %v2933_v41 = vmul.f32 %v16096_v24, %v7065_v33  ;;  %v9111_v24 = vsel %vm1251_vm7, 1.0, %v15872_v9  ;;  %2637 = vadd.xlane.f32.xlu0 %v2636_v31  ;;  %v2649_v31 = vadd.f32 %v9147_v49, %v9144_v29 }
 0x1ec   : > { %16091 = vst [vmem:[#allocation50_spill] sm:$0xff] %v9051_v37  ;;  %v6713_v37 = vld [vmem:[%s7032_s15] sm:$0xf]  ;;  %v2655_v5 = vadd.f32 %v9111_v24, %v2654_v17  ;;  %v3178_v17 = vadd.f32 %v3177_v61, %v9016_v46  ;;  %v9195_v61 = vsel %vm1262_vm0, 1.0, %v15872_v9 }
 0x1ed   : > { %16092 = vst [vmem:[#allocation52_spill] sm:$0xff] %v9054_v13  ;;  %v2650_v46 = vadd.f32 %v9162_v28, %v2649_v31  ;;  %v3192_v60 = vadd.f32 %v2933_v41, %v8982_v26  ;;  %v9239_v41 = vsel %vm1264_vm2, 1.0, %v15872_v9 }
 0x1ee   : > { %478 = vst.msk [vmem:[#allocation3 + $0xc8] sm:$0xff] %vm388_vm4, %v15872_v9 }
 0x1ef   : > { %479 = vst.msk [vmem:[#allocation3 + $0xd0] sm:$0xff] %vm388_vm4, %v15872_v9 }
 0x1f0   : > { %16094 = vst [vmem:[#allocation61_spill] sm:$0xff] %v9070_v8  ;;  %v16101_v8 = vld [vmem:[#allocation28_spill] sm:$0xff] }
 0x1f1   : > { %480 = vst.msk [vmem:[#allocation3 + $0xd8] sm:$0xff] %vm388_vm4, %v15872_v9  ;;  %v9115_v13 = vmul.f32 %v16101_v8, %v7067_v34  ;;  %v9139_v8 = vsel %vm1252_vm8, 1.0, %v15872_v9 }
 0x1f2   : > { %481 = vst.msk [vmem:[#allocation3 + $0xe0] sm:$0xff] %vm388_vm4, %v15872_v9 }
 0x1f3   : > { %16097 = vst [vmem:[#allocation63_spill] sm:$0xff] %v9088_v12  ;;  %v9119_v12 = vmul.f32 %v16102_v23, %v7071_v35  ;;  %v9157_v23 = vpop.permute.xlu0 %984 }
 0x1f4   : > { %16098 = vst [vmem:[#allocation22_spill] sm:$0xff] %v9093_v58  ;;  %vm1257_vm3 = vcmp.gt.f32.partialorder %v9157_v23, %v6992_v10  ;;  %vm1258_vm5 = vcmp.gt.f32.partialorder %v9157_v23, %v6994_v11  ;;  %vm1259_vm6 = vcmp.gt.f32.partialorder %v9157_v23, %v7005_v15  ;;  %vm1260_vm7 = vcmp.gt.f32.partialorder %v9157_v23, %v7019_v20  ;;  %v16124_v58 = vld [vmem:[#allocation34_spill] sm:$0xff] }
 0x1f5   : > { %16099 = vst [vmem:[#allocation204_spill] sm:$0xff] %v9096_v30  ;;  %v9122_v30 = vsub.f32 1.0, %v6713_v37  ;;  %v2656_v37 = vadd.f32 %v9139_v8, %v2655_v5  ;;  %v9169_v5 = vadd.f32 %v3182_v36, %v8969_v48  ;;  %v9187_v36 = vsel %vm1248_vm12, 1.0, %v15872_v9 }
 0x1f6   : > { %482 = vst.msk [vmem:[#allocation3 + $0xe8] sm:$0xff] %vm388_vm4, %v15872_v9  ;;  %v9192_v48 = vsel %vm1261_vm15, 1.0, %v15872_v9  ;;  %v9273_v45 = vmul.f32 %v16124_v58, %v7071_v35  ;;  %v9293_v58 = vsel %vm1260_vm7, 1.0, %v15872_v9 }
 0x1f7   : > { %483 = vst.msk [vmem:[#allocation3 + $0xf0] sm:$0xff] %vm388_vm4, %v15872_v9  ;;  %2657 = vadd.xlane.f32.xlu1 %v2656_v37  ;;  %v2651_v37 = vadd.f32 %v9187_v36, %v2650_v46  ;;  %v2669_v31 = vadd.f32 %v9195_v61, %v9192_v48  ;;  %v9217_v46 = vadd.f32 %v3187_v2, %v9058_v22  ;;  %v9244_v22 = vsel %vm1257_vm3, 1.0, %v15872_v9 }
 0x1f8   : > { %16100 = vst [vmem:[#allocation205_spill] sm:$0xff] %v9111_v24  ;;  %v16109_v24 = vld [vmem:[#allocation162_spill] sm:$0xff] }
 0x1f9   : > { %16103 = vst [vmem:[#allocation28_spill] sm:$0xff] %v9124_v21  ;;  %vm1265_vm13 = vcmp.gt.f32.partialorder %v16109_v24, %v6992_v10  ;;  %vm1266_vm14 = vcmp.gt.f32.partialorder %v16109_v24, %v6994_v11  ;;  %v16115_v21 = vld [vmem:[#allocation26_spill] sm:$0xff]  ;;  %2652 = vadd.xlane.f32.xlu0 %v2651_v37  ;;  %v9249_v37 = vpop.permute.xlu1 %1004  ;;  %vm1267_vm8 = vcmp.gt.f32.partialorder %v16109_v24, %v7005_v15 }
 0x1fa   : > { %484 = vst.msk [vmem:[#allocation3 + $0xf8] sm:$0xff] %vm388_vm4, %v15872_v9  ;;  %v9234_v2 = vsel %vm1266_vm14, 1.0, %v15872_v9  ;;  %vm1268_vm9 = vcmp.gt.f32.partialorder %v16109_v24, %v7019_v20  ;;  %vm1273_vm10 = vcmp.gt.f32.partialorder %v9249_v37, %v6992_v10  ;;  %vm1274_vm11 = vcmp.gt.f32.partialorder %v9249_v37, %v6994_v11 }
 0x1fb   : > { %485 = vst.msk [vmem:[#allocation3 + $0x100] sm:$0xff] %vm388_vm4, %v15872_v9  ;;  %vm1275_vm12 = vcmp.gt.f32.partialorder %v9249_v37, %v7005_v15 }
 0x1fc   : > { %16104 = vst [vmem:[#allocation31_spill] sm:$0xff] %v9139_v8 }
 0x1fd   : > { %16105 = vst [vmem:[#allocation206_spill] sm:$0xff] %v9144_v29  ;;  %v9214_v29 = vsel %vm1265_vm13, 1.0, %v15872_v9  ;;  %vm1276_vm13 = vcmp.gt.f32.partialorder %v9249_v37, %v7019_v20 }
 0x1fe   : > { %16106 = vst [vmem:[#allocation207_spill] sm:$0xff] %v9147_v49  ;;  %v9172_v49 = vperm.slane %v9122_v30, 0 }
 0x1ff   : > { %486 = vst.msk [vmem:[#allocation3 + $0x108] sm:$0xff] %vm388_vm4, %v15872_v9 }
 0x200   : > { %16107 = vst [vmem:[#allocation208_spill] sm:$0xff] %v9157_v23  ;;  %v9314_v23 = vsel %vm1268_vm9, 1.0, %v15872_v9 }
 0x201   : > { %487 = vst.msk [vmem:[#allocation3 + $0x110] sm:$0xff] %vm388_vm4, %v15872_v9 }
 0x202   : > { %16108 = vst [vmem:[#allocation209_spill] sm:$0xff] %v9162_v28  ;;  %v9208_v28 = vsel %vm1263_vm1, 1.0, %v15872_v9 }
 0x203   : > { %488 = vst.msk [vmem:[#allocation3 + $0x118] sm:$0xff] %vm388_vm4, %v15872_v9  ;;  %v2670_v26 = vadd.f32 %v9208_v28, %v2669_v31 }
 0x204   : > { %489 = vst.msk [vmem:[#allocation3 + $0x120] sm:$0xff] %vm388_vm4, %v15872_v9 }
 0x205   : > { %16110 = vst [vmem:[#allocation210_spill] sm:$0xff] %v9187_v36  ;;  %v2671_v31 = vadd.f32 %v9239_v41, %v2670_v26  ;;  %v16122_v36 = vld [vmem:[#allocation27_spill] sm:$0xff]  ;;  %v16123_v26 = vld [vmem:[#allocation32_spill] sm:$0xff] }
 0x206   : > { %16111 = vst [vmem:[#allocation211_spill] sm:$0xff] %v9192_v48  ;;  %v9263_v48 = vsel %vm1259_vm6, 1.0, %v15872_v9  ;;  %v2937_v8 = vmul.f32 %v16122_v36, %v7065_v33  ;;  %v2674_v36 = vadd.f32 %v9234_v2, %v9214_v29 }
 0x207   : > { %16112 = vst [vmem:[#allocation212_spill] sm:$0xff] %v9195_v61  ;;  %v9221_v61 = vmul.f32 %v16115_v21, %v7063_v32  ;;  %v9247_v21 = vsel %vm1258_vm5, 1.0, %v15872_v9  ;;  %2672 = vadd.xlane.f32.xlu1 %v2671_v31  ;;  %v9296_v31 = vsel %vm1267_vm8, 1.0, %v15872_v9 }
 0x208   : > { %490 = vst.msk [vmem:[#allocation3 + $0x128] sm:$0xff] %vm388_vm4, %v15872_v9 }
 0x209   : > { %491 = vst.msk [vmem:[#allocation3 + $0x130] sm:$0xff] %vm388_vm4, %v15872_v9 }
 0x20a   : > { %16113 = vst [vmem:[#allocation213_spill] sm:$0xff] %v9208_v28  ;;  %v2664_v28 = vadd.f32 %v9247_v21, %v9244_v22 }
 0x20b   : > { %16114 = vst [vmem:[#allocation214_spill] sm:$0xff] %v9214_v29 }
 0x20c   : > { %492 = vst.msk [vmem:[#allocation3 + $0x138] sm:$0xff] %vm388_vm4, %v15872_v9 }
 0x20d   : > { %16116 = vst [vmem:[#allocation26_spill] sm:$0xff] %v9234_v2  ;;  %v2675_v2 = vadd.f32 %v9296_v31, %v2674_v36  ;;  %v9327_v36 = vperm.slane %v9122_v30, 2 }
 0x20e   : > { %493 = vst.msk [vmem:[#allocation3 + $0x140] sm:$0xff] %vm388_vm4, %v15872_v9 }
 0x20f   : > { %16117 = vst [vmem:[#allocation215_spill] sm:$0xff] %v9239_v41  ;;  %v9269_v41 = vmul.f32 %v16123_v26, %v7067_v34  ;;  %v9285_v26 = vpop.permute.xlu0 %999 }
 0x210   : > { %16118 = vst [vmem:[#allocation216_spill] sm:$0xff] %v9244_v22  ;;  %v2665_v22 = vadd.f32 %v9263_v48, %v2664_v28  ;;  %v9301_v28 = vadd.f32 %v3178_v17, %v9020_v7  ;;  %v9317_v7 = vsel %vm1273_vm10, 1.0, %v15872_v9  ;;  %v9320_v17 = vsel %vm1274_vm11, 1.0, %v15872_v9 }
 0x211   : > { %16119 = vst [vmem:[#allocation217_spill] sm:$0xff] %v9247_v21  ;;  %v9276_v21 = vperm.slane %v9122_v30, 1  ;;  %v2684_v29 = vadd.f32 %v9320_v17, %v9317_v7  ;;  %vm1269_vm14 = vcmp.gt.f32.partialorder %v9285_v26, %v6992_v10  ;;  %vm1270_vm15 = vcmp.gt.f32.partialorder %v9285_v26, %v6994_v11 }
 0x212   : > { %16120 = vst [vmem:[#allocation218_spill] sm:$0xff] %v9249_v37  ;;  %v2666_v24 = vadd.f32 %v9293_v58, %v2665_v22  ;;  %v9324_v22 = vadd.f32 %v9169_v5, %v8978_v27  ;;  %v9339_v27 = vsel %vm1275_vm12, 1.0, %v15872_v9  ;;  %v3193_v5 = vadd.f32 %v3192_v60, %v9115_v13 }
 0x213   : > { %494 = vst.msk [vmem:[#allocation3 + $0x148] sm:$0xff] %vm388_vm4, %v15872_v9  ;;  %v2685_v37 = vadd.f32 %v9339_v27, %v2684_v29  ;;  %vm1271_vm0 = vcmp.gt.f32.partialorder %v9285_v26, %v7005_v15  ;;  %v9359_v60 = vsel %vm1276_vm13, 1.0, %v15872_v9  ;;  %v9362_v13 = vsel %vm1270_vm15, 1.0, %v15872_v9 }
 0x214   : > { %495 = vst.msk [vmem:[#allocation3 + $0x150] sm:$0xff] %vm388_vm4, %v15872_v9  ;;  %2667 = vadd.xlane.f32.xlu0 %v2666_v24  ;;  %v16133_v24 = vld [vmem:[#allocation29_spill] sm:$0xff]  ;;  %v9366_v29 = vadd.f32 %v9217_v46, %v9074_v38  ;;  %vm1272_vm1 = vcmp.gt.f32.partialorder %v9285_v26, %v7019_v20  ;;  %v9381_v38 = vsel %vm1271_vm0, 1.0, %v15872_v9  ;;  %vm1289_vm15 = vcmp.gt.f32.partialorder %v8375_v1, %v6992_v10 }
 0x215   : > { %16121 = vst [vmem:[#allocation219_spill] sm:$0xff] %v9263_v48  ;;  %v16148_v48 = vld [vmem:[#allocation47_spill] sm:$0xff]  ;;  %vm1290_vm0 = vcmp.gt.f32.partialorder %v8375_v1, %v6994_v11 }
 0x216   : > { %496 = vst.msk [vmem:[#allocation3 + $0x158] sm:$0xff] %vm388_vm4, %v15872_v9  ;;  %v2961_v14 = vmul.f32 %v16148_v48, %v7065_v33 }
 0x217   : > { %16125 = vst [vmem:[#allocation27_spill] sm:$0xff] %v9285_v26 }
 0x218   : > { %497 = vst.msk [vmem:[#allocation3 + $0x160] sm:$0xff] %vm388_vm4, %v15872_v9 }
 0x219   : > { %16126 = vst [vmem:[#allocation32_spill] sm:$0xff] %v9293_v58 }
 0x21a   : > { %16127 = vst [vmem:[#allocation34_spill] sm:$0xff] %v9296_v31  ;;  %v2676_v31 = vadd.f32 %v9314_v23, %v2675_v2  ;;  %v2948_v2 = vmul.f32 %v16133_v24, %v7063_v32  ;;  %v2686_v24 = vadd.f32 %v9359_v60, %v2685_v37  ;;  %v9391_v37 = vpop.permute.xlu1 %1019 }
 0x21b   : > { %498 = vst.msk [vmem:[#allocation3 + $0x168] sm:$0xff] %vm388_vm4, %v15872_v9  ;;  %vm1285_vm7 = vcmp.gt.f32.partialorder %v9391_v37, %v6992_v10  ;;  %vm1286_vm8 = vcmp.gt.f32.partialorder %v9391_v37, %v6994_v11  ;;  %vm1287_vm9 = vcmp.gt.f32.partialorder %v9391_v37, %v7005_v15  ;;  %vm1288_vm10 = vcmp.gt.f32.partialorder %v9391_v37, %v7019_v20 }
 0x21c   : > { %499 = vst.msk [vmem:[#allocation3 + $0x170] sm:$0xff] %vm388_vm4, %v15872_v9  ;;  %2677 = vadd.xlane.f32.xlu2 %v2676_v31  ;;  %v3197_v31 = vadd.f32 %v2937_v8, %v9221_v61  ;;  %v16139_v8 = vld [vmem:[#allocation174_spill] sm:$0xff]  ;;  %2687 = vadd.xlane.f32.xlu1 %v2686_v24  ;;  %v9412_v24 = vsel %vm1272_vm1, 1.0, %v15872_v9  ;;  %vm1291_vm1 = vcmp.gt.f32.partialorder %v8375_v1, %v7005_v15 }
 0x21d   : > { %16128 = vst [vmem:[#allocation220_spill] sm:$0xff] %v9314_v23  ;;  %vm1277_vm2 = vcmp.gt.f32.partialorder %v16139_v8, %v6992_v10  ;;  %vm1278_vm3 = vcmp.gt.f32.partialorder %v16139_v8, %v6994_v11  ;;  %v16140_v61 = vld [vmem:[#allocation38_spill] sm:$0xff]  ;;  %vm1279_vm5 = vcmp.gt.f32.partialorder %v16139_v8, %v7005_v15  ;;  %vm1280_vm6 = vcmp.gt.f32.partialorder %v16139_v8, %v7019_v20 }
 0x21e   : > { %16129 = vst [vmem:[#allocation221_spill] sm:$0xff] %v9317_v7  ;;  %v16137_v7 = vld [vmem:[#allocation30_spill] sm:$0xff]  ;;  %v9389_v46 = vmul.f32 %v16140_v61, %v7067_v34  ;;  %v16146_v61 = vld [vmem:[#allocation45_spill] sm:$0xff]  ;;  %v9453_v8 = vadd.f32 %v3197_v31, %v9269_v41  ;;  %v9470_v31 = vsel %vm1287_vm9, 1.0, %v15872_v9 }
 0x21f   : > { %16130 = vst [vmem:[#allocation222_spill] sm:$0xff] %v9320_v17  ;;  %v9354_v17 = vsel %vm1269_vm14, 1.0, %v15872_v9  ;;  %v2949_v23 = vmul.f32 %v16137_v7, %v7065_v33 }
 0x220   : > { %16131 = vst [vmem:[#allocation223_spill] sm:$0xff] %v9327_v36 }
 0x221   : > { %500 = vst.msk [vmem:[#allocation3 + $0x178] sm:$0xff] %vm388_vm4, %v15872_v9 }
 0x222   : > { %501 = vst.msk [vmem:[#allocation3 + $0x180] sm:$0xff] %vm388_vm4, %v15872_v9 }
 0x223   : > { %16132 = vst [vmem:[#allocation224_spill] sm:$0xff] %v9339_v27  ;;  %v2679_v27 = vadd.f32 %v9362_v13, %v9354_v17 }
 0x224   : > { %502 = vst.msk [vmem:[#allocation3 + $0x188] sm:$0xff] %vm388_vm4, %v15872_v9 }
 0x225   : > { %16134 = vst [vmem:[#allocation29_spill] sm:$0xff] %v9354_v17  ;;  %v2680_v7 = vadd.f32 %v9381_v38, %v2679_v27  ;;  %v9402_v17 = vadd.f32 %v3193_v5, %v9119_v12  ;;  %v9415_v27 = vsel %vm1278_vm3, 1.0, %v15872_v9  ;;  %v16147_v12 = vld [vmem:[#allocation46_spill] sm:$0xff] }
 0x226   : > { %503 = vst.msk [vmem:[#allocation3 + $0x190] sm:$0xff] %vm388_vm4, %v15872_v9  ;;  %v2960_v5 = vmul.f32 %v16147_v12, %v7063_v32  ;;  %v9450_v12 = vsel %vm1286_vm8, 1.0, %v15872_v9 }
 0x227   : > { %16135 = vst [vmem:[#allocation225_spill] sm:$0xff] %v9359_v60  ;;  %v9404_v60 = vpop.permute.xlu0 %1014  ;;  %v2681_v58 = vadd.f32 %v9412_v24, %v2680_v7  ;;  %v9447_v7 = vsel %vm1285_vm7, 1.0, %v15872_v9 }
 0x228   : > { %16136 = vst [vmem:[#allocation226_spill] sm:$0xff] %v9362_v13  ;;  %v9399_v13 = vsel %vm1277_vm2, 1.0, %v15872_v9  ;;  %vm1281_vm11 = vcmp.gt.f32.partialorder %v9404_v60, %v6992_v10  ;;  %vm1282_vm12 = vcmp.gt.f32.partialorder %v9404_v60, %v6994_v11  ;;  %vm1283_vm13 = vcmp.gt.f32.partialorder %v9404_v60, %v7005_v15 }
 0x229   : > { %504 = vst.msk [vmem:[#allocation3 + $0x198] sm:$0xff] %vm388_vm4, %v15872_v9  ;;  %v2689_v26 = vadd.f32 %v9415_v27, %v9399_v13  ;;  %2682 = vadd.xlane.f32.xlu0 %v2681_v58  ;;  %v9464_v58 = vadd.f32 %v2949_v23, %v2948_v2  ;;  %v9492_v2 = vsel %vm1288_vm10, 1.0, %v15872_v9  ;;  %vm1284_vm14 = vcmp.gt.f32.partialorder %v9404_v60, %v7019_v20 }
 0x22a   : > { %505 = vst.msk [vmem:[#allocation3 + $0x1a0] sm:$0xff] %vm388_vm4, %v15872_v9  ;;  %vm1292_vm2 = vcmp.gt.f32.partialorder %v8375_v1, %v7019_v20 }
 0x22b   : > { %16138 = vst [vmem:[#allocation30_spill] sm:$0xff] %v9381_v38  ;;  %v9419_v38 = vmul.f32 %v16146_v61, %v7071_v35  ;;  %v9435_v61 = vsel %vm1279_vm5, 1.0, %v15872_v9 }
 0x22c   : > { %16141 = vst [vmem:[#allocation38_spill] sm:$0xff] %v9391_v37  ;;  %v2690_v48 = vadd.f32 %v9435_v61, %v2689_v26  ;;  %v2699_v26 = vadd.f32 %v9450_v12, %v9447_v7 }
 0x22d   : > { %506 = vst.msk [vmem:[#allocation3 + $0x1a8] sm:$0xff] %vm388_vm4, %v15872_v9 }
 0x22e   : > { %16142 = vst [vmem:[#allocation227_spill] sm:$0xff] %v9399_v13  ;;  %v2700_v23 = vadd.f32 %v9470_v31, %v2699_v26 }
 0x22f   : > { %16143 = vst [vmem:[#allocation228_spill] sm:$0xff] %v9404_v60 }
 0x230   : > { %507 = vst.msk [vmem:[#allocation3 + $0x1b0] sm:$0xff] %vm388_vm4, %v15872_v9  ;;  %v2701_v26 = vadd.f32 %v9492_v2, %v2700_v23  ;;  %v16162_v23 = vld [vmem:[#allocation65_spill] sm:$0xff] }
 0x231   : > { %16144 = vst [vmem:[#allocation229_spill] sm:$0xff] %v9412_v24  ;;  %v16155_v24 = vld [vmem:[#allocation62_spill] sm:$0xff] }
 0x232   : > { %16145 = vst [vmem:[#allocation230_spill] sm:$0xff] %v9415_v27  ;;  %v9458_v27 = vsel %vm1280_vm6, 1.0, %v15872_v9  ;;  %v9478_v37 = vmul.f32 %v16155_v24, %v7071_v35  ;;  %v9495_v24 = vsel %vm1281_vm11, 1.0, %v15872_v9  ;;  %2702 = vadd.xlane.f32.xlu1 %v2701_v26  ;;  %v9541_v26 = vsel %vm1290_vm0, 1.0, %v15872_v9 }
 0x233   : > { %508 = vst.msk [vmem:[#allocation3 + $0x1b8] sm:$0xff] %vm388_vm4, %v15872_v9  ;;  %v2691_v41 = vadd.f32 %v9458_v27, %v2690_v48  ;;  %v3227_v48 = vadd.f32 %v2961_v14, %v2960_v5  ;;  %v16161_v14 = vld [vmem:[#allocation64_spill] sm:$0xff] }
 0x234   : > { %509 = vst.msk [vmem:[#allocation3 + $0x1c0] sm:$0xff] %vm388_vm4, %v15872_v9  ;;  %v2940_v5 = vmul.f32 %v16161_v14, %v7063_v32  ;;  %v9538_v14 = vsel %vm1284_vm14, 1.0, %v15872_v9 }
 0x235   : > { %16149 = vst [vmem:[#allocation45_spill] sm:$0xff] %v9435_v61  ;;  %v16154_v61 = vld [vmem:[#allocation57_spill] sm:$0xff]  ;;  %2692 = vadd.xlane.f32.xlu2 %v2691_v41 }
 0x236   : > { %510 = vst.msk [vmem:[#allocation3 + $0x1c8] sm:$0xff] %vm388_vm4, %v15872_v9  ;;  %v9474_v13 = vmul.f32 %v16154_v61, %v7067_v34  ;;  %v9498_v61 = vsel %vm1282_vm12, 1.0, %v15872_v9 }
 0x237   : > { %16150 = vst [vmem:[#allocation46_spill] sm:$0xff] %v9447_v7  ;;  %v2694_v41 = vadd.f32 %v9498_v61, %v9495_v24  ;;  %v9512_v7 = vsel %vm1283_vm13, 1.0, %v15872_v9 }
 0x238   : > { %16151 = vst [vmem:[#allocation47_spill] sm:$0xff] %v9450_v12 }
 0x239   : > { %511 = vst.msk [vmem:[#allocation3 + $0x1d0] sm:$0xff] %vm388_vm4, %v15872_v9 }
 0x23a   : > { %16152 = vst [vmem:[#allocation231_spill] sm:$0xff] %v9458_v27  ;;  %v9520_v27 = vpop.permute.xlu0 %1029  ;;  %3175 = vadd.xlane.f32.xlu1 %v9106_v53 }
 0x23b   : > { %512 = vst.msk [vmem:[#allocation3 + $0x1d8] sm:$0xff] %vm388_vm4, %v15872_v9  ;;  %vm1293_vm3 = vcmp.gt.f32.partialorder %v9520_v27, %v6992_v10  ;;  %vm1294_vm5 = vcmp.gt.f32.partialorder %v9520_v27, %v6994_v11  ;;  %vm1295_vm6 = vcmp.gt.f32.partialorder %v9520_v27, %v7005_v15  ;;  %vm1296_vm7 = vcmp.gt.f32.partialorder %v9520_v27, %v7019_v20 }
 0x23c   : > { %16153 = vst [vmem:[#allocation232_spill] sm:$0xff] %v9470_v31  ;;  %v16159_v31 = vld [vmem:[#allocation67_spill] sm:$0xff]  ;;  %v9573_v1 = vsel %vm1293_vm3, 1.0, %v15872_v9  ;;  %v9595_v39 = vsel %vm1295_vm6, 1.0, %v15872_v9 }
 0x23d   : > { %513 = vst.msk [vmem:[#allocation3 + $0x1e0] sm:$0xff] %vm388_vm4, %v15872_v9  ;;  %v2972_v12 = vmul.f32 %v16159_v31, %v7063_v32  ;;  %v2695_v31 = vadd.f32 %v9512_v7, %v2694_v41  ;;  %v16167_v41 = vld [vmem:[#allocation59_spill] sm:$0xff] }
 0x23e   : > { %514 = vst.msk [vmem:[#allocation3 + $0x1e8] sm:$0xff] %vm388_vm4, %v15872_v9 }
 0x23f   : > { %16156 = vst [vmem:[#allocation57_spill] sm:$0xff] %v9492_v2  ;;  %v2941_v2 = vmul.f32 %v16162_v23, %v7065_v33  ;;  %v2944_v23 = vmul.f32 %v16167_v41, %v7063_v32  ;;  %v2696_v0 = vadd.f32 %v9538_v14, %v2695_v31  ;;  %v9559_v41 = vsel %vm1291_vm1, 1.0, %v15872_v9 }
 0x240   : > { %16157 = vst [vmem:[#allocation62_spill] sm:$0xff] %v9495_v24  ;;  %v3242_v57 = vadd.f32 %v2973_v56, %v2972_v12  ;;  %v3213_v12 = vadd.f32 %v9464_v58, %v9389_v46 }
 0x241   : > { %16158 = vst [vmem:[#allocation233_spill] sm:$0xff] %v9498_v61  ;;  %v9530_v61 = vsel %vm1289_vm15, 1.0, %v15872_v9  ;;  %2697 = vadd.xlane.f32.xlu0 %v2696_v0  ;;  %v3202_v0 = vadd.f32 %v2941_v2, %v2940_v5  ;;  %v16177_v2 = vld [vmem:[#allocation77_spill] sm:$0xff]  ;;  %v9601_v5 = vadd.f32 %v9453_v8, %v9273_v45  ;;  %v9615_v45 = vsel %vm1296_vm7, 1.0, %v15872_v9 }
 0x242   : > { %515 = vst.msk [vmem:[#allocation3 + $0x1f0] sm:$0xff] %vm388_vm4, %v15872_v9  ;;  %v2704_v60 = vadd.f32 %v9541_v26, %v9530_v61  ;;  %3190 = vadd.xlane.f32.xlu1 %v9366_v29 }
 0x243   : > { %516 = vst.msk [vmem:[#allocation3 + $0x1f8] sm:$0xff] %vm388_vm4, %v15872_v9 }
 0x244   : > { %16160 = vst [vmem:[#allocation67_spill] sm:$0xff] %v9512_v7  ;;  %v16168_v7 = vld [vmem:[#allocation60_spill] sm:$0xff]  ;;  %v2705_v51 = vadd.f32 %v9559_v41, %v2704_v60 }
 0x245   : > { %16163 = vst [vmem:[#allocation64_spill] sm:$0xff] %v9520_v27  ;;  %v2945_v24 = vmul.f32 %v16168_v7, %v7065_v33  ;;  %v16171_v7 = vld [vmem:[#allocation70_spill] sm:$0xff] }
 0x246   : > { %517 = vst.msk [vmem:[#allocation4] sm:$0xff] %vm388_vm4, %v15872_v9  ;;  %v2974_v31 = vmul.f32 %v16171_v7, %v7067_v34  ;;  %v9580_v7 = vsel %vm1292_vm2, 1.0, %v15872_v9 }
 0x247   : > { %16164 = vst [vmem:[#allocation65_spill] sm:$0xff] %v9530_v61  ;;  %v3207_v60 = vadd.f32 %v2945_v24, %v2944_v23  ;;  %v2943_v24 = vmul.f32 %v16177_v2, %v7071_v35  ;;  %v16178_v23 = vld [vmem:[#allocation66_spill] sm:$0xff]  ;;  %v3228_v2 = vadd.f32 %v3227_v48, %v9474_v13  ;;  %v16182_v48 = vld [vmem:[#allocation80_spill] sm:$0xff] }
 0x248   : > { %518 = vst.msk [vmem:[#allocation4 + $0x8] sm:$0xff] %vm388_vm4, %v15872_v9  ;;  %v3243_v13 = vadd.f32 %v3242_v57, %v2974_v31  ;;  %v9637_v57 = vperm.slane %v9122_v30, 3  ;;  %v9642_v31 = vadd.f32 %v3213_v12, %v9419_v38 }
 0x249   : > { %16165 = vst [vmem:[#allocation234_spill] sm:$0xff] %v9538_v14  ;;  %v9583_v14 = vsel %vm1294_vm5, 1.0, %v15872_v9 }
 0x24a   : > { %16166 = vst [vmem:[#allocation235_spill] sm:$0xff] %v9541_v26  ;;  %v16173_v26 = vld [vmem:[#allocation75_spill] sm:$0xff] }
 0x24b   : > { %519 = vst.msk [vmem:[#allocation4 + $0x10] sm:$0xff] %vm388_vm4, %v15872_v9  ;;  %v2942_v61 = vmul.f32 %v16173_v26, %v7067_v34  ;;  %v2709_v26 = vadd.f32 %v9583_v14, %v9573_v1 }
 0x24c   : > { %520 = vst.msk [vmem:[#allocation4 + $0x18] sm:$0xff] %vm388_vm4, %v15872_v9 }
 0x24d   : > { %16170 = vst [vmem:[#allocation59_spill] sm:$0xff] %v9559_v41  ;;  %v2706_v41 = vadd.f32 %v9580_v7, %v2705_v51  ;;  %v2946_v51 = vmul.f32 %v16178_v23, %v7067_v34  ;;  %v2710_v56 = vadd.f32 %v9595_v39, %v2709_v26  ;;  %v3203_v8 = vadd.f32 %v3202_v0, %v2942_v61  ;;  %v16180_v23 = vld [vmem:[#allocation74_spill] sm:$0xff]  ;;  %v16183_v61 = vld [vmem:[#allocation81_spill] sm:$0xff] }
 0x24e   : > { %521 = vst.msk [vmem:[#allocation4 + $0x20] sm:$0xff] %vm388_vm4, %v15872_v9  ;;  %v2947_v27 = vmul.f32 %v16180_v23, %v7071_v35  ;;  %v2985_v26 = vmul.f32 %v16182_v48, %v7065_v33  ;;  %v2952_v0 = vmul.f32 %v16183_v61, %v7063_v32  ;;  %v16184_v23 = vld [vmem:[#allocation82_spill] sm:$0xff]  ;;  %v16190_v61 = vld [vmem:[#allocation92_spill] sm:$0xff] }
 0x24f   : > { %16172 = vst [vmem:[#allocation60_spill] sm:$0xff] %v9573_v1  ;;  %2707 = vadd.xlane.f32.xlu2 %v2706_v41  ;;  %v16181_v41 = vld [vmem:[#allocation79_spill] sm:$0xff]  ;;  %v2711_v46 = vadd.f32 %v9615_v45, %v2710_v56  ;;  %v3208_v58 = vadd.f32 %v3207_v60, %v2946_v51  ;;  %v16186_v1 = vld [vmem:[#allocation73_spill] sm:$0xff]  ;;  %v9645_v60 = vadd.f32 %v3228_v2, %v9478_v37  ;;  %v16188_v51 = vld [vmem:[#allocation78_spill] sm:$0xff] }
 0x250   : > { %522 = vst.msk [vmem:[#allocation4 + $0x28] sm:$0xff] %vm388_vm4, %v15872_v9  ;;  %v2984_v53 = vmul.f32 %v16181_v41, %v7063_v32  ;;  %v16185_v41 = vld [vmem:[#allocation72_spill] sm:$0xff]  ;;  %v2957_v56 = vmul.f32 %v16186_v1, %v7065_v33  ;;  %v2975_v48 = vmul.f32 %v16188_v51, %v7071_v35  ;;  %v3204_v38 = vadd.f32 %v3203_v8, %v2943_v24  ;;  %v16194_v8 = vld [vmem:[#allocation95_spill] sm:$0xff] }
 0x251   : > { %16174 = vst [vmem:[#allocation69_spill] sm:$0xff] %v9580_v7  ;;  %2712 = vadd.xlane.f32.xlu0 %v2711_v46  ;;  %v16189_v1 = vld [vmem:[#allocation84_spill] sm:$0xff]  ;;  %v9661_v37 = vadd.f32 %v3208_v58, %v2947_v27  ;;  %v16193_v27 = vld [vmem:[#allocation94_spill] sm:$0xff]  ;;  %v16196_v58 = vld [vmem:[#allocation85_spill] sm:$0xff] }
 0x252   : > { %16175 = vst [vmem:[#allocation70_spill] sm:$0xff] %v9583_v14  ;;  %v2956_v14 = vmul.f32 %v16185_v41, %v7063_v32  ;;  %v2986_v30 = vmul.f32 %v16189_v1, %v7067_v34  ;;  %v16191_v46 = vld [vmem:[#allocation16_spill] sm:$0xff]  ;;  %v9663_v12 = vadd.f32 %v3243_v13, %v2975_v48  ;;  %v3257_v2 = vadd.f32 %v2985_v26, %v2984_v53  ;;  %v16192_v1 = vld [vmem:[#allocation15_spill] sm:$0xff]  ;;  %v16197_v26 = vld [vmem:[#allocation86_spill] sm:$0xff] }
 0x253   : > { %523 = vst.msk [vmem:[#allocation4 + $0x30] sm:$0xff] %vm388_vm4, %v15872_v9  ;;  %vm1809_vm8 = vcmp.eq.f32.partialorder %v16191_v46, %v6992_v10  ;;  %vm1810_vm9 = vcmp.eq.f32.partialorder %v16191_v46, %v6994_v11  ;;  %vm1817_vm10 = vcmp.eq.f32.partialorder %v16192_v1, %v6992_v10  ;;  %vm1818_vm11 = vcmp.eq.f32.partialorder %v16192_v1, %v6994_v11 }
 0x254   : > { %524 = vst.msk [vmem:[#allocation4 + $0x38] sm:$0xff] %vm388_vm4, %v15872_v9  ;;  %v3222_v51 = vadd.f32 %v2957_v56, %v2956_v14  ;;  %v2964_v24 = vmul.f32 %v16193_v27, %v7063_v32  ;;  %v2074_v14 = vsel %vm1809_vm8, %v9172_v49, 0.0  ;;  %v2075_v53 = vsel %vm1810_vm9, %v9276_v21, 0.0  ;;  %v16198_v56 = vld [vmem:[#allocation83_spill] sm:$0xff]  ;;  %3205 = vadd.xlane.f32.xlu1 %v3204_v38  ;;  %v16205_v38 = vld [vmem:[#allocation104_spill] sm:$0xff] }
 0x255   : > { %16176 = vst [vmem:[#allocation75_spill] sm:$0xff] %v9595_v39  ;;  %v2953_v39 = vmul.f32 %v16184_v23, %v7065_v33  ;;  %v2987_v23 = vmul.f32 %v16190_v61, %v7071_v35  ;;  %v2968_v13 = vmul.f32 %v16196_v58, %v7063_v32  ;;  %vm1811_vm12 = vcmp.eq.f32.partialorder %v16191_v46, %v7005_v15 }
 0x256   : > { %525 = vst.msk [vmem:[#allocation4 + $0x40] sm:$0xff] %vm388_vm4, %v15872_v9  ;;  %v2958_v48 = vmul.f32 %v16198_v56, %v7067_v34  ;;  %vm1812_vm13 = vcmp.eq.f32.partialorder %v16191_v46, %v7019_v20  ;;  %v2082_v61 = vsel %vm1817_vm10, %v9172_v49, 0.0  ;;  %v2083_v27 = vsel %vm1818_vm11, %v9276_v21, 0.0 }
 0x257   : > { %526 = vst.msk [vmem:[#allocation4 + $0x48] sm:$0xff] %vm388_vm4, %v15872_v9  ;;  %v3217_v41 = vadd.f32 %v2953_v39, %v2952_v0  ;;  %3180 = vadd.xlane.f32.xlu2 %v9301_v28  ;;  %v2965_v39 = vmul.f32 %v16194_v8, %v7065_v33  ;;  %v16195_v28 = vld [vmem:[#allocation89_spill] sm:$0xff]  ;;  %v2969_v0 = vmul.f32 %v16197_v26, %v7065_v33  ;;  %v16199_v26 = vld [vmem:[#allocation90_spill] sm:$0xff] }
 0x258   : > { %16179 = vst [vmem:[#allocation77_spill] sm:$0xff] %v9615_v45  ;;  %v2954_v29 = vmul.f32 %v16195_v28, %v7067_v34  ;;  %v3258_v28 = vadd.f32 %v3257_v2, %v2986_v30  ;;  %v3684_v58 = vadd.f32 %v2075_v53, %v2074_v14  ;;  %vm1819_vm14 = vcmp.eq.f32.partialorder %v16192_v1, %v7005_v15  ;;  %v16200_v30 = vld [vmem:[#allocation88_spill] sm:$0xff]  ;;  %v16202_v53 = vld [vmem:[#allocation19_spill] sm:$0xff] }
 0x259   : > { %527 = vst.msk [vmem:[#allocation4 + $0x50] sm:$0xff] %vm388_vm4, %v15872_v9  ;;  %3185 = vadd.xlane.f32.xlu0 %v9324_v22  ;;  %v2955_v56 = vmul.f32 %v16199_v26, %v7071_v35  ;;  %v3223_v45 = vadd.f32 %v3222_v51, %v2958_v48  ;;  %v3232_v7 = vadd.f32 %v2965_v39, %v2964_v24  ;;  %v16201_v51 = vld [vmem:[#allocation100_spill] sm:$0xff]  ;;  %v2084_v39 = vsel %vm1819_vm14, %v9327_v36, 0.0 }
 0x25a   : > { %528 = vst.msk [vmem:[#allocation4 + $0x58] sm:$0xff] %vm388_vm4, %v15872_v9  ;;  %v3218_v8 = vadd.f32 %v3217_v41, %v2954_v29  ;;  %v2076_v41 = vsel %vm1811_vm12, %v9327_v36, 0.0  ;;  %v2959_v2 = vmul.f32 %v16200_v30, %v7071_v35  ;;  %v3237_v14 = vadd.f32 %v2969_v0, %v2968_v13  ;;  %v16203_v13 = vld [vmem:[#allocation96_spill] sm:$0xff]  ;;  %v16207_v30 = vld [vmem:[#allocation99_spill] sm:$0xff] }
 0x25b   : > { %16187 = vst [vmem:[#allocation66_spill] sm:$0xff] %v9637_v57  ;;  %vm1820_vm15 = vcmp.eq.f32.partialorder %v16192_v1, %v7019_v20  ;;  %v3694_v22 = vadd.f32 %v2083_v27, %v2082_v61  ;;  %v2966_v24 = vmul.f32 %v16201_v51, %v7067_v34  ;;  %vm1813_vm0 = vcmp.eq.f32.partialorder %v16202_v53, %v6992_v10 }
 0x25c   : > { %529 = vst.msk [vmem:[#allocation4 + $0x60] sm:$0xff] %vm388_vm4, %v15872_v9  ;;  %vm1814_vm1 = vcmp.eq.f32.partialorder %v16202_v53, %v6994_v11  ;;  %v3219_v29 = vadd.f32 %v3218_v8, %v2955_v56  ;;  %v2970_v0 = vmul.f32 %v16203_v13, %v7067_v34  ;;  %v9743_v48 = vadd.f32 %v3258_v28, %v2987_v23  ;;  %v16206_v56 = vld [vmem:[#allocation98_spill] sm:$0xff] }
 0x25d   : > { %530 = vst.msk [vmem:[#allocation4 + $0x68] sm:$0xff] %vm388_vm4, %v15872_v9  ;;  %v3685_v61 = vadd.f32 %v3684_v58, %v2076_v41  ;;  %v9748_v27 = vadd.f32 %v3223_v45, %v2959_v2  ;;  %v3233_v26 = vadd.f32 %v3232_v7, %v2966_v24  ;;  %v2077_v8 = vsel %vm1812_vm13, %v9637_v57, 0.0  ;;  %v16204_v45 = vld [vmem:[#allocation103_spill] sm:$0xff]  ;;  %v16209_v24 = vld [vmem:[#allocation97_spill] sm:$0xff]  ;;  %v16210_v13 = vld [vmem:[#allocation18_spill] sm:$0xff] }
 0x25e   : > { %531 = vst.msk [vmem:[#allocation4 + $0x70] sm:$0xff] %vm388_vm4, %v15872_v9  ;;  %v2085_v23 = vsel %vm1820_vm15, %v9637_v57, 0.0  ;;  %v3238_v28 = vadd.f32 %v3237_v14, %v2970_v0  ;;  %v3695_v58 = vadd.f32 %v3694_v22, %v2084_v39  ;;  %v2079_v7 = vsel %vm1814_vm1, %v9276_v21, 0.0  ;;  %v9780_v14 = vpop.xlane.xlu1 %2397  ;;  %v16208_v22 = vld [vmem:[#allocation101_spill] sm:$0xff]  ;;  %3220 = vadd.xlane.f32.xlu1 %v3219_v29  ;;  %v16218_v29 = vld [vmem:[#allocation10_spill] sm:$0xff] }
 0x25f   : > { %532 = vst.msk [vmem:[#allocation4 + $0x78] sm:$0xff] %vm388_vm4, %v15872_v9  ;;  %3195 = vadd.xlane.f32.xlu2 %v9402_v17  ;;  %v2078_v17 = vsel %vm1813_vm0, %v9172_v49, 0.0  ;;  %v2976_v46 = vmul.f32 %v16204_v45, %v7063_v32  ;;  %v2977_v1 = vmul.f32 %v16205_v38, %v7065_v33  ;;  %v2980_v41 = vmul.f32 %v16206_v56, %v7063_v32 }
 0x260   : > { %533 = vst.msk [vmem:[#allocation4 + $0x80] sm:$0xff] %vm388_vm4, %v15872_v9  ;;  %v2981_v2 = vmul.f32 %v16207_v30, %v7065_v33  ;;  %v2967_v51 = vmul.f32 %v16208_v22, %v7071_v35  ;;  %v2971_v39 = vmul.f32 %v16209_v24, %v7071_v35  ;;  %vm1821_vm2 = vcmp.eq.f32.partialorder %v16210_v13, %v6992_v10  ;;  %v16213_v24 = vld [vmem:[#allocation113_spill] sm:$0xff] }
 0x261   : > { %534 = vst.msk [vmem:[#allocation4 + $0x88] sm:$0xff] %vm388_vm4, %v15872_v9  ;;  %vm1822_vm3 = vcmp.eq.f32.partialorder %v16210_v13, %v6994_v11  ;;  %3200 = vadd.xlane.f32.xlu0 %v9601_v5  ;;  %v9793_v0 = vadd.f32 %v3685_v61, %v2077_v8  ;;  %vm1815_vm5 = vcmp.eq.f32.partialorder %v16202_v53, %v7005_v15  ;;  %v2086_v8 = vsel %vm1821_vm2, %v9172_v49, 0.0 }
 0x262   : > { %535 = vst.msk [vmem:[#allocation4 + $0x90] sm:$0xff] %vm388_vm4, %v15872_v9  ;;  %vm1816_vm6 = vcmp.eq.f32.partialorder %v16202_v53, %v7019_v20  ;;  %v3234_v45 = vadd.f32 %v3233_v26, %v2967_v51  ;;  %v9801_v38 = vadd.f32 %v3238_v28, %v2971_v39  ;;  %v9803_v56 = vadd.f32 %v3695_v58, %v2085_v23  ;;  %v16214_v28 = vld [vmem:[#allocation114_spill] sm:$0xff]  ;;  %v16215_v58 = vld [vmem:[#allocation11_spill] sm:$0xff] }
 0x263   : > { %536 = vst.msk [vmem:[#allocation4 + $0x98] sm:$0xff] %vm388_vm4, %v15872_v9  ;;  %v3689_v30 = vadd.f32 %v2079_v7, %v2078_v17  ;;  %v3247_v5 = vadd.f32 %v2977_v1, %v2976_v46  ;;  %v3252_v61 = vadd.f32 %v2981_v2, %v2980_v41  ;;  %v2087_v22 = vsel %vm1822_vm3, %v9276_v21, 0.0  ;;  %v16216_v17 = vld [vmem:[#allocation109_spill] sm:$0xff]  ;;  %v16217_v46 = vld [vmem:[#allocation107_spill] sm:$0xff] }
 0x264   : > { %537 = vst.msk [vmem:[#allocation4 + $0xa0] sm:$0xff] %vm388_vm4, %v15872_v9  ;;  %v2988_v26 = vmul.f32 %v16213_v24, %v7063_v32  ;;  %v2989_v23 = vmul.f32 %v16214_v28, %v7065_v33  ;;  %vm1829_vm7 = vcmp.eq.f32.partialorder %v16215_v58, %v6992_v10  ;;  %vm1830_vm8 = vcmp.eq.f32.partialorder %v16215_v58, %v6994_v11  ;;  %v16220_v28 = vld [vmem:[#allocation108_spill] sm:$0xff] }
 0x265   : > { %538 = vst.msk [vmem:[#allocation4 + $0xa8] sm:$0xff] %vm388_vm4, %v15872_v9  ;;  %v2978_v7 = vmul.f32 %v16216_v17, %v7067_v34  ;;  %v2982_v1 = vmul.f32 %v16217_v46, %v7067_v34  ;;  %v2080_v41 = vsel %vm1815_vm5, %v9327_v36, 0.0  ;;  %v2081_v2 = vsel %vm1816_vm6, %v9637_v57, 0.0 }
 0x266   : > { %539 = vst.msk [vmem:[#allocation4 + $0xb0] sm:$0xff] %vm388_vm4, %v15872_v9  ;;  %vm1823_vm9 = vcmp.eq.f32.partialorder %v16210_v13, %v7005_v15  ;;  %vm1825_vm10 = vcmp.eq.f32.partialorder %v16218_v29, %v6992_v10  ;;  %vm1826_vm11 = vcmp.eq.f32.partialorder %v16218_v29, %v6994_v11  ;;  %v3690_v39 = vadd.f32 %v3689_v30, %v2080_v41 }
 0x267   : > { %540 = vst.msk [vmem:[#allocation4 + $0xb8] sm:$0xff] %vm388_vm4, %v15872_v9  ;;  %3210 = vadd.xlane.f32.xlu2 %v9661_v37  ;;  %v3699_v37 = vadd.f32 %v2087_v22, %v2086_v8  ;;  %v3248_v51 = vadd.f32 %v3247_v5, %v2978_v7  ;;  %v2094_v53 = vsel %vm1829_vm7, %v9172_v49, 0.0  ;;  %v2095_v8 = vsel %vm1830_vm8, %v9276_v21, 0.0  ;;  %v16219_v22 = vld [vmem:[#allocation110_spill] sm:$0xff]  ;;  %v9860_v7 = vpop.xlane.xlu2 %2412  ;;  %3235 = vadd.xlane.f32.xlu1 %v3234_v45 }
 0x268   : > { %541 = vst.msk [vmem:[#allocation4 + $0xc0] sm:$0xff] %vm388_vm4, %v15872_v9  ;;  %v2979_v24 = vmul.f32 %v16219_v22, %v7071_v35  ;;  %v2983_v5 = vmul.f32 %v16220_v28, %v7071_v35  ;;  %v3253_v30 = vadd.f32 %v3252_v61, %v2982_v1  ;;  %v3262_v17 = vadd.f32 %v2989_v23, %v2988_v26  ;;  %v9881_v23 = vpop.xlane.xlu0 %2407  ;;  %v16221_v1 = vld [vmem:[#allocation116_spill] sm:$0xff] }
 0x269   : > { %542 = vst.msk [vmem:[#allocation4 + $0xc8] sm:$0xff] %vm388_vm4, %v15872_v9  ;;  %3215 = vadd.xlane.f32.xlu0 %v9642_v31  ;;  %vm1824_vm12 = vcmp.eq.f32.partialorder %v16210_v13, %v7019_v20  ;;  %v2088_v46 = vsel %vm1823_vm9, %v9327_v36, 0.0  ;;  %v2090_v61 = vsel %vm1825_vm10, %v9172_v49, 0.0  ;;  %v2091_v26 = vsel %vm1826_vm11, %v9276_v21, 0.0  ;;  %v9879_v31 = vpop.xlane.xlu1 %2417 }
 0x26a   : > { %543 = vst.msk [vmem:[#allocation4 + $0xd0] sm:$0xff] %vm388_vm4, %v15872_v9  ;;  %v2990_v41 = vmul.f32 %v16221_v1, %v7067_v34  ;;  %v3700_v22 = vadd.f32 %v3699_v37, %v2088_v46  ;;  %vm1831_vm13 = vcmp.eq.f32.partialorder %v16215_v58, %v7005_v15  ;;  %v3709_v28 = vadd.f32 %v2095_v8, %v2094_v53 }
 0x26b   : > { %544 = vst.msk [vmem:[#allocation4 + $0xd8] sm:$0xff] %vm388_vm4, %v15872_v9  ;;  %vm1841_vm14 = vcmp.eq.f32.partialorder %v16222_v59, %v6992_v10  ;;  %vm1842_vm15 = vcmp.eq.f32.partialorder %v16222_v59, %v6994_v11  ;;  %v9897_v37 = vadd.f32 %v3253_v30, %v2983_v5  ;;  %vm1827_vm0 = vcmp.eq.f32.partialorder %v16218_v29, %v7005_v15  ;;  %v16224_v30 = vld [vmem:[#allocation24_spill] sm:$0xff] }
 0x26c   : > { %545 = vst.msk [vmem:[#allocation4 + $0xe0] sm:$0xff] %vm388_vm4, %v15872_v9  ;;  %v3263_v46 = vadd.f32 %v3262_v17, %v2990_v41  ;;  %v3704_v53 = vadd.f32 %v2091_v26, %v2090_v61  ;;  %vm1832_vm1 = vcmp.eq.f32.partialorder %v16215_v58, %v7019_v20  ;;  %v2096_v8 = vsel %vm1831_vm13, %v9327_v36, 0.0 }
 0x26d   : > { %16211 = vst [vmem:[#allocation74_spill] sm:$0xff] %v9793_v0  ;;  %v9889_v0 = vadd.f32 %v3690_v39, %v2081_v2  ;;  %v16223_v2 = vld [vmem:[#allocation117_spill] sm:$0xff]  ;;  %v2089_v39 = vsel %vm1824_vm12, %v9637_v57, 0.0  ;;  %v3710_v45 = vadd.f32 %v3709_v28, %v2096_v8  ;;  %v2106_v13 = vsel %vm1841_vm14, %v9172_v49, 0.0 }
 0x26e   : > { %546 = vst.msk [vmem:[#allocation4 + $0xe8] sm:$0xff] %vm388_vm4, %v15872_v9  ;;  %vm1828_vm2 = vcmp.eq.f32.partialorder %v16218_v29, %v7019_v20  ;;  %v2092_v5 = vsel %vm1827_vm0, %v9327_v36, 0.0  ;;  %vm1833_vm3 = vcmp.eq.f32.partialorder %v16224_v30, %v6992_v10  ;;  %vm1834_vm5 = vcmp.eq.f32.partialorder %v16224_v30, %v6994_v11 }
 0x26f   : > { %16212 = vst [vmem:[#allocation79_spill] sm:$0xff] %v9803_v56  ;;  %v3249_v56 = vadd.f32 %v3248_v51, %v2979_v24  ;;  %3225 = vadd.xlane.f32.xlu2 %v9748_v27  ;;  %v2991_v51 = vmul.f32 %v16223_v2, %v7071_v35  ;;  %v9918_v27 = vadd.f32 %v3700_v22, %v2089_v39  ;;  %v2107_v24 = vsel %vm1842_vm15, %v9276_v21, 0.0  ;;  %v9950_v26 = vpop.xlane.xlu2 %2422  ;;  %v16225_v22 = vld [vmem:[#allocation23_spill] sm:$0xff]  ;;  %v16227_v39 = vld [vmem:[#allocation13_spill] sm:$0xff] }
 0x270   : > { %547 = vst.msk [vmem:[#allocation4 + $0xf0] sm:$0xff] %vm388_vm4, %v15872_v9  ;;  %v3705_v61 = vadd.f32 %v3704_v53, %v2092_v5  ;;  %vm1843_vm6 = vcmp.eq.f32.partialorder %v16222_v59, %v7005_v15  ;;  %vm1844_vm7 = vcmp.eq.f32.partialorder %v16222_v59, %v7019_v20  ;;  %v2097_v1 = vsel %vm1832_vm1, %v9637_v57, 0.0  ;;  %v16229_v5 = vld [vmem:[#allocation35_spill] sm:$0xff] }
 0x271   : > { %548 = vst.msk [vmem:[#allocation4 + $0xf8] sm:$0xff] %vm388_vm4, %v15872_v9  ;;  %v9942_v17 = vadd.f32 %v3263_v46, %v2991_v51  ;;  %3230 = vadd.xlane.f32.xlu0 %v9645_v60  ;;  %v3724_v41 = vadd.f32 %v2107_v24, %v2106_v13  ;;  %vm1837_vm8 = vcmp.eq.f32.partialorder %v16225_v22, %v6992_v10  ;;  %v9963_v28 = vpop.xlane.xlu1 %2432  ;;  %v9965_v46 = vpop.xlane.xlu0 %2427  ;;  %v2093_v58 = vsel %vm1828_vm2, %v9637_v57, 0.0 }
 0x272   : > { %549 = vst.msk [vmem:[#allocation4 + $0x100] sm:$0xff] %vm388_vm4, %v15872_v9  ;;  %vm1838_vm9 = vcmp.eq.f32.partialorder %v16225_v22, %v6994_v11  ;;  %v9967_v60 = vadd.f32 %v3710_v45, %v2097_v1  ;;  %v2098_v53 = vsel %vm1833_vm3, %v9172_v49, 0.0  ;;  %v2099_v2 = vsel %vm1834_vm5, %v9276_v21, 0.0  ;;  %3250 = vadd.xlane.f32.xlu1 %v3249_v56 }
 0x273   : > { %550 = vst.msk [vmem:[#allocation4 + $0x108] sm:$0xff] %vm388_vm4, %v15872_v9  ;;  %v2108_v51 = vsel %vm1843_vm6, %v9327_v36, 0.0  ;;  %v2109_v29 = vsel %vm1844_vm7, %v9637_v57, 0.0  ;;  %vm1853_vm10 = vcmp.eq.f32.partialorder %v16227_v39, %v6992_v10  ;;  %vm1854_vm11 = vcmp.eq.f32.partialorder %v16227_v39, %v6994_v11 }
 0x274   : > { %551 = vst.msk [vmem:[#allocation4 + $0x110] sm:$0xff] %vm388_vm4, %v15872_v9  ;;  %v9997_v8 = vadd.f32 %v3705_v61, %v2093_v58  ;;  %v2102_v45 = vsel %vm1837_vm8, %v9172_v49, 0.0  ;;  %v2103_v59 = vsel %vm1838_vm9, %v9276_v21, 0.0  ;;  %vm1855_vm12 = vcmp.eq.f32.partialorder %v16227_v39, %v7005_v15 }
 0x275   : > { %552 = vst.msk [vmem:[#allocation4 + $0x118] sm:$0xff] %vm388_vm4, %v15872_v9  ;;  %vm1835_vm13 = vcmp.eq.f32.partialorder %v16224_v30, %v7005_v15  ;;  %v3714_v13 = vadd.f32 %v2099_v2, %v2098_v53  ;;  %v3725_v24 = vadd.f32 %v3724_v41, %v2108_v51  ;;  %vm1845_vm14 = vcmp.eq.f32.partialorder %v16229_v5, %v6992_v10 }
 0x276   : > { %553 = vst.msk [vmem:[#allocation4 + $0x120] sm:$0xff] %vm388_vm4, %v15872_v9  ;;  %vm1846_vm15 = vcmp.eq.f32.partialorder %v16229_v5, %v6994_v11  ;;  %vm1856_vm0 = vcmp.eq.f32.partialorder %v16227_v39, %v7019_v20  ;;  %vm1836_vm1 = vcmp.eq.f32.partialorder %v16224_v30, %v7019_v20  ;;  %vm1839_vm2 = vcmp.eq.f32.partialorder %v16225_v22, %v7005_v15  ;;  %v16233_v39 = vld [vmem:[#allocation14_spill] sm:$0xff] }
 0x277   : > { %554 = vst.msk [vmem:[#allocation4 + $0x128] sm:$0xff] %vm388_vm4, %v15872_v9  ;;  %3240 = vadd.xlane.f32.xlu2 %v9801_v38  ;;  %v2118_v38 = vsel %vm1853_vm10, %v9172_v49, 0.0  ;;  %v3719_v56 = vadd.f32 %v2103_v59, %v2102_v45  ;;  %v2119_v61 = vsel %vm1854_vm11, %v9276_v21, 0.0  ;;  %v2100_v1 = vsel %vm1835_vm13, %v9327_v36, 0.0  ;;  %v10047_v53 = vpop.xlane.xlu2 %2437 }
 0x278   : > { %555 = vst.msk [vmem:[#allocation4 + $0x130] sm:$0xff] %vm388_vm4, %v15872_v9  ;;  %vm1840_vm3 = vcmp.eq.f32.partialorder %v16225_v22, %v7019_v20  ;;  %v3327_v41 = vadd.f32 %v8584_v42, %v8577_v40  ;;  %v3332_v58 = vadd.f32 %v8605_v62, %v8601_v25  ;;  %v3715_v2 = vadd.f32 %v3714_v13, %v2100_v1  ;;  %v4138_v1 = vld [vmem:[#allocation2 + $0x8] sm:$0xff] }
 0x279   : > { %556 = vst.msk [vmem:[#allocation4 + $0x138] sm:$0xff] %vm388_vm4, %v15872_v9  ;;  %3245 = vadd.xlane.f32.xlu0 %v9663_v12  ;;  %v2110_v51 = vsel %vm1845_vm14, %v9172_v49, 0.0  ;;  %v2111_v42 = vsel %vm1846_vm15, %v9276_v21, 0.0  ;;  %v2120_v62 = vsel %vm1855_vm12, %v9327_v36, 0.0  ;;  %v10064_v40 = vpop.xlane.xlu1 %2447  ;;  %v10066_v25 = vpop.xlane.xlu0 %2442  ;;  %v2104_v12 = vsel %vm1839_vm2, %v9327_v36, 0.0 }
 0x27a   : > { %557 = vst.msk [vmem:[#allocation4 + $0x140] sm:$0xff] %vm388_vm4, %v15872_v9  ;;  %v3739_v45 = vadd.f32 %v2119_v61, %v2118_v38  ;;  %v3328_v59 = vadd.f32 %v3327_v41, %v8588_v16  ;;  %v3333_v13 = vadd.f32 %v3332_v58, %v8609_v4  ;;  %v2105_v38 = vsel %vm1840_vm3, %v9637_v57, 0.0  ;;  %3265 = vadd.xlane.f32.xlu1 %v9942_v17 }
 0x27b   : > { %558 = vst.msk [vmem:[#allocation4 + $0x148] sm:$0xff] %vm388_vm4, %v15872_v9  ;;  %v3720_v61 = vadd.f32 %v3719_v56, %v2104_v12  ;;  %vm1847_vm5 = vcmp.eq.f32.partialorder %v16229_v5, %v7005_v15  ;;  %v3729_v16 = vadd.f32 %v2111_v42, %v2110_v51  ;;  %vm1848_vm6 = vcmp.eq.f32.partialorder %v16229_v5, %v7019_v20  ;;  %v16232_v56 = vld [vmem:[#allocation33_spill] sm:$0xff]  ;;  %v2332_v51 = vld [vmem:[#allocation2 + $0x10] sm:$0xff] }
 0x27c   : > { %559 = vst.msk [vmem:[#allocation4 + $0x150] sm:$0xff] %vm388_vm4, %v15872_v9  ;;  %v10091_v4 = vadd.f32 %v3328_v59, %v8592_v47  ;;  %v10094_v30 = vadd.f32 %v3333_v13, %v8616_v18  ;;  %v4792_v47 = vsub.f32 16.0, %v4138_v1  ;;  %v2330_v18 = vld [vmem:[#allocation2] sm:$0xff]  ;;  %vm1849_vm7 = vcmp.eq.f32.partialorder %v16232_v56, %v6992_v10 }
 0x27d   : > { %560 = vst.msk [vmem:[#allocation4 + $0x158] sm:$0xff] %vm388_vm4, %v15872_v9  ;;  %vm1850_vm8 = vcmp.eq.f32.partialorder %v16232_v56, %v6994_v11  ;;  %vm1851_vm9 = vcmp.eq.f32.partialorder %v16232_v56, %v7005_v15  ;;  %v10127_v41 = vadd.f32 %v3720_v61, %v2105_v38  ;;  %v2113_v58 = vsel %vm1848_vm6, %v9637_v57, 0.0 }
 0x27e   : > { %561 = vst.msk [vmem:[#allocation4 + $0x160] sm:$0xff] %vm388_vm4, %v15872_v9  ;;  %vm1852_vm10 = vcmp.eq.f32.partialorder %v16232_v56, %v7019_v20  ;;  %vm1865_vm11 = vcmp.eq.f32.partialorder %v16233_v39, %v6992_v10  ;;  %v2114_v5 = vsel %vm1849_vm7, %v9172_v49, 0.0  ;;  %v10173_v38 = vmul.f32 %v8507_v6, %v7063_v32  ;;  %v16242_v56 = vld [vmem:[#allocation130_spill] sm:$0xff] }
 0x27f   : > { %562 = vst.msk [vmem:[#allocation4 + $0x168] sm:$0xff] %vm388_vm4, %v15872_v9  ;;  %3255 = vadd.xlane.f32.xlu2 %v9897_v37  ;;  %v2333_v37 = vld [vmem:[#allocation2 + $0x18] sm:$0xff]  ;;  %v10140_v42 = vpop.xlane.xlu2 %2452  ;;  %v10190_v6 = vmul.f32 %v8537_v55, %v7071_v35  ;;  %vm1868_vm2 = vcmp.eq.f32.partialorder %v16233_v39, %v7019_v20 }
 0x280   : > { %16226 = vst [vmem:[#allocation80_spill] sm:$0xff] %v9967_v60  ;;  %v10080_v60 = vadd.f32 %v3725_v24, %v2109_v29  ;;  %v3347_v29 = vadd.f32 %v8680_v3, %v8676_v52  ;;  %v3740_v24 = vadd.f32 %v3739_v45, %v2120_v62  ;;  %v2112_v3 = vsel %vm1847_vm5, %v9327_v36, 0.0 }
 0x281   : > { %563 = vst.msk [vmem:[#allocation4 + $0x170] sm:$0xff] %vm388_vm4, %v15872_v9  ;;  %v2121_v52 = vsel %vm1856_vm0, %v9637_v57, 0.0  ;;  %3260 = vadd.xlane.f32.xlu0 %v9743_v48  ;;  %v2115_v62 = vsel %vm1850_vm8, %v9276_v21, 0.0  ;;  %v10154_v45 = vmax.f32 %v4792_v47, 1.0  ;;  %v2717_v48 = vadd.f32 %v9860_v7, %v2333_v37  ;;  %v10159_v59 = vpop.xlane.xlu1 %2462  ;;  %v10161_v13 = vpop.xlane.xlu0 %2457  ;;  %v16237_v37 = vld [vmem:[#allocation119_spill] sm:$0xff] }
 0x282   : > { %564 = vst.msk [vmem:[#allocation4 + $0x178] sm:$0xff] %vm388_vm4, %v15872_v9  ;;  %v3348_v17 = vadd.f32 %v3347_v29, %v8689_v44  ;;  %v2714_v44 = vadd.f32 %v9780_v14, %v2330_v18  ;;  %v2335_v14 = vld [vmem:[#allocation2 + $0x28] sm:$0xff]  ;;  %v10163_v1 = vadd.f32 %v3740_v24, %v2121_v52  ;;  %v10177_v7 = vmul.f32 %v8510_v43, %v7065_v33  ;;  %v2336_v18 = vld [vmem:[#allocation2 + $0x30] sm:$0xff] }
 0x283   : > { %16228 = vst [vmem:[#allocation81_spill] sm:$0xff] %v9997_v8  ;;  %v2101_v8 = vsel %vm1836_vm1, %v9637_v57, 0.0  ;;  %v3337_v29 = vadd.f32 %v8658_v19, %v8646_v54  ;;  %v10186_v47 = vmul.f32 %v8523_v50, %v7067_v34  ;;  %v2716_v43 = vadd.f32 %v9881_v23, %v2332_v51  ;;  %v2338_v19 = vld [vmem:[#allocation2 + $0x40] sm:$0xff]  ;;  %v16236_v54 = vld [vmem:[#allocation176_spill] sm:$0xff]  ;;  %3280 = vadd.xlane.f32.xlu1 %v16237_v37 }
 0x284   : > { %565 = vst.msk [vmem:[#allocation4 + $0x180] sm:$0xff] %vm388_vm4, %v15872_v9  ;;  %v10100_v22 = vadd.f32 %v3715_v2, %v2101_v8  ;;  %v2334_v8 = vld [vmem:[#allocation2 + $0x20] sm:$0xff]  ;;  %v3730_v2 = vadd.f32 %v3729_v16, %v2112_v3  ;;  %v10152_v12 = vadd.f32 %v3348_v17, %v8693_v63  ;;  %v2116_v63 = vsel %vm1851_vm9, %v9327_v36, 0.0  ;;  %v2337_v16 = vld [vmem:[#allocation2 + $0x38] sm:$0xff]  ;;  %v2340_v23 = vld [vmem:[#allocation2 + $0x50] sm:$0xff] }
 0x285   : > { %566 = vst.msk [vmem:[#allocation4 + $0x188] sm:$0xff] %vm388_vm4, %v15872_v9  ;;  %v2718_v61 = vadd.f32 %v9879_v31, %v2334_v8  ;;  %v3734_v24 = vadd.f32 %v2115_v62, %v2114_v5  ;;  %v2719_v31 = vadd.f32 %v9950_v26, %v2335_v14  ;;  %v16238_v50 = vld [vmem:[#allocation53_spill] sm:$0xff]  ;;  %v2721_v55 = vadd.f32 %v9963_v28, %v2337_v16  ;;  %v2339_v8 = vld [vmem:[#allocation2 + $0x48] sm:$0xff] }
 0x286   : > { %567 = vst.msk [vmem:[#allocation4 + $0x190] sm:$0xff] %vm388_vm4, %v15872_v9  ;;  %vm1857_vm12 = vcmp.eq.f32.partialorder %v16238_v50, %v6992_v10  ;;  %v16239_v3 = vld [vmem:[#allocation149_spill] sm:$0xff]  ;;  %v10202_v17 = vadd.f32 %v3730_v2, %v2113_v58  ;;  %vm1858_vm13 = vcmp.eq.f32.partialorder %v16238_v50, %v6994_v11  ;;  %vm1859_vm14 = vcmp.eq.f32.partialorder %v16238_v50, %v7005_v15  ;;  %v16240_v28 = vld [vmem:[#allocation139_spill] sm:$0xff] }
 0x287   : > { %568 = vst.msk [vmem:[#allocation4 + $0x198] sm:$0xff] %vm388_vm4, %v15872_v9  ;;  %3270 = vadd.xlane.f32.xlu2 %v16236_v54  ;;  %v3338_v52 = vadd.f32 %v3337_v29, %v16239_v3  ;;  %v2720_v26 = vadd.f32 %v9965_v46, %v2336_v18  ;;  %vm1860_vm15 = vcmp.eq.f32.partialorder %v16238_v50, %v7019_v20  ;;  %v2341_v51 = vld [vmem:[#allocation2 + $0x58] sm:$0xff]  ;;  %v2122_v46 = vsel %vm1857_vm12, %v9172_v49, 0.0  ;;  %v2343_v14 = vld [vmem:[#allocation2 + $0x68] sm:$0xff]  ;;  %v2342_v54 = vld [vmem:[#allocation2 + $0x60] sm:$0xff] }
 0x288   : > { %569 = vst.msk [vmem:[#allocation4 + $0x1a0] sm:$0xff] %vm388_vm4, %v15872_v9  ;;  %v2722_v2 = vadd.f32 %v10047_v53, %v2338_v19  ;;  %v3735_v5 = vadd.f32 %v3734_v24, %v2116_v63  ;;  %vm1866_vm0 = vcmp.eq.f32.partialorder %v16233_v39, %v6994_v11  ;;  %v10229_v62 = vmul.f32 %v16242_v56, %v7063_v32  ;;  %v2468_v53 = vpop.xlane.xlu2 %2467  ;;  %v16244_v29 = vld [vmem:[#allocation125_spill] sm:$0xff]  ;;  %v16247_v56 = vld [vmem:[#allocation135_spill] sm:$0xff] }
 0x289   : > { %570 = vst.msk [vmem:[#allocation4 + $0x1a8] sm:$0xff] %vm388_vm4, %v15872_v9  ;;  %v10217_v58 = vadd.f32 %v3338_v52, %v16240_v28  ;;  %v2123_v63 = vsel %vm1858_vm13, %v9276_v21, 0.0  ;;  %v2124_v16 = vsel %vm1859_vm14, %v9327_v36, 0.0  ;;  %v16246_v24 = vld [vmem:[#allocation133_spill] sm:$0xff]  ;;  %v2723_v19 = vadd.f32 %v10066_v25, %v2339_v8  ;;  %v2478_v37 = vpop.xlane.xlu1 %2477  ;;  %v2473_v3 = vpop.xlane.xlu0 %2472  ;;  %v16248_v25 = vld [vmem:[#allocation136_spill] sm:$0xff] }
 0x28a   : > { %571 = vst.msk [vmem:[#allocation4 + $0x1b0] sm:$0xff] %vm388_vm4, %v15872_v9  ;;  %v2725_v52 = vadd.f32 %v10140_v42, %v2341_v51  ;;  %v2130_v28 = vsel %vm1865_vm11, %v9172_v49, 0.0  ;;  %v3342_v8 = vadd.f32 %v16248_v25, %v16247_v56  ;;  %v3744_v51 = vadd.f32 %v2123_v63, %v2122_v46  ;;  %v16254_v46 = vld [vmem:[#allocation179_spill] sm:$0xff]  ;;  %v16262_v25 = vld [vmem:[#allocation188_spill] sm:$0xff] }
 0x28b   : > { %572 = vst.msk [vmem:[#allocation4 + $0x1b8] sm:$0xff] %vm388_vm4, %v15872_v9  ;;  %vm1867_vm1 = vcmp.eq.f32.partialorder %v16233_v39, %v7005_v15  ;;  %v2133_v50 = vsel %vm1868_vm2, %v9637_v57, 0.0 }
 0x28c   : > { %16230 = vst [vmem:[#allocation82_spill] sm:$0xff] %v10091_v4  ;;  %v2132_v56 = vsel %vm1867_vm1, %v9327_v36, 0.0 }
 0x28d   : > { %16231 = vst [vmem:[#allocation72_spill] sm:$0xff] %v10094_v30  ;;  %v16252_v30 = vld [vmem:[#allocation124_spill] sm:$0xff] }
 0x28e   : > { %573 = vst.msk [vmem:[#allocation4 + $0x1c0] sm:$0xff] %vm388_vm4, %v15872_v9  ;;  %3295 = vadd.xlane.f32.xlu1 %v16252_v30  ;;  %v16255_v30 = vld [vmem:[#allocation51_spill] sm:$0xff] }
 0x28f   : > { %574 = vst.msk [vmem:[#allocation4 + $0x1c8] sm:$0xff] %vm388_vm4, %v15872_v9  ;;  %vm1861_vm3 = vcmp.eq.f32.partialorder %v16255_v30, %v6992_v10  ;;  %vm1862_vm5 = vcmp.eq.f32.partialorder %v16255_v30, %v6994_v11  ;;  %vm1863_vm8 = vcmp.eq.f32.partialorder %v16255_v30, %v7005_v15  ;;  %vm1864_vm9 = vcmp.eq.f32.partialorder %v16255_v30, %v7019_v20 }
 0x290   : > { %575 = vst.msk [vmem:[#allocation4 + $0x1d0] sm:$0xff] %vm388_vm4, %v15872_v9 }
 0x291   : > { %576 = vst.msk [vmem:[#allocation4 + $0x1d8] sm:$0xff] %vm388_vm4, %v15872_v9 }
 0x292   : > { %577 = vst.msk [vmem:[#allocation4 + $0x1e0] sm:$0xff] %vm388_vm4, %v15872_v9 }
 0x293   : > { %16234 = vst [vmem:[#allocation73_spill] sm:$0xff] %v10152_v12  ;;  %v2345_v12 = vld [vmem:[#allocation2 + $0x78] sm:$0xff] }
 0x294   : > { %16235 = vst [vmem:[#allocation78_spill] sm:$0xff] %v10154_v45 }
 0x295   : > { %578 = vst.msk [vmem:[#allocation4 + $0x1e8] sm:$0xff] %vm388_vm4, %v15872_v9 }
 0x296   : > { %579 = vst.msk [vmem:[#allocation4 + $0x1f0] sm:$0xff] %vm388_vm4, %v15872_v9 }
 0x297   : > { %580 = vst.msk [vmem:[#allocation4 + $0x1f8] sm:$0xff] %vm388_vm4, %v15872_v9  ;;  %v2726_v9 = vadd.f32 %v10161_v13, %v2342_v54  ;;  %v16258_v54 = vld [vmem:[#allocation71_spill] sm:$0xff] }
 0x298   : > { %2779 = vst.msk [vmem:[#allocation2] sm:$0xff] %vm388_vm4, %v2714_v44  ;;  %v2117_v44 = vsel %vm1852_vm10, %v9637_v57, 0.0  ;;  %vm1869_vm6 = vcmp.eq.f32.partialorder %v16258_v54, %v6992_v10  ;;  %vm1870_vm7 = vcmp.eq.f32.partialorder %v16258_v54, %v6994_v11  ;;  %vm1871_vm10 = vcmp.eq.f32.partialorder %v16258_v54, %v7005_v15 }
 0x299   : > { %2782 = vst.msk [vmem:[#allocation2 + $0x18] sm:$0xff] %vm388_vm4, %v2717_v48  ;;  %v2724_v48 = vadd.f32 %v10064_v40, %v2340_v23  ;;  %v16245_v40 = vld [vmem:[#allocation126_spill] sm:$0xff]  ;;  %v2344_v23 = vld [vmem:[#allocation2 + $0x70] sm:$0xff]  ;;  %v10270_v42 = vadd.f32 %v3735_v5, %v2117_v44  ;;  %v2134_v39 = vsel %vm1869_vm6, %v9172_v49, 0.0  ;;  %vm1872_vm11 = vcmp.eq.f32.partialorder %v16258_v54, %v7019_v20 }
 0x29a   : > { %2783 = vst.msk [vmem:[#allocation2 + $0x20] sm:$0xff] %vm388_vm4, %v2718_v61  ;;  %v16243_v61 = vld [vmem:[#allocation156_spill] sm:$0xff]  ;;  %v10248_v18 = vmul.f32 %v16245_v40, %v7067_v34  ;;  %v2728_v44 = vadd.f32 %v2468_v53, %v2344_v23  ;;  %v2729_v53 = vadd.f32 %v2473_v3, %v2345_v12  ;;  %v2483_v23 = vpop.xlane.xlu2 %2482  ;;  %v2125_v12 = vsel %vm1860_vm15, %v9637_v57, 0.0  ;;  %v16282_v54 = vld [vmem:[#allocation182_spill] sm:$0xff] }
 0x29b   : > { %16241 = vst [vmem:[#allocation84_spill] sm:$0xff] %v10217_v58  ;;  %3275 = vadd.xlane.f32.xlu0 %v16243_v61  ;;  %v2346_v61 = vld [vmem:[#allocation2 + $0x80] sm:$0xff]  ;;  %v16250_v40 = vld [vmem:[#allocation164_spill] sm:$0xff]  ;;  %v16251_v58 = vld [vmem:[#allocation123_spill] sm:$0xff]  ;;  %v3745_v3 = vadd.f32 %v3744_v51, %v2124_v16  ;;  %v2126_v16 = vsel %vm1861_vm3, %v9172_v49, 0.0  ;;  %v2127_v51 = vsel %vm1862_vm5, %v9276_v21, 0.0 }
 0x29c   : > { %2781 = vst.msk [vmem:[#allocation2 + $0x10] sm:$0xff] %vm388_vm4, %v2716_v43  ;;  %v10244_v43 = vmul.f32 %v16244_v29, %v7065_v33  ;;  %v16249_v29 = vld [vmem:[#allocation163_spill] sm:$0xff]  ;;  %3285 = vadd.xlane.f32.xlu2 %v16251_v58  ;;  %v2730_v13 = vadd.f32 %v2478_v37, %v2346_v61  ;;  %v16259_v37 = vld [vmem:[#allocation181_spill] sm:$0xff]  ;;  %v2493_v61 = vpop.xlane.xlu1 %2492 }
 0x29d   : > { %2784 = vst.msk [vmem:[#allocation2 + $0x28] sm:$0xff] %vm388_vm4, %v2719_v31  ;;  %v10252_v31 = vmul.f32 %v16246_v24, %v7071_v35  ;;  %v3362_v24 = vadd.f32 %v16250_v40, %v16249_v29  ;;  %v2347_v58 = vld [vmem:[#allocation2 + $0x88] sm:$0xff]  ;;  %v2488_v29 = vpop.xlane.xlu0 %2487 }
 0x29e   : > { %2786 = vst.msk [vmem:[#allocation2 + $0x38] sm:$0xff] %vm388_vm4, %v2721_v55  ;;  %v2131_v55 = vsel %vm1866_vm0, %v9276_v21, 0.0 }
 0x29f   : > { %2785 = vst.msk [vmem:[#allocation2 + $0x30] sm:$0xff] %vm388_vm4, %v2720_v26  ;;  %v2727_v26 = vadd.f32 %v10159_v59, %v2343_v14  ;;  %v16253_v59 = vld [vmem:[#allocation144_spill] sm:$0xff]  ;;  %v3754_v5 = vadd.f32 %v2131_v55, %v2130_v28  ;;  %v16256_v14 = vld [vmem:[#allocation141_spill] sm:$0xff] }
 0x2a0   : > { %2787 = vst.msk [vmem:[#allocation2 + $0x40] sm:$0xff] %vm388_vm4, %v2722_v2  ;;  %v3343_v2 = vadd.f32 %v3342_v8, %v16253_v59  ;;  %v2348_v28 = vld [vmem:[#allocation2 + $0x90] sm:$0xff]  ;;  %v16261_v55 = vld [vmem:[#allocation165_spill] sm:$0xff]  ;;  %v16264_v59 = vld [vmem:[#allocation142_spill] sm:$0xff] }
 0x2a1   : > { %2789 = vst.msk [vmem:[#allocation2 + $0x50] sm:$0xff] %vm388_vm4, %v2724_v48  ;;  %v3363_v48 = vadd.f32 %v3362_v24, %v16254_v46  ;;  %v16263_v8 = vld [vmem:[#allocation189_spill] sm:$0xff]  ;;  %v2135_v24 = vsel %vm1870_vm7, %v9276_v21, 0.0 }
 0x2a2   : > { %2788 = vst.msk [vmem:[#allocation2 + $0x48] sm:$0xff] %vm388_vm4, %v2723_v19  ;;  %v10291_v63 = vadd.f32 %v3343_v2, %v16256_v14  ;;  %v2349_v19 = vld [vmem:[#allocation2 + $0x98] sm:$0xff]  ;;  %v10339_v2 = vmul.f32 %v16264_v59, %v7063_v32 }
 0x2a3   : > { %2790 = vst.msk [vmem:[#allocation2 + $0x58] sm:$0xff] %vm388_vm4, %v2725_v52  ;;  %v10299_v52 = vadd.f32 %v3363_v48, %v16259_v37  ;;  %3290 = vadd.xlane.f32.xlu0 %v16261_v55  ;;  %v2733_v40 = vadd.f32 %v2493_v61, %v2349_v19  ;;  %v2732_v48 = vadd.f32 %v2488_v29, %v2348_v28  ;;  %v16270_v19 = vld [vmem:[#allocation122_spill] sm:$0xff]  ;;  %v16271_v37 = vld [vmem:[#allocation129_spill] sm:$0xff] }
 0x2a4   : > { %16257 = vst [vmem:[#allocation92_spill] sm:$0xff] %v10291_v63  ;;  %3300 = vadd.xlane.f32.xlu2 %v16270_v19  ;;  %3310 = vadd.xlane.f32.xlu1 %v16271_v37  ;;  %v16272_v55 = vld [vmem:[#allocation190_spill] sm:$0xff]  ;;  %v10364_v28 = vadd.f32 %v3745_v3, %v2125_v12  ;;  %v16278_v12 = vld [vmem:[#allocation191_spill] sm:$0xff]  ;;  %v16280_v59 = vld [vmem:[#allocation173_spill] sm:$0xff]  ;;  %v2508_v37 = vpop.xlane.xlu1 %2507 }
 0x2a5   : > { %2792 = vst.msk [vmem:[#allocation2 + $0x68] sm:$0xff] %vm388_vm4, %v2727_v26  ;;  %v3377_v26 = vadd.f32 %v16263_v8, %v16262_v25  ;;  %v16273_v8 = vld [vmem:[#allocation154_spill] sm:$0xff] }
 0x2a6   : > { %16260 = vst [vmem:[#allocation16_spill] sm:$0xff] %v10299_v52  ;;  %v10356_v61 = vmul.f32 %v16273_v8, %v7071_v35  ;;  %v16310_v52 = vld [vmem:[#allocation177_spill] sm:$0xff] }
 0x2a7   : > { %2791 = vst.msk [vmem:[#allocation2 + $0x60] sm:$0xff] %vm388_vm4, %v2726_v9  ;;  %v2731_v9 = vadd.f32 %v2483_v23, %v2347_v58  ;;  %v16268_v58 = vld [vmem:[#allocation140_spill] sm:$0xff]  ;;  %v3749_v23 = vadd.f32 %v2127_v51, %v2126_v16  ;;  %v3378_v25 = vadd.f32 %v3377_v26, %v16272_v55  ;;  %v16275_v26 = vld [vmem:[#allocation157_spill] sm:$0xff]  ;;  %v2503_v55 = vpop.xlane.xlu0 %2502 }
 0x2a8   : > { %2793 = vst.msk [vmem:[#allocation2 + $0x70] sm:$0xff] %vm388_vm4, %v2728_v44  ;;  %v16266_v44 = vld [vmem:[#allocation137_spill] sm:$0xff]  ;;  %v10348_v14 = vmul.f32 %v16268_v58, %v7067_v34  ;;  %v2352_v16 = vld [vmem:[#allocation2 + $0xb0] sm:$0xff] }
 0x2a9   : > { %2795 = vst.msk [vmem:[#allocation2 + $0x80] sm:$0xff] %vm388_vm4, %v2730_v13  ;;  %v10343_v46 = vmul.f32 %v16266_v44, %v7065_v33  ;;  %v3755_v13 = vadd.f32 %v3754_v5, %v2132_v56  ;;  %v3759_v5 = vadd.f32 %v2135_v24, %v2134_v39  ;;  %v2128_v56 = vsel %vm1863_vm8, %v9327_v36, 0.0  ;;  %v2498_v39 = vpop.xlane.xlu2 %2497  ;;  %v2351_v24 = vld [vmem:[#allocation2 + $0xa8] sm:$0xff] }
 0x2aa   : > { %16265 = vst [vmem:[#allocation15_spill] sm:$0xff] %v10339_v2  ;;  %v10381_v3 = vadd.f32 %v3378_v25, %v16278_v12  ;;  %v2129_v44 = vsel %vm1864_vm9, %v9637_v57, 0.0  ;;  %v2137_v25 = vsel %vm1872_vm11, %v9637_v57, 0.0  ;;  %v2736_v30 = vadd.f32 %v2508_v37, %v2352_v16  ;;  %v16288_v12 = vld [vmem:[#allocation196_spill] sm:$0xff]  ;;  %v16292_v37 = vld [vmem:[#allocation166_spill] sm:$0xff] }
 0x2ab   : > { %16267 = vst [vmem:[#allocation94_spill] sm:$0xff] %v10343_v46  ;;  %v10374_v51 = vadd.f32 %v3755_v13, %v2133_v50  ;;  %3305 = vadd.xlane.f32.xlu0 %v16280_v59  ;;  %v3750_v50 = vadd.f32 %v3749_v23, %v2128_v56  ;;  %v16281_v13 = vld [vmem:[#allocation160_spill] sm:$0xff]  ;;  %v16284_v56 = vld [vmem:[#allocation183_spill] sm:$0xff]  ;;  %v2735_v16 = vadd.f32 %v2503_v55, %v2351_v24 }
 0x2ac   : > { %2794 = vst.msk [vmem:[#allocation2 + $0x78] sm:$0xff] %vm388_vm4, %v2729_v53  ;;  %v2350_v53 = vld [vmem:[#allocation2 + $0xa0] sm:$0xff]  ;;  %v16290_v59 = vld [vmem:[#allocation128_spill] sm:$0xff]  ;;  %v16295_v55 = vld [vmem:[#allocation203_spill] sm:$0xff] }
 0x2ad   : > { %16269 = vst [vmem:[#allocation95_spill] sm:$0xff] %v10348_v14  ;;  %v2734_v19 = vadd.f32 %v2498_v39, %v2350_v53  ;;  %v10424_v39 = vmul.f32 %v16288_v12, %v7071_v35  ;;  %3315 = vadd.xlane.f32.xlu2 %v16290_v59  ;;  %v16299_v12 = vld [vmem:[#allocation54_spill] sm:$0xff] }
 0x2ae   : > { %2796 = vst.msk [vmem:[#allocation2 + $0x88] sm:$0xff] %vm388_vm4, %v2731_v9  ;;  %v16276_v9 = vld [vmem:[#allocation159_spill] sm:$0xff]  ;;  %v10473_v59 = vmul.f32 %v16299_v12, %v7065_v33  ;;  %v16306_v12 = vld [vmem:[#allocation41_spill] sm:$0xff] }
 0x2af   : > { %16274 = vst [vmem:[#allocation89_spill] sm:$0xff] %v10356_v61  ;;  %v3352_v29 = vadd.f32 %v16276_v9, %v16275_v26  ;;  %v10415_v26 = vmul.f32 %v16284_v56, %v7065_v33  ;;  %v16286_v9 = vld [vmem:[#allocation186_spill] sm:$0xff]  ;;  %v2518_v4 = vpop.xlane.xlu0 %2517 }
 0x2b0   : > { %2798 = vst.msk [vmem:[#allocation2 + $0x98] sm:$0xff] %vm388_vm4, %v2733_v40  ;;  %v16277_v40 = vld [vmem:[#allocation17_spill] sm:$0xff] }
 0x2b1   : > { %2797 = vst.msk [vmem:[#allocation2 + $0x90] sm:$0xff] %vm388_vm4, %v2732_v48  ;;  %vm1877_vm12 = vcmp.eq.f32.partialorder %v16277_v40, %v6992_v10  ;;  %vm1878_vm13 = vcmp.eq.f32.partialorder %v16277_v40, %v6994_v11  ;;  %v2136_v48 = vsel %vm1871_vm10, %v9327_v36, 0.0  ;;  %v3353_v58 = vadd.f32 %v3352_v29, %v16281_v13 }
 0x2b2   : > { %16279 = vst [vmem:[#allocation85_spill] sm:$0xff] %v10381_v3  ;;  %v3760_v8 = vadd.f32 %v3759_v5, %v2136_v48  ;;  %vm1879_vm14 = vcmp.eq.f32.partialorder %v16277_v40, %v7005_v15  ;;  %vm1880_vm15 = vcmp.eq.f32.partialorder %v16277_v40, %v7019_v20  ;;  %v2142_v23 = vsel %vm1877_vm12, %v9172_v49, 0.0  ;;  %v16291_v48 = vld [vmem:[#allocation132_spill] sm:$0xff] }
 0x2b3   : > { %v2143_v53 = vsel %vm1878_vm13, %v9276_v21, 0.0  ;;  %v10411_v5 = vmul.f32 %v16282_v54, %v7063_v32  ;;  %16285 = vst [vmem:[#allocation83_spill] sm:$0xff] %v10415_v26  ;;  %v10419_v29 = vmul.f32 %v16286_v9, %v7067_v34  ;;  %3325 = vadd.xlane.f32.xlu1 %v16291_v48  ;;  %v10429_v13 = vadd.f32 %v3750_v50, %v2129_v44  ;;  %v16294_v50 = vld [vmem:[#allocation202_spill] sm:$0xff]  ;;  %v2353_v40 = vld [vmem:[#allocation2 + $0xb8] sm:$0xff]  ;;  %v16300_v48 = vld [vmem:[#allocation43_spill] sm:$0xff] }
 0x2b4   : > { %2799 = vst.msk [vmem:[#allocation2 + $0xa0] sm:$0xff] %vm388_vm4, %v2734_v19  ;;  %v10432_v54 = vadd.f32 %v3353_v58, %v16292_v37  ;;  %v10435_v56 = vadd.f32 %v3760_v8, %v2137_v25  ;;  %v10441_v24 = vsel %vm1879_vm14, %v9327_v36, 0.0  ;;  %v10447_v19 = vsel %vm1880_vm15, %v9637_v57, 0.0  ;;  %v16296_v8 = vld [vmem:[#allocation37_spill] sm:$0xff]  ;;  %v16297_v9 = vld [vmem:[#allocation42_spill] sm:$0xff]  ;;  %3320 = vadd.xlane.f32.xlu0 %v16310_v52 }
 0x2b5   : > { %16283 = vst [vmem:[#allocation86_spill] sm:$0xff] %v10411_v5  ;;  %v10449_v44 = vadd.f32 %v2143_v53, %v2142_v23  ;;  %v10453_v58 = vmul.f32 %v16294_v50, %v7063_v32  ;;  %v10457_v25 = vmul.f32 %v16295_v55, %v7065_v33  ;;  %v16298_v23 = vld [vmem:[#allocation44_spill] sm:$0xff]  ;;  %v10477_v37 = vmul.f32 %v16300_v48, %v7067_v34  ;;  %v16308_v48 = vld [vmem:[#allocation55_spill] sm:$0xff]  ;;  %v16317_v52 = vld [vmem:[#allocation22_spill] sm:$0xff] }
 0x2b6   : > { %16287 = vst [vmem:[#allocation90_spill] sm:$0xff] %v10419_v29  ;;  %v10469_v53 = vmul.f32 %v16298_v23, %v7063_v32  ;;  %v16301_v50 = vld [vmem:[#allocation48_spill] sm:$0xff]  ;;  %v10493_v5 = vmul.f32 %v16306_v12, %v7067_v34  ;;  %v10497_v3 = vmul.f32 %v16308_v48, %v7071_v35  ;;  %v16315_v48 = vld [vmem:[#allocation63_spill] sm:$0xff]  ;;  %v10518_v46 = vmul.f32 %v16317_v52, %v7063_v32  ;;  %v16331_v52 = vld [vmem:[#allocation210_spill] sm:$0xff] }
 0x2b7   : > { %16289 = vst [vmem:[#allocation88_spill] sm:$0xff] %v10424_v39  ;;  %v10481_v55 = vmul.f32 %v16301_v50, %v7071_v35  ;;  %v16302_v39 = vld [vmem:[#allocation40_spill] sm:$0xff]  ;;  %v2513_v50 = vpop.xlane.xlu2 %2512 }
 0x2b8   : > { %2801 = vst.msk [vmem:[#allocation2 + $0xb0] sm:$0xff] %vm388_vm4, %v2736_v30  ;;  %v10461_v30 = vmul.f32 %v16296_v8, %v7067_v34  ;;  %v2355_v8 = vld [vmem:[#allocation2 + $0xc8] sm:$0xff]  ;;  %v10485_v29 = vmul.f32 %v16302_v39, %v7063_v32  ;;  %v16304_v23 = vld [vmem:[#allocation56_spill] sm:$0xff]  ;;  %v2737_v12 = vadd.f32 %v2513_v50, %v2353_v40 }
 0x2b9   : > { %16293 = vst [vmem:[#allocation100_spill] sm:$0xff] %v10432_v54  ;;  %v10489_v26 = vmul.f32 %v16304_v23, %v7065_v33  ;;  %v16311_v54 = vld [vmem:[#allocation50_spill] sm:$0xff]  ;;  %v16312_v39 = vld [vmem:[#allocation52_spill] sm:$0xff]  ;;  %v16313_v23 = vld [vmem:[#allocation61_spill] sm:$0xff] }
 0x2ba   : > { %2800 = vst.msk [vmem:[#allocation2 + $0xa8] sm:$0xff] %vm388_vm4, %v2735_v16  ;;  %v10465_v16 = vmul.f32 %v16297_v9, %v7071_v35  ;;  %v2354_v9 = vld [vmem:[#allocation2 + $0xc0] sm:$0xff]  ;;  %v10502_v63 = vmul.f32 %v16311_v54, %v7063_v32  ;;  %v10506_v61 = vmul.f32 %v16312_v39, %v7065_v33  ;;  %v10510_v14 = vmul.f32 %v16313_v23, %v7067_v34  ;;  %v16319_v39 = vld [vmem:[#allocation204_spill] sm:$0xff]  ;;  %v16323_v40 = vld [vmem:[#allocation31_spill] sm:$0xff] }
 0x2bb   : > { %16303 = vst [vmem:[#allocation19_spill] sm:$0xff] %v10485_v29  ;;  %v2738_v2 = vadd.f32 %v2518_v4, %v2354_v9  ;;  %v16321_v23 = vld [vmem:[#allocation205_spill] sm:$0xff]  ;;  %v10530_v50 = vmul.f32 %v16323_v40, %v7071_v35  ;;  %v16327_v4 = vld [vmem:[#allocation207_spill] sm:$0xff] }
 0x2bc   : > { %16305 = vst [vmem:[#allocation96_spill] sm:$0xff] %v10489_v26  ;;  %v10522_v26 = vmul.f32 %v16319_v39, %v7065_v33  ;;  %v10526_v29 = vmul.f32 %v16321_v23, %v7067_v34  ;;  %v10547_v39 = vmul.f32 %v16331_v52, %v7071_v35  ;;  %v16333_v23 = vld [vmem:[#allocation74_spill] sm:$0xff]  ;;  %v16334_v40 = vld [vmem:[#allocation79_spill] sm:$0xff]  ;;  %3692 = vadd.xlane.f32.xlu0 %v9889_v0 }
 0x2bd   : > { %16307 = vst [vmem:[#allocation103_spill] sm:$0xff] %v10493_v5  ;;  %v2523_v5 = vpop.xlane.xlu1 %2522  ;;  %3687 = vadd.xlane.f32.xlu2 %v16333_v23  ;;  %3697 = vadd.xlane.f32.xlu1 %v16334_v40  ;;  %v16341_v52 = vld [vmem:[#allocation215_spill] sm:$0xff]  ;;  %v16345_v40 = vld [vmem:[#allocation217_spill] sm:$0xff]  ;;  %v16375_v0 = vld [vmem:[#allocation30_spill] sm:$0xff] }
 0x2be   : > { %16309 = vst [vmem:[#allocation104_spill] sm:$0xff] %v10497_v3  ;;  %v10514_v3 = vmul.f32 %v16315_v48, %v7071_v35  ;;  %v2739_v54 = vadd.f32 %v2523_v5, %v2355_v8  ;;  %v16325_v48 = vld [vmem:[#allocation206_spill] sm:$0xff]  ;;  %v10539_v5 = vmul.f32 %v16327_v4, %v7065_v33  ;;  %v16329_v8 = vld [vmem:[#allocation209_spill] sm:$0xff]  ;;  %v16337_v4 = vld [vmem:[#allocation212_spill] sm:$0xff]  ;;  %v10632_v45 = vmul.f32 %v16375_v0, %v7067_v34 }
 0x2bf   : > { %16314 = vst [vmem:[#allocation98_spill] sm:$0xff] %v10510_v14  ;;  %v10543_v9 = vmul.f32 %v16329_v8, %v7067_v34  ;;  %v16339_v8 = vld [vmem:[#allocation213_spill] sm:$0xff]  ;;  %v16383_v14 = vld [vmem:[#allocation230_spill] sm:$0xff] }
 0x2c0   : > { %16316 = vst [vmem:[#allocation99_spill] sm:$0xff] %v10514_v3  ;;  %v10534_v3 = vmul.f32 %v16325_v48, %v7063_v32  ;;  %v10647_v0 = vmul.f32 %v16383_v14, %v7065_v33  ;;  %v16392_v14 = vld [vmem:[#allocation68_spill] sm:$0xff] }
 0x2c1   : > { %16318 = vst [vmem:[#allocation101_spill] sm:$0xff] %v10518_v46  ;;  %v16356_v46 = vld [vmem:[#allocation146_spill] sm:$0xff]  ;;  %vm1873_vm0 = vcmp.eq.f32.partialorder %v16392_v14, %v6992_v10  ;;  %vm1874_vm1 = vcmp.eq.f32.partialorder %v16392_v14, %v6994_v11  ;;  %vm1875_vm7 = vcmp.eq.f32.partialorder %v16392_v14, %v7005_v15  ;;  %vm1876_vm8 = vcmp.eq.f32.partialorder %v16392_v14, %v7019_v20 }
 0x2c2   : > { %16320 = vst [vmem:[#allocation97_spill] sm:$0xff] %v10522_v26  ;;  %v10566_v26 = vmul.f32 %v16341_v52, %v7071_v35  ;;  %v2356_v52 = vld [vmem:[#allocation2 + $0xd0] sm:$0xff] }
 0x2c3   : > { %16322 = vst [vmem:[#allocation18_spill] sm:$0xff] %v10526_v29  ;;  %v10562_v29 = vmul.f32 %v16339_v8, %v7067_v34  ;;  %v16349_v8 = vld [vmem:[#allocation32_spill] sm:$0xff] }
 0x2c4   : > { %16324 = vst [vmem:[#allocation113_spill] sm:$0xff] %v10530_v50  ;;  %v10558_v50 = vmul.f32 %v16337_v4, %v7065_v33  ;;  %v16347_v4 = vld [vmem:[#allocation219_spill] sm:$0xff] }
 0x2c5   : > { %16326 = vst [vmem:[#allocation114_spill] sm:$0xff] %v10534_v3  ;;  %3702 = vadd.xlane.f32.xlu2 %v9918_v27 }
 0x2c6   : > { %2802 = vst.msk [vmem:[#allocation2 + $0xb8] sm:$0xff] %vm388_vm4, %v2737_v12  ;;  %v16335_v12 = vld [vmem:[#allocation211_spill] sm:$0xff] }
 0x2c7   : > { %16328 = vst [vmem:[#allocation11_spill] sm:$0xff] %v10539_v5  ;;  %v10554_v48 = vmul.f32 %v16335_v12, %v7063_v32  ;;  %v10575_v12 = vmul.f32 %v16345_v40, %v7065_v33  ;;  %v2357_v40 = vld [vmem:[#allocation2 + $0xd8] sm:$0xff] }
 0x2c8   : > { %16330 = vst [vmem:[#allocation109_spill] sm:$0xff] %v10543_v9  ;;  %v16361_v5 = vld [vmem:[#allocation220_spill] sm:$0xff] }
 0x2c9   : > { %16332 = vst [vmem:[#allocation107_spill] sm:$0xff] %v10547_v39 }
 0x2ca   : > { %2804 = vst.msk [vmem:[#allocation2 + $0xc8] sm:$0xff] %vm388_vm4, %v2739_v54  ;;  %v16343_v54 = vld [vmem:[#allocation216_spill] sm:$0xff] }
 0x2cb   : > { %16336 = vst [vmem:[#allocation10_spill] sm:$0xff] %v10554_v48  ;;  %v10571_v23 = vmul.f32 %v16343_v54, %v7063_v32  ;;  %v16353_v54 = vld [vmem:[#allocation26_spill] sm:$0xff] }
 0x2cc   : > { %16338 = vst [vmem:[#allocation110_spill] sm:$0xff] %v10558_v50  ;;  %v10579_v50 = vmul.f32 %v16347_v4, %v7067_v34  ;;  %v10591_v48 = vmul.f32 %v16353_v54, %v7065_v33  ;;  %v16357_v4 = vld [vmem:[#allocation169_spill] sm:$0xff] }
 0x2cd   : > { %16340 = vst [vmem:[#allocation108_spill] sm:$0xff] %v10562_v29  ;;  %v10583_v29 = vmul.f32 %v16349_v8, %v7071_v35  ;;  %v16359_v8 = vld [vmem:[#allocation34_spill] sm:$0xff]  ;;  %3717 = vadd.xlane.f32.xlu2 %v10100_v22 }
 0x2ce   : > { %16342 = vst [vmem:[#allocation116_spill] sm:$0xff] %v10566_v26  ;;  %v16351_v26 = vld [vmem:[#allocation214_spill] sm:$0xff] }
 0x2cf   : > { %2803 = vst.msk [vmem:[#allocation2 + $0xc0] sm:$0xff] %vm388_vm4, %v2738_v2  ;;  %v10587_v2 = vmul.f32 %v16351_v26, %v7063_v32  ;;  %v10603_v26 = vmul.f32 %v16361_v5, %v7071_v35  ;;  %v16371_v5 = vld [vmem:[#allocation29_spill] sm:$0xff] }
 0x2d0   : > { %16344 = vst [vmem:[#allocation12_spill] sm:$0xff] %v10571_v23  ;;  %v2358_v23 = vld [vmem:[#allocation2 + $0xe0] sm:$0xff] }
 0x2d1   : > { %16346 = vst [vmem:[#allocation117_spill] sm:$0xff] %v10575_v12  ;;  %v16355_v12 = vld [vmem:[#allocation148_spill] sm:$0xff] }
 0x2d2   : > { %16348 = vst [vmem:[#allocation24_spill] sm:$0xff] %v10579_v50  ;;  %v3357_v39 = vadd.f32 %v16356_v46, %v16355_v12  ;;  %v16358_v50 = vld [vmem:[#allocation170_spill] sm:$0xff]  ;;  %v2528_v46 = vpop.xlane.xlu2 %2527 }
 0x2d3   : > { %16350 = vst [vmem:[#allocation23_spill] sm:$0xff] %v10583_v29  ;;  %v3367_v9 = vadd.f32 %v16358_v50, %v16357_v4  ;;  %v10599_v29 = vmul.f32 %v16359_v8, %v7067_v34  ;;  %v16367_v50 = vld [vmem:[#allocation224_spill] sm:$0xff]  ;;  %v16369_v4 = vld [vmem:[#allocation225_spill] sm:$0xff] }
 0x2d4   : > { %16352 = vst [vmem:[#allocation13_spill] sm:$0xff] %v10587_v2  ;;  %v16363_v2 = vld [vmem:[#allocation221_spill] sm:$0xff]  ;;  %v10616_v12 = vmul.f32 %v16367_v50, %v7067_v34  ;;  %v10620_v8 = vmul.f32 %v16369_v4, %v7071_v35 }
 0x2d5   : > { %16354 = vst [vmem:[#allocation35_spill] sm:$0xff] %v10591_v48  ;;  %v10607_v54 = vmul.f32 %v16363_v2, %v7063_v32  ;;  %v16365_v48 = vld [vmem:[#allocation222_spill] sm:$0xff]  ;;  %v2740_v2 = vadd.f32 %v2528_v46, %v2356_v52  ;;  %v16377_v4 = vld [vmem:[#allocation229_spill] sm:$0xff]  ;;  %v16381_v52 = vld [vmem:[#allocation147_spill] sm:$0xff]  ;;  %3732 = vadd.xlane.f32.xlu2 %v10202_v17 }
 0x2d6   : > { %16360 = vst [vmem:[#allocation33_spill] sm:$0xff] %v10599_v29  ;;  %v10611_v3 = vmul.f32 %v16365_v48, %v7065_v33  ;;  %v2533_v29 = vpop.xlane.xlu0 %2532  ;;  %v16373_v48 = vld [vmem:[#allocation226_spill] sm:$0xff]  ;;  %v3358_v46 = vadd.f32 %v3357_v39, %v16381_v52  ;;  %v16394_v52 = vld [vmem:[#allocation187_spill] sm:$0xff]  ;;  %v16431_v17 = vld [vmem:[#allocation25_spill] sm:$0xff] }
 0x2d7   : > { %16362 = vst [vmem:[#allocation14_spill] sm:$0xff] %v10603_v26  ;;  %v10624_v26 = vmul.f32 %v16371_v5, %v7063_v32  ;;  %v16379_v5 = vld [vmem:[#allocation227_spill] sm:$0xff] }
 0x2d8   : > { %16364 = vst [vmem:[#allocation176_spill] sm:$0xff] %v10607_v54  ;;  %v2538_v54 = vpop.xlane.xlu1 %2537 }
 0x2d9   : > { %16366 = vst [vmem:[#allocation119_spill] sm:$0xff] %v10611_v3  ;;  %v10628_v3 = vmul.f32 %v16373_v48, %v7065_v33  ;;  %v2742_v50 = vadd.f32 %v2538_v54, %v2358_v23  ;;  %v16382_v48 = vld [vmem:[#allocation175_spill] sm:$0xff] }
 0x2da   : > { %16368 = vst [vmem:[#allocation53_spill] sm:$0xff] %v10616_v12  ;;  %v2741_v12 = vadd.f32 %v2533_v29, %v2357_v40  ;;  %v16385_v29 = vld [vmem:[#allocation45_spill] sm:$0xff]  ;;  %v16387_v40 = vld [vmem:[#allocation231_spill] sm:$0xff] }
 0x2db   : > { %16370 = vst [vmem:[#allocation149_spill] sm:$0xff] %v10620_v8  ;;  %v10636_v8 = vmul.f32 %v16377_v4, %v7071_v35  ;;  %v10651_v23 = vmul.f32 %v16385_v29, %v7067_v34  ;;  %v10655_v54 = vmul.f32 %v16387_v40, %v7071_v35  ;;  %v16393_v4 = vld [vmem:[#allocation151_spill] sm:$0xff]  ;;  %v16398_v29 = vld [vmem:[#allocation232_spill] sm:$0xff] }
 0x2dc   : > { %16372 = vst [vmem:[#allocation139_spill] sm:$0xff] %v10624_v26  ;;  %v10640_v26 = vmul.f32 %v16379_v5, %v7063_v32  ;;  %v10668_v5 = vadd.f32 %v3358_v46, %v16393_v4  ;;  %v10679_v40 = vmul.f32 %v16398_v29, %v7067_v34  ;;  %v16402_v46 = vld [vmem:[#allocation62_spill] sm:$0xff]  ;;  %v16404_v4 = vld [vmem:[#allocation233_spill] sm:$0xff] }
 0x2dd   : > { %16374 = vst [vmem:[#allocation130_spill] sm:$0xff] %v10628_v3  ;;  %v3368_v3 = vadd.f32 %v3367_v9, %v16382_v48  ;;  %v16390_v9 = vld [vmem:[#allocation46_spill] sm:$0xff]  ;;  %3747 = vadd.xlane.f32.xlu2 %v10364_v28  ;;  %v2368_v28 = vld [vmem:[#allocation2 + $0x130] sm:$0xff] }
 0x2de   : > { %16376 = vst [vmem:[#allocation156_spill] sm:$0xff] %v10632_v45  ;;  %v10662_v39 = vmul.f32 %v16390_v9, %v7063_v32  ;;  %v2359_v9 = vld [vmem:[#allocation2 + $0xe8] sm:$0xff]  ;;  %v3770_v45 = vadd.f32 %v10449_v44, %v10441_v24  ;;  %v16421_v44 = vld [vmem:[#allocation60_spill] sm:$0xff] }
 0x2df   : > { %16378 = vst [vmem:[#allocation125_spill] sm:$0xff] %v10636_v8  ;;  %v10671_v48 = vadd.f32 %v3368_v3, %v16394_v52  ;;  %v10689_v3 = vmul.f32 %v16402_v46, %v7063_v32  ;;  %v10693_v52 = vmul.f32 %v16404_v4, %v7065_v33  ;;  %v2543_v46 = vpop.xlane.xlu2 %2542  ;;  %v2138_v4 = vsel %vm1873_vm0, %v9172_v49, 0.0 }
 0x2e0   : > { %16380 = vst [vmem:[#allocation126_spill] sm:$0xff] %v10640_v26  ;;  %v16419_v26 = vld [vmem:[#allocation69_spill] sm:$0xff] }
 0x2e1   : > { %2805 = vst.msk [vmem:[#allocation2 + $0xd0] sm:$0xff] %vm388_vm4, %v2740_v2  ;;  %v16389_v2 = vld [vmem:[#allocation80_spill] sm:$0xff]  ;;  %v10734_v8 = vmul.f32 %v16419_v26, %v7071_v35 }
 0x2e2   : > { %16384 = vst [vmem:[#allocation133_spill] sm:$0xff] %v10647_v0  ;;  %3712 = vadd.xlane.f32.xlu1 %v16389_v2  ;;  %v16400_v2 = vld [vmem:[#allocation57_spill] sm:$0xff] }
 0x2e3   : > { %16386 = vst [vmem:[#allocation135_spill] sm:$0xff] %v10651_v23  ;;  %v16412_v23 = vld [vmem:[#allocation81_spill] sm:$0xff] }
 0x2e4   : > { %16388 = vst [vmem:[#allocation136_spill] sm:$0xff] %v10655_v54  ;;  %3707 = vadd.xlane.f32.xlu0 %v16412_v23  ;;  %v16414_v23 = vld [vmem:[#allocation20_spill] sm:$0xff] }
 0x2e5   : > { %2807 = vst.msk [vmem:[#allocation2 + $0xe0] sm:$0xff] %vm388_vm4, %v2742_v50  ;;  %v16396_v50 = vld [vmem:[#allocation47_spill] sm:$0xff]  ;;  %vm1889_vm5 = vcmp.eq.f32.partialorder %v16414_v23, %v6992_v10  ;;  %vm1890_vm6 = vcmp.eq.f32.partialorder %v16414_v23, %v6994_v11  ;;  %vm1891_vm12 = vcmp.eq.f32.partialorder %v16414_v23, %v7005_v15  ;;  %vm1892_vm14 = vcmp.eq.f32.partialorder %v16414_v23, %v7019_v20 }
 0x2e6   : > { %16391 = vst [vmem:[#allocation163_spill] sm:$0xff] %v10662_v39  ;;  %v10675_v27 = vmul.f32 %v16396_v50, %v7065_v33  ;;  %v16406_v50 = vld [vmem:[#allocation67_spill] sm:$0xff]  ;;  %v16410_v39 = vld [vmem:[#allocation65_spill] sm:$0xff]  ;;  %v2155_v24 = vsel %vm1890_vm6, %v9276_v21, 0.0  ;;  %3762 = vadd.xlane.f32.xlu2 %v10435_v56 }
 0x2e7   : > { %2806 = vst.msk [vmem:[#allocation2 + $0xd8] sm:$0xff] %vm388_vm4, %v2741_v12  ;;  %v10683_v12 = vmul.f32 %v16400_v2, %v7071_v35  ;;  %v10697_v29 = vmul.f32 %v16406_v50, %v7067_v34  ;;  %v10705_v54 = vmul.f32 %v16410_v39, %v7063_v32  ;;  %v16413_v50 = vld [vmem:[#allocation91_spill] sm:$0xff]  ;;  %v2139_v39 = vsel %vm1874_vm1, %v9276_v21, 0.0 }
 0x2e8   : > { %16395 = vst [vmem:[#allocation164_spill] sm:$0xff] %v10671_v48  ;;  %vm1881_vm2 = vcmp.eq.f32.partialorder %v16413_v50, %v6992_v10  ;;  %vm1882_vm3 = vcmp.eq.f32.partialorder %v16413_v50, %v6994_v11  ;;  %v3764_v26 = vadd.f32 %v2139_v39, %v2138_v4  ;;  %vm1883_vm9 = vcmp.eq.f32.partialorder %v16413_v50, %v7005_v15 }
 0x2e9   : > { %16397 = vst [vmem:[#allocation123_spill] sm:$0xff] %v10675_v27  ;;  %v2360_v27 = vld [vmem:[#allocation2 + $0xf0] sm:$0xff]  ;;  %v2146_v48 = vsel %vm1881_vm2, %v9172_v49, 0.0  ;;  %v2140_v39 = vsel %vm1875_vm7, %v9327_v36, 0.0  ;;  %vm1884_vm13 = vcmp.eq.f32.partialorder %v16413_v50, %v7019_v20 }
 0x2ea   : > { %16399 = vst [vmem:[#allocation124_spill] sm:$0xff] %v10679_v40  ;;  %v16408_v40 = vld [vmem:[#allocation234_spill] sm:$0xff]  ;;  %3727 = vadd.xlane.f32.xlu1 %v10080_v60 }
 0x2eb   : > { %16401 = vst [vmem:[#allocation144_spill] sm:$0xff] %v10683_v12  ;;  %v10701_v2 = vmul.f32 %v16408_v40, %v7071_v35  ;;  %v2361_v12 = vld [vmem:[#allocation2 + $0xf8] sm:$0xff]  ;;  %v2743_v40 = vadd.f32 %v2543_v46, %v2359_v9  ;;  %v16423_v60 = vld [vmem:[#allocation70_spill] sm:$0xff] }
 0x2ec   : > { %16403 = vst [vmem:[#allocation179_spill] sm:$0xff] %v10689_v3  ;;  %v16417_v3 = vld [vmem:[#allocation59_spill] sm:$0xff]  ;;  %v10760_v22 = vmul.f32 %v16423_v60, %v7065_v33  ;;  %3722 = vadd.xlane.f32.xlu0 %v10127_v41 }
 0x2ed   : > { %16405 = vst [vmem:[#allocation51_spill] sm:$0xff] %v10693_v52  ;;  %v10730_v9 = vmul.f32 %v16417_v3, %v7067_v34  ;;  %v16425_v3 = vld [vmem:[#allocation75_spill] sm:$0xff] }
 0x2ee   : > { %16407 = vst [vmem:[#allocation141_spill] sm:$0xff] %v10697_v29  ;;  %v2548_v29 = vpop.xlane.xlu0 %2547 }
 0x2ef   : > { %16409 = vst [vmem:[#allocation71_spill] sm:$0xff] %v10701_v2  ;;  %v2553_v2 = vpop.xlane.xlu1 %2552  ;;  %v2744_v0 = vadd.f32 %v2548_v29, %v2360_v27  ;;  %v2154_v27 = vsel %vm1889_vm5, %v9172_v49, 0.0  ;;  %v10764_v29 = vmul.f32 %v16425_v3, %v7067_v34  ;;  %vm1902_vm5 = vcmp.eq.f32.partialorder %v16431_v17, %v6994_v11 }
 0x2f0   : > { %16411 = vst [vmem:[#allocation181_spill] sm:$0xff] %v10705_v54  ;;  %v16415_v54 = vld [vmem:[#allocation235_spill] sm:$0xff]  ;;  %v2745_v46 = vadd.f32 %v2553_v2, %v2361_v12  ;;  %v10756_v12 = vmul.f32 %v16421_v44, %v7063_v32  ;;  %v2362_v2 = vld [vmem:[#allocation2 + $0x100] sm:$0xff]  ;;  %v3765_v44 = vadd.f32 %v3764_v26, %v2140_v39 }
 0x2f1   : > { %v10726_v52 = vmul.f32 %v16415_v54, %v7065_v33  ;;  %16418 = vst [vmem:[#allocation188_spill] sm:$0xff] %v10730_v9  ;;  %v2147_v54 = vsel %vm1882_vm3, %v9276_v21, 0.0  ;;  %v16427_v32 = vld [vmem:[#allocation87_spill] sm:$0xff]  ;;  %v16428_v33 = vld [vmem:[#allocation77_spill] sm:$0xff]  ;;  %vm1901_vm3 = vcmp.eq.f32.partialorder %v16431_v17, %v6992_v10 }
 0x2f2   : > { %16420 = vst [vmem:[#allocation189_spill] sm:$0xff] %v10734_v8  ;;  %v3774_v4 = vadd.f32 %v2147_v54, %v2146_v48  ;;  %vm1885_vm10 = vcmp.eq.f32.partialorder %v16427_v32, %v6992_v10  ;;  %vm1886_vm11 = vcmp.eq.f32.partialorder %v16427_v32, %v6994_v11  ;;  %v10777_v34 = vmul.f32 %v16428_v33, %v7071_v35  ;;  %v16430_v39 = vld [vmem:[#allocation105_spill] sm:$0xff] }
 0x2f3   : > { %16416 = vst [vmem:[#allocation165_spill] sm:$0xff] %v10726_v52  ;;  %v3784_v48 = vadd.f32 %v2155_v24, %v2154_v27  ;;  %v10787_v54 = vadd.f32 %v3770_v45, %v10447_v19  ;;  %v2141_v35 = vsel %vm1876_vm8, %v9637_v57, 0.0  ;;  %v2148_v27 = vsel %vm1883_vm9, %v9327_v36, 0.0  ;;  %3742 = vadd.xlane.f32.xlu1 %v10163_v1  ;;  %v2365_v1 = vld [vmem:[#allocation2 + $0x118] sm:$0xff] }
 0x2f4   : > { %2808 = vst.msk [vmem:[#allocation2 + $0xe8] sm:$0xff] %vm388_vm4, %v2743_v40  ;;  %v2364_v40 = vld [vmem:[#allocation2 + $0x110] sm:$0xff]  ;;  %v2150_v41 = vsel %vm1885_vm10, %v9172_v49, 0.0  ;;  %v2151_v45 = vsel %vm1886_vm11, %v9276_v21, 0.0  ;;  %v3775_v24 = vadd.f32 %v3774_v4, %v2148_v27  ;;  %vm1893_vm15 = vcmp.eq.f32.partialorder %v16430_v39, %v6992_v10  ;;  %3737 = vadd.xlane.f32.xlu0 %v10270_v42  ;;  %v16432_v42 = vld [vmem:[#allocation102_spill] sm:$0xff] }
 0x2f5   : > { %2810 = vst.msk [vmem:[#allocation2 + $0xf8] sm:$0xff] %vm388_vm4, %v2745_v46  ;;  %v2558_v46 = vpop.xlane.xlu2 %2557  ;;  %vm1894_vm0 = vcmp.eq.f32.partialorder %v16430_v39, %v6994_v11  ;;  %vm1887_vm1 = vcmp.eq.f32.partialorder %v16427_v32, %v7005_v15  ;;  %vm1888_vm2 = vcmp.eq.f32.partialorder %v16427_v32, %v7019_v20  ;;  %v3779_v4 = vadd.f32 %v2151_v45, %v2150_v41 }
 0x2f6   : > { %16422 = vst [vmem:[#allocation142_spill] sm:$0xff] %v10756_v12  ;;  %v2746_v60 = vadd.f32 %v2558_v46, %v2362_v2  ;;  %v2563_v14 = vpop.xlane.xlu0 %2562  ;;  %v2156_v2 = vsel %vm1891_vm12, %v9327_v36, 0.0  ;;  %v2157_v46 = vsel %vm1892_vm14, %v9637_v57, 0.0  ;;  %v2158_v50 = vsel %vm1893_vm15, %v9172_v49, 0.0 }
 0x2f7   : > { %16424 = vst [vmem:[#allocation137_spill] sm:$0xff] %v10760_v22  ;;  %v2568_v3 = vpop.xlane.xlu1 %2567  ;;  %v3785_v33 = vadd.f32 %v3784_v48, %v2156_v2  ;;  %v2152_v23 = vsel %vm1887_vm1, %v9327_v36, 0.0  ;;  %vm1895_vm6 = vcmp.eq.f32.partialorder %v16430_v39, %v7005_v15  ;;  %vm1896_vm7 = vcmp.eq.f32.partialorder %v16430_v39, %v7019_v20 }
 0x2f8   : > { %16426 = vst [vmem:[#allocation140_spill] sm:$0xff] %v10764_v29  ;;  %v2748_v19 = vadd.f32 %v2568_v3, %v2364_v40  ;;  %v10823_v40 = vadd.f32 %v3765_v44, %v2141_v35  ;;  %v2159_v35 = vsel %vm1894_vm0, %v9276_v21, 0.0  ;;  %v2367_v44 = vld [vmem:[#allocation2 + $0x128] sm:$0xff]  ;;  %v3780_v41 = vadd.f32 %v3779_v4, %v2152_v23 }
 0x2f9   : > { %2809 = vst.msk [vmem:[#allocation2 + $0xf0] sm:$0xff] %vm388_vm4, %v2744_v0  ;;  %v2363_v0 = vld [vmem:[#allocation2 + $0x108] sm:$0xff]  ;;  %v10847_v3 = vadd.f32 %v3785_v33, %v2157_v46  ;;  %v2166_v45 = vsel %vm1901_vm3, %v9172_v49, 0.0  ;;  %v2167_v32 = vsel %vm1902_vm5, %v9276_v21, 0.0  ;;  %v3789_v2 = vadd.f32 %v2159_v35, %v2158_v50  ;;  %v16434_v50 = vld [vmem:[#allocation168_spill] sm:$0xff] }
 0x2fa   : > { %16429 = vst [vmem:[#allocation122_spill] sm:$0xff] %v10777_v34  ;;  %v2747_v26 = vadd.f32 %v2563_v14, %v2363_v0  ;;  %v2149_v0 = vsel %vm1884_vm13, %v9637_v57, 0.0  ;;  %v2153_v14 = vsel %vm1888_vm2, %v9637_v57, 0.0  ;;  %vm1897_vm8 = vcmp.eq.f32.partialorder %v16432_v42, %v6992_v10  ;;  %v16433_v46 = vld [vmem:[#allocation167_spill] sm:$0xff]  ;;  %v16466_v29 = vld [vmem:[#allocation82_spill] sm:$0xff] }
 0x2fb   : > { %2811 = vst.msk [vmem:[#allocation2 + $0x100] sm:$0xff] %vm388_vm4, %v2746_v60  ;;  %v10833_v48 = vadd.f32 %v3775_v24, %v2149_v0  ;;  %v2366_v60 = vld [vmem:[#allocation2 + $0x120] sm:$0xff]  ;;  %vm1898_vm9 = vcmp.eq.f32.partialorder %v16432_v42, %v6994_v11  ;;  %v2160_v4 = vsel %vm1895_vm6, %v9327_v36, 0.0  ;;  %vm1903_vm10 = vcmp.eq.f32.partialorder %v16431_v17, %v7005_v15  ;;  %3757 = vadd.xlane.f32.xlu1 %v10374_v51 }
 0x2fc   : > { %2813 = vst.msk [vmem:[#allocation2 + $0x110] sm:$0xff] %vm388_vm4, %v2748_v19  ;;  %v2161_v0 = vsel %vm1896_vm7, %v9637_v57, 0.0  ;;  %vm1904_vm11 = vcmp.eq.f32.partialorder %v16431_v17, %v7019_v20  ;;  %v3372_v35 = vadd.f32 %v16434_v50, %v16433_v46  ;;  %v2163_v23 = vsel %vm1898_vm9, %v9276_v21, 0.0  ;;  %3752 = vadd.xlane.f32.xlu0 %v10429_v13 }
 0x2fd   : > { %2812 = vst.msk [vmem:[#allocation2 + $0x108] sm:$0xff] %vm388_vm4, %v2747_v26  ;;  %v2573_v27 = vpop.xlane.xlu2 %2572  ;;  %v2169_v51 = vsel %vm1904_vm11, %v9637_v57, 0.0  ;;  %vm1899_vm0 = vcmp.eq.f32.partialorder %v16432_v42, %v7005_v15  ;;  %vm1900_vm1 = vcmp.eq.f32.partialorder %v16432_v42, %v7019_v20  ;;  %3777 = vadd.xlane.f32.xlu2 %v10833_v48  ;;  %v3392_v48 = vadd.f32 %v10177_v7, %v10173_v38 }
 0x2fe   : > { %v2749_v19 = vadd.f32 %v2573_v27, %v2365_v1  ;;  %v2578_v24 = vpop.xlane.xlu0 %2577  ;;  %v3799_v1 = vadd.f32 %v2167_v32, %v2166_v45  ;;  %v16435_v27 = vld [vmem:[#allocation197_spill] sm:$0xff]  ;;  %v3790_v45 = vadd.f32 %v3789_v2, %v2160_v4  ;;  %v2168_v32 = vsel %vm1903_vm10, %v9327_v36, 0.0 }
 0x2ff   : > { %v2583_v26 = vpop.xlane.xlu1 %2582  ;;  %v2750_v39 = vadd.f32 %v2578_v24, %v2366_v60  ;;  %v2162_v60 = vsel %vm1897_vm8, %v9172_v49, 0.0  ;;  %v16437_v24 = vld [vmem:[#allocation112_spill] sm:$0xff]  ;;  %v3393_v7 = vadd.f32 %v3392_v48, %v10186_v47  ;;  %v16451_v48 = vld [vmem:[#allocation131_spill] sm:$0xff] }
 0x300   : > { %v2751_v33 = vadd.f32 %v2583_v26, %v2367_v44  ;;  %2814 = vst.msk [vmem:[#allocation2 + $0x118] sm:$0xff] %vm388_vm4, %v2749_v19  ;;  %v10886_v44 = vadd.f32 %v3780_v41, %v2153_v14  ;;  %v16436_v19 = vld [vmem:[#allocation198_spill] sm:$0xff]  ;;  %vm1905_vm12 = vcmp.eq.f32.partialorder %v16437_v24, %v6992_v10  ;;  %vm1906_vm13 = vcmp.eq.f32.partialorder %v16437_v24, %v6994_v11  ;;  %v16438_v14 = vld [vmem:[#allocation39_spill] sm:$0xff]  ;;  %v16439_v41 = vld [vmem:[#allocation184_spill] sm:$0xff] }
 0x301   : > { %v3382_v26 = vadd.f32 %v16436_v19, %v16435_v27  ;;  %2815 = vst.msk [vmem:[#allocation2 + $0x120] sm:$0xff] %vm388_vm4, %v2750_v39  ;;  %vm1913_vm14 = vcmp.eq.f32.partialorder %v16438_v14, %v6992_v10  ;;  %vm1914_vm15 = vcmp.eq.f32.partialorder %v16438_v14, %v6994_v11  ;;  %v3373_v2 = vadd.f32 %v3372_v35, %v16439_v41  ;;  %v2369_v39 = vld [vmem:[#allocation2 + $0x138] sm:$0xff]  ;;  %v16441_v35 = vld [vmem:[#allocation199_spill] sm:$0xff] }
 0x302   : > { %2816 = vst.msk [vmem:[#allocation2 + $0x128] sm:$0xff] %vm388_vm4, %v2751_v33  ;;  %v2370_v33 = vld [vmem:[#allocation2 + $0x140] sm:$0xff]  ;;  %v3800_v4 = vadd.f32 %v3799_v1, %v2168_v32  ;;  %v3794_v46 = vadd.f32 %v2163_v23, %v2162_v60  ;;  %v2170_v50 = vsel %vm1905_vm12, %v9172_v49, 0.0  ;;  %v2171_v27 = vsel %vm1906_vm13, %v9276_v21, 0.0  ;;  %v16442_v23 = vld [vmem:[#allocation111_spill] sm:$0xff] }
 0x303   : > { %v16440_v19 = vld [vmem:[#allocation185_spill] sm:$0xff]  ;;  %v3383_v41 = vadd.f32 %v3382_v26, %v16441_v35  ;;  %v2178_v60 = vsel %vm1913_vm14, %v9172_v49, 0.0  ;;  %v2179_v13 = vsel %vm1914_vm15, %v9276_v21, 0.0  ;;  %vm1909_vm2 = vcmp.eq.f32.partialorder %v16442_v23, %v6992_v10  ;;  %3772 = vadd.xlane.f32.xlu1 %v10787_v54 }
 0x304   : > { %v10915_v34 = vadd.f32 %v3373_v2, %v16440_v19  ;;  %vm1910_vm3 = vcmp.eq.f32.partialorder %v16442_v23, %v6994_v11  ;;  %v16443_v26 = vld [vmem:[#allocation201_spill] sm:$0xff]  ;;  %v2164_v35 = vsel %vm1899_vm0, %v9327_v36, 0.0  ;;  %vm1907_vm5 = vcmp.eq.f32.partialorder %v16437_v24, %v7005_v15  ;;  %3767 = vadd.xlane.f32.xlu0 %v10823_v40  ;;  %v16445_v40 = vld [vmem:[#allocation58_spill] sm:$0xff] }
 0x305   : > { %v2588_v17 = vpop.xlane.xlu2 %2587  ;;  %vm1908_vm6 = vcmp.eq.f32.partialorder %v16437_v24, %v7019_v20  ;;  %vm1915_vm7 = vcmp.eq.f32.partialorder %v16438_v14, %v7005_v15  ;;  %v2174_v56 = vsel %vm1909_vm2, %v9172_v49, 0.0  ;;  %v2175_v54 = vsel %vm1910_vm3, %v9276_v21, 0.0 }
 0x306   : > { %v2752_v1 = vadd.f32 %v2588_v17, %v2368_v28  ;;  %v2593_v8 = vpop.xlane.xlu0 %2592  ;;  %v10931_v28 = vadd.f32 %v3383_v41, %v16443_v26  ;;  %v10934_v17 = vadd.f32 %v3790_v45, %v2161_v0  ;;  %v2165_v0 = vsel %vm1900_vm1, %v9637_v57, 0.0  ;;  %v16444_v45 = vld [vmem:[#allocation120_spill] sm:$0xff] }
 0x307   : > { %v2598_v32 = vpop.xlane.xlu1 %2597  ;;  %v2753_v19 = vadd.f32 %v2593_v8, %v2369_v39  ;;  %v3814_v8 = vadd.f32 %v2179_v13, %v2178_v60  ;;  %vm1917_vm8 = vcmp.eq.f32.partialorder %v16444_v45, %v6992_v10  ;;  %v2371_v39 = vld [vmem:[#allocation2 + $0x148] sm:$0xff]  ;;  %v2172_v42 = vsel %vm1907_vm5, %v9327_v36, 0.0  ;;  %v2373_v41 = vld [vmem:[#allocation2 + $0x158] sm:$0xff] }
 0x308   : > { %v2754_v2 = vadd.f32 %v2598_v32, %v2370_v33  ;;  %2817 = vst.msk [vmem:[#allocation2 + $0x130] sm:$0xff] %vm388_vm4, %v2752_v1  ;;  %v3804_v33 = vadd.f32 %v2171_v27, %v2170_v50  ;;  %v10964_v50 = vadd.f32 %v3800_v4, %v2169_v51  ;;  %v3795_v27 = vadd.f32 %v3794_v46, %v2164_v35  ;;  %v2372_v1 = vld [vmem:[#allocation2 + $0x150] sm:$0xff] }
 0x309   : > { %2818 = vst.msk [vmem:[#allocation2 + $0x138] sm:$0xff] %vm388_vm4, %v2753_v19  ;;  %vm1918_vm9 = vcmp.eq.f32.partialorder %v16444_v45, %v6994_v11  ;;  %v2173_v32 = vsel %vm1908_vm6, %v9637_v57, 0.0  ;;  %vm1916_vm10 = vcmp.eq.f32.partialorder %v16438_v14, %v7019_v20  ;;  %v2180_v51 = vsel %vm1915_vm7, %v9327_v36, 0.0  ;;  %3792 = vadd.xlane.f32.xlu2 %v10934_v17 }
 0x30a   : > { %2819 = vst.msk [vmem:[#allocation2 + $0x140] sm:$0xff] %vm388_vm4, %v2754_v2  ;;  %v3805_v60 = vadd.f32 %v3804_v33, %v2172_v42  ;;  %v3815_v24 = vadd.f32 %v3814_v8, %v2180_v51  ;;  %vm1911_vm11 = vcmp.eq.f32.partialorder %v16442_v23, %v7005_v15  ;;  %v3809_v46 = vadd.f32 %v2175_v54, %v2174_v56 }
 0x30b   : > { %v2182_v13 = vsel %vm1917_vm8, %v9172_v49, 0.0  ;;  %v2183_v35 = vsel %vm1918_vm9, %v9276_v21, 0.0  ;;  %vm1925_vm12 = vcmp.eq.f32.partialorder %v16445_v40, %v6992_v10  ;;  %vm1926_vm13 = vcmp.eq.f32.partialorder %v16445_v40, %v6994_v11  ;;  %3787 = vadd.xlane.f32.xlu1 %v10847_v3  ;;  %v2374_v3 = vld [vmem:[#allocation2 + $0x160] sm:$0xff] }
 0x30c   : > { %v10994_v56 = vadd.f32 %v3795_v27, %v2165_v0  ;;  %v2181_v54 = vsel %vm1916_vm10, %v9637_v57, 0.0  ;;  %vm1912_vm14 = vcmp.eq.f32.partialorder %v16442_v23, %v7019_v20  ;;  %v2176_v42 = vsel %vm1911_vm11, %v9327_v36, 0.0  ;;  %3782 = vadd.xlane.f32.xlu0 %v10886_v44  ;;  %v16452_v23 = vld [vmem:[#allocation127_spill] sm:$0xff] }
 0x30d   : > { %v2603_v4 = vpop.xlane.xlu2 %2602  ;;  %vm1919_vm15 = vcmp.eq.f32.partialorder %v16444_v45, %v7005_v15  ;;  %v3819_v14 = vadd.f32 %v2183_v35, %v2182_v13  ;;  %v2190_v0 = vsel %vm1925_vm12, %v9172_v49, 0.0  ;;  %v2191_v27 = vsel %vm1926_vm13, %v9276_v21, 0.0  ;;  %v16449_v13 = vld [vmem:[#allocation194_spill] sm:$0xff] }
 0x30e   : > { %v2755_v2 = vadd.f32 %v2603_v4, %v2371_v39  ;;  %v2608_v26 = vpop.xlane.xlu0 %2607  ;;  %v11001_v39 = vadd.f32 %v3805_v60, %v2173_v32  ;;  %v11019_v60 = vadd.f32 %v3815_v24, %v2181_v54  ;;  %v3810_v51 = vadd.f32 %v3809_v46, %v2176_v42  ;;  %v16448_v4 = vld [vmem:[#allocation118_spill] sm:$0xff] }
 0x30f   : > { %v2613_v19 = vpop.xlane.xlu1 %2612  ;;  %v2756_v8 = vadd.f32 %v2608_v26, %v2372_v1  ;;  %v16447_v1 = vld [vmem:[#allocation193_spill] sm:$0xff]  ;;  %vm1920_vm0 = vcmp.eq.f32.partialorder %v16444_v45, %v7019_v20  ;;  %vm1921_vm1 = vcmp.eq.f32.partialorder %v16448_v4, %v6992_v10  ;;  %vm1922_vm2 = vcmp.eq.f32.partialorder %v16448_v4, %v6994_v11  ;;  %v2375_v46 = vld [vmem:[#allocation2 + $0x168] sm:$0xff] }
 0x310   : > { %v2757_v33 = vadd.f32 %v2613_v19, %v2373_v41  ;;  %2820 = vst.msk [vmem:[#allocation2 + $0x148] sm:$0xff] %vm388_vm4, %v2755_v2  ;;  %v16446_v41 = vld [vmem:[#allocation192_spill] sm:$0xff]  ;;  %v3397_v24 = vadd.f32 %v10473_v59, %v10469_v53  ;;  %v2184_v26 = vsel %vm1919_vm15, %v9327_v36, 0.0  ;;  %vm1927_vm3 = vcmp.eq.f32.partialorder %v16445_v40, %v7005_v15  ;;  %v16450_v53 = vld [vmem:[#allocation195_spill] sm:$0xff] }
 0x311   : > { %v3387_v32 = vadd.f32 %v16447_v1, %v16446_v41  ;;  %2821 = vst.msk [vmem:[#allocation2 + $0x150] sm:$0xff] %vm388_vm4, %v2756_v8  ;;  %v2376_v19 = vld [vmem:[#allocation2 + $0x170] sm:$0xff]  ;;  %v3829_v38 = vadd.f32 %v2191_v27, %v2190_v0  ;;  %vm1928_vm5 = vcmp.eq.f32.partialorder %v16445_v40, %v7019_v20  ;;  %v2186_v47 = vsel %vm1921_vm1, %v9172_v49, 0.0  ;;  %v2377_v45 = vld [vmem:[#allocation2 + $0x178] sm:$0xff]  ;;  %3807 = vadd.xlane.f32.xlu2 %v11001_v39 }
 0x312   : > { %2822 = vst.msk [vmem:[#allocation2 + $0x158] sm:$0xff] %vm388_vm4, %v2757_v33  ;;  %v3820_v33 = vadd.f32 %v3819_v14, %v2184_v26  ;;  %v3398_v8 = vadd.f32 %v3397_v24, %v10477_v37  ;;  %v2187_v44 = vsel %vm1922_vm2, %v9276_v21, 0.0  ;;  %v11055_v14 = vadd.f32 %v3393_v7, %v10190_v6  ;;  %v2379_v24 = vld [vmem:[#allocation2 + $0x188] sm:$0xff] }
 0x313   : > { %v3388_v2 = vadd.f32 %v3387_v32, %v16449_v13  ;;  %v2192_v37 = vsel %vm1927_vm3, %v9327_v36, 0.0  ;;  %vm1923_vm6 = vcmp.eq.f32.partialorder %v16448_v4, %v7005_v15  ;;  %vm1929_vm7 = vcmp.eq.f32.partialorder %v16451_v48, %v6992_v10  ;;  %3802 = vadd.xlane.f32.xlu1 %v10964_v50 }
 0x314   : > { %v11062_v1 = vadd.f32 %v3398_v8, %v10481_v55  ;;  %v3830_v32 = vadd.f32 %v3829_v38, %v2192_v37  ;;  %vm1930_vm8 = vcmp.eq.f32.partialorder %v16451_v48, %v6994_v11  ;;  %v2177_v6 = vsel %vm1912_vm14, %v9637_v57, 0.0  ;;  %v16453_v38 = vld [vmem:[#allocation76_spill] sm:$0xff]  ;;  %3797 = vadd.xlane.f32.xlu0 %v10994_v56 }
 0x315   : > { %v2618_v35 = vpop.xlane.xlu2 %2617  ;;  %v11043_v59 = vadd.f32 %v3388_v2, %v16450_v53  ;;  %v2185_v55 = vsel %vm1920_vm0, %v9637_v57, 0.0  ;;  %vm1924_vm9 = vcmp.eq.f32.partialorder %v16448_v4, %v7019_v20  ;;  %v3811_v13 = vadd.f32 %v3810_v51, %v2177_v6 }
 0x316   : > { %v2758_v54 = vadd.f32 %v2618_v35, %v2374_v3  ;;  %v2623_v41 = vpop.xlane.xlu0 %2622  ;;  %v3824_v3 = vadd.f32 %v2187_v44, %v2186_v47  ;;  %v2193_v17 = vsel %vm1928_vm5, %v9637_v57, 0.0  ;;  %vm1933_vm10 = vcmp.eq.f32.partialorder %v16452_v23, %v6992_v10 }
 0x317   : > { %v2628_v42 = vpop.xlane.xlu1 %2627  ;;  %v2759_v27 = vadd.f32 %v2623_v41, %v2375_v46  ;;  %vm1934_vm11 = vcmp.eq.f32.partialorder %v16452_v23, %v6994_v11  ;;  %v11093_v50 = vadd.f32 %v3820_v33, %v2185_v55  ;;  %v2188_v2 = vsel %vm1923_vm6, %v9327_v36, 0.0 }
 0x318   : > { %v2760_v0 = vadd.f32 %v2628_v42, %v2376_v19  ;;  %2823 = vst.msk [vmem:[#allocation2 + $0x160] sm:$0xff] %vm388_vm4, %v2758_v54  ;;  %v2194_v40 = vsel %vm1929_vm7, %v9172_v49, 0.0  ;;  %v2195_v51 = vsel %vm1930_vm8, %v9276_v21, 0.0  ;;  %v2378_v19 = vld [vmem:[#allocation2 + $0x180] sm:$0xff]  ;;  %v11107_v46 = vadd.f32 %v3830_v32, %v2193_v17  ;;  %v2380_v17 = vld [vmem:[#allocation2 + $0x190] sm:$0xff] }
 0x319   : > { %2824 = vst.msk [vmem:[#allocation2 + $0x168] sm:$0xff] %vm388_vm4, %v2759_v27  ;;  %v2189_v26 = vsel %vm1924_vm9, %v9637_v57, 0.0  ;;  %vm1937_vm12 = vcmp.eq.f32.partialorder %v16453_v38, %v6992_v10  ;;  %vm1938_vm13 = vcmp.eq.f32.partialorder %v16453_v38, %v6994_v11  ;;  %v3825_v7 = vadd.f32 %v3824_v3, %v2188_v2  ;;  %v16454_v27 = vld [vmem:[#allocation93_spill] sm:$0xff]  ;;  %3822 = vadd.xlane.f32.xlu2 %v11093_v50 }
 0x31a   : > { %2825 = vst.msk [vmem:[#allocation2 + $0x170] sm:$0xff] %vm388_vm4, %v2760_v0  ;;  %vm1931_vm14 = vcmp.eq.f32.partialorder %v16451_v48, %v7005_v15  ;;  %v2198_v35 = vsel %vm1933_vm10, %v9172_v49, 0.0  ;;  %v2199_v33 = vsel %vm1934_vm11, %v9276_v21, 0.0  ;;  %vm1932_vm15 = vcmp.eq.f32.partialorder %v16451_v48, %v7019_v20 }
 0x31b   : > { %v3834_v56 = vadd.f32 %v2195_v51, %v2194_v40  ;;  %vm1935_vm0 = vcmp.eq.f32.partialorder %v16452_v23, %v7005_v15  ;;  %v2202_v47 = vsel %vm1937_vm12, %v9172_v49, 0.0  ;;  %v2203_v44 = vsel %vm1938_vm13, %v9276_v21, 0.0  ;;  %3817 = vadd.xlane.f32.xlu1 %v11019_v60 }
 0x31c   : > { %vm1936_vm1 = vcmp.eq.f32.partialorder %v16452_v23, %v7019_v20  ;;  %v3839_v0 = vadd.f32 %v2199_v33, %v2198_v35  ;;  %vm1949_vm2 = vcmp.eq.f32.partialorder %v16454_v27, %v6992_v10  ;;  %vm1950_vm3 = vcmp.eq.f32.partialorder %v16454_v27, %v6994_v11  ;;  %3812 = vadd.xlane.f32.xlu0 %v3811_v13  ;;  %v4140_v13 = vld [vmem:[#allocation2 + $0x18] sm:$0xff] }
 0x31d   : > { %v2633_v4 = vpop.xlane.xlu2 %2632  ;;  %v11147_v37 = vadd.f32 %v3825_v7, %v2189_v26  ;;  %v2196_v32 = vsel %vm1931_vm14, %v9327_v36, 0.0  ;;  %v2197_v6 = vsel %vm1932_vm15, %v9637_v57, 0.0  ;;  %vm1939_vm5 = vcmp.eq.f32.partialorder %v16453_v38, %v7005_v15  ;;  %v4137_v26 = vld [vmem:[#allocation2] sm:$0xff] }
 0x31e   : > { %v2761_v53 = vadd.f32 %v2633_v4, %v2377_v45  ;;  %v2638_v54 = vpop.xlane.xlu0 %2637  ;;  %v3835_v39 = vadd.f32 %v3834_v56, %v2196_v32  ;;  %v2200_v60 = vsel %vm1935_vm0, %v9327_v36, 0.0  ;;  %v3844_v55 = vadd.f32 %v2203_v44, %v2202_v47  ;;  %v16456_v47 = vld [vmem:[#allocation143_spill] sm:$0xff]  ;;  %v16457_v44 = vld [vmem:[#allocation106_spill] sm:$0xff] }
 0x31f   : > { %v2643_v8 = vpop.xlane.xlu1 %2642  ;;  %v2762_v41 = vadd.f32 %v2638_v54, %v2378_v19  ;;  %v3402_v3 = vadd.f32 %v10457_v25, %v10453_v58  ;;  %v2201_v48 = vsel %vm1936_vm1, %v9637_v57, 0.0  ;;  %v2214_v45 = vsel %vm1949_vm2, %v9172_v49, 0.0  ;;  %v2382_v58 = vld [vmem:[#allocation2 + $0x1a0] sm:$0xff]  ;;  %v2381_v25 = vld [vmem:[#allocation2 + $0x198] sm:$0xff] }
 0x320   : > { %v2763_v42 = vadd.f32 %v2643_v8, %v2379_v24  ;;  %2826 = vst.msk [vmem:[#allocation2 + $0x178] sm:$0xff] %vm388_vm4, %v2761_v53  ;;  %v2215_v2 = vsel %vm1950_vm3, %v9276_v21, 0.0  ;;  %v3407_v40 = vadd.f32 %v10244_v43, %v10229_v62  ;;  %v3840_v51 = vadd.f32 %v3839_v0, %v2200_v60 }
 0x321   : > { %2827 = vst.msk [vmem:[#allocation2 + $0x180] sm:$0xff] %vm388_vm4, %v2762_v41  ;;  %vm1940_vm6 = vcmp.eq.f32.partialorder %v16453_v38, %v7019_v20  ;;  %v2204_v23 = vsel %vm1939_vm5, %v9327_v36, 0.0  ;;  %v3403_v24 = vadd.f32 %v3402_v3, %v10461_v30  ;;  %vm1951_vm7 = vcmp.eq.f32.partialorder %v16454_v27, %v7005_v15  ;;  %v4141_v41 = vld [vmem:[#allocation2 + $0x20] sm:$0xff]  ;;  %v4142_v3 = vld [vmem:[#allocation2 + $0x28] sm:$0xff]  ;;  %v2385_v38 = vld [vmem:[#allocation2 + $0x1b8] sm:$0xff] }
 0x322   : > { %2828 = vst.msk [vmem:[#allocation2 + $0x188] sm:$0xff] %vm388_vm4, %v2763_v42  ;;  %vm1952_vm8 = vcmp.eq.f32.partialorder %v16454_v27, %v7019_v20  ;;  %v3408_v62 = vadd.f32 %v3407_v40, %v10248_v18  ;;  %v3412_v43 = vadd.f32 %v10506_v61, %v10502_v63  ;;  %v3845_v33 = vadd.f32 %v3844_v55, %v2204_v23  ;;  %v16455_v42 = vld [vmem:[#allocation98_spill] sm:$0xff]  ;;  %v4144_v23 = vld [vmem:[#allocation2 + $0x38] sm:$0xff] }
 0x323   : > { %v3859_v53 = vadd.f32 %v2215_v2, %v2214_v45  ;;  %v11192_v30 = vadd.f32 %v3403_v24, %v10465_v16  ;;  %v3836_v63 = vadd.f32 %v3835_v39, %v2197_v6  ;;  %v3841_v61 = vadd.f32 %v3840_v51, %v2201_v48  ;;  %v16458_v16 = vld [vmem:[#allocation78_spill] sm:$0xff]  ;;  %3832 = vadd.xlane.f32.xlu1 %v11107_v46  ;;  %v4139_v39 = vld [vmem:[#allocation2 + $0x10] sm:$0xff] }
 0x324   : > { %v11195_v56 = vadd.f32 %v3408_v62, %v10252_v31  ;;  %v3413_v18 = vadd.f32 %v3412_v43, %v16455_v42  ;;  %vm1941_vm9 = vcmp.eq.f32.partialorder %v16456_v47, %v6992_v10  ;;  %vm1961_vm10 = vcmp.eq.f32.partialorder %v16457_v44, %v6992_v10  ;;  %v16459_v31 = vld [vmem:[#allocation99_spill] sm:$0xff]  ;;  %3827 = vadd.xlane.f32.xlu0 %v11147_v37 }
 0x325   : > { %v2648_v19 = vpop.xlane.xlu2 %2647  ;;  %6581 = vrcp.f32 %v16458_v16  ;;  %v4791_v0 = vsub.f32 16.0, %v4137_v26  ;;  %vm1942_vm11 = vcmp.eq.f32.partialorder %v16456_v47, %v6994_v11  ;;  %v4794_v6 = vsub.f32 16.0, %v4140_v13  ;;  %v2384_v2 = vld [vmem:[#allocation2 + $0x1b0] sm:$0xff]  ;;  %v4145_v13 = vld [vmem:[#allocation2 + $0x40] sm:$0xff]  ;;  %3837 = vadd.xlane.f32.xlu2 %v3836_v63 }
 0x326   : > { %v2764_v4 = vadd.f32 %v2648_v19, %v2380_v17  ;;  %v2653_v35 = vpop.xlane.xlu0 %2652  ;;  %v11210_v32 = vadd.f32 %v3413_v18, %v16459_v31  ;;  %v2205_v60 = vsel %vm1940_vm6, %v9637_v57, 0.0  ;;  %v2216_v50 = vsel %vm1951_vm7, %v9327_v36, 0.0  ;;  %v2383_v17 = vld [vmem:[#allocation2 + $0x1a8] sm:$0xff]  ;;  %v4143_v26 = vld [vmem:[#allocation2 + $0x30] sm:$0xff]  ;;  %v2386_v63 = vld [vmem:[#allocation2 + $0x1c0] sm:$0xff] }
 0x327   : > { %v2658_v7 = vpop.xlane.xlu1 %2657  ;;  %v2765_v54 = vadd.f32 %v2653_v35, %v2381_v25  ;;  %v11225_v46 = vsel %vm1952_vm8, %v9637_v57, 0.0  ;;  %v4795_v55 = vsub.f32 16.0, %v4141_v41  ;;  %v11227_v48 = vadd.f32 %v3845_v33, %v2205_v60  ;;  %v16460_v19 = vld [vmem:[#allocation138_spill] sm:$0xff]  ;;  %v4147_v41 = vld [vmem:[#allocation2 + $0x50] sm:$0xff] }
 0x328   : > { %v2766_v8 = vadd.f32 %v2658_v7, %v2382_v58  ;;  %2829 = vst.msk [vmem:[#allocation2 + $0x190] sm:$0xff] %vm388_vm4, %v2764_v4  ;;  %v11229_v45 = vadd.f32 %v3859_v53, %v2216_v50  ;;  %vm1962_vm12 = vcmp.eq.f32.partialorder %v16457_v44, %v6994_v11  ;;  %vm1943_vm13 = vcmp.eq.f32.partialorder %v16456_v47, %v7005_v15  ;;  %v4146_v50 = vld [vmem:[#allocation2 + $0x48] sm:$0xff] }
 0x329   : > { %2830 = vst.msk [vmem:[#allocation2 + $0x198] sm:$0xff] %vm388_vm4, %v2765_v54  ;;  %v2206_v27 = vsel %vm1941_vm9, %v9172_v49, 0.0  ;;  %v2207_v40 = vsel %vm1942_vm11, %v9276_v21, 0.0  ;;  %v11247_v58 = vsel %vm1961_vm10, %v9172_v49, 0.0  ;;  %v11249_v25 = vmax.f32 %v4791_v0, 1.0 }
 0x32a   : > { %2831 = vst.msk [vmem:[#allocation2 + $0x1a0] sm:$0xff] %vm388_vm4, %v2766_v8  ;;  %v4793_v51 = vsub.f32 16.0, %v4139_v39  ;;  %vm1945_vm14 = vcmp.eq.f32.partialorder %v16460_v19, %v6992_v10  ;;  %vm1946_vm15 = vcmp.eq.f32.partialorder %v16460_v19, %v6994_v11  ;;  %v11256_v62 = vmax.f32 %v4794_v6, 1.0 }
 0x32b   : > { %v4796_v43 = vsub.f32 16.0, %v4142_v3  ;;  %v11262_v33 = vsel %vm1962_vm12, %v9276_v21, 0.0  ;;  %v11264_v37 = vpop.eup %6581  ;;  %v11266_v53 = vmax.f32 %v4795_v55, 1.0  ;;  %v3849_v42 = vadd.f32 %v2207_v40, %v2206_v27  ;;  %3842 = vadd.xlane.f32.xlu1 %v3841_v61 }
 0x32c   : > { %v4798_v18 = vsub.f32 16.0, %v4144_v23  ;;  %vm1944_vm0 = vcmp.eq.f32.partialorder %v16456_v47, %v7019_v20  ;;  %v2208_v0 = vsel %vm1943_vm13, %v9327_v36, 0.0  ;;  %v2210_v31 = vsel %vm1945_vm14, %v9172_v49, 0.0  ;;  %v2388_v23 = vld [vmem:[#allocation2 + $0x1d0] sm:$0xff]  ;;  %3330 = vadd.xlane.f32.xlu0 %v16466_v29  ;;  %v4154_v47 = vld [vmem:[#allocation2 + $0x88] sm:$0xff] }
 0x32d   : > { %v2663_v24 = vpop.xlane.xlu2 %2662  ;;  %v2211_v6 = vsel %vm1946_vm15, %v9276_v21, 0.0  ;;  %6583 = vrcp.f32 %v11249_v25  ;;  %v11284_v39 = vmax.f32 %v4793_v51, 1.0  ;;  %v4797_v60 = vsub.f32 16.0, %v4143_v26  ;;  %v16463_v26 = vld [vmem:[#allocation96_spill] sm:$0xff] }
 0x32e   : > { %v2767_v4 = vadd.f32 %v2663_v24, %v2383_v17  ;;  %v2668_v35 = vpop.xlane.xlu0 %2667  ;;  %vm1947_vm1 = vcmp.eq.f32.partialorder %v16460_v19, %v7005_v15  ;;  %6585 = vrcp.f32 %v11256_v62  ;;  %v11290_v55 = vmax.f32 %v4796_v43, 1.0  ;;  %v4148_v17 = vld [vmem:[#allocation2 + $0x58] sm:$0xff]  ;;  %v2387_v24 = vld [vmem:[#allocation2 + $0x1c8] sm:$0xff] }
 0x32f   : > { %v2673_v7 = vpop.xlane.xlu1 %2672  ;;  %v2768_v54 = vadd.f32 %v2668_v35, %v2384_v2  ;;  %v4799_v3 = vsub.f32 16.0, %v4145_v13  ;;  %vm1948_vm2 = vcmp.eq.f32.partialorder %v16460_v19, %v7019_v20  ;;  %6587 = vrcp.f32 %v11266_v53  ;;  %v4150_v2 = vld [vmem:[#allocation2 + $0x68] sm:$0xff] }
 0x330   : > { %v2769_v8 = vadd.f32 %v2673_v7, %v2385_v38  ;;  %2832 = vst.msk [vmem:[#allocation2 + $0x1a8] sm:$0xff] %vm388_vm4, %v2767_v4  ;;  %v4801_v38 = vsub.f32 16.0, %v4147_v41  ;;  %v3850_v61 = vadd.f32 %v3849_v42, %v2208_v0  ;;  %v3854_v27 = vadd.f32 %v2211_v6, %v2210_v31  ;;  %v16462_v43 = vld [vmem:[#allocation19_spill] sm:$0xff]  ;;  %v16465_v35 = vld [vmem:[#allocation94_spill] sm:$0xff] }
 0x331   : > { %2833 = vst.msk [vmem:[#allocation2 + $0x1b0] sm:$0xff] %vm388_vm4, %v2768_v54  ;;  %v11296_v40 = vmax.f32 %v4798_v18, 1.0  ;;  %v4800_v51 = vsub.f32 16.0, %v4146_v50  ;;  %v3417_v4 = vadd.f32 %v16463_v26, %v16462_v43  ;;  %v16464_v7 = vld [vmem:[#allocation15_spill] sm:$0xff]  ;;  %6589 = vrcp.f32 %v11284_v39 }
 0x332   : > { %2834 = vst.msk [vmem:[#allocation2 + $0x1b8] sm:$0xff] %vm388_vm4, %v2769_v8  ;;  %v3422_v13 = vadd.f32 %v16465_v35, %v16464_v7  ;;  %v11303_v8 = vmax.f32 %v4797_v60, 1.0  ;;  %v4802_v54 = vsub.f32 16.0, %v4148_v17  ;;  %v2212_v42 = vsel %vm1947_vm1, %v9327_v36, 0.0  ;;  %v4149_v17 = vld [vmem:[#allocation2 + $0x60] sm:$0xff]  ;;  %v16469_v7 = vld [vmem:[#allocation103_spill] sm:$0xff] }
 0x333   : > { %16461 = vst [vmem:[#allocation129_spill] sm:$0xff] %v11296_v40  ;;  %6591 = vrcp.f32 %v11290_v55  ;;  %v11311_v18 = vmax.f32 %v4799_v3, 1.0  ;;  %v4804_v0 = vsub.f32 16.0, %v4150_v2  ;;  %v11313_v43 = vpop.eup %6583  ;;  %v11315_v60 = vmax.f32 %v4801_v38, 1.0  ;;  %v4151_v2 = vld [vmem:[#allocation2 + $0x70] sm:$0xff] }
 0x334   : > { %vm1963_vm3 = vcmp.eq.f32.partialorder %v16457_v44, %v7005_v15  ;;  %v3418_v35 = vadd.f32 %v3417_v4, %v16469_v7  ;;  %v11320_v9 = vpop.eup %6585  ;;  %6593 = vrcp.f32 %v11296_v40  ;;  %v11323_v3 = vmax.f32 %v4800_v51, 1.0  ;;  %v16471_v38 = vld [vmem:[#allocation95_spill] sm:$0xff]  ;;  %v16473_v4 = vld [vmem:[#allocation72_spill] sm:$0xff]  ;;  %3847 = vadd.xlane.f32.xlu0 %v11227_v48 }
 0x335   : > { %v2678_v41 = vpop.xlane.xlu2 %2677  ;;  %16467 = vst [vmem:[#allocation190_spill] sm:$0xff] %v11311_v18  ;;  %v11327_v22 = vpop.eup %6587  ;;  %6595 = vrcp.f32 %v11303_v8  ;;  %3335 = vadd.xlane.f32.xlu2 %v16473_v4  ;;  %v16475_v51 = vld [vmem:[#allocation104_spill] sm:$0xff]  ;;  %v4803_v7 = vsub.f32 16.0, %v4149_v17  ;;  %v4805_v4 = vsub.f32 16.0, %v4151_v2  ;;  %v2213_v2 = vsel %vm1948_vm2, %v9637_v57, 0.0 }
 0x336   : > { %v2770_v31 = vadd.f32 %v2678_v41, %v2386_v63  ;;  %v2683_v50 = vpop.xlane.xlu0 %2682  ;;  %16468 = vst [vmem:[#allocation154_spill] sm:$0xff] %v11315_v60  ;;  %v3855_v63 = vadd.f32 %v3854_v27, %v2212_v42  ;;  %v3423_v41 = vadd.f32 %v3422_v13, %v16471_v38  ;;  %v16478_v27 = vld [vmem:[#allocation11_spill] sm:$0xff]  ;;  %6597 = vrcp.f32 %v11311_v18 }
 0x337   : > { %v2688_v6 = vpop.xlane.xlu1 %2687  ;;  %v2771_v29 = vadd.f32 %v2683_v50, %v2387_v24  ;;  %16470 = vst [vmem:[#allocation157_spill] sm:$0xff] %v11323_v3  ;;  %v4153_v24 = vld [vmem:[#allocation2 + $0x80] sm:$0xff]  ;;  %v11336_v50 = vadd.f32 %v3418_v35, %v16475_v51  ;;  %v11341_v13 = vmax.f32 %v4804_v0, 1.0  ;;  %6599 = vrcp.f32 %v11315_v60  ;;  %v2389_v35 = vld [vmem:[#allocation2 + $0x1d8] sm:$0xff] }
 0x338   : > { %v2772_v26 = vadd.f32 %v2688_v6, %v2388_v23  ;;  %2835 = vst.msk [vmem:[#allocation2 + $0x1c0] sm:$0xff] %vm388_vm4, %v2770_v31  ;;  %v11330_v23 = vmax.f32 %v4802_v54, 1.0  ;;  %v16474_v6 = vld [vmem:[#allocation84_spill] sm:$0xff]  ;;  %v16477_v31 = vld [vmem:[#allocation114_spill] sm:$0xff]  ;;  %v16480_v54 = vld [vmem:[#allocation89_spill] sm:$0xff]  ;;  %6601 = vrcp.f32 %v11323_v3  ;;  %v4807_v17 = vsub.f32 16.0, %v4153_v24 }
 0x339   : > { %3340 = vadd.xlane.f32.xlu1 %v16474_v6  ;;  %16476 = vst [vmem:[#allocation17_spill] sm:$0xff] %v11336_v50  ;;  %v3427_v42 = vadd.f32 %v16478_v27, %v16477_v31  ;;  %v11345_v38 = vadd.f32 %v3423_v41, %v16480_v54  ;;  %v2209_v6 = vsel %vm1944_vm0, %v9637_v57, 0.0  ;;  %v16482_v51 = vld [vmem:[#allocation109_spill] sm:$0xff]  ;;  %v2391_v41 = vld [vmem:[#allocation2 + $0x1e8] sm:$0xff]  ;;  %v11373_v19 = vmax.f32 %v4803_v7, 1.0 }
 0x33a   : > { %16472 = vst [vmem:[#allocation159_spill] sm:$0xff] %v11330_v23  ;;  %v2390_v27 = vld [vmem:[#allocation2 + $0x1e0] sm:$0xff]  ;;  %v3851_v54 = vadd.f32 %v3850_v61, %v2209_v6  ;;  %6603 = vrcp.f32 %v11330_v23  ;;  %v3874_v61 = vadd.f32 %v11262_v33, %v11247_v58  ;;  %v3856_v23 = vadd.f32 %v3855_v63, %v2213_v2  ;;  %v4156_v3 = vld [vmem:[#allocation2 + $0x98] sm:$0xff]  ;;  %v2392_v2 = vld [vmem:[#allocation2 + $0x1f0] sm:$0xff] }
 0x33b   : > { %2837 = vst.msk [vmem:[#allocation2 + $0x1d0] sm:$0xff] %vm388_vm4, %v2772_v26  ;;  %v11347_v26 = vpop.eup %6589  ;;  %v3428_v0 = vadd.f32 %v3427_v42, %v16482_v51  ;;  %v16483_v42 = vld [vmem:[#allocation152_spill] sm:$0xff]  ;;  %6605 = vrcp.f32 %v11341_v13  ;;  %v11377_v60 = vmax.f32 %v4805_v4, 1.0  ;;  %v11381_v58 = vmax.f32 %v4807_v17, 1.0  ;;  %v16489_v4 = vld [vmem:[#allocation150_spill] sm:$0xff] }
 0x33c   : > { %16479 = vst [vmem:[#allocation191_spill] sm:$0xff] %v11341_v13  ;;  %v11355_v31 = vpop.eup %6591  ;;  %vm1953_vm5 = vcmp.eq.f32.partialorder %v16483_v42, %v6992_v10  ;;  %vm1954_vm6 = vcmp.eq.f32.partialorder %v16483_v42, %v6994_v11  ;;  %v4808_v33 = vsub.f32 16.0, %v4154_v47  ;;  %vm1957_vm7 = vcmp.eq.f32.partialorder %v16489_v4, %v6992_v10  ;;  %v2393_v47 = vld [vmem:[#allocation2 + $0x1f8] sm:$0xff] }
 0x33d   : > { %2836 = vst.msk [vmem:[#allocation2 + $0x1c8] sm:$0xff] %vm388_vm4, %v2771_v29  ;;  %v4152_v29 = vld [vmem:[#allocation2 + $0x78] sm:$0xff]  ;;  %v2693_v12 = vpop.xlane.xlu2 %2692  ;;  %v11370_v24 = vpop.eup %6593  ;;  %v2219_v63 = vsel %vm1954_vm6, %v9276_v21, 0.0  ;;  %3852 = vadd.xlane.f32.xlu2 %v3851_v54  ;;  %vm1958_vm8 = vcmp.eq.f32.partialorder %v16489_v4, %v6994_v11  ;;  %6607 = vrcp.f32 %v11373_v19  ;;  %vm1955_vm9 = vcmp.eq.f32.partialorder %v16483_v42, %v7005_v15 }
 0x33e   : > { %16481 = vst [vmem:[#allocation173_spill] sm:$0xff] %v11345_v38  ;;  %v2773_v6 = vadd.f32 %v2693_v12, %v2389_v35  ;;  %v2698_v52 = vpop.xlane.xlu0 %2697  ;;  %v11375_v48 = vpop.eup %6595  ;;  %v4806_v18 = vsub.f32 16.0, %v4152_v29  ;;  %v2218_v12 = vsel %vm1953_vm5, %v9172_v49, 0.0  ;;  %v16490_v35 = vld [vmem:[#allocation107_spill] sm:$0xff]  ;;  %6609 = vrcp.f32 %v11377_v60 }
 0x33f   : > { %16484 = vst [vmem:[#allocation160_spill] sm:$0xff] %v11373_v19  ;;  %v2703_v51 = vpop.xlane.xlu1 %2702  ;;  %v2774_v50 = vadd.f32 %v2698_v52, %v2390_v27  ;;  %v11379_v40 = vpop.eup %6597  ;;  %v4155_v52 = vld [vmem:[#allocation2 + $0x90] sm:$0xff]  ;;  %v11400_v17 = vadd.f32 %v3428_v0, %v16490_v35  ;;  %v4157_v27 = vld [vmem:[#allocation2 + $0xa0] sm:$0xff]  ;;  %vm1964_vm10 = vcmp.eq.f32.partialorder %v16457_v44, %v7019_v20  ;;  %v2223_v35 = vsel %vm1958_vm8, %v9276_v21, 0.0 }
 0x340   : > { %16485 = vst [vmem:[#allocation182_spill] sm:$0xff] %v11377_v60  ;;  %v2775_v38 = vadd.f32 %v2703_v51, %v2391_v41  ;;  %v11392_v7 = vpop.eup %6599  ;;  %v4810_v41 = vsub.f32 16.0, %v4156_v3  ;;  %v4159_v0 = vld [vmem:[#allocation2 + $0xb0] sm:$0xff]  ;;  %v2222_v51 = vsel %vm1957_vm7, %v9172_v49, 0.0  ;;  %6611 = vrcp.f32 %v11381_v58 }
 0x341   : > { %16486 = vst [vmem:[#allocation183_spill] sm:$0xff] %v11379_v40  ;;  %3857 = vadd.xlane.f32.xlu1 %v3856_v23  ;;  %v11402_v29 = vpop.eup %6601  ;;  %v11408_v23 = vadd.f32 %v11229_v45, %v11225_v46  ;;  %v4809_v45 = vsub.f32 16.0, %v4155_v52  ;;  %v11432_v60 = vmax.f32 %v4806_v18, 1.0  ;;  %v4811_v52 = vsub.f32 16.0, %v4157_v27 }
 0x342   : > { %16487 = vst [vmem:[#allocation186_spill] sm:$0xff] %v11381_v58  ;;  %v11414_v54 = vpop.eup %6603  ;;  %v4813_v13 = vsub.f32 16.0, %v4159_v0  ;;  %v2220_v58 = vsel %vm1955_vm9, %v9327_v36, 0.0  ;;  %vm1959_vm11 = vcmp.eq.f32.partialorder %v16489_v4, %v7005_v15  ;;  %v4160_v0 = vld [vmem:[#allocation2 + $0xb8] sm:$0xff]  ;;  %vm1956_vm12 = vcmp.eq.f32.partialorder %v16483_v42, %v7019_v20 }
 0x343   : > { %2838 = vst.msk [vmem:[#allocation2 + $0x1d8] sm:$0xff] %vm388_vm4, %v2773_v6  ;;  %v11421_v46 = vpop.eup %6605  ;;  %v3864_v6 = vadd.f32 %v2219_v63, %v2218_v12  ;;  %v16495_v12 = vld [vmem:[#allocation92_spill] sm:$0xff]  ;;  %v11437_v63 = vmax.f32 %v4810_v41, 1.0  ;;  %6613 = vrcp.f32 %v11432_v60  ;;  %vm1960_vm13 = vcmp.eq.f32.partialorder %v16489_v4, %v7019_v20 }
 0x344   : > { %16488 = vst [vmem:[#allocation196_spill] sm:$0xff] %v11392_v7  ;;  %3345 = vadd.xlane.f32.xlu0 %v16495_v12  ;;  %v11445_v27 = vpop.eup %6607  ;;  %v11447_v12 = vmax.f32 %v4809_v45, 1.0  ;;  %v16500_v45 = vld [vmem:[#allocation73_spill] sm:$0xff]  ;;  %v4814_v44 = vsub.f32 16.0, %v4160_v0  ;;  %v2225_v42 = vsel %vm1960_vm13, %v9637_v57, 0.0  ;;  %vm4925_vm0 = vweird.f32 %v11249_v25 }
 0x345   : > { %2840 = vst.msk [vmem:[#allocation2 + $0x1e8] sm:$0xff] %vm388_vm4, %v2775_v38  ;;  %v2228_v38 = vsel %vm1963_vm3, %v9327_v36, 0.0  ;;  %3350 = vadd.xlane.f32.xlu2 %v16500_v45  ;;  %v4161_v0 = vld [vmem:[#allocation2 + $0xc0] sm:$0xff]  ;;  %vm4926_vm9 = vweird.f32 %v11313_v43 }
 0x346   : > { %2839 = vst.msk [vmem:[#allocation2 + $0x1e0] sm:$0xff] %vm388_vm4, %v2774_v50  ;;  %v3875_v3 = vadd.f32 %v3874_v61, %v2228_v38  ;;  %v2843_v50 = vld [vmem:[#allocation3] sm:$0xff]  ;;  %v11434_v61 = vmax.f32 %v4808_v33, 1.0  ;;  %v4158_v38 = vld [vmem:[#allocation2 + $0xa8] sm:$0xff]  ;;  %v2713_v7 = vpop.xlane.xlu0 %2712  ;;  %v3869_v33 = vadd.f32 %v2223_v35, %v2222_v51  ;;  %v4815_v4 = vsub.f32 16.0, %v4161_v0 }
 0x347   : > { %16491 = vst [vmem:[#allocation128_spill] sm:$0xff] %v11414_v54  ;;  %v3176_v19 = vpop.xlane.xlu1 %3175  ;;  %v2777_v40 = vadd.f32 %v2713_v7, %v2393_v47  ;;  %v4812_v41 = vsub.f32 16.0, %v4158_v38  ;;  %v4921_v7 = vmul.f32 %v11313_v43, %v11249_v25  ;;  %v2224_v47 = vsel %vm1959_vm11, %v9327_v36, 0.0  ;;  %v4162_v51 = vld [vmem:[#allocation2 + $0xc8] sm:$0xff]  ;;  %v2846_v38 = vld [vmem:[#allocation3 + $0x18] sm:$0xff] }
 0x348   : > { %16492 = vst [vmem:[#allocation132_spill] sm:$0xff] %v11421_v46  ;;  %v2708_v46 = vpop.xlane.xlu2 %2707  ;;  %v3492_v18 = vadd.f32 %v3176_v19, %v2843_v50  ;;  %v11455_v19 = vmax.f32 %v4811_v52, 1.0  ;;  %v16501_v50 = vld [vmem:[#allocation100_spill] sm:$0xff]  ;;  %6615 = vrcp.f32 %v11434_v61  ;;  %v2844_v35 = vld [vmem:[#allocation3 + $0x8] sm:$0xff] }
 0x349   : > { %16493 = vst [vmem:[#allocation166_spill] sm:$0xff] %v11432_v60  ;;  %v2776_v54 = vadd.f32 %v2708_v46, %v2392_v2  ;;  %v3865_v2 = vadd.f32 %v3864_v6, %v2220_v58  ;;  %v11452_v46 = vpop.eup %6609  ;;  %3355 = vadd.xlane.f32.xlu1 %v16501_v50  ;;  %v2229_v58 = vsel %vm1964_vm10, %v9637_v57, 0.0  ;;  %6617 = vrcp.f32 %v11437_v63  ;;  %vm11580_vm10 = vmor %vm4925_vm0, %vm4926_vm9 }
 0x34a   : > { %16494 = vst [vmem:[#allocation202_spill] sm:$0xff] %v11434_v61  ;;  %v11476_v6 = vpop.eup %6611  ;;  %6619 = vrcp.f32 %v11447_v12  ;;  %v11484_v52 = vmax.f32 %v4812_v41, 1.0  ;;  %v11486_v50 = vadd.f32 %v3875_v3, %v2229_v58  ;;  %v4931_v61 = vand.u32 2147483648, %v11249_v25  ;;  %v4163_v41 = vld [vmem:[#allocation2 + $0xd0] sm:$0xff] }
 0x34b   : > { %16496 = vst [vmem:[#allocation203_spill] sm:$0xff] %v11437_v63  ;;  %6621 = vrcp.f32 %v11455_v19  ;;  %v4922_v63 = vsub.f32 1.0, %v4921_v7  ;;  %v4929_v3 = vand.u32 2147483647, %v11249_v25  ;;  %v11497_v7 = vpop.eup %6613 }
 0x34c   : > { %16497 = vst [vmem:[#allocation37_spill] sm:$0xff] %v11447_v12  ;;  %3862 = vadd.xlane.f32.xlu0 %v11408_v23 }
 0x34d   : > { %2841 = vst.msk [vmem:[#allocation2 + $0x1f0] sm:$0xff] %vm388_vm4, %v2776_v54  ;;  %v11467_v54 = vmax.f32 %v4813_v13, 1.0  ;;  %v3870_v13 = vadd.f32 %v3869_v33, %v2224_v47  ;;  %v4816_v33 = vsub.f32 16.0, %v4162_v51  ;;  %v4164_v51 = vld [vmem:[#allocation2 + $0xd8] sm:$0xff]  ;;  %vm11528_vm3 = vcmp.eq.f32.partialorder %v4929_v3, 8.507059e+37 }
 0x34e   : > { %16498 = vst [vmem:[#allocation42_spill] sm:$0xff] %v11452_v46  ;;  %v3186_v47 = vpop.xlane.xlu0 %3185  ;;  %v11501_v60 = vpop.eup %6615 }
 0x34f   : > { %16499 = vst [vmem:[#allocation44_spill] sm:$0xff] %v11455_v19  ;;  %6623 = vrcp.f32 %v11467_v54  ;;  %v3191_v58 = vpop.xlane.xlu1 %3190  ;;  %v4165_v19 = vld [vmem:[#allocation2 + $0xe0] sm:$0xff]  ;;  %v3871_v46 = vadd.f32 %v3870_v13, %v2225_v42  ;;  %v11513_v13 = vor.u32 1.1754944e-38, %v4931_v61  ;;  %v11518_v0 = vmax.f32 %v4816_v33, 1.0 }
 0x350   : > { %3556 = vst.msk [vmem:[#allocation3] sm:$0xff] %vm388_vm4, %v3492_v18  ;;  %v2845_v18 = vld [vmem:[#allocation3 + $0x10] sm:$0xff]  ;;  %v3495_v23 = vadd.f32 %v3191_v58, %v2846_v38  ;;  %6625 = vrcp.f32 %v11484_v52  ;;  %v4923_v38 = vmul.f32 %v11313_v43, %v4922_v63  ;;  %v4819_v42 = vsub.f32 16.0, %v4165_v19  ;;  %v2847_v19 = vld [vmem:[#allocation3 + $0x20] sm:$0xff] }
 0x351   : > { %16502 = vst [vmem:[#allocation54_spill] sm:$0xff] %v11467_v54  ;;  %v3494_v12 = vadd.f32 %v3186_v47, %v2845_v18  ;;  %3872 = vadd.xlane.f32.xlu1 %v3871_v46  ;;  %v4818_v61 = vsub.f32 16.0, %v4164_v51  ;;  %v2849_v58 = vld [vmem:[#allocation3 + $0x30] sm:$0xff]  ;;  %v2848_v47 = vld [vmem:[#allocation3 + $0x28] sm:$0xff] }
 0x352   : > { %2842 = vst.msk [vmem:[#allocation2 + $0x1f8] sm:$0xff] %vm388_vm4, %v2777_v40  ;;  %v2221_v40 = vsel %vm1956_vm12, %v9637_v57, 0.0  ;;  %v4924_v51 = vadd.f32 %v11313_v43, %v4923_v38  ;;  %vm4941_vm12 = vweird.f32 %v11264_v37 }
 0x353   : > { %16503 = vst [vmem:[#allocation43_spill] sm:$0xff] %v11476_v6  ;;  %v3866_v45 = vadd.f32 %v3865_v2, %v2221_v40  ;;  %v3181_v6 = vpop.xlane.xlu2 %3180  ;;  %v11499_v40 = vmax.f32 %v4814_v44, 1.0  ;;  %v11509_v44 = vpop.eup %6617 }
 0x354   : > { %16504 = vst [vmem:[#allocation48_spill] sm:$0xff] %v11484_v52  ;;  %v3493_v2 = vadd.f32 %v3181_v6, %v2844_v35  ;;  %v16508_v6 = vld [vmem:[#allocation161_spill] sm:$0xff]  ;;  %v4817_v35 = vsub.f32 16.0, %v4163_v41  ;;  %v11516_v18 = vpop.eup %6619  ;;  %v11537_v41 = vmax.f32 %v4815_v4, 1.0  ;;  %3360 = vadd.xlane.f32.xlu0 %v10668_v5  ;;  %v11569_v5 = vmax.f32 %v4818_v61, 1.0  ;;  %v4167_v61 = vld [vmem:[#allocation2 + $0xf0] sm:$0xff] }
 0x355   : > { %16505 = vst [vmem:[#allocation40_spill] sm:$0xff] %v11497_v7  ;;  %vm1965_vm14 = vcmp.eq.f32.partialorder %v16508_v6, %v6992_v10  ;;  %vm1966_vm15 = vcmp.eq.f32.partialorder %v16508_v6, %v6994_v11  ;;  %3867 = vadd.xlane.f32.xlu2 %v3866_v45  ;;  %vm1967_vm1 = vcmp.eq.f32.partialorder %v16508_v6, %v7005_v15  ;;  %v11525_v63 = vpop.eup %6621  ;;  %6627 = vrcp.f32 %v11499_v40 }
 0x356   : > { %16506 = vst [vmem:[#allocation56_spill] sm:$0xff] %v11499_v40  ;;  %vm1968_vm2 = vcmp.eq.f32.partialorder %v16508_v6, %v7019_v20  ;;  %v4946_v45 = vand.u32 2147483648, %v16458_v16  ;;  %v11535_v33 = vpop.eup %6623  ;;  %v2230_v3 = vsel %vm1965_vm14, %v9172_v49, 0.0  ;;  %v11551_v4 = vmax.f32 %v4817_v35, 1.0  ;;  %v4169_v6 = vld [vmem:[#allocation2 + $0x100] sm:$0xff] }
 0x357   : > { %16507 = vst [vmem:[#allocation41_spill] sm:$0xff] %v11501_v60  ;;  %v11560_v54 = vpop.eup %6625  ;;  %6629 = vrcp.f32 %v11518_v0  ;;  %v3206_v52 = vpop.xlane.xlu1 %3205  ;;  %v4166_v60 = vld [vmem:[#allocation2 + $0xe8] sm:$0xff]  ;;  %vm4940_vm14 = vweird.f32 %v16458_v16 }
 0x358   : > { %3557 = vst.msk [vmem:[#allocation3 + $0x8] sm:$0xff] %vm388_vm4, %v3493_v2  ;;  %v4936_v2 = vmul.f32 %v11264_v37, %v16458_v16  ;;  %6631 = vrcp.f32 %v11537_v41  ;;  %v11593_v25 = vor.u32 1.1754944e-38, %v4946_v45  ;;  %v2850_v45 = vld [vmem:[#allocation3 + $0x38] sm:$0xff] }
 0x359   : > { %16509 = vst [vmem:[#allocation55_spill] sm:$0xff] %v11509_v44  ;;  %v3201_v44 = vpop.xlane.xlu0 %3200  ;;  %6633 = vrcp.f32 %v11551_v4 }
 0x35a   : > { %3559 = vst.msk [vmem:[#allocation3 + $0x18] sm:$0xff] %vm388_vm4, %v3495_v23  ;;  %v16518_v23 = vld [vmem:[#allocation115_spill] sm:$0xff]  ;;  %v3497_v7 = vadd.f32 %v3201_v44, %v2848_v47  ;;  %v4168_v47 = vld [vmem:[#allocation2 + $0xf8] sm:$0xff] }
 0x35b   : > { %16510 = vst [vmem:[#allocation177_spill] sm:$0xff] %v11516_v18  ;;  %vm1973_vm7 = vcmp.eq.f32.partialorder %v16518_v23, %v6992_v10  ;;  %vm1974_vm8 = vcmp.eq.f32.partialorder %v16518_v23, %v6994_v11  ;;  %v3196_v40 = vpop.xlane.xlu2 %3195  ;;  %v3498_v18 = vadd.f32 %v3206_v52, %v2849_v58  ;;  %v4976_v52 = vand.u32 2147483648, %v11256_v62  ;;  %v11587_v44 = vpop.eup %6627 }
 0x35c   : > { %16511 = vst [vmem:[#allocation50_spill] sm:$0xff] %v11518_v0  ;;  %v3496_v35 = vadd.f32 %v3196_v40, %v2847_v19  ;;  %v4928_v19 = vsel %vm11580_vm10, %v11313_v43, %v4924_v51  ;;  %v16526_v51 = vld [vmem:[#allocation16_spill] sm:$0xff]  ;;  %v4822_v43 = vsub.f32 16.0, %v4168_v47  ;;  %3877 = vadd.xlane.f32.xlu0 %v11486_v50 }
 0x35d   : > { %3558 = vst.msk [vmem:[#allocation3 + $0x10] sm:$0xff] %vm388_vm4, %v3494_v12  ;;  %v16515_v12 = vld [vmem:[#allocation158_spill] sm:$0xff]  ;;  %3365 = vadd.xlane.f32.xlu2 %v16526_v51 }
 0x35e   : > { %16512 = vst [vmem:[#allocation52_spill] sm:$0xff] %v11525_v63  ;;  %vm1969_vm5 = vcmp.eq.f32.partialorder %v16515_v12, %v6992_v10  ;;  %vm1970_vm6 = vcmp.eq.f32.partialorder %v16515_v12, %v6994_v11  ;;  %v11563_v63 = vmax.f32 %v4819_v42, 1.0  ;;  %v4937_v42 = vsub.f32 1.0, %v4936_v2  ;;  %v2852_v51 = vld [vmem:[#allocation3 + $0x48] sm:$0xff] }
 0x35f   : > { %16516 = vst [vmem:[#allocation61_spill] sm:$0xff] %v11535_v33  ;;  %v2231_v33 = vsel %vm1966_vm15, %v9276_v21, 0.0  ;;  %v2234_v38 = vsel %vm1969_vm5, %v9172_v49, 0.0  ;;  %v2235_v0 = vsel %vm1970_vm6, %v9276_v21, 0.0  ;;  %v4820_v2 = vsub.f32 16.0, %v4166_v60  ;;  %v3221_v40 = vpop.xlane.xlu1 %3220  ;;  %vm11705_vm6 = vmor %vm4940_vm14, %vm4941_vm12 }
 0x360   : > { %16517 = vst [vmem:[#allocation63_spill] sm:$0xff] %v11537_v41  ;;  %v3879_v58 = vadd.f32 %v2231_v33, %v2230_v3  ;;  %6635 = vrcp.f32 %v11563_v63  ;;  %vm1971_vm11 = vcmp.eq.f32.partialorder %v16515_v12, %v7005_v15  ;;  %v2232_v60 = vsel %vm1967_vm1, %v9327_v36, 0.0 }
 0x361   : > { %16519 = vst [vmem:[#allocation22_spill] sm:$0xff] %v11551_v4  ;;  %6637 = vrcp.f32 %v11569_v5  ;;  %v11617_v33 = vsel %vm11528_vm3, %v11513_v13, %v4928_v19  ;;  %v4938_v3 = vmul.f32 %v11264_v37, %v4937_v42  ;;  %vm1972_vm13 = vcmp.eq.f32.partialorder %v16515_v12, %v7019_v20  ;;  %v4171_v19 = vld [vmem:[#allocation2 + $0x110] sm:$0xff]  ;;  %v3216_v50 = vpop.xlane.xlu0 %3215 }
 0x362   : > { %16520 = vst [vmem:[#allocation204_spill] sm:$0xff] %v11560_v54  ;;  %v3880_v4 = vadd.f32 %v3879_v58, %v2232_v60  ;;  %v2236_v13 = vsel %vm1971_vm11, %v9327_v36, 0.0  ;;  %v11633_v42 = vmax.f32 %v4820_v2, 1.0  ;;  %vm1975_vm15 = vcmp.eq.f32.partialorder %v16518_v23, %v7005_v15  ;;  %v16536_v12 = vld [vmem:[#allocation172_spill] sm:$0xff]  ;;  %v650_v54 = vld [vmem:[%s12235_s20 + $0x28] sm:$0xff] }
 0x363   : > { %16521 = vst [vmem:[#allocation205_spill] sm:$0xff] %v11563_v63  ;;  %v3211_v63 = vpop.xlane.xlu2 %3210  ;;  %vm1977_vm0 = vcmp.eq.f32.partialorder %v16536_v12, %v6992_v10  ;;  %vm1978_vm1 = vcmp.eq.f32.partialorder %v16536_v12, %v6994_v11  ;;  %vm1976_vm5 = vcmp.eq.f32.partialorder %v16518_v23, %v7019_v20  ;;  %vm1980_vm9 = vcmp.eq.f32.partialorder %v16536_v12, %v7019_v20 }
 0x364   : > { %16522 = vst [vmem:[#allocation31_spill] sm:$0xff] %v11569_v5  ;;  %v3499_v47 = vadd.f32 %v3211_v63, %v2850_v45  ;;  %v3501_v5 = vadd.f32 %v3221_v40, %v2852_v51  ;;  %v4823_v63 = vsub.f32 16.0, %v4169_v6  ;;  %v11649_v45 = vadd.f32 %v11264_v37, %v4938_v3  ;;  %v4170_v6 = vld [vmem:[#allocation2 + $0x108] sm:$0xff]  ;;  %3375 = vadd.xlane.f32.xlu0 %v10915_v34 }
 0x365   : > { %3560 = vst.msk [vmem:[#allocation3 + $0x20] sm:$0xff] %vm388_vm4, %v3496_v35  ;;  %v3884_v35 = vadd.f32 %v2235_v0, %v2234_v38  ;;  %v11612_v0 = vpop.eup %6629  ;;  %v11621_v38 = vor.u32 1.1754944e-38, %v4976_v52  ;;  %v4821_v52 = vsub.f32 16.0, %v4167_v61  ;;  %v2239_v61 = vsel %vm1974_vm8, %v9276_v21, 0.0 }
 0x366   : > { %16525 = vst [vmem:[#allocation206_spill] sm:$0xff] %v11587_v44  ;;  %v11631_v46 = vpop.eup %6631  ;;  %v2238_v44 = vsel %vm1973_vm7, %v9172_v49, 0.0  ;;  %v2237_v3 = vsel %vm1972_vm13, %v9637_v57, 0.0  ;;  %6639 = vrcp.f32 %v11633_v42  ;;  %v2243_v34 = vsel %vm1978_vm1, %v9276_v21, 0.0 }
 0x367   : > { %3562 = vst.msk [vmem:[#allocation3 + $0x30] sm:$0xff] %vm388_vm4, %v3498_v18  ;;  %v16527_v18 = vld [vmem:[#allocation164_spill] sm:$0xff]  ;;  %v3885_v58 = vadd.f32 %v3884_v35, %v2236_v13  ;;  %v11636_v60 = vpop.eup %6633  ;;  %v4966_v35 = vmul.f32 %v11320_v9, %v11256_v62  ;;  %v4825_v13 = vsub.f32 16.0, %v4171_v19  ;;  %v2855_v19 = vld [vmem:[#allocation3 + $0x60] sm:$0xff]  ;;  %vm1979_vm7 = vcmp.eq.f32.partialorder %v16536_v12, %v7005_v15 }
 0x368   : > { %3561 = vst.msk [vmem:[#allocation3 + $0x28] sm:$0xff] %vm388_vm4, %v3497_v7  ;;  %3370 = vadd.xlane.f32.xlu1 %v16527_v18  ;;  %v2233_v7 = vsel %vm1968_vm2, %v9637_v57, 0.0  ;;  %v2851_v18 = vld [vmem:[#allocation3 + $0x40] sm:$0xff]  ;;  %v11646_v2 = vpop.eup %6635  ;;  %v2244_v23 = vsel %vm1979_vm7, %v9327_v36, 0.0 }
 0x369   : > { %16528 = vst [vmem:[#allocation207_spill] sm:$0xff] %v11612_v0  ;;  %v3500_v0 = vadd.f32 %v3216_v50, %v2851_v18  ;;  %v11655_v51 = vpop.eup %6637  ;;  %v11657_v18 = vmax.f32 %v4822_v43, 1.0  ;;  %v3881_v50 = vadd.f32 %v3880_v4, %v2233_v7  ;;  %v3889_v43 = vadd.f32 %v2239_v61, %v2238_v44  ;;  %v16538_v44 = vld [vmem:[#allocation171_spill] sm:$0xff]  ;;  %v3231_v40 = vpop.xlane.xlu0 %3230 }
 0x36a   : > { %16529 = vst [vmem:[#allocation209_spill] sm:$0xff] %v11631_v46  ;;  %v11672_v4 = vmax.f32 %v4821_v52, 1.0  ;;  %v11678_v7 = vmax.f32 %v4823_v63, 1.0  ;;  %vm1981_vm2 = vcmp.eq.f32.partialorder %v16538_v44, %v6992_v10  ;;  %vm1982_vm3 = vcmp.eq.f32.partialorder %v16538_v44, %v6994_v11 }
 0x36b   : > { %16530 = vst [vmem:[#allocation210_spill] sm:$0xff] %v11633_v42  ;;  %3882 = vadd.xlane.f32.xlu2 %v3881_v50  ;;  %v11684_v52 = vmax.f32 %v4825_v13, 1.0  ;;  %v4824_v61 = vsub.f32 16.0, %v4170_v6  ;;  %v4172_v50 = vld [vmem:[#allocation2 + $0x118] sm:$0xff]  ;;  %v2240_v63 = vsel %vm1975_vm15, %v9327_v36, 0.0  ;;  %v2242_v13 = vsel %vm1977_vm0, %v9172_v49, 0.0 }
 0x36c   : > { %16531 = vst [vmem:[#allocation74_spill] sm:$0xff] %v11636_v60  ;;  %v3890_v42 = vadd.f32 %v3889_v43, %v2240_v63  ;;  %v2247_v63 = vsel %vm1982_vm3, %v9276_v21, 0.0  ;;  %6641 = vrcp.f32 %v11657_v18  ;;  %v4826_v60 = vsub.f32 16.0, %v4172_v50  ;;  %v2862_v6 = vld [vmem:[#allocation3 + $0x98] sm:$0xff] }
 0x36d   : > { %16532 = vst [vmem:[#allocation79_spill] sm:$0xff] %v11646_v2  ;;  %v11666_v2 = vmul.f32 %v11347_v26, %v11284_v39  ;;  %6643 = vrcp.f32 %v11672_v4  ;;  %v3894_v50 = vadd.f32 %v2243_v34, %v2242_v13  ;;  %vm1983_vm8 = vcmp.eq.f32.partialorder %v16538_v44, %v7005_v15  ;;  %v2856_v13 = vld [vmem:[#allocation3 + $0x68] sm:$0xff]  ;;  %v16544_v34 = vld [vmem:[#allocation85_spill] sm:$0xff] }
 0x36e   : > { %3563 = vst.msk [vmem:[#allocation3 + $0x38] sm:$0xff] %vm388_vm4, %v3499_v47  ;;  %v3886_v47 = vadd.f32 %v3885_v58, %v2237_v3  ;;  %v2854_v58 = vld [vmem:[#allocation3 + $0x58] sm:$0xff]  ;;  %v3226_v3 = vpop.xlane.xlu2 %3225  ;;  %6645 = vrcp.f32 %v11678_v7  ;;  %vm1984_vm12 = vcmp.eq.f32.partialorder %v16538_v44, %v7019_v20 }
 0x36f   : > { %16533 = vst [vmem:[#allocation211_spill] sm:$0xff] %v11655_v51  ;;  %v3503_v43 = vadd.f32 %v3231_v40, %v2854_v58  ;;  %v4174_v51 = vld [vmem:[#allocation2 + $0x128] sm:$0xff]  ;;  %v11724_v58 = vpop.eup %6639  ;;  %6647 = vrcp.f32 %v11684_v52  ;;  %v4175_v40 = vld [vmem:[#allocation2 + $0x130] sm:$0xff] }
 0x370   : > { %16534 = vst [vmem:[#allocation212_spill] sm:$0xff] %v11657_v18  ;;  %3887 = vadd.xlane.f32.xlu1 %v3886_v47  ;;  %v3236_v47 = vpop.xlane.xlu1 %3235 }
 0x371   : > { %3565 = vst.msk [vmem:[#allocation3 + $0x48] sm:$0xff] %vm388_vm4, %v3501_v5  ;;  %v2853_v5 = vld [vmem:[#allocation3 + $0x50] sm:$0xff] }
 0x372   : > { %3564 = vst.msk [vmem:[#allocation3 + $0x40] sm:$0xff] %vm388_vm4, %v3500_v0  ;;  %v4967_v0 = vsub.f32 1.0, %v4966_v35  ;;  %v3502_v35 = vadd.f32 %v3226_v3, %v2853_v5  ;;  %v3504_v5 = vadd.f32 %v3236_v47, %v2855_v19  ;;  %v2246_v3 = vsel %vm1981_vm2, %v9172_v49, 0.0  ;;  %v4173_v47 = vld [vmem:[#allocation2 + $0x120] sm:$0xff] }
 0x373   : > { %16535 = vst [vmem:[#allocation213_spill] sm:$0xff] %v11672_v4  ;;  %v4828_v19 = vsub.f32 16.0, %v4174_v51  ;;  %3380 = vadd.xlane.f32.xlu2 %v16544_v34  ;;  %v4827_v18 = vsub.f32 16.0, %v4173_v47  ;;  %v4177_v51 = vld [vmem:[#allocation2 + $0x140] sm:$0xff]  ;;  %v4176_v47 = vld [vmem:[#allocation2 + $0x138] sm:$0xff]  ;;  %v4178_v4 = vld [vmem:[#allocation2 + $0x148] sm:$0xff]  ;;  %vm4971_vm2 = vweird.f32 %v11320_v9 }
 0x374   : > { %16537 = vst [vmem:[#allocation215_spill] sm:$0xff] %v11678_v7  ;;  %v11728_v46 = vmul.f32 %v11320_v9, %v4967_v0  ;;  %v3899_v0 = vadd.f32 %v2247_v63, %v2246_v3  ;;  %v3895_v3 = vadd.f32 %v3894_v50, %v2244_v23  ;;  %v4829_v63 = vsub.f32 16.0, %v4175_v40 }
 0x375   : > { %16539 = vst [vmem:[#allocation216_spill] sm:$0xff] %v11684_v52  ;;  %v11769_v23 = vmax.f32 %v4828_v19, 1.0 }
 0x376   : > { %3566 = vst.msk [vmem:[#allocation3 + $0x50] sm:$0xff] %vm388_vm4, %v3502_v35  ;;  %v2241_v35 = vsel %vm1976_vm5, %v9637_v57, 0.0  ;;  %vm4970_vm5 = vweird.f32 %v11256_v62 }
 0x377   : > { %16542 = vst [vmem:[#allocation217_spill] sm:$0xff] %v11724_v58  ;;  %v3891_v7 = vadd.f32 %v3890_v42, %v2241_v35  ;;  %v2858_v58 = vld [vmem:[#allocation3 + $0x78] sm:$0xff]  ;;  %v2248_v42 = vsel %vm1983_vm8, %v9327_v36, 0.0 }
 0x378   : > { %3568 = vst.msk [vmem:[#allocation3 + $0x60] sm:$0xff] %vm388_vm4, %v3504_v5  ;;  %v11742_v5 = vmax.f32 %v4824_v61, 1.0  ;;  %3385 = vadd.xlane.f32.xlu1 %v10931_v28  ;;  %v3241_v61 = vpop.xlane.xlu2 %3240  ;;  %v11762_v28 = vpop.eup %6641 }
 0x379   : > { %3567 = vst.msk [vmem:[#allocation3 + $0x58] sm:$0xff] %vm388_vm4, %v3503_v43  ;;  %v11745_v43 = vmax.f32 %v4826_v60, 1.0  ;;  %3892 = vadd.xlane.f32.xlu0 %v3891_v7  ;;  %v16546_v60 = vld [vmem:[#allocation121_spill] sm:$0xff]  ;;  %v3505_v35 = vadd.f32 %v3241_v61, %v2856_v13  ;;  %v3251_v34 = vpop.xlane.xlu1 %3250  ;;  %v3900_v7 = vadd.f32 %v3899_v0, %v2248_v42  ;;  %v11766_v50 = vpop.eup %6643  ;;  %v11777_v13 = vmax.f32 %v4827_v18, 1.0 }
 0x37a   : > { %16543 = vst [vmem:[#allocation219_spill] sm:$0xff] %v11742_v5  ;;  %vm1985_vm10 = vcmp.eq.f32.partialorder %v16546_v60, %v6992_v10  ;;  %vm1986_vm11 = vcmp.eq.f32.partialorder %v16546_v60, %v6994_v11  ;;  %6649 = vrcp.f32 %v11742_v5  ;;  %v3507_v52 = vadd.f32 %v3251_v34, %v2858_v58  ;;  %v11775_v40 = vpop.eup %6645  ;;  %v16554_v5 = vld [vmem:[#allocation180_spill] sm:$0xff] }
 0x37b   : > { %16545 = vst [vmem:[#allocation32_spill] sm:$0xff] %v11745_v43  ;;  %v4831_v61 = vsub.f32 16.0, %v4177_v51  ;;  %v2250_v19 = vsel %vm1985_vm10, %v9172_v49, 0.0  ;;  %v2251_v58 = vsel %vm1986_vm11, %v9276_v21, 0.0  ;;  %v11788_v12 = vpop.eup %6647  ;;  %6651 = vrcp.f32 %v11745_v43 }
 0x37c   : > { %16547 = vst [vmem:[#allocation214_spill] sm:$0xff] %v11762_v28  ;;  %v2245_v28 = vsel %vm1980_vm9, %v9637_v57, 0.0  ;;  %v4830_v18 = vsub.f32 16.0, %v4176_v47  ;;  %v2249_v51 = vsel %vm1984_vm12, %v9637_v57, 0.0  ;;  %v11796_v42 = vmax.f32 %v4829_v63, 1.0 }
 0x37d   : > { %16548 = vst [vmem:[#allocation26_spill] sm:$0xff] %v11766_v50  ;;  %v3896_v0 = vadd.f32 %v3895_v3, %v2245_v28  ;;  %v3901_v34 = vadd.f32 %v3900_v7, %v2249_v51  ;;  %vm1989_vm13 = vcmp.eq.f32.partialorder %v16554_v5, %v6992_v10  ;;  %vm1990_vm14 = vcmp.eq.f32.partialorder %v16554_v5, %v6994_v11  ;;  %v16556_v3 = vld [vmem:[#allocation155_spill] sm:$0xff]  ;;  %v16639_v50 = vld [vmem:[#allocation196_spill] sm:$0xff] }
 0x37e   : > { %16549 = vst [vmem:[#allocation148_spill] sm:$0xff] %v11769_v23  ;;  %6653 = vrcp.f32 %v11769_v23  ;;  %v4832_v47 = vsub.f32 16.0, %v4178_v4  ;;  %vm1987_vm15 = vcmp.eq.f32.partialorder %v16546_v60, %v7005_v15  ;;  %v11806_v44 = vmax.f32 %v4831_v61, 1.0  ;;  %v4179_v7 = vld [vmem:[#allocation2 + $0x150] sm:$0xff] }
 0x37f   : > { %16550 = vst [vmem:[#allocation146_spill] sm:$0xff] %v11775_v40  ;;  %3897 = vadd.xlane.f32.xlu2 %v3896_v0  ;;  %6655 = vrcp.f32 %v11777_v13  ;;  %vm1993_vm0 = vcmp.eq.f32.partialorder %v16556_v3, %v6992_v10  ;;  %vm1994_vm1 = vcmp.eq.f32.partialorder %v16556_v3, %v6994_v11  ;;  %v11814_v63 = vmax.f32 %v4830_v18, 1.0  ;;  %v3246_v0 = vpop.xlane.xlu0 %3245  ;;  %v16638_v40 = vld [vmem:[#allocation154_spill] sm:$0xff] }
 0x380   : > { %16551 = vst [vmem:[#allocation169_spill] sm:$0xff] %v11777_v13  ;;  %3902 = vadd.xlane.f32.xlu1 %v3901_v34  ;;  %v11812_v28 = vpop.eup %6649  ;;  %v2254_v61 = vsel %vm1989_vm13, %v9172_v49, 0.0  ;;  %6657 = vrcp.f32 %v11796_v42  ;;  %vm1988_vm3 = vcmp.eq.f32.partialorder %v16546_v60, %v7019_v20  ;;  %v4181_v34 = vld [vmem:[#allocation2 + $0x160] sm:$0xff]  ;;  %v4833_v13 = vsub.f32 16.0, %v4179_v7 }
 0x381   : > { %3569 = vst.msk [vmem:[#allocation3 + $0x68] sm:$0xff] %vm388_vm4, %v3505_v35  ;;  %v4180_v35 = vld [vmem:[#allocation2 + $0x158] sm:$0xff]  ;;  %3390 = vadd.xlane.f32.xlu0 %v11043_v59  ;;  %v2252_v59 = vsel %vm1987_vm15, %v9327_v36, 0.0  ;;  %v11836_v51 = vpop.eup %6651  ;;  %6659 = vrcp.f32 %v11806_v44  ;;  %vm1991_vm7 = vcmp.eq.f32.partialorder %v16554_v5, %v7005_v15  ;;  %v11859_v43 = vadd.f32 %v11320_v9, %v11728_v46  ;;  %v2859_v46 = vld [vmem:[#allocation3 + $0x80] sm:$0xff] }
 0x382   : > { %16552 = vst [vmem:[#allocation170_spill] sm:$0xff] %v11788_v12  ;;  %v4834_v4 = vsub.f32 16.0, %v4180_v35  ;;  %v11838_v35 = vmax.f32 %v4832_v47, 1.0  ;;  %6661 = vrcp.f32 %v11814_v63  ;;  %v2253_v7 = vsel %vm1988_vm3, %v9637_v57, 0.0  ;;  %vm11945_vm3 = vmor %vm4970_vm5, %vm4971_vm2 }
 0x383   : > { %3571 = vst.msk [vmem:[#allocation3 + $0x78] sm:$0xff] %vm388_vm4, %v3507_v52  ;;  %v3904_v52 = vadd.f32 %v2251_v58, %v2250_v19  ;;  %v2255_v19 = vsel %vm1990_vm14, %v9276_v21, 0.0  ;;  %v16559_v58 = vsub.f32 1.0, %v11666_v2  ;;  %v2258_v2 = vsel %vm1993_vm0, %v9172_v49, 0.0 }
 0x384   : > { %16553 = vst [vmem:[#allocation34_spill] sm:$0xff] %v11796_v42  ;;  %v2857_v42 = vld [vmem:[#allocation3 + $0x70] sm:$0xff]  ;;  %v3909_v47 = vadd.f32 %v2255_v19, %v2254_v61  ;;  %v4835_v12 = vsub.f32 16.0, %v4181_v34  ;;  %v4184_v61 = vld [vmem:[#allocation2 + $0x178] sm:$0xff]  ;;  %vm1995_vm8 = vcmp.eq.f32.partialorder %v16556_v3, %v7005_v15  ;;  %6663 = vrcp.f32 %v11838_v35 }
 0x385   : > { %16555 = vst [vmem:[#allocation220_spill] sm:$0xff] %v11806_v44  ;;  %v4953_v18 = vmul.f32 %v11347_v26, %v16559_v58  ;;  %v3905_v23 = vadd.f32 %v3904_v52, %v2252_v59  ;;  %v2259_v58 = vsel %vm1994_vm1, %v9276_v21, 0.0  ;;  %v11852_v52 = vpop.eup %6653  ;;  %v11855_v59 = vmax.f32 %v4834_v4, 1.0 }
 0x386   : > { %16557 = vst [vmem:[#allocation221_spill] sm:$0xff] %v11812_v28  ;;  %v11865_v44 = vpop.eup %6655  ;;  %v3506_v19 = vadd.f32 %v3246_v0, %v2857_v42  ;;  %v3914_v4 = vadd.f32 %v2259_v58, %v2258_v2  ;;  %vm4955_vm9 = vweird.f32 %v11284_v39  ;;  %v3266_v28 = vpop.xlane.xlu1 %3265  ;;  %vm1992_vm10 = vcmp.eq.f32.partialorder %v16554_v5, %v7019_v20 }
 0x387   : > { %16558 = vst [vmem:[#allocation222_spill] sm:$0xff] %v11814_v63  ;;  %v3256_v63 = vpop.xlane.xlu2 %3255  ;;  %3395 = vadd.xlane.f32.xlu2 %v11055_v14  ;;  %v3906_v60 = vadd.f32 %v3905_v23, %v2253_v7  ;;  %v2256_v42 = vsel %vm1991_vm7, %v9327_v36, 0.0  ;;  %v11878_v0 = vpop.eup %6657  ;;  %v11880_v34 = vmax.f32 %v4833_v13, 1.0  ;;  %vm1996_vm11 = vcmp.eq.f32.partialorder %v16556_v3, %v7019_v20  ;;  %v4182_v14 = vld [vmem:[#allocation2 + $0x168] sm:$0xff] }
 0x388   : > { %16560 = vst [vmem:[#allocation224_spill] sm:$0xff] %v11836_v51  ;;  %v4183_v51 = vld [vmem:[#allocation2 + $0x170] sm:$0xff]  ;;  %3400 = vadd.xlane.f32.xlu1 %v11062_v1  ;;  %v3910_v58 = vadd.f32 %v3909_v47, %v2256_v42  ;;  %v4838_v23 = vsub.f32 16.0, %v4184_v61  ;;  %v2260_v7 = vsel %vm1995_vm8, %v9327_v36, 0.0  ;;  %v16567_v13 = vld [vmem:[#allocation134_spill] sm:$0xff]  ;;  %v11896_v1 = vmax.f32 %v4835_v12, 1.0 }
 0x389   : > { %16561 = vst [vmem:[#allocation225_spill] sm:$0xff] %v11838_v35  ;;  %v4837_v2 = vsub.f32 16.0, %v4183_v51  ;;  %3907 = vadd.xlane.f32.xlu0 %v3906_v60  ;;  %vm1997_vm12 = vcmp.eq.f32.partialorder %v16567_v13, %v6992_v10  ;;  %vm1998_vm13 = vcmp.eq.f32.partialorder %v16567_v13, %v6994_v11  ;;  %v11894_v51 = vpop.eup %6659  ;;  %v3508_v47 = vadd.f32 %v3256_v63, %v2859_v46  ;;  %v3261_v46 = vpop.xlane.xlu0 %3260 }
 0x38a   : > { %16562 = vst [vmem:[#allocation29_spill] sm:$0xff] %v11852_v52  ;;  %v2861_v52 = vld [vmem:[#allocation3 + $0x90] sm:$0xff]  ;;  %v3915_v42 = vadd.f32 %v3914_v4, %v2260_v7  ;;  %v11898_v61 = vpop.eup %6661  ;;  %6665 = vrcp.f32 %v11855_v59  ;;  %v16571_v60 = vand.u32 2147483647, %v16458_v16  ;;  %v4954_v12 = vadd.f32 %v11347_v26, %v4953_v18 }
 0x38b   : > { %16563 = vst [vmem:[#allocation226_spill] sm:$0xff] %v11855_v59  ;;  %vm4956_vm0 = vweird.f32 %v11347_v26  ;;  %v2257_v16 = vsel %vm1992_vm10, %v9637_v57, 0.0  ;;  %v4836_v4 = vsub.f32 16.0, %v4182_v14  ;;  %v2262_v18 = vsel %vm1997_vm12, %v9172_v49, 0.0  ;;  %v11936_v7 = vpop.eup %6663 }
 0x38c   : > { %16564 = vst [vmem:[#allocation30_spill] sm:$0xff] %v11865_v44  ;;  %vm11903_vm14 = vcmp.eq.f32.partialorder %v16571_v60, 8.507059e+37  ;;  %6667 = vrcp.f32 %v11880_v34  ;;  %v11939_v5 = vmax.f32 %v4838_v23, 1.0  ;;  %v3911_v14 = vadd.f32 %v3910_v58, %v2257_v16  ;;  %v16586_v58 = vld [vmem:[#allocation36_spill] sm:$0xff]  ;;  %vm11977_vm8 = vmor %vm4955_vm9, %vm4956_vm0 }
 0x38d   : > { %16565 = vst [vmem:[#allocation229_spill] sm:$0xff] %v11878_v0  ;;  %v16574_v0 = vand.u32 2147483647, %v11256_v62  ;;  %6669 = vrcp.f32 %v11896_v1  ;;  %v4973_v23 = vsel %vm11945_vm3, %v11320_v9, %v11859_v43  ;;  %v16585_v62 = vand.u32 2147483648, %v11284_v39  ;;  %v4185_v43 = vld [vmem:[#allocation2 + $0x180] sm:$0xff] }
 0x38e   : > { %16566 = vst [vmem:[#allocation227_spill] sm:$0xff] %v11880_v34  ;;  %v4186_v34 = vld [vmem:[#allocation2 + $0x188] sm:$0xff]  ;;  %vm1999_vm2 = vcmp.eq.f32.partialorder %v16567_v13, %v7005_v15  ;;  %vm2001_vm5 = vcmp.eq.f32.partialorder %v16586_v58, %v6992_v10  ;;  %vm2002_vm7 = vcmp.eq.f32.partialorder %v16586_v58, %v6994_v11  ;;  %v11971_v9 = vmax.f32 %v4836_v4, 1.0 }
 0x38f   : > { %3570 = vst.msk [vmem:[#allocation3 + $0x70] sm:$0xff] %vm388_vm4, %v3506_v19  ;;  %v3510_v19 = vadd.f32 %v3266_v28, %v2861_v52  ;;  %vm11909_vm15 = vcmp.eq.f32.partialorder %v16574_v0, 8.507059e+37  ;;  %v16577_v28 = vand.u32 2147483647, %v11284_v39  ;;  %v11925_v52 = vmax.f32 %v4837_v2, 1.0  ;;  %3912 = vadd.xlane.f32.xlu2 %v3911_v14 }
 0x390   : > { %16568 = vst [vmem:[#allocation147_spill] sm:$0xff] %v11894_v51  ;;  %v2263_v0 = vsel %vm1998_vm13, %v9276_v21, 0.0  ;;  %v4962_v60 = vor.u32 1.1754944e-38, %v16585_v62  ;;  %v11985_v16 = vpop.eup %6665  ;;  %v4958_v4 = vsel %vm11977_vm8, %v11347_v26, %v4954_v12  ;;  %vm2000_vm9 = vcmp.eq.f32.partialorder %v16567_v13, %v7019_v20  ;;  %v645_v51 = vld [vmem:[%s12235_s20] sm:$0xff] }
 0x391   : > { %16569 = vst [vmem:[#allocation175_spill] sm:$0xff] %v11896_v1  ;;  %vm11917_vm1 = vcmp.eq.f32.partialorder %v16577_v28, 8.507059e+37  ;;  %v2860_v28 = vld [vmem:[#allocation3 + $0x88] sm:$0xff]  ;;  %v3919_v3 = vadd.f32 %v2263_v0, %v2262_v18  ;;  %6671 = vrcp.f32 %v11925_v52  ;;  %3405 = vadd.xlane.f32.xlu0 %v11192_v30  ;;  %v4187_v18 = vld [vmem:[#allocation2 + $0x190] sm:$0xff]  ;;  %v2264_v0 = vsel %vm1999_vm2, %v9327_v36, 0.0  ;;  %v3276_v63 = vpop.xlane.xlu0 %3275 }
 0x392   : > { %16570 = vst [vmem:[#allocation230_spill] sm:$0xff] %v11898_v61  ;;  %6673 = vrcp.f32 %v11939_v5  ;;  %v3509_v39 = vadd.f32 %v3261_v46, %v2860_v28  ;;  %v2266_v2 = vsel %vm2001_vm5, %v9172_v49, 0.0  ;;  %v2267_v30 = vsel %vm2002_vm7, %v9276_v21, 0.0  ;;  %v12006_v26 = vpop.eup %6667  ;;  %v4189_v28 = vld [vmem:[#allocation2 + $0x1a0] sm:$0xff]  ;;  %v646_v1 = vld [vmem:[%s12235_s20 + $0x8] sm:$0xff]  ;;  %v12282_v61 = vld [vmem:[#allocation3 + $0x18] sm:$0xff] }
 0x393   : > { %16580 = vst [vmem:[#allocation45_spill] sm:$0xff] %v11925_v52  ;;  %v4839_v12 = vsub.f32 16.0, %v4185_v43  ;;  %v3920_v46 = vadd.f32 %v3919_v3, %v2264_v0  ;;  %v12017_v62 = vpop.eup %6669  ;;  %6675 = vrcp.f32 %v11971_v9  ;;  %v16594_v3 = vsel %vm11705_vm6, %v11264_v37, %v11649_v45  ;;  %v4188_v52 = vld [vmem:[#allocation2 + $0x198] sm:$0xff]  ;;  %v3281_v37 = vpop.xlane.xlu1 %3280 }
 0x394   : > { %3572 = vst.msk [vmem:[#allocation3 + $0x80] sm:$0xff] %vm388_vm4, %v3508_v47  ;;  %v2261_v47 = vsel %vm1996_vm11, %v9637_v57, 0.0  ;;  %v12028_v43 = vsel %vm11903_vm14, %v11593_v25, %v16594_v3  ;;  %v4841_v0 = vsub.f32 16.0, %v4187_v18  ;;  %v2265_v25 = vsel %vm2000_vm9, %v9637_v57, 0.0 }
 0x395   : > { %16581 = vst [vmem:[#allocation231_spill] sm:$0xff] %v11936_v7  ;;  %v3916_v59 = vadd.f32 %v3915_v42, %v2261_v47  ;;  %v16590_v42 = vld [vmem:[#allocation200_spill] sm:$0xff]  ;;  %vm2003_vm6 = vcmp.eq.f32.partialorder %v16586_v58, %v7005_v15  ;;  %v4981_v35 = vmul.f32 %v11327_v22, %v11266_v53  ;;  %v12055_v13 = vmax.f32 %v4839_v12, 1.0 }
 0x396   : > { %16582 = vst [vmem:[#allocation80_spill] sm:$0xff] %v11939_v5  ;;  %vm2005_vm10 = vcmp.eq.f32.partialorder %v16590_v42, %v6992_v10  ;;  %vm2006_vm11 = vcmp.eq.f32.partialorder %v16590_v42, %v6994_v11  ;;  %vm2007_vm12 = vcmp.eq.f32.partialorder %v16590_v42, %v7005_v15  ;;  %v3921_v18 = vadd.f32 %v3920_v46, %v2265_v25 }
 0x397   : > { %3574 = vst.msk [vmem:[#allocation3 + $0x90] sm:$0xff] %vm388_vm4, %v3510_v19  ;;  %3917 = vadd.xlane.f32.xlu1 %v3916_v59  ;;  %v4840_v59 = vsub.f32 16.0, %v4186_v34  ;;  %v3271_v34 = vpop.xlane.xlu2 %3270  ;;  %v2270_v14 = vsel %vm2005_vm10, %v9172_v49, 0.0  ;;  %v2271_v47 = vsel %vm2006_vm11, %v9276_v21, 0.0  ;;  %v12033_v19 = vsel %vm11909_vm15, %v11621_v38, %v4973_v23  ;;  %v12045_v45 = vpop.eup %6671  ;;  %3410 = vadd.xlane.f32.xlu2 %v11195_v56 }
 0x398   : > { %16587 = vst [vmem:[#allocation46_spill] sm:$0xff] %v11971_v9  ;;  %v2864_v9 = vld [vmem:[#allocation3 + $0xa8] sm:$0xff]  ;;  %v3924_v38 = vadd.f32 %v2267_v30, %v2266_v2  ;;  %v3929_v23 = vadd.f32 %v2271_v47, %v2270_v14  ;;  %vm2004_vm13 = vcmp.eq.f32.partialorder %v16586_v58, %v7019_v20  ;;  %v3511_v2 = vadd.f32 %v3271_v34, %v2862_v6  ;;  %v12108_v58 = vld [vmem:[#allocation2 + $0x1b8] sm:$0xff] }
 0x399   : > { %16591 = vst [vmem:[#allocation68_spill] sm:$0xff] %v11985_v16  ;;  %v12047_v44 = vmax.f32 %v4840_v59, 1.0  ;;  %v4842_v59 = vsub.f32 16.0, %v4188_v52  ;;  %v3513_v30 = vadd.f32 %v3281_v37, %v2864_v9  ;;  %v2268_v14 = vsel %vm2003_vm6, %v9327_v36, 0.0  ;;  %3922 = vadd.xlane.f32.xlu0 %v3921_v18  ;;  %v2863_v37 = vld [vmem:[#allocation3 + $0xa0] sm:$0xff] }
 0x39a   : > { %16592 = vst [vmem:[#allocation151_spill] sm:$0xff] %v12006_v26  ;;  %v12066_v12 = vmax.f32 %v4841_v0, 1.0  ;;  %v3925_v47 = vadd.f32 %v3924_v38, %v2268_v14  ;;  %vm2008_vm14 = vcmp.eq.f32.partialorder %v16590_v42, %v7019_v20  ;;  %v2272_v56 = vsel %vm2007_vm12, %v9327_v36, 0.0  ;;  %v16606_v14 = vld [vmem:[#allocation129_spill] sm:$0xff] }
 0x39b   : > { %3573 = vst.msk [vmem:[#allocation3 + $0x88] sm:$0xff] %vm388_vm4, %v3509_v39  ;;  %v12037_v39 = vsel %vm11917_vm1, %v4962_v60, %v4958_v4  ;;  %v12053_v60 = vpop.eup %6673  ;;  %v4843_v4 = vsub.f32 16.0, %v4189_v28  ;;  %6677 = vrcp.f32 %v12047_v44  ;;  %v4982_v9 = vsub.f32 1.0, %v4981_v35  ;;  %v12102_v35 = vld [vmem:[#allocation2 + $0x1a8] sm:$0xff] }
 0x39c   : > { %16593 = vst [vmem:[#allocation187_spill] sm:$0xff] %v12017_v62  ;;  %v12074_v52 = vpop.eup %6675  ;;  %v3930_v34 = vadd.f32 %v3929_v23, %v2272_v56  ;;  %6679 = vrcp.f32 %v12055_v13  ;;  %v12085_v28 = vstv %s4136_s17  ;;  %v4996_v3 = vmul.f32 %v11355_v31, %v11290_v55  ;;  %v2866_v62 = vld [vmem:[#allocation3 + $0xb8] sm:$0xff] }
 0x39d   : > { %16595 = vst [vmem:[#allocation47_spill] sm:$0xff] %v12045_v45  ;;  %v12083_v46 = vmax.f32 %v4843_v4, 1.0  ;;  %v12090_v0 = vmax.f32 %v4842_v59, 1.0  ;;  %v4989_v6 = vand.u32 2147483647, %v11266_v53  ;;  %v2269_v25 = vsel %vm2004_vm13, %v9637_v57, 0.0 }
 0x39e   : > { %16596 = vst [vmem:[#allocation232_spill] sm:$0xff] %v12047_v44  ;;  %v2273_v38 = vsel %vm2008_vm14, %v9637_v57, 0.0  ;;  %6681 = vrcp.f32 %v12066_v12  ;;  %v4991_v23 = vand.u32 2147483648, %v11266_v53  ;;  %v5011_v4 = vmul.f32 %v11375_v48, %v11303_v8 }
 0x39f   : > { %16597 = vst [vmem:[#allocation57_spill] sm:$0xff] %v12053_v60  ;;  %3415 = vadd.xlane.f32.xlu1 %v11210_v32  ;;  %v12078_v32 = vmul.f32 %v12053_v60, %v11939_v5  ;;  %v3286_v18 = vpop.xlane.xlu2 %3285  ;;  %v3926_v59 = vadd.f32 %v3925_v47, %v2269_v25  ;;  %v5026_v42 = vmul.f32 %v11370_v24, %v16606_v14  ;;  %6683 = vrcp.f32 %v12083_v46  ;;  %v12124_v25 = vpop.xlane.xlu0 %3290 }
 0x3a0   : > { %16598 = vst [vmem:[#allocation62_spill] sm:$0xff] %v12055_v13  ;;  %v3931_v56 = vadd.f32 %v3930_v34, %v2273_v38  ;;  %vm4985_vm15 = vweird.f32 %v11266_v53  ;;  %v3512_v44 = vadd.f32 %v3276_v63, %v2863_v37  ;;  %v3296_v13 = vpop.xlane.xlu1 %3295  ;;  %6685 = vrcp.f32 %v12090_v0  ;;  %v647_v53 = vld [vmem:[%s12235_s20 + $0x10] sm:$0xff] }
 0x3a1   : > { %16599 = vst [vmem:[#allocation233_spill] sm:$0xff] %v12066_v12  ;;  %v4997_v12 = vsub.f32 1.0, %v4996_v3  ;;  %3927 = vadd.xlane.f32.xlu2 %v3926_v59  ;;  %v12115_v5 = vpop.eup %6677  ;;  %vm12119_vm0 = vcmp.eq.f32.partialorder %v4989_v6, 8.507059e+37  ;;  %v5021_v34 = vand.u32 2147483648, %v11303_v8  ;;  %v4992_v3 = vor.u32 1.1754944e-38, %v4991_v23  ;;  %v16611_v59 = vld [vmem:[#allocation17_spill] sm:$0xff] }
 0x3a2   : > { %16600 = vst [vmem:[#allocation67_spill] sm:$0xff] %v12074_v52  ;;  %v12126_v38 = vpop.eup %6679  ;;  %v5012_v37 = vsub.f32 1.0, %v5011_v4  ;;  %3420 = vadd.xlane.f32.xlu0 %v16611_v59  ;;  %v16612_v6 = vld [vmem:[#allocation145_spill] sm:$0xff]  ;;  %vm4986_vm3 = vweird.f32 %v11327_v22  ;;  %v5004_v47 = vand.u32 2147483647, %v11290_v55  ;;  %vm5015_vm7 = vweird.f32 %v11303_v8 }
 0x3a3   : > { %16601 = vst [vmem:[#allocation234_spill] sm:$0xff] %v12078_v32  ;;  %vm2009_vm1 = vcmp.eq.f32.partialorder %v16612_v6, %v6992_v10  ;;  %v5019_v23 = vand.u32 2147483647, %v11303_v8  ;;  %v4998_v4 = vmul.f32 %v11355_v31, %v4997_v12  ;;  %vm2010_vm2 = vcmp.eq.f32.partialorder %v16612_v6, %v6994_v11  ;;  %v2867_v59 = vld [vmem:[#allocation3 + $0xc0] sm:$0xff]  ;;  %vm12157_vm10 = vmor %vm4985_vm15, %vm4986_vm3 }
 0x3a4   : > { %3575 = vst.msk [vmem:[#allocation3 + $0x98] sm:$0xff] %vm388_vm4, %v3511_v2  ;;  %vm2011_vm5 = vcmp.eq.f32.partialorder %v16612_v6, %v7005_v15  ;;  %vm5000_vm8 = vweird.f32 %v11290_v55  ;;  %v12166_v32 = vld [vmem:[#allocation3] sm:$0xff]  ;;  %vm12171_vm11 = vcmp.eq.f32.partialorder %v5004_v47, 8.507059e+37  ;;  %vm5030_vm9 = vweird.f32 %v16606_v14 }
 0x3a5   : > { %16602 = vst [vmem:[#allocation65_spill] sm:$0xff] %v12083_v46  ;;  %v2865_v46 = vld [vmem:[#allocation3 + $0xb0] sm:$0xff]  ;;  %vm12179_vm6 = vcmp.eq.f32.partialorder %v5019_v23, 8.507059e+37  ;;  %vm5001_vm12 = vweird.f32 %v11355_v31  ;;  %v16624_v47 = vld [vmem:[#allocation173_spill] sm:$0xff]  ;;  %vm5016_vm13 = vweird.f32 %v11375_v48  ;;  %vm2012_vm14 = vcmp.eq.f32.partialorder %v16612_v6, %v7019_v20 }
 0x3a6   : > { %3577 = vst.msk [vmem:[#allocation3 + $0xa8] sm:$0xff] %vm388_vm4, %v3513_v30  ;;  %v4983_v30 = vmul.f32 %v11327_v22, %v4982_v9  ;;  %v16626_v23 = vld [vmem:[#allocation157_spill] sm:$0xff]  ;;  %vm12215_vm3 = vmor %vm5000_vm8, %vm5001_vm12  ;;  %v5071_v41 = vmul.f32 %v16639_v50, %v16638_v40  ;;  %vm5076_vm12 = vweird.f32 %v16639_v50 }
 0x3a7   : > { %16603 = vst [vmem:[#allocation81_spill] sm:$0xff] %v12090_v0  ;;  %3932 = vadd.xlane.f32.xlu1 %v3931_v56  ;;  %v5027_v56 = vsub.f32 1.0, %v5026_v42  ;;  %v12136_v0 = vpop.eup %6681  ;;  %v5006_v42 = vand.u32 2147483648, %v11290_v55  ;;  %v5064_v26 = vand.u32 2147483647, %v16626_v23 }
 0x3a8   : > { %16604 = vst [vmem:[#allocation91_spill] sm:$0xff] %v12102_v35  ;;  %v4984_v2 = vadd.f32 %v11327_v22, %v4983_v30  ;;  %v12147_v30 = vor.u32 1.1754944e-38, %v5021_v34  ;;  %v12151_v63 = vpop.eup %6683  ;;  %v5034_v34 = vand.u32 2147483647, %v16606_v14 }
 0x3a9   : > { %16605 = vst [vmem:[#allocation20_spill] sm:$0xff] %v12108_v58  ;;  %v12164_v60 = vpop.eup %6685  ;;  %v5028_v45 = vmul.f32 %v11370_v24, %v5027_v56  ;;  %3425 = vadd.xlane.f32.xlu2 %v16624_v47  ;;  %v12189_v56 = vld [vmem:[#allocation3 + $0x10] sm:$0xff]  ;;  %v5007_v12 = vor.u32 1.1754944e-38, %v5006_v42 }
 0x3aa   : > { %16607 = vst [vmem:[#allocation235_spill] sm:$0xff] %v12115_v5  ;;  %v5036_v5 = vand.u32 2147483648, %v16606_v14  ;;  %vm12204_vm15 = vcmp.eq.f32.partialorder %v5034_v34, 8.507059e+37  ;;  %v16631_v34 = vld [vmem:[#allocation190_spill] sm:$0xff] }
 0x3ab   : > { %16610 = vst [vmem:[#allocation59_spill] sm:$0xff] %v12126_v38  ;;  %v3514_v38 = vadd.f32 %v3286_v18, %v2865_v46  ;;  %v4999_v18 = vadd.f32 %v11355_v31, %v4998_v4  ;;  %v5029_v9 = vadd.f32 %v11370_v24, %v5028_v45  ;;  %v4729_v45 = vsub.f32 %v12085_v28, %v12189_v56  ;;  %v2870_v46 = vld [vmem:[#allocation3 + $0xd8] sm:$0xff] }
 0x3ac   : > { %3576 = vst.msk [vmem:[#allocation3 + $0xa0] sm:$0xff] %vm388_vm4, %v3512_v44  ;;  %v12144_v44 = vld [vmem:[#allocation3 + $0x8] sm:$0xff]  ;;  %v5049_v7 = vand.u32 2147483647, %v16631_v34 }
 0x3ad   : > { %16613 = vst [vmem:[#allocation69_spill] sm:$0xff] %v12136_v0  ;;  %v5013_v0 = vmul.f32 %v11375_v48, %v5012_v37  ;;  %v4728_v37 = vsub.f32 %v12085_v28, %v12144_v44  ;;  %v4964_v58 = vmul.f32 %v12037_v39, %v4729_v45  ;;  %v4730_v39 = vsub.f32 %v12085_v28, %v12282_v61 }
 0x3ae   : > { %16614 = vst [vmem:[#allocation60_spill] sm:$0xff] %v12144_v44 }
 0x3af   : > { %16615 = vst [vmem:[#allocation70_spill] sm:$0xff] %v12151_v63  ;;  %v4988_v63 = vsel %vm12157_vm10, %v11327_v22, %v4984_v2  ;;  %v3516_v22 = vadd.f32 %v3296_v13, %v2867_v59  ;;  %v12186_v2 = vpop.xlane.xlu2 %3300  ;;  %3430 = vadd.xlane.f32.xlu1 %v11400_v17  ;;  %v4727_v13 = vsub.f32 %v12085_v28, %v12166_v32  ;;  %v5037_v59 = vor.u32 1.1754944e-38, %v5036_v5  ;;  %v12209_v17 = vpop.xlane.xlu1 %3310 }
 0x3b0   : > { %16618 = vst [vmem:[#allocation75_spill] sm:$0xff] %v12164_v60  ;;  %v5056_v60 = vmul.f32 %v11402_v29, %v16626_v23  ;;  %v5014_v4 = vadd.f32 %v11375_v48, %v5013_v0  ;;  %v5066_v0 = vand.u32 2147483648, %v16626_v23  ;;  %v12228_v5 = vsel %vm2009_vm1, %v9172_v49, 0.0  ;;  %vm12250_vm1 = vmor %vm5015_vm7, %vm5016_vm13 }
 0x3b1   : > { %16619 = vst [vmem:[#allocation87_spill] sm:$0xff] %v12166_v32  ;;  %v4949_v55 = vmul.f32 %v12028_v43, %v4728_v37  ;;  %v5051_v37 = vand.u32 2147483648, %v16631_v34  ;;  %v4934_v8 = vmul.f32 %v11617_v33, %v4727_v13  ;;  %v12284_v33 = vld [vmem:[#allocation3 + $0x20] sm:$0xff]  ;;  %v3515_v13 = vadd.f32 %v12124_v25, %v2866_v62  ;;  %v2869_v32 = vld [vmem:[#allocation3 + $0xd0] sm:$0xff] }
 0x3b2   : > { %3578 = vst.msk [vmem:[#allocation3 + $0xb0] sm:$0xff] %vm388_vm4, %v3514_v38  ;;  %v12201_v38 = vsel %vm12119_vm0, %v4992_v3, %v4988_v63  ;;  %vm5031_vm0 = vweird.f32 %v11370_v24  ;;  %v12222_v63 = vpop.xlane.xlu0 %3305  ;;  %v5003_v3 = vsel %vm12215_vm3, %v11355_v31, %v4999_v18  ;;  %v5057_v43 = vsub.f32 1.0, %v5056_v60 }
 0x3b3   : > { %16625 = vst [vmem:[#allocation77_spill] sm:$0xff] %v12189_v56  ;;  %v12259_v31 = vsel %vm2010_vm2, %v9276_v21, 0.0  ;;  %v12265_v18 = vsel %vm2011_vm5, %v9327_v36, 0.0  ;;  %v5018_v60 = vsel %vm12250_vm1, %v11375_v48, %v5014_v4  ;;  %vm12275_vm7 = vmor %vm5030_vm9, %vm5031_vm0  ;;  %v12288_v48 = vsel %vm12171_vm11, %v5007_v12, %v5003_v3  ;;  %v653_v36 = vld [vmem:[%s12235_s20 + $0x40] sm:$0xff] }
 0x3b4   : > { %3580 = vst.msk [vmem:[#allocation3 + $0xc0] sm:$0xff] %vm388_vm4, %v3516_v22  ;;  %v16632_v22 = vld [vmem:[#allocation183_spill] sm:$0xff]  ;;  %v5033_v16 = vsel %vm12275_vm7, %v11370_v24, %v5029_v9  ;;  %v12293_v14 = vor.u32 1.1754944e-38, %v5066_v0  ;;  %v5881_v4 = vmul.f32 %v4949_v55, %v646_v1  ;;  %vm5060_vm2 = vweird.f32 %v16626_v23 }
 0x3b5   : > { %v5041_v52 = vmul.f32 %v16632_v22, %v16631_v34  ;;  %16637 = vst [vmem:[#allocation105_spill] sm:$0xff] %v12282_v61  ;;  %v12304_v12 = vsel %vm12179_vm6, %v12147_v30, %v5018_v60  ;;  %v5058_v24 = vmul.f32 %v11402_v29, %v5057_v43  ;;  %v12307_v9 = vor.u32 1.1754944e-38, %v5051_v37  ;;  %v2868_v30 = vld [vmem:[#allocation3 + $0xc8] sm:$0xff]  ;;  %v16659_v60 = vld [vmem:[#allocation132_spill] sm:$0xff] }
 0x3b6   : > { %3579 = vst.msk [vmem:[#allocation3 + $0xb8] sm:$0xff] %vm388_vm4, %v3515_v13  ;;  %v5880_v62 = vmul.f32 %v4934_v8, %v645_v51  ;;  %vm5045_vm5 = vweird.f32 %v16631_v34  ;;  %v5081_v25 = vand.u32 2147483648, %v16638_v40  ;;  %v12319_v55 = vld [vmem:[#allocation3 + $0x28] sm:$0xff]  ;;  %v12323_v45 = vsel %vm12204_vm15, %v5037_v59, %v5033_v16  ;;  %v16640_v51 = vld [vmem:[#allocation160_spill] sm:$0xff] }
 0x3b7   : > { %v5042_v35 = vsub.f32 1.0, %v5041_v52  ;;  %v4731_v52 = vsub.f32 %v12085_v28, %v12284_v33  ;;  %v12317_v0 = vpop.xlane.xlu2 %3315  ;;  %vm5046_vm8 = vweird.f32 %v16632_v22  ;;  %v5101_v3 = vmul.f32 %v11445_v27, %v16640_v51  ;;  %v12340_v47 = vpop.xlane.xlu1 %3325  ;;  %v16668_v61 = vld [vmem:[#allocation40_spill] sm:$0xff] }
 0x3b8   : > { %v12332_v43 = vsel %vm2012_vm14, %v9637_v57, 0.0  ;;  %v5945_v37 = vsel %vm388_vm4, %v5881_v4, 0.0  ;;  %v5882_v8 = vmul.f32 %v4964_v58, %v647_v53  ;;  %vm12335_vm10 = vcmp.eq.f32.partialorder %v5064_v26, 8.507059e+37  ;;  %v12353_v53 = vld [vmem:[#allocation2] sm:$0xff]  ;;  %vm12398_vm15 = vmor %vm5045_vm5, %vm5046_vm8 }
 0x3b9   : > { %v5043_v42 = vmul.f32 %v16632_v22, %v5042_v35  ;;  %v5072_v59 = vsub.f32 1.0, %v5071_v41  ;;  %v5059_v16 = vadd.f32 %v11402_v29, %v5058_v24  ;;  %vm5061_vm11 = vweird.f32 %v11402_v29  ;;  %16643 = vst [vmem:[#allocation25_spill] sm:$0xff] %v12353_v53 }
 0x3ba   : > { %v3517_v6 = vadd.f32 %v12186_v2, %v2868_v30  ;;  %v3519_v13 = vadd.f32 %v12209_v17, %v2870_v46  ;;  %v12346_v58 = vpop.xlane.xlu0 %3320  ;;  %v5944_v26 = vsel %vm388_vm4, %v5880_v62, 0.0  ;;  %v4979_v4 = vmul.f32 %v12033_v19, %v4730_v39  ;;  %v648_v2 = vld [vmem:[%s12235_s20 + $0x18] sm:$0xff]  ;;  %v649_v30 = vld [vmem:[%s12235_s20 + $0x20] sm:$0xff]  ;;  %v16646_v62 = vld [vmem:[#allocation159_spill] sm:$0xff] }
 0x3bb   : > { %v4994_v35 = vmul.f32 %v12201_v38, %v4731_v52  ;;  %v4732_v41 = vsub.f32 %v12085_v28, %v12319_v55  ;;  %v5946_v1 = vadd.f32 %v5945_v37, %v5944_v26  ;;  %vm12359_vm9 = vcmp.eq.f32.partialorder %v5049_v7, 8.507059e+37  ;;  %v16647_v38 = vld [vmem:[#allocation128_spill] sm:$0xff]  ;;  %vm12380_vm13 = vmor %vm5060_vm2, %vm5061_vm11 }
 0x3bc   : > { %vm5075_vm6 = vweird.f32 %v16638_v40  ;;  %v5102_v19 = vsub.f32 1.0, %v5101_v3  ;;  %v5086_v39 = vmul.f32 %v16647_v38, %v16646_v62  ;;  %3581 = vst.msk [vmem:[#allocation3 + $0xc8] sm:$0xff] %vm388_vm4, %v3517_v6  ;;  %v5947_v52 = vsel %vm388_vm4, %v5882_v8, 0.0  ;;  %v12372_v7 = vld [vmem:[#allocation3 + $0x30] sm:$0xff]  ;;  %v12374_v26 = vld [vmem:[#allocation3 + $0x38] sm:$0xff] }
 0x3bd   : > { %v5044_v46 = vadd.f32 %v16632_v22, %v5043_v42  ;;  %v5073_v37 = vmul.f32 %v16639_v50, %v5072_v59  ;;  %3583 = vst.msk [vmem:[#allocation3 + $0xd8] sm:$0xff] %vm388_vm4, %v3519_v13  ;;  %v12384_v8 = vor.u32 1.1754944e-38, %v5081_v25  ;;  %vm5105_vm14 = vweird.f32 %v16640_v51  ;;  %vm12464_vm2 = vmor %vm5075_vm6, %vm5076_vm12 }
 0x3be   : > { %v5109_v42 = vand.u32 2147483647, %v16640_v51  ;;  %v5111_v59 = vand.u32 2147483648, %v16640_v51  ;;  %v5883_v6 = vmul.f32 %v4979_v4, %v648_v2  ;;  %v5884_v13 = vmul.f32 %v4994_v35, %v649_v30 }
 0x3bf   : > { %v5009_v24 = vmul.f32 %v12288_v48, %v4732_v41  ;;  %v5063_v23 = vsel %vm12380_vm13, %v11402_v29, %v5059_v16  ;;  %v5948_v53 = vadd.f32 %v5947_v52, %v5946_v1  ;;  %v5103_v4 = vmul.f32 %v11445_v27, %v5102_v19  ;;  %v12418_v30 = vpop.xlane.xlu2 %3687  ;;  %v12420_v19 = vpop.xlane.xlu1 %3697 }
 0x3c0   : > { %v5087_v35 = vsub.f32 1.0, %v5086_v39  ;;  %v5094_v48 = vand.u32 2147483647, %v16646_v62  ;;  %v4733_v41 = vsub.f32 %v12085_v28, %v12372_v7  ;;  %v4734_v29 = vsub.f32 %v12085_v28, %v12374_v26  ;;  %v12422_v39 = vld [vmem:[#allocation2 + $0x8] sm:$0xff] }
 0x3c1   : > { %v5048_v1 = vsel %vm12398_vm15, %v16632_v22, %v5044_v46  ;;  %v5074_v34 = vadd.f32 %v16639_v50, %v5073_v37  ;;  %v16652_v16 = vand.u32 2147483647, %v16638_v40  ;;  %16655 = vst [vmem:[#allocation102_spill] sm:$0xff] %v12422_v39  ;;  %v12429_v22 = vsel %vm12335_vm10, %v12293_v14, %v5063_v23  ;;  %v12431_v46 = vld [vmem:[#allocation3 + $0x40] sm:$0xff]  ;;  %v16658_v14 = vld [vmem:[#allocation191_spill] sm:$0xff] }
 0x3c2   : > { %v12433_v37 = vor.u32 1.1754944e-38, %v5111_v59  ;;  %vm5090_vm0 = vweird.f32 %v16646_v62  ;;  %v3518_v3 = vadd.f32 %v12222_v63, %v2869_v32  ;;  %v12437_v25 = vpop.xlane.xlu0 %3692  ;;  %v5951_v57 = vsel %vm388_vm4, %v5884_v13, 0.0  ;;  %v12468_v13 = vld [vmem:[#allocation2 + $0x18] sm:$0xff] }
 0x3c3   : > { %vm12414_vm3 = vcmp.eq.f32.partialorder %v16652_v16, 8.507059e+37  ;;  %v5949_v16 = vsel %vm388_vm4, %v5883_v6, 0.0  ;;  %v5885_v52 = vmul.f32 %v5009_v24, %v650_v54  ;;  %vm12441_vm1 = vcmp.eq.f32.partialorder %v5109_v42, 8.507059e+37  ;;  %v12453_v24 = vld [vmem:[#allocation3 + $0x48] sm:$0xff]  ;;  %16663 = vst [vmem:[#allocation168_spill] sm:$0xff] %v12468_v13 }
 0x3c4   : > { %v5116_v23 = vmul.f32 %v16659_v60, %v16658_v14  ;;  %v5950_v59 = vadd.f32 %v5949_v16, %v5948_v53  ;;  %v5104_v39 = vadd.f32 %v11445_v27, %v5103_v4  ;;  %vm5106_vm7 = vweird.f32 %v11445_v27  ;;  %3582 = vst.msk [vmem:[#allocation3 + $0xd0] sm:$0xff] %vm388_vm4, %v3518_v3  ;;  %v12472_v4 = vld [vmem:[#allocation2 + $0x10] sm:$0xff] }
 0x3c5   : > { %v5088_v32 = vmul.f32 %v16647_v38, %v5087_v35  ;;  %v5024_v54 = vmul.f32 %v12304_v12, %v4733_v41  ;;  %v5039_v63 = vmul.f32 %v12323_v45, %v4734_v29  ;;  %16660 = vst [vmem:[#allocation167_spill] sm:$0xff] %v12453_v24  ;;  %v5053_v53 = vsel %vm12359_vm9, %v12307_v9, %v5048_v1  ;;  %v2871_v12 = vld [vmem:[#allocation3 + $0xe0] sm:$0xff]  ;;  %v651_v35 = vld [vmem:[%s12235_s20 + $0x30] sm:$0xff]  ;;  %v652_v41 = vld [vmem:[%s12235_s20 + $0x38] sm:$0xff] }
 0x3c6   : > { %v4735_v42 = vsub.f32 %v12085_v28, %v12431_v46  ;;  %16664 = vst [vmem:[#allocation197_spill] sm:$0xff] %v12472_v4  ;;  %v5952_v17 = vadd.f32 %v5951_v57, %v5950_v59  ;;  %v5078_v40 = vsel %vm12464_vm2, %v16639_v50, %v5074_v34  ;;  %v5953_v29 = vsel %vm388_vm4, %v5885_v52, 0.0  ;;  %vm12486_vm5 = vmor %vm5105_vm14, %vm5106_vm7  ;;  %v2873_v16 = vld [vmem:[#allocation3 + $0xf0] sm:$0xff]  ;;  %v16667_v9 = vld [vmem:[#allocation166_spill] sm:$0xff] }
 0x3c7   : > { %vm5091_vm8 = vweird.f32 %v16647_v38  ;;  %v5096_v57 = vand.u32 2147483648, %v16646_v62  ;;  %v5117_v3 = vsub.f32 1.0, %v5116_v23  ;;  %v4736_v50 = vsub.f32 %v12085_v28, %v12453_v24  ;;  %v12501_v56 = vpop.xlane.xlu2 %3702  ;;  %v12503_v23 = vpop.xlane.xlu1 %3712  ;;  %v654_v1 = vld [vmem:[%s12235_s20 + $0x48] sm:$0xff] }
 0x3c8   : > { %v5108_v34 = vsel %vm12486_vm5, %v11445_v27, %v5104_v39  ;;  %v5089_v51 = vadd.f32 %v16647_v38, %v5088_v32  ;;  %v3520_v52 = vadd.f32 %v12317_v0, %v2871_v12  ;;  %v5886_v59 = vmul.f32 %v5024_v54, %v651_v35  ;;  %v12517_v54 = vld [vmem:[#allocation2 + $0x20] sm:$0xff]  ;;  %vm12535_vm11 = vmor %vm5090_vm0, %vm5091_vm8 }
 0x3c9   : > { %v5887_v6 = vmul.f32 %v5039_v63, %v652_v41  ;;  %v5054_v45 = vmul.f32 %v5053_v53, %v4735_v42  ;;  %v5146_v13 = vmul.f32 %v16668_v61, %v16667_v9  ;;  %v5954_v4 = vadd.f32 %v5953_v29, %v5952_v17  ;;  %v12521_v53 = vld [vmem:[#allocation2 + $0x30] sm:$0xff] }
 0x3ca   : > { %v5083_v27 = vsel %vm12414_vm3, %v12384_v8, %v5078_v40  ;;  %vm12509_vm10 = vcmp.eq.f32.partialorder %v5094_v48, 8.507059e+37  ;;  %3584 = vst.msk [vmem:[#allocation3 + $0xe0] sm:$0xff] %vm388_vm4, %v3520_v52  ;;  %v3522_v0 = vadd.f32 %v12340_v47, %v2873_v16  ;;  %v12515_v32 = vpop.xlane.xlu0 %3707  ;;  %v12525_v48 = vld [vmem:[#allocation2 + $0x28] sm:$0xff]  ;;  %v12529_v42 = vld [vmem:[#allocation3 + $0x50] sm:$0xff]  ;;  %v5118_v12 = vmul.f32 %v16659_v60, %v5117_v3 }
 0x3cb   : > { %16671 = vst [vmem:[#allocation198_spill] sm:$0xff] %v12529_v42  ;;  %v5069_v17 = vmul.f32 %v12429_v22, %v4736_v50  ;;  %v12544_v35 = vsel %vm12441_vm1, %v12433_v37, %v5108_v34  ;;  %v5093_v41 = vsel %vm12535_vm11, %v16647_v38, %v5089_v51  ;;  %v5097_v40 = vor.u32 1.1754944e-38, %v5096_v57  ;;  %v2872_v22 = vld [vmem:[#allocation3 + $0xe8] sm:$0xff]  ;;  %v3620_v38 = vld [vmem:[#allocation4] sm:$0xff]  ;;  %v3622_v37 = vld [vmem:[#allocation4 + $0x10] sm:$0xff] }
 0x3cc   : > { %3586 = vst.msk [vmem:[#allocation3 + $0xf0] sm:$0xff] %vm388_vm4, %v3522_v0  ;;  %v5955_v62 = vsel %vm388_vm4, %v5886_v59, 0.0  ;;  %v5957_v29 = vsel %vm388_vm4, %v5887_v6, 0.0  ;;  %v5888_v3 = vmul.f32 %v5054_v45, %v653_v36  ;;  %v5147_v16 = vsub.f32 1.0, %v5146_v13  ;;  %v12559_v34 = vld [vmem:[#allocation3 + $0x58] sm:$0xff]  ;;  %v12606_v0 = vld [vmem:[#allocation3 + $0x68] sm:$0xff] }
 0x3cd   : > { %v5956_v50 = vadd.f32 %v5955_v62, %v5954_v4  ;;  %v4737_v44 = vsub.f32 %v12085_v28, %v12529_v42  ;;  %vm5120_vm9 = vweird.f32 %v16658_v14  ;;  %vm5121_vm6 = vweird.f32 %v16659_v60  ;;  %16674 = vst [vmem:[#allocation112_spill] sm:$0xff] %v12559_v34  ;;  %v12564_v45 = vld [vmem:[#allocation2 + $0x38] sm:$0xff] }
 0x3ce   : > { %v5098_v57 = vsel %vm12509_vm10, %v5097_v40, %v5093_v41  ;;  %v5119_v51 = vadd.f32 %v16659_v60, %v5118_v12  ;;  %v5124_v36 = vand.u32 2147483647, %v16658_v14  ;;  %v5126_v13 = vand.u32 2147483648, %v16658_v14  ;;  %vm12572_vm12 = vmor %vm5120_vm9, %vm5121_vm6  ;;  %v3621_v40 = vld [vmem:[#allocation4 + $0x8] sm:$0xff]  ;;  %16682 = vst [vmem:[#allocation184_spill] sm:$0xff] %v12606_v0 }
 0x3cf   : > { %v5958_v52 = vadd.f32 %v5957_v29, %v5956_v50  ;;  %v5889_v59 = vmul.f32 %v5069_v17, %v654_v1  ;;  %v3521_v6 = vadd.f32 %v12346_v58, %v2872_v22  ;;  %v5959_v39 = vsel %vm388_vm4, %v5888_v3, 0.0  ;;  %v3718_v62 = vpop.xlane.xlu2 %3717  ;;  %v3728_v17 = vpop.xlane.xlu1 %3727  ;;  %v12579_v29 = vld [vmem:[#allocation2 + $0x48] sm:$0xff]  ;;  %v12583_v1 = vld [vmem:[#allocation3 + $0x60] sm:$0xff] }
 0x3d0   : > { %v5148_v47 = vmul.f32 %v16668_v61, %v5147_v16  ;;  %v4004_v12 = vadd.f32 %v12418_v30, %v3620_v38  ;;  %v4006_v41 = vadd.f32 %v12420_v19, %v3622_v37  ;;  %v5084_v14 = vmul.f32 %v5083_v27, %v4737_v44  ;;  %16677 = vst [vmem:[#allocation39_spill] sm:$0xff] %v12583_v1  ;;  %v16678_v16 = vld [vmem:[#allocation182_spill] sm:$0xff]  ;;  %v3623_v30 = vld [vmem:[#allocation4 + $0x18] sm:$0xff]  ;;  %v655_v37 = vld [vmem:[%s12235_s20 + $0x50] sm:$0xff] }
 0x3d1   : > { %v4738_v3 = vsub.f32 %v12085_v28, %v12559_v34  ;;  %v16679_v22 = vld [vmem:[#allocation42_spill] sm:$0xff]  ;;  %3585 = vst.msk [vmem:[#allocation3 + $0xe8] sm:$0xff] %vm388_vm4, %v3521_v6  ;;  %v5123_v4 = vsel %vm12572_vm12, %v16659_v60, %v5119_v51  ;;  %vm12594_vm13 = vcmp.eq.f32.partialorder %v5124_v36, 8.507059e+37  ;;  %v5127_v44 = vor.u32 1.1754944e-38, %v5126_v13  ;;  %v3626_v51 = vld [vmem:[#allocation4 + $0x30] sm:$0xff] }
 0x3d2   : > { %v5131_v50 = vmul.f32 %v16679_v22, %v16678_v16  ;;  %v3625_v19 = vld [vmem:[#allocation4 + $0x28] sm:$0xff]  ;;  %v3723_v38 = vpop.xlane.xlu0 %3722  ;;  %vm5150_vm14 = vweird.f32 %v16667_v9  ;;  %4068 = vst.msk [vmem:[#allocation4] sm:$0xff] %vm388_vm4, %v4004_v12  ;;  %v3624_v58 = vld [vmem:[#allocation4 + $0x20] sm:$0xff]  ;;  %v5961_v6 = vsel %vm388_vm4, %v5889_v59, 0.0  ;;  %v5960_v8 = vadd.f32 %v5959_v39, %v5958_v52  ;;  %v3627_v59 = vld [vmem:[#allocation4 + $0x38] sm:$0xff] }
 0x3d3   : > { %vm5151_vm15 = vweird.f32 %v16668_v61  ;;  %4070 = vst.msk [vmem:[#allocation4 + $0x10] sm:$0xff] %vm388_vm4, %v4006_v41  ;;  %v4005_v60 = vadd.f32 %v12437_v25, %v3621_v40  ;;  %v3628_v36 = vld [vmem:[#allocation4 + $0x40] sm:$0xff]  ;;  %v4739_v13 = vsub.f32 %v12085_v28, %v12583_v1  ;;  %v5149_v12 = vadd.f32 %v16668_v61, %v5148_v47  ;;  %v656_v41 = vld [vmem:[%s12235_s20 + $0x58] sm:$0xff]  ;;  %v3629_v47 = vld [vmem:[#allocation4 + $0x48] sm:$0xff] }
 0x3d4   : > { %v4007_v2 = vadd.f32 %v12501_v56, %v3623_v30  ;;  %v4009_v52 = vadd.f32 %v12503_v23, %v3625_v19  ;;  %v5890_v39 = vmul.f32 %v5084_v14, %v655_v37  ;;  %v5099_v63 = vmul.f32 %v5098_v57, %v4738_v3  ;;  %vm12618_vm3 = vmor %vm5150_vm14, %vm5151_vm15  ;;  %v12630_v3 = vld [vmem:[#allocation3 + $0x78] sm:$0xff]  ;;  %v657_v27 = vld [vmem:[%s12235_s20 + $0x60] sm:$0xff] }
 0x3d5   : > { %v5132_v24 = vsub.f32 1.0, %v5131_v50  ;;  %4069 = vst.msk [vmem:[#allocation4 + $0x8] sm:$0xff] %vm388_vm4, %v4005_v60  ;;  %v4008_v25 = vadd.f32 %v12515_v32, %v3624_v58  ;;  %v5154_v56 = vand.u32 2147483647, %v16667_v9  ;;  %v4010_v23 = vadd.f32 %v3718_v62, %v3626_v51  ;;  %v3631_v62 = vld [vmem:[#allocation4 + $0x58] sm:$0xff]  ;;  %v12648_v51 = vld [vmem:[#allocation2 + $0x40] sm:$0xff] }
 0x3d6   : > { %4071 = vst.msk [vmem:[#allocation4 + $0x18] sm:$0xff] %vm388_vm4, %v4007_v2  ;;  %v4012_v57 = vadd.f32 %v3728_v17, %v3628_v36  ;;  %v3934_v14 = vadd.f32 %v12259_v31, %v12228_v5  ;;  %v5128_v32 = vsel %vm12594_vm13, %v5127_v44, %v5123_v4  ;;  %v4740_v58 = vsub.f32 %v12085_v28, %v12606_v0  ;;  %v3630_v17 = vld [vmem:[#allocation4 + $0x50] sm:$0xff] }
 0x3d7   : > { %16685 = vst [vmem:[#allocation185_spill] sm:$0xff] %v12630_v3  ;;  %v5156_v50 = vand.u32 2147483648, %v16667_v9  ;;  %v4011_v2 = vadd.f32 %v3723_v38, %v3627_v59  ;;  %v5962_v30 = vadd.f32 %v5961_v6, %v5960_v8  ;;  %v5114_v19 = vmul.f32 %v12544_v35, %v4739_v13  ;;  %v3733_v31 = vpop.xlane.xlu2 %3732  ;;  %v3743_v4 = vpop.xlane.xlu1 %3742 }
 0x3d8   : > { %4073 = vst.msk [vmem:[#allocation4 + $0x28] sm:$0xff] %vm388_vm4, %v4009_v52  ;;  %v5153_v5 = vsel %vm12618_vm3, %v16668_v61, %v5149_v12  ;;  %v3935_v37 = vadd.f32 %v3934_v14, %v12265_v18  ;;  %v5963_v9 = vsel %vm388_vm4, %v5890_v39, 0.0  ;;  %v5891_v44 = vmul.f32 %v5099_v63, %v656_v41  ;;  %v658_v39 = vld [vmem:[%s12235_s20 + $0x68] sm:$0xff]  ;;  %v3636_v63 = vld [vmem:[#allocation4 + $0x80] sm:$0xff] }
 0x3d9   : > { %4072 = vst.msk [vmem:[#allocation4 + $0x20] sm:$0xff] %vm388_vm4, %v4008_v25  ;;  %v5133_v38 = vmul.f32 %v16679_v22, %v5132_v24  ;;  %v4013_v8 = vadd.f32 %v3733_v31, %v3629_v47  ;;  %v4742_v61 = vsub.f32 %v12085_v28, %v12630_v3  ;;  %v4015_v6 = vadd.f32 %v3743_v4, %v3631_v62  ;;  %v12652_v24 = vld [vmem:[#allocation2 + $0x50] sm:$0xff]  ;;  %v16687_v25 = vld [vmem:[#allocation186_spill] sm:$0xff] }
 0x3da   : > { %4074 = vst.msk [vmem:[#allocation4 + $0x30] sm:$0xff] %vm388_vm4, %v4010_v23  ;;  %v3738_v35 = vpop.xlane.xlu0 %3737  ;;  %v3936_v18 = vadd.f32 %v3935_v37, %v12332_v43  ;;  %v5129_v13 = vmul.f32 %v5128_v32, %v4740_v58  ;;  %v5157_v12 = vor.u32 1.1754944e-38, %v5156_v50  ;;  %v5964_v52 = vadd.f32 %v5963_v9, %v5962_v30  ;;  %v16688_v43 = vld [vmem:[#allocation43_spill] sm:$0xff]  ;;  %v12671_v32 = vld [vmem:[#allocation2 + $0x60] sm:$0xff] }
 0x3db   : > { %4076 = vst.msk [vmem:[#allocation4 + $0x40] sm:$0xff] %vm388_vm4, %v4012_v57  ;;  %v4014_v60 = vadd.f32 %v3738_v35, %v3630_v17  ;;  %v5892_v59 = vmul.f32 %v5114_v19, %v657_v27  ;;  %vm5155_vm0 = vcmp.eq.f32.partialorder %v5154_v56, 8.507059e+37  ;;  %v5161_v41 = vmul.f32 %v16688_v43, %v16687_v25  ;;  %v16689_v57 = vld [vmem:[#allocation49_spill] sm:$0xff] }
 0x3dc   : > { %16686 = vst [vmem:[#allocation199_spill] sm:$0xff] %v12652_v24  ;;  %3937 = vadd.xlane.f32.xlu0 %v3936_v18  ;;  %v5965_v40 = vsel %vm388_vm4, %v5891_v44, 0.0  ;;  %v5158_v23 = vsel %vm5155_vm0, %v5157_v12, %v5153_v5  ;;  %vm2013_vm1 = vcmp.eq.f32.partialorder %v16689_v57, %v6992_v10  ;;  %vm2014_vm7 = vcmp.eq.f32.partialorder %v16689_v57, %v6994_v11  ;;  %v3632_v17 = vld [vmem:[#allocation4 + $0x60] sm:$0xff]  ;;  %v12687_v27 = vld [vmem:[#allocation2 + $0x58] sm:$0xff] }
 0x3dd   : > { %4075 = vst.msk [vmem:[#allocation4 + $0x38] sm:$0xff] %vm388_vm4, %v4011_v2  ;;  %v5159_v47 = vmul.f32 %v5158_v23, %v4742_v61  ;;  %v5134_v56 = vadd.f32 %v16679_v22, %v5133_v38  ;;  %vm5136_vm2 = vweird.f32 %v16679_v22  ;;  %v5139_v14 = vand.u32 2147483647, %v16678_v16  ;;  %v660_v2 = vld [vmem:[%s12235_s20 + $0x78] sm:$0xff]  ;;  %v12691_v38 = vld [vmem:[#allocation2 + $0x68] sm:$0xff] }
 0x3de   : > { %4077 = vst.msk [vmem:[#allocation4 + $0x48] sm:$0xff] %vm388_vm4, %v4013_v8  ;;  %v5893_v50 = vmul.f32 %v5129_v13, %v658_v39  ;;  %vm5135_vm5 = vweird.f32 %v16678_v16  ;;  %v5141_v62 = vand.u32 2147483648, %v16678_v16  ;;  %v5966_v30 = vadd.f32 %v5965_v40, %v5964_v52  ;;  %v12695_v35 = vld [vmem:[#allocation2 + $0x78] sm:$0xff]  ;;  %v3637_v61 = vld [vmem:[#allocation4 + $0x88] sm:$0xff] }
 0x3df   : > { %4079 = vst.msk [vmem:[#allocation4 + $0x58] sm:$0xff] %vm388_vm4, %v4015_v6  ;;  %v5162_v19 = vsub.f32 1.0, %v5161_v41  ;;  %v3748_v5 = vpop.xlane.xlu2 %3747  ;;  %v3758_v31 = vpop.xlane.xlu1 %3757  ;;  %v2278_v4 = vsel %vm2013_vm1, %v9172_v49, 0.0  ;;  %v2279_v37 = vsel %vm2014_vm7, %v9276_v21, 0.0  ;;  %v5967_v9 = vsel %vm388_vm4, %v5892_v59, 0.0  ;;  %vm12703_vm8 = vmor %vm5135_vm5, %vm5136_vm2 }
 0x3e0   : > { %4078 = vst.msk [vmem:[#allocation4 + $0x50] sm:$0xff] %vm388_vm4, %v4014_v60  ;;  %v5895_v18 = vmul.f32 %v5159_v47, %v660_v2  ;;  %v5138_v13 = vsel %vm12703_vm8, %v16679_v22, %v5134_v56  ;;  %vm12710_vm10 = vcmp.eq.f32.partialorder %v5139_v14, 8.507059e+37  ;;  %v4016_v52 = vadd.f32 %v3748_v5, %v3632_v17  ;;  %v16698_v47 = vld [vmem:[#allocation37_spill] sm:$0xff]  ;;  %v12722_v56 = vld [vmem:[#allocation3 + $0x70] sm:$0xff] }
 0x3e1   : > { %16690 = vst [vmem:[#allocation111_spill] sm:$0xff] %v12671_v32  ;;  %v5969_v59 = vsel %vm388_vm4, %v5893_v50, 0.0  ;;  %v5171_v39 = vand.u32 2147483648, %v16687_v25  ;;  %vm2015_vm11 = vcmp.eq.f32.partialorder %v16689_v57, %v7005_v15  ;;  %v3939_v16 = vadd.f32 %v2279_v37, %v2278_v4  ;;  %v16699_v2 = vld [vmem:[#allocation177_spill] sm:$0xff]  ;;  %v16701_v50 = vld [vmem:[#allocation202_spill] sm:$0xff]  ;;  %v16703_v37 = vld [vmem:[#allocation223_spill] sm:$0xff] }
 0x3e2   : > { %16691 = vst [vmem:[#allocation201_spill] sm:$0xff] %v12687_v27  ;;  %v3753_v60 = vpop.xlane.xlu0 %3752  ;;  %v5968_v41 = vadd.f32 %v5967_v9, %v5966_v30  ;;  %v5142_v40 = vor.u32 1.1754944e-38, %v5141_v62  ;;  %v5163_v23 = vmul.f32 %v16688_v43, %v5162_v19  ;;  %v5191_v22 = vmul.f32 %v16699_v2, %v16698_v47  ;;  %v16702_v17 = vld [vmem:[#allocation41_spill] sm:$0xff]  ;;  %v3634_v30 = vld [vmem:[#allocation4 + $0x70] sm:$0xff]  ;;  %v3633_v4 = vld [vmem:[#allocation4 + $0x68] sm:$0xff] }
 0x3e3   : > { %16692 = vst [vmem:[#allocation120_spill] sm:$0xff] %v12691_v38  ;;  %vm5165_vm9 = vweird.f32 %v16687_v25  ;;  %vm5166_vm6 = vweird.f32 %v16688_v43  ;;  %v5169_v14 = vand.u32 2147483647, %v16687_v25  ;;  %v5176_v5 = vmul.f32 %v16702_v17, %v16701_v50 }
 0x3e4   : > { %16693 = vst [vmem:[#allocation58_spill] sm:$0xff] %v12695_v35  ;;  %v12729_v62 = vadd.f32 %v5969_v59, %v5968_v41  ;;  %v5143_v19 = vsel %vm12710_vm10, %v5142_v40, %v5138_v13  ;;  %vm2016_vm12 = vcmp.eq.f32.partialorder %v16689_v57, %v7019_v20  ;;  %v2280_v9 = vsel %vm2015_vm11, %v16703_v37, 0.0  ;;  %v3635_v41 = vld [vmem:[#allocation4 + $0x78] sm:$0xff]  ;;  %vm12771_vm1 = vmor %vm5165_vm9, %vm5166_vm6 }
 0x3e5   : > { %4080 = vst.msk [vmem:[#allocation4 + $0x60] sm:$0xff] %vm388_vm4, %v4016_v52  ;;  %v12740_v6 = vsel %vm388_vm4, %v5895_v18, 0.0  ;;  %v12742_v52 = vor.u32 1.1754944e-38, %v5171_v39  ;;  %v5199_v59 = vand.u32 2147483647, %v16698_v47  ;;  %v3940_v12 = vadd.f32 %v3939_v16, %v2280_v9  ;;  %v16706_v9 = vld [vmem:[#allocation66_spill] sm:$0xff] }
 0x3e6   : > { %16700 = vst [vmem:[#allocation192_spill] sm:$0xff] %v12722_v56  ;;  %v4741_v13 = vsub.f32 %v12085_v28, %v12722_v56  ;;  %v12748_v40 = vadd.f32 %v16688_v43, %v5163_v23  ;;  %v5192_v8 = vsub.f32 1.0, %v5191_v22  ;;  %v4018_v58 = vadd.f32 %v3758_v31, %v3634_v30  ;;  %v16717_v56 = vld [vmem:[#allocation203_spill] sm:$0xff] }
 0x3e7   : > { %v3763_v44 = vpop.xlane.xlu2 %3762  ;;  %v3773_v36 = vpop.xlane.xlu1 %3772  ;;  %vm12750_vm13 = vcmp.eq.f32.partialorder %v5169_v14, 8.507059e+37  ;;  %v5201_v39 = vand.u32 2147483648, %v16698_v47  ;;  %v5177_v3 = vsub.f32 1.0, %v5176_v5  ;;  %v4017_v35 = vadd.f32 %v3753_v60, %v3633_v4  ;;  %v16707_v14 = vld [vmem:[#allocation21_spill] sm:$0xff] }
 0x3e8   : > { %v2281_v23 = vsel %vm2016_vm12, %v16706_v9, 0.0  ;;  %4082 = vst.msk [vmem:[#allocation4 + $0x70] sm:$0xff] %vm388_vm4, %v4018_v58  ;;  %v4019_v31 = vadd.f32 %v3763_v44, %v3635_v41  ;;  %v4021_v22 = vadd.f32 %v3773_v36, %v3637_v61  ;;  %vm2017_vm14 = vcmp.eq.f32.partialorder %v16707_v14, %v6992_v10  ;;  %v12796_v61 = vld [vmem:[#allocation2 + $0x70] sm:$0xff] }
 0x3e9   : > { %vm2018_vm15 = vcmp.eq.f32.partialorder %v16707_v14, %v6994_v11  ;;  %vm5195_vm3 = vweird.f32 %v16698_v47  ;;  %vm5196_vm0 = vweird.f32 %v16699_v2  ;;  %4081 = vst.msk [vmem:[#allocation4 + $0x68] sm:$0xff] %vm388_vm4, %v4017_v35  ;;  %v3941_v57 = vadd.f32 %v3940_v12, %v2281_v23  ;;  %v659_v35 = vld [vmem:[%s12235_s20 + $0x70] sm:$0xff] }
 0x3ea   : > { %v3768_v16 = vpop.xlane.xlu0 %3767  ;;  %v5144_v5 = vmul.f32 %v5143_v19, %v4741_v13  ;;  %v5193_v58 = vmul.f32 %v16699_v2, %v5192_v8  ;;  %vm5181_vm7 = vweird.f32 %v16702_v17  ;;  %v5184_v44 = vand.u32 2147483647, %v16701_v50  ;;  %4083 = vst.msk [vmem:[#allocation4 + $0x78] sm:$0xff] %vm388_vm4, %v4019_v31  ;;  %v3638_v12 = vld [vmem:[#allocation4 + $0x90] sm:$0xff]  ;;  %v3640_v13 = vld [vmem:[#allocation4 + $0xa0] sm:$0xff]  ;;  %vm12838_vm11 = vmor %vm5195_vm3, %vm5196_vm0 }
 0x3eb   : > { %v4020_v60 = vadd.f32 %v3768_v16, %v3636_v63  ;;  %v5168_v63 = vsel %vm12771_vm1, %v16688_v43, %v12748_v40  ;;  %vm5180_vm2 = vweird.f32 %v16701_v50  ;;  %4085 = vst.msk [vmem:[#allocation4 + $0x88] sm:$0xff] %vm388_vm4, %v4021_v22  ;;  %3942 = vadd.xlane.f32.xlu2 %v3941_v57  ;;  %vm2019_vm5 = vcmp.eq.f32.partialorder %v16707_v14, %v7005_v15  ;;  %v12807_v40 = vld [vmem:[#allocation3 + $0x80] sm:$0xff]  ;;  %v3639_v16 = vld [vmem:[#allocation4 + $0x98] sm:$0xff] }
 0x3ec   : > { %v2282_v25 = vsel %vm2017_vm14, %v9172_v49, 0.0  ;;  %v2283_v8 = vsel %vm2018_vm15, %v9276_v21, 0.0  ;;  %16710 = vst [vmem:[#allocation193_spill] sm:$0xff] %v12796_v61  ;;  %vm12800_vm8 = vcmp.eq.f32.partialorder %v5199_v59, 8.507059e+37  ;;  %v5202_v19 = vor.u32 1.1754944e-38, %v5201_v39  ;;  %v16713_v59 = vld [vmem:[#allocation101_spill] sm:$0xff]  ;;  %vm12867_vm6 = vmor %vm5180_vm2, %vm5181_vm7 }
 0x3ed   : > { %v5178_v4 = vmul.f32 %v16702_v17, %v5177_v3  ;;  %v5186_v41 = vand.u32 2147483648, %v16701_v50  ;;  %4084 = vst.msk [vmem:[#allocation4 + $0x80] sm:$0xff] %vm388_vm4, %v4020_v60  ;;  %vm2020_vm10 = vcmp.eq.f32.partialorder %v16707_v14, %v7019_v20  ;;  %v3944_v23 = vadd.f32 %v2283_v8, %v2282_v25  ;;  %v16714_v31 = vld [vmem:[#allocation97_spill] sm:$0xff]  ;;  %v16715_v57 = vld [vmem:[#allocation86_spill] sm:$0xff]  ;;  %v16716_v39 = vld [vmem:[#allocation83_spill] sm:$0xff] }
 0x3ee   : > { %v3432_v22 = vadd.f32 %v16714_v31, %v16713_v59  ;;  %v3437_v36 = vadd.f32 %v16716_v39, %v16715_v57  ;;  %v5894_v3 = vmul.f32 %v5144_v5, %v659_v35  ;;  %v5194_v43 = vadd.f32 %v16699_v2, %v5193_v58  ;;  %v16718_v60 = vld [vmem:[#allocation55_spill] sm:$0xff]  ;;  %v16720_v57 = vld [vmem:[#allocation18_spill] sm:$0xff] }
 0x3ef   : > { %v5206_v61 = vmul.f32 %v16718_v60, %v16717_v56  ;;  %v3778_v0 = vpop.xlane.xlu2 %3777  ;;  %v3788_v38 = vpop.xlane.xlu1 %3787  ;;  %v2284_v1 = vsel %vm2019_vm5, %v16703_v37, 0.0  ;;  %v12822_v25 = vld [vmem:[#allocation3 + $0x90] sm:$0xff]  ;;  %v5173_v58 = vsel %vm12750_vm13, %v12742_v52, %v5168_v63  ;;  %v4743_v35 = vsub.f32 %v12085_v28, %v12807_v40  ;;  %v16723_v52 = vld [vmem:[#allocation113_spill] sm:$0xff]  ;;  %v16724_v63 = vld [vmem:[#allocation90_spill] sm:$0xff] }
 0x3f0   : > { %16719 = vst [vmem:[#allocation118_spill] sm:$0xff] %v12822_v25  ;;  %v4022_v8 = vadd.f32 %v3778_v0, %v3638_v12  ;;  %v4024_v59 = vadd.f32 %v3788_v38, %v3640_v13  ;;  %v3945_v32 = vadd.f32 %v3944_v23, %v2284_v1  ;;  %v3433_v5 = vadd.f32 %v3432_v22, %v16720_v57  ;;  %v16726_v23 = vld [vmem:[#allocation117_spill] sm:$0xff]  ;;  %v3641_v57 = vld [vmem:[#allocation4 + $0xa8] sm:$0xff]  ;;  %v16736_v1 = vld [vmem:[#allocation52_spill] sm:$0xff] }
 0x3f1   : > { %v2285_v34 = vsel %vm2020_vm10, %v16706_v9, 0.0  ;;  %v5179_v0 = vadd.f32 %v16702_v17, %v5178_v4  ;;  %v3438_v12 = vadd.f32 %v3437_v36, %v16724_v63  ;;  %v4745_v14 = vsub.f32 %v12085_v28, %v12822_v25  ;;  %v12859_v36 = vld [vmem:[#allocation3 + $0x88] sm:$0xff] }
 0x3f2   : > { %v3783_v31 = vpop.xlane.xlu0 %3782  ;;  %4086 = vst.msk [vmem:[#allocation4 + $0x90] sm:$0xff] %vm388_vm4, %v4022_v8  ;;  %v3946_v38 = vadd.f32 %v3945_v32, %v2285_v34  ;;  %v3434_v18 = vadd.f32 %v3433_v5, %v16723_v52  ;;  %v5198_v47 = vsel %vm12838_vm11, %v16699_v2, %v5194_v43  ;;  %v5207_v13 = vsub.f32 1.0, %v5206_v61  ;;  %v16730_v2 = vld [vmem:[#allocation88_spill] sm:$0xff] }
 0x3f3   : > { %v4023_v39 = vadd.f32 %v3783_v31, %v3639_v16  ;;  %4088 = vst.msk [vmem:[#allocation4 + $0xa0] sm:$0xff] %vm388_vm4, %v4024_v59  ;;  %v16725_v16 = vld [vmem:[#allocation12_spill] sm:$0xff]  ;;  %v5971_v34 = vsel %vm388_vm4, %v5894_v3, 0.0  ;;  %vm12855_vm9 = vcmp.eq.f32.partialorder %v5184_v44, 8.507059e+37  ;;  %v5187_v22 = vor.u32 1.1754944e-38, %v5186_v41  ;;  %v16738_v3 = vld [vmem:[#allocation153_spill] sm:$0xff] }
 0x3f4   : > { %v3442_v4 = vadd.f32 %v16726_v23, %v16725_v16  ;;  %16729 = vst [vmem:[#allocation194_spill] sm:$0xff] %v12859_v36  ;;  %3947 = vadd.xlane.f32.xlu1 %v3946_v38  ;;  %3435 = vadd.xlane.f32.xlu0 %v3434_v18  ;;  %v3439_v61 = vadd.f32 %v3438_v12, %v16730_v2  ;;  %v5214_v44 = vand.u32 2147483647, %v16717_v56  ;;  %v5216_v41 = vand.u32 2147483648, %v16717_v56  ;;  %v16733_v8 = vld [vmem:[#allocation48_spill] sm:$0xff] }
 0x3f5   : > { %4087 = vst.msk [vmem:[#allocation4 + $0x98] sm:$0xff] %vm388_vm4, %v4023_v39  ;;  %v5174_v43 = vmul.f32 %v5173_v58, %v4743_v35  ;;  %v16734_v59 = vld [vmem:[#allocation204_spill] sm:$0xff]  ;;  %v661_v39 = vld [vmem:[%s12235_s20 + $0x80] sm:$0xff]  ;;  %v5203_v58 = vsel %vm12800_vm8, %v5202_v19, %v5198_v47  ;;  %v5183_v50 = vsel %vm12867_vm6, %v16702_v17, %v5179_v0  ;;  %v5972_v12 = vadd.f32 %v5971_v34, %v12729_v62 }
 0x3f6   : > { %v5236_v31 = vmul.f32 %v16734_v59, %v16733_v8  ;;  %v3643_v5 = vld [vmem:[#allocation4 + $0xb8] sm:$0xff]  ;;  %v3642_v52 = vld [vmem:[#allocation4 + $0xb0] sm:$0xff]  ;;  %3440 = vadd.xlane.f32.xlu2 %v3439_v61  ;;  %v5204_v16 = vmul.f32 %v5203_v58, %v4745_v14  ;;  %v4744_v23 = vsub.f32 %v12085_v28, %v12859_v36  ;;  %v5208_v30 = vmul.f32 %v16718_v60, %v5207_v13 }
 0x3f7   : > { %v16735_v35 = vld [vmem:[#allocation44_spill] sm:$0xff]  ;;  %v3793_v19 = vpop.xlane.xlu2 %3792  ;;  %v3803_v47 = vpop.xlane.xlu1 %3802  ;;  %vm2021_vm12 = vcmp.eq.f32.partialorder %v16738_v3, %v6992_v10  ;;  %vm2022_vm13 = vcmp.eq.f32.partialorder %v16738_v3, %v6994_v11  ;;  %vm5210_vm14 = vweird.f32 %v16717_v56  ;;  %v5188_v13 = vsel %vm12855_vm9, %v5187_v22, %v5183_v50  ;;  %v16803_v36 = vld [vmem:[#allocation197_spill] sm:$0xff] }
 0x3f8   : > { %v5221_v38 = vmul.f32 %v16736_v1, %v16735_v35  ;;  %v16737_v18 = vld [vmem:[#allocation24_spill] sm:$0xff]  ;;  %v4025_v2 = vadd.f32 %v3793_v19, %v3641_v57  ;;  %v4027_v17 = vadd.f32 %v3803_v47, %v3643_v5  ;;  %v5237_v62 = vsub.f32 1.0, %v5236_v31  ;;  %v16739_v57 = vld [vmem:[#allocation23_spill] sm:$0xff] }
 0x3f9   : > { %v3443_v63 = vadd.f32 %v3442_v4, %v16737_v18  ;;  %v5896_v4 = vmul.f32 %v5174_v43, %v661_v39  ;;  %v663_v61 = vld [vmem:[%s12235_s20 + $0x90] sm:$0xff]  ;;  %vm5211_vm15 = vweird.f32 %v16718_v60  ;;  %v5209_v58 = vadd.f32 %v16718_v60, %v5208_v30  ;;  %v3644_v18 = vld [vmem:[#allocation4 + $0xc0] sm:$0xff] }
 0x3fa   : > { %v3798_v0 = vpop.xlane.xlu0 %3797  ;;  %v5222_v34 = vsub.f32 1.0, %v5221_v38  ;;  %4089 = vst.msk [vmem:[#allocation4 + $0xa8] sm:$0xff] %vm388_vm4, %v4025_v2  ;;  %vm12900_vm3 = vcmp.eq.f32.partialorder %v5214_v44, 8.507059e+37  ;;  %v5217_v39 = vor.u32 1.1754944e-38, %v5216_v41  ;;  %v2286_v32 = vsel %vm2021_vm12, %v9172_v49, 0.0  ;;  %v662_v38 = vld [vmem:[%s12235_s20 + $0x88] sm:$0xff]  ;;  %vm12928_vm7 = vmor %vm5210_vm14, %vm5211_vm15 }
 0x3fb   : > { %v4026_v14 = vadd.f32 %v3798_v0, %v3642_v52  ;;  %v3444_v5 = vadd.f32 %v3443_v63, %v16739_v57  ;;  %4091 = vst.msk [vmem:[#allocation4 + $0xb8] sm:$0xff] %vm388_vm4, %v4027_v17  ;;  %v2287_v22 = vsel %vm2022_vm13, %v9276_v21, 0.0  ;;  %v5974_v31 = vadd.f32 %v12740_v6, %v5972_v12  ;;  %v3646_v63 = vld [vmem:[#allocation4 + $0xd0] sm:$0xff]  ;;  %v16742_v30 = vld [vmem:[#allocation13_spill] sm:$0xff]  ;;  %v3645_v2 = vld [vmem:[#allocation4 + $0xc8] sm:$0xff] }
 0x3fc   : > { %v12914_v50 = vmul.f32 %v5204_v16, %v663_v61  ;;  %v5189_v44 = vmul.f32 %v5188_v13, %v4744_v23  ;;  %vm5240_vm0 = vweird.f32 %v16733_v8  ;;  %v5975_v41 = vsel %vm388_vm4, %v5896_v4, 0.0  ;;  %v16743_v19 = vld [vmem:[#allocation35_spill] sm:$0xff]  ;;  %v12932_v16 = vld [vmem:[#allocation3 + $0x98] sm:$0xff]  ;;  %v16747_v4 = vld [vmem:[#allocation54_spill] sm:$0xff] }
 0x3fd   : > { %4090 = vst.msk [vmem:[#allocation4 + $0xb0] sm:$0xff] %vm388_vm4, %v4026_v14  ;;  %3445 = vadd.xlane.f32.xlu1 %v3444_v5  ;;  %v5238_v52 = vmul.f32 %v16734_v59, %v5237_v62  ;;  %vm5241_vm1 = vweird.f32 %v16734_v59  ;;  %v3452_v6 = vadd.f32 %v16743_v19, %v16742_v30  ;;  %v5244_v23 = vand.u32 2147483647, %v16733_v8  ;;  %v16748_v61 = vld [vmem:[#allocation61_spill] sm:$0xff] }
 0x3fe   : > { %16746 = vst [vmem:[#allocation195_spill] sm:$0xff] %v12932_v16  ;;  %v5223_v47 = vmul.f32 %v16736_v1, %v5222_v34  ;;  %vm2023_vm2 = vcmp.eq.f32.partialorder %v16738_v3, %v7005_v15  ;;  %v3949_v17 = vadd.f32 %v2287_v22, %v2286_v32  ;;  %v5213_v0 = vsel %vm12928_vm7, %v16718_v60, %v5209_v58  ;;  %v16749_v57 = vld [vmem:[#allocation33_spill] sm:$0xff]  ;;  %vm12977_vm11 = vmor %vm5240_vm0, %vm5241_vm1 }
 0x3ff   : > { %v5246_v56 = vand.u32 2147483648, %v16733_v8  ;;  %v5251_v62 = vmul.f32 %v16748_v61, %v16747_v4  ;;  %v3808_v14 = vpop.xlane.xlu2 %3807  ;;  %v3818_v13 = vpop.xlane.xlu1 %3817  ;;  %v12945_v5 = vadd.f32 %v3452_v6, %v16749_v57  ;;  %v5897_v34 = vmul.f32 %v5189_v44, %v662_v38 }
 0x400   : > { %vm5226_vm5 = vweird.f32 %v16736_v1  ;;  %v4028_v30 = vadd.f32 %v3808_v14, %v3644_v18  ;;  %v4030_v19 = vadd.f32 %v3818_v13, %v3646_v63  ;;  %v4746_v22 = vsub.f32 %v12085_v28, %v12932_v16  ;;  %v12960_v63 = vld [vmem:[#allocation3 + $0xa8] sm:$0xff]  ;;  %v12967_v14 = vld [vmem:[#allocation3 + $0xa0] sm:$0xff] }
 0x401   : > { %v5239_v60 = vadd.f32 %v16734_v59, %v5238_v52  ;;  %v2288_v12 = vsel %vm2023_vm2, %v16703_v37, 0.0  ;;  %v5224_v6 = vadd.f32 %v16736_v1, %v5223_v47  ;;  %v5229_v44 = vand.u32 2147483647, %v16735_v35  ;;  %16750 = vst [vmem:[#allocation131_spill] sm:$0xff] %v12960_v63  ;;  %v16802_v16 = vld [vmem:[#allocation74_spill] sm:$0xff] }
 0x402   : > { %v3813_v32 = vpop.xlane.xlu0 %3812  ;;  %4092 = vst.msk [vmem:[#allocation4 + $0xc0] sm:$0xff] %vm388_vm4, %v4028_v30  ;;  %vm2024_vm8 = vcmp.eq.f32.partialorder %v16738_v3, %v7019_v20  ;;  %v3950_v38 = vadd.f32 %v3949_v17, %v2288_v12  ;;  %v5976_v18 = vadd.f32 %v5975_v41, %v5974_v31  ;;  %vm12962_vm10 = vcmp.eq.f32.partialorder %v5244_v23, 8.507059e+37  ;;  %v16756_v41 = vld [vmem:[#allocation63_spill] sm:$0xff]  ;;  %v16757_v23 = vld [vmem:[#allocation209_spill] sm:$0xff] }
 0x403   : > { %v4029_v58 = vadd.f32 %v3813_v32, %v3645_v2  ;;  %v5231_v2 = vand.u32 2147483648, %v16735_v35  ;;  %16753 = vst [vmem:[#allocation127_spill] sm:$0xff] %v12967_v14  ;;  %v5252_v47 = vsub.f32 1.0, %v5251_v62  ;;  %v5977_v13 = vsel %vm388_vm4, %v5897_v34, 0.0  ;;  %v3649_v34 = vld [vmem:[#allocation4 + $0xe8] sm:$0xff]  ;;  %v664_v30 = vld [vmem:[%s12235_s20 + $0x98] sm:$0xff] }
 0x404   : > { %4094 = vst.msk [vmem:[#allocation4 + $0xd0] sm:$0xff] %vm388_vm4, %v4030_v19  ;;  %v5218_v17 = vsel %vm12900_vm3, %v5217_v39, %v5213_v0  ;;  %vm5225_vm9 = vweird.f32 %v16735_v35  ;;  %v5281_v62 = vmul.f32 %v16757_v23, %v16756_v41  ;;  %v5243_v43 = vsel %vm12977_vm11, %v16734_v59, %v5239_v60  ;;  %v3647_v0 = vld [vmem:[#allocation4 + $0xd8] sm:$0xff]  ;;  %v3648_v32 = vld [vmem:[#allocation4 + $0xe0] sm:$0xff] }
 0x405   : > { %4093 = vst.msk [vmem:[#allocation4 + $0xc8] sm:$0xff] %vm388_vm4, %v4029_v58  ;;  %v5219_v57 = vmul.f32 %v5218_v17, %v4746_v22  ;;  %v5247_v39 = vor.u32 1.1754944e-38, %v5246_v56  ;;  %vm12990_vm6 = vmor %vm5225_vm9, %vm5226_vm5  ;;  %v2289_v35 = vsel %vm2024_vm8, %v16706_v9, 0.0  ;;  %v4748_v19 = vsub.f32 %v12085_v28, %v12960_v63 }
 0x406   : > { %v5228_v59 = vsel %vm12990_vm6, %v16736_v1, %v5224_v6  ;;  %v4747_v56 = vsub.f32 %v12085_v28, %v12967_v14  ;;  %v3951_v22 = vadd.f32 %v3950_v38, %v2289_v35  ;;  %v5978_v60 = vadd.f32 %v5977_v13, %v5976_v18  ;;  %v16760_v38 = vld [vmem:[#allocation56_spill] sm:$0xff]  ;;  %v16761_v18 = vld [vmem:[#allocation206_spill] sm:$0xff] }
 0x407   : > { %vm5230_vm12 = vcmp.eq.f32.partialorder %v5229_v44, 8.507059e+37  ;;  %v5232_v58 = vor.u32 1.1754944e-38, %v5231_v2  ;;  %v5253_v12 = vmul.f32 %v16748_v61, %v5252_v47  ;;  %v3823_v3 = vpop.xlane.xlu2 %3822  ;;  %v3833_v17 = vpop.xlane.xlu1 %3832  ;;  %v5248_v31 = vsel %vm12962_vm10, %v5247_v39, %v5243_v43  ;;  %v13018_v39 = vld [vmem:[#allocation2 + $0x90] sm:$0xff]  ;;  %v16800_v14 = vld [vmem:[#allocation110_spill] sm:$0xff] }
 0x408   : > { %v5282_v27 = vsub.f32 1.0, %v5281_v62  ;;  %v4031_v42 = vadd.f32 %v3823_v3, %v3647_v0  ;;  %v4033_v24 = vadd.f32 %v3833_v17, %v3649_v34  ;;  %3952 = vadd.xlane.f32.xlu0 %v3951_v22  ;;  %v5899_v6 = vmul.f32 %v5219_v57, %v664_v30  ;;  %v13014_v62 = vld [vmem:[#allocation2 + $0x80] sm:$0xff]  ;;  %16762 = vst [vmem:[#allocation76_spill] sm:$0xff] %v13018_v39  ;;  %v666_v0 = vld [vmem:[%s12235_s20 + $0xa8] sm:$0xff]  ;;  %v13038_v22 = vld [vmem:[#allocation2 + $0x98] sm:$0xff] }
 0x409   : > { %v5233_v8 = vsel %vm5230_vm12, %v5232_v58, %v5228_v59  ;;  %v5266_v44 = vmul.f32 %v16761_v18, %v16760_v38  ;;  %v5249_v13 = vmul.f32 %v5248_v31, %v4748_v19  ;;  %v5259_v35 = vand.u32 2147483647, %v16747_v4  ;;  %v665_v34 = vld [vmem:[%s12235_s20 + $0xa0] sm:$0xff]  ;;  %v13029_v19 = vld [vmem:[#allocation2 + $0x88] sm:$0xff]  ;;  %16765 = vst [vmem:[#allocation143_spill] sm:$0xff] %v13038_v22  ;;  %v3650_v3 = vld [vmem:[#allocation4 + $0xf0] sm:$0xff] }
 0x40a   : > { %v3828_v1 = vpop.xlane.xlu0 %3827  ;;  %v5234_v47 = vmul.f32 %v5233_v8, %v4747_v56  ;;  %v5261_v52 = vand.u32 2147483648, %v16747_v4  ;;  %4095 = vst.msk [vmem:[#allocation4 + $0xd8] sm:$0xff] %vm388_vm4, %v4031_v42  ;;  %v5254_v30 = vadd.f32 %v16748_v61, %v5253_v12  ;;  %vm5256_vm13 = vweird.f32 %v16748_v61  ;;  %v13034_v56 = vld [vmem:[#allocation3 + $0xb0] sm:$0xff]  ;;  %v3651_v17 = vld [vmem:[#allocation4 + $0xf8] sm:$0xff]  ;;  %v4266_v59 = vld [vmem:[#allocation4 + $0x8] sm:$0xff] }
 0x40b   : > { %v4032_v2 = vadd.f32 %v3828_v1, %v3648_v32  ;;  %4097 = vst.msk [vmem:[#allocation4 + $0xe8] sm:$0xff] %vm388_vm4, %v4033_v24  ;;  %v5979_v42 = vsel %vm388_vm4, %v12914_v50, 0.0  ;;  %vm5255_vm14 = vweird.f32 %v16747_v4  ;;  %v5283_v32 = vmul.f32 %v16757_v23, %v5282_v27  ;;  %v16781_v43 = vld [vmem:[#allocation208_spill] sm:$0xff] }
 0x40c   : > { %16763 = vst [vmem:[#allocation93_spill] sm:$0xff] %v13029_v19  ;;  %v5980_v58 = vadd.f32 %v5979_v42, %v5978_v60  ;;  %v5981_v50 = vsel %vm388_vm4, %v5899_v6, 0.0  ;;  %v5267_v12 = vsub.f32 1.0, %v5266_v44  ;;  %v5901_v31 = vmul.f32 %v5249_v13, %v666_v0  ;;  %vm13045_vm15 = vmor %vm5255_vm14, %vm5256_vm13  ;;  %v13061_v42 = vld [vmem:[#allocation3 + $0xc0] sm:$0xff]  ;;  %v13228_v19 = vld [vmem:[%s12235_s20 + $0xb8] sm:$0xff] }
 0x40d   : > { %16764 = vst [vmem:[#allocation98_spill] sm:$0xff] %v13034_v56  ;;  %v5900_v1 = vmul.f32 %v5234_v47, %v665_v34  ;;  %vm13049_vm3 = vcmp.eq.f32.partialorder %v5259_v35, 8.507059e+37  ;;  %v5262_v8 = vor.u32 1.1754944e-38, %v5261_v52  ;;  %v5258_v60 = vsel %vm13045_vm15, %v16748_v61, %v5254_v30 }
 0x40e   : > { %4096 = vst.msk [vmem:[#allocation4 + $0xe0] sm:$0xff] %vm388_vm4, %v4032_v2  ;;  %v2874_v2 = vld [vmem:[#allocation3 + $0xf8] sm:$0xff]  ;;  %v4749_v6 = vsub.f32 %v12085_v28, %v13034_v56  ;;  %vm5285_vm0 = vweird.f32 %v16756_v41  ;;  %vm5286_vm1 = vweird.f32 %v16757_v23  ;;  %v5982_v47 = vadd.f32 %v5981_v50, %v5980_v58  ;;  %v16771_v50 = vld [vmem:[#allocation50_spill] sm:$0xff] }
 0x40f   : > { %v3838_v44 = vpop.xlane.xlu2 %3837  ;;  %v3843_v13 = vpop.xlane.xlu1 %3842  ;;  %v5284_v35 = vadd.f32 %v16757_v23, %v5283_v32  ;;  %16770 = vst [vmem:[#allocation106_spill] sm:$0xff] %v13061_v42  ;;  %v5289_v4 = vand.u32 2147483647, %v16756_v41  ;;  %v5291_v61 = vand.u32 2147483648, %v16756_v41  ;;  %v5268_v30 = vmul.f32 %v16761_v18, %v5267_v12  ;;  %vm13082_vm7 = vmor %vm5285_vm0, %vm5286_vm1  ;;  %v4268_v56 = vld [vmem:[#allocation4 + $0x18] sm:$0xff] }
 0x410   : > { %v4034_v0 = vadd.f32 %v3838_v44, %v3650_v3  ;;  %v4035_v34 = vadd.f32 %v3843_v13, %v3651_v17  ;;  %v5983_v57 = vsel %vm388_vm4, %v5900_v1, 0.0  ;;  %v5263_v58 = vsel %vm13049_vm3, %v5262_v8, %v5258_v60  ;;  %v16772_v3 = vld [vmem:[#allocation207_spill] sm:$0xff]  ;;  %v13088_v8 = vld [vmem:[#allocation2 + $0xa0] sm:$0xff] }
 0x411   : > { %v5274_v32 = vand.u32 2147483647, %v16760_v38  ;;  %v5296_v17 = vmul.f32 %v16772_v3, %v16771_v50  ;;  %v13073_v44 = vld [vmem:[#allocation2 + $0xa8] sm:$0xff]  ;;  %v5985_v12 = vsel %vm388_vm4, %v5901_v31, 0.0  ;;  %v5276_v27 = vand.u32 2147483648, %v16760_v38  ;;  %16776 = vst [vmem:[#allocation99_spill] sm:$0xff] %v13088_v8 }
 0x412   : > { %v3331_v52 = vpop.xlane.xlu0 %3330  ;;  %4098 = vst.msk [vmem:[#allocation4 + $0xf0] sm:$0xff] %vm388_vm4, %v4034_v0  ;;  %v13093_v0 = vld [vmem:[%s12235_s20 + $0xb0] sm:$0xff]  ;;  %v4751_v31 = vsub.f32 %v12085_v28, %v13061_v42  ;;  %v5288_v41 = vsel %vm13082_vm7, %v16757_v23, %v5284_v35  ;;  %vm5270_vm2 = vweird.f32 %v16760_v38  ;;  %vm5271_vm5 = vweird.f32 %v16761_v18  ;;  %v2876_v13 = vld [vmem:[#allocation3 + $0x108] sm:$0xff] }
 0x413   : > { %v3523_v24 = vadd.f32 %v3331_v52, %v2874_v2  ;;  %16773 = vst [vmem:[#allocation78_spill] sm:$0xff] %v13073_v44  ;;  %v5264_v2 = vmul.f32 %v5263_v58, %v4749_v6  ;;  %v5984_v6 = vadd.f32 %v5983_v57, %v5982_v47  ;;  %v5269_v52 = vadd.f32 %v16761_v18, %v5268_v30  ;;  %v2875_v58 = vld [vmem:[#allocation3 + $0x100] sm:$0xff]  ;;  %v13104_v60 = vld [vmem:[#allocation2 + $0xb0] sm:$0xff]  ;;  %vm13119_vm9 = vmor %vm5270_vm2, %vm5271_vm5 }
 0x414   : > { %4099 = vst.msk [vmem:[#allocation4 + $0xf8] sm:$0xff] %vm388_vm4, %v4035_v34  ;;  %v5292_v34 = vor.u32 1.1754944e-38, %v5291_v61  ;;  %vm5290_vm8 = vcmp.eq.f32.partialorder %v5289_v4, 8.507059e+37  ;;  %vm13108_vm10 = vcmp.eq.f32.partialorder %v5274_v32, 8.507059e+37  ;;  %v5297_v35 = vsub.f32 1.0, %v5296_v17  ;;  %v3652_v57 = vld [vmem:[#allocation4 + $0x100] sm:$0xff] }
 0x415   : > { %16777 = vst [vmem:[#allocation138_spill] sm:$0xff] %v13093_v0  ;;  %v5277_v61 = vor.u32 1.1754944e-38, %v5276_v27  ;;  %vm2025_vm11 = vcmp.eq.f32.partialorder %v16781_v43, %v6992_v10  ;;  %vm5300_vm6 = vweird.f32 %v16771_v50  ;;  %vm2026_vm12 = vcmp.eq.f32.partialorder %v16781_v43, %v6994_v11  ;;  %v16794_v42 = vld [vmem:[#allocation102_spill] sm:$0xff] }
 0x416   : > { %3587 = vst.msk [vmem:[#allocation3 + $0xf8] sm:$0xff] %vm388_vm4, %v3523_v24  ;;  %v5902_v24 = vmul.f32 %v5264_v2, %v13093_v0  ;;  %v5293_v47 = vsel %vm5290_vm8, %v5292_v34, %v5288_v41  ;;  %v5986_v27 = vadd.f32 %v5985_v12, %v5984_v6  ;;  %v13127_v41 = vld [vmem:[%s12235_s20 + $0xc0] sm:$0xff]  ;;  %v5273_v34 = vsel %vm13119_vm9, %v16761_v18, %v5269_v52 }
 0x417   : > { %16778 = vst [vmem:[#allocation19_spill] sm:$0xff] %v13104_v60  ;;  %v3336_v30 = vpop.xlane.xlu2 %3335  ;;  %v3341_v1 = vpop.xlane.xlu1 %3340  ;;  %v5294_v63 = vmul.f32 %v5293_v47, %v4751_v31  ;;  %v13129_v31 = vld [vmem:[#allocation2 + $0xc0] sm:$0xff]  ;;  %vm5301_vm13 = vweird.f32 %v16772_v3  ;;  %v5306_v12 = vand.u32 2147483648, %v16771_v50  ;;  %v2290_v6 = vsel %vm2025_vm11, %v9172_v49, 0.0 }
 0x418   : > { %v3524_v32 = vadd.f32 %v3336_v30, %v2875_v58  ;;  %v3525_v17 = vadd.f32 %v3341_v1, %v2876_v13  ;;  %16784 = vst [vmem:[#allocation96_spill] sm:$0xff] %v13127_v41  ;;  %v4265_v47 = vld [vmem:[#allocation4] sm:$0xff]  ;;  %v5298_v13 = vmul.f32 %v16772_v3, %v5297_v35  ;;  %v5987_v30 = vsel %vm388_vm4, %v5902_v24, 0.0  ;;  %vm13196_vm2 = vmor %vm5300_vm6, %vm5301_vm13 }
 0x419   : > { %16785 = vst [vmem:[#allocation15_spill] sm:$0xff] %v13129_v31  ;;  %v5304_v18 = vand.u32 2147483647, %v16771_v50  ;;  %vm2027_vm14 = vcmp.eq.f32.partialorder %v16781_v43, %v7005_v15  ;;  %v2291_v52 = vsel %vm2026_vm12, %v9276_v21, 0.0  ;;  %v5904_v35 = vmul.f32 %v5294_v63, %v13127_v41  ;;  %v16795_v31 = vld [vmem:[#allocation60_spill] sm:$0xff]  ;;  %v3653_v50 = vld [vmem:[#allocation4 + $0x108] sm:$0xff] }
 0x41a   : > { %v3848_v2 = vpop.xlane.xlu0 %3847  ;;  %3588 = vst.msk [vmem:[#allocation3 + $0x100] sm:$0xff] %vm388_vm4, %v3524_v32  ;;  %v4393_v1 = vmul.f32 0.5, %v4265_v47  ;;  %v4394_v4 = vmul.f32 0.5, %v4266_v59  ;;  %vm2028_vm15 = vcmp.eq.f32.partialorder %v16781_v43, %v7019_v20  ;;  %v3954_v24 = vadd.f32 %v2291_v52, %v2290_v6  ;;  %v16786_v32 = vld [vmem:[#allocation28_spill] sm:$0xff]  ;;  %v16790_v47 = vld [vmem:[#allocation211_spill] sm:$0xff]  ;;  %v16799_v44 = vld [vmem:[#allocation10_spill] sm:$0xff] }
 0x41b   : > { %v4036_v58 = vadd.f32 %v3848_v2, %v3652_v57  ;;  %3589 = vst.msk [vmem:[#allocation3 + $0x108] sm:$0xff] %vm388_vm4, %v3525_v17  ;;  %v5278_v57 = vsel %vm13108_vm10, %v5277_v61, %v5273_v34  ;;  %vm2029_vm3 = vcmp.eq.f32.partialorder %v16786_v32, %v6992_v10  ;;  %vm2030_vm0 = vcmp.eq.f32.partialorder %v16786_v32, %v6994_v11  ;;  %v13167_v59 = vld [vmem:[#allocation3 + $0xb8] sm:$0xff]  ;;  %v16789_v34 = vld [vmem:[#allocation31_spill] sm:$0xff] }
 0x41c   : > { %v13163_v17 = vadd.f32 %v5987_v30, %v5986_v27  ;;  %v5299_v63 = vadd.f32 %v16772_v3, %v5298_v13  ;;  %v5307_v23 = vor.u32 1.1754944e-38, %v5306_v12  ;;  %v2292_v61 = vsel %vm2027_vm14, %v16703_v37, 0.0  ;;  %v4267_v6 = vld [vmem:[#allocation4 + $0x10] sm:$0xff]  ;;  %v16791_v30 = vld [vmem:[#allocation25_spill] sm:$0xff]  ;;  %v4270_v2 = vld [vmem:[#allocation4 + $0x28] sm:$0xff] }
 0x41d   : > { %4100 = vst.msk [vmem:[#allocation4 + $0x100] sm:$0xff] %vm388_vm4, %v4036_v58  ;;  %vm13169_vm1 = vcmp.eq.f32.partialorder %v5304_v18, 8.507059e+37  ;;  %v5326_v58 = vmul.f32 %v16790_v47, %v16789_v34  ;;  %v3955_v52 = vadd.f32 %v3954_v24, %v2292_v61  ;;  %v2294_v38 = vsel %vm2029_vm3, %v9172_v49, 0.0  ;;  %v16792_v13 = vld [vmem:[#allocation87_spill] sm:$0xff] }
 0x41e   : > { %v2295_v27 = vsel %vm2030_vm0, %v9276_v21, 0.0  ;;  %v16793_v12 = vsub.f32 %v16791_v30, %v16792_v13  ;;  %v16796_v0 = vsub.f32 %v16794_v42, %v16795_v31  ;;  %v2293_v60 = vsel %vm2028_vm15, %v16706_v9, 0.0  ;;  %v3654_v30 = vld [vmem:[#allocation4 + $0x110] sm:$0xff] }
 0x41f   : > { %vm2031_vm7 = vcmp.eq.f32.partialorder %v16786_v32, %v7005_v15  ;;  %v13190_v24 = vsel %vm388_vm4, %v5904_v35, 0.0  ;;  %v3959_v43 = vadd.f32 %v2295_v27, %v2294_v38  ;;  %v4750_v31 = vsub.f32 %v12085_v28, %v13167_v59  ;;  %v3853_v61 = vpop.xlane.xlu2 %3852  ;;  %v3858_v13 = vpop.xlane.xlu1 %3857 }
 0x420   : > { %v4457_v41 = vadd.f32 %v4393_v1, %v16793_v12  ;;  %v4458_v18 = vadd.f32 %v4394_v4, %v16796_v0  ;;  %v3956_v0 = vadd.f32 %v3955_v52, %v2293_v60  ;;  %v5303_v35 = vsel %vm13196_vm2, %v16772_v3, %v5299_v63  ;;  %v6738_v3 = vld [vmem:[%s12235_s20] sm:$0xff] }
 0x421   : > { %v4395_v4 = vmul.f32 0.5, %v4267_v6  ;;  %vm2032_vm5 = vcmp.eq.f32.partialorder %v16786_v32, %v7019_v20  ;;  %v5327_v12 = vsub.f32 1.0, %v5326_v58  ;;  %v5336_v60 = vand.u32 2147483648, %v16789_v34  ;;  %v6739_v6 = vld [vmem:[%s12235_s20 + $0x8] sm:$0xff]  ;;  %v4269_v1 = vld [vmem:[#allocation4 + $0x20] sm:$0xff] }
 0x422   : > { %v4396_v38 = vmul.f32 0.5, %v4268_v56  ;;  %3957 = vadd.xlane.f32.xlu2 %v3956_v0  ;;  %v2296_v52 = vsel %vm2031_vm7, %v16703_v37, 0.0  ;;  %v4522_v63 = vmul.f32 %v6738_v3, %v4457_v41  ;;  %v4523_v27 = vmul.f32 %v6739_v6, %v4458_v18  ;;  %v16801_v58 = vld [vmem:[#allocation22_spill] sm:$0xff]  ;;  %v16804_v41 = vld [vmem:[#allocation77_spill] sm:$0xff] }
 0x423   : > { %v3960_v42 = vadd.f32 %v3959_v43, %v2296_v52  ;;  %v3447_v8 = vadd.f32 %v16800_v14, %v16799_v44  ;;  %v5311_v22 = vmul.f32 %v16802_v16, %v16801_v58  ;;  %v2297_v56 = vsel %vm2032_vm5, %v16706_v9, 0.0  ;;  %v16806_v43 = vld [vmem:[#allocation108_spill] sm:$0xff] }
 0x424   : > { %v4037_v0 = vadd.f32 %v3853_v61, %v3653_v50  ;;  %v4038_v25 = vadd.f32 %v3858_v13, %v3654_v30  ;;  %v5279_v39 = vmul.f32 %v5278_v57, %v4750_v31  ;;  %v16805_v3 = vsub.f32 %v16803_v36, %v16804_v41  ;;  %v13230_v14 = vld [vmem:[#allocation2 + $0xb8] sm:$0xff]  ;;  %v4271_v41 = vld [vmem:[#allocation4 + $0x30] sm:$0xff] }
 0x425   : > { %v3961_v6 = vadd.f32 %v3960_v42, %v2297_v56  ;;  %v3448_v52 = vadd.f32 %v3447_v8, %v16806_v43  ;;  %v5328_v32 = vmul.f32 %v16790_v47, %v5327_v12  ;;  %vm5331_vm8 = vweird.f32 %v16790_v47  ;;  %v16807_v50 = vld [vmem:[#allocation168_spill] sm:$0xff]  ;;  %v16808_v57 = vld [vmem:[#allocation105_spill] sm:$0xff]  ;;  %v3346_v42 = vpop.xlane.xlu0 %3345 }
 0x426   : > { %v4459_v18 = vadd.f32 %v4395_v4, %v16805_v3  ;;  %v16809_v31 = vsub.f32 %v16807_v50, %v16808_v57  ;;  %v4397_v36 = vmul.f32 0.5, %v4269_v1  ;;  %4101 = vst.msk [vmem:[#allocation4 + $0x108] sm:$0xff] %vm388_vm4, %v4037_v0  ;;  %v2877_v8 = vld [vmem:[#allocation3 + $0x110] sm:$0xff]  ;;  %v13242_v4 = vsel %vm13169_vm1, %v5307_v23, %v5303_v35 }
 0x427   : > { %v4586_v30 = vsel %vm388_vm4, %v4522_v63, 0.0  ;;  %v4587_v13 = vsel %vm388_vm4, %v4523_v27, 0.0  ;;  %3962 = vadd.xlane.f32.xlu1 %v3961_v6  ;;  %v16810_v12 = vld [vmem:[#allocation116_spill] sm:$0xff]  ;;  %4102 = vst.msk [vmem:[#allocation4 + $0x110] sm:$0xff] %vm388_vm4, %v4038_v25  ;;  %vm5330_vm10 = vweird.f32 %v16789_v34  ;;  %v5312_v1 = vsub.f32 1.0, %v5311_v22  ;;  %v16811_v6 = vld [vmem:[#allocation14_spill] sm:$0xff] }
 0x428   : > { %v4460_v61 = vadd.f32 %v4396_v38, %v16809_v31  ;;  %v3449_v56 = vadd.f32 %v3448_v52, %v16810_v12  ;;  %v13249_v38 = vor.u32 1.1754944e-38, %v5336_v60  ;;  %v5321_v23 = vand.u32 2147483648, %v16801_v58  ;;  %v6741_v63 = vld [vmem:[%s12235_s20 + $0x10] sm:$0xff]  ;;  %v6742_v22 = vld [vmem:[%s12235_s20 + $0x18] sm:$0xff]  ;;  %vm13313_vm15 = vmor %vm5330_vm10, %vm5331_vm8 }
 0x429   : > { %v5903_v35 = vmul.f32 %v5279_v39, %v13228_v19  ;;  %v4524_v27 = vmul.f32 %v6741_v63, %v4459_v18  ;;  %v3526_v3 = vadd.f32 %v3346_v42, %v2877_v8  ;;  %v3454_v25 = vadd.f32 %v12945_v5, %v16811_v6  ;;  %v16813_v39 = vld [vmem:[#allocation139_spill] sm:$0xff]  ;;  %v16814_v18 = vld [vmem:[#allocation130_spill] sm:$0xff] }
 0x42a   : > { %3450 = vadd.xlane.f32.xlu0 %v3449_v56  ;;  %v13258_v43 = vadd.f32 %v16790_v47, %v5328_v32  ;;  %v4588_v60 = vadd.f32 %v4587_v13, %v4586_v30  ;;  %v4525_v52 = vmul.f32 %v6742_v22, %v4460_v61  ;;  %v16812_v50 = vsub.f32 %v12517_v54, %v12284_v33  ;;  %v16815_v5 = vld [vmem:[#allocation162_spill] sm:$0xff]  ;;  %v16819_v33 = vld [vmem:[#allocation205_spill] sm:$0xff]  ;;  %v16820_v54 = vld [vmem:[#allocation79_spill] sm:$0xff] }
 0x42b   : > { %v4398_v31 = vmul.f32 0.5, %v4270_v2  ;;  %3590 = vst.msk [vmem:[#allocation3 + $0x110] sm:$0xff] %vm388_vm4, %v3526_v3  ;;  %3455 = vadd.xlane.f32.xlu2 %v3454_v25  ;;  %v3457_v8 = vadd.f32 %v16814_v18, %v16813_v39  ;;  %vm2033_vm11 = vcmp.eq.f32.partialorder %v16815_v5, %v6992_v10  ;;  %vm2034_vm9 = vcmp.eq.f32.partialorder %v16815_v5, %v6994_v11  ;;  %v4272_v56 = vld [vmem:[#allocation4 + $0x38] sm:$0xff]  ;;  %v6743_v25 = vld [vmem:[%s12235_s20 + $0x20] sm:$0xff]  ;;  %v3351_v39 = vpop.xlane.xlu2 %3350 }
 0x42c   : > { %v4461_v57 = vadd.f32 %v4397_v36, %v16812_v50  ;;  %v16816_v32 = vand.u32 2147483647, %v16789_v34  ;;  %v13279_v36 = vmul.f32 %v16820_v54, %v16819_v33  ;;  %v4399_v42 = vmul.f32 0.5, %v4271_v41  ;;  %v16821_v2 = vld [vmem:[#allocation156_spill] sm:$0xff]  ;;  %v2879_v18 = vld [vmem:[#allocation3 + $0x120] sm:$0xff] }
 0x42d   : > { %vm2035_vm12 = vcmp.eq.f32.partialorder %v16815_v5, %v7005_v15  ;;  %v2298_v30 = vsel %vm2033_vm11, %v9172_v49, 0.0  ;;  %v5313_v13 = vmul.f32 %v16802_v16, %v5312_v1  ;;  %v4589_v12 = vsel %vm388_vm4, %v4524_v27, 0.0  ;;  %v2878_v50 = vld [vmem:[#allocation3 + $0x118] sm:$0xff]  ;;  %v13292_v1 = vld [vmem:[#allocation3 + $0xc8] sm:$0xff] }
 0x42e   : > { %vm13273_vm6 = vcmp.eq.f32.partialorder %v16816_v32, 8.507059e+37  ;;  %v3458_v63 = vadd.f32 %v3457_v8, %v16821_v2  ;;  %v2299_v3 = vsel %vm2034_vm9, %v9276_v21, 0.0  ;;  %v4591_v6 = vsel %vm388_vm4, %v4525_v52, 0.0  ;;  %v3356_v32 = vpop.xlane.xlu1 %3355  ;;  %v16823_v52 = vld [vmem:[#allocation125_spill] sm:$0xff] }
 0x42f   : > { %v4526_v22 = vmul.f32 %v6743_v25, %v4461_v57  ;;  %vm2036_vm13 = vcmp.eq.f32.partialorder %v16815_v5, %v7019_v20  ;;  %v3964_v41 = vadd.f32 %v2299_v3, %v2298_v30  ;;  %vm5316_vm14 = vweird.f32 %v16802_v16  ;;  %v13304_v3 = vld [vmem:[#allocation3 + $0xd8] sm:$0xff] }
 0x430   : > { %v4590_v27 = vadd.f32 %v4589_v12, %v4588_v60  ;;  %v16822_v8 = vsub.f32 %v12525_v48, %v12319_v55  ;;  %v3459_v44 = vadd.f32 %v3458_v63, %v16823_v52  ;;  %v2300_v57 = vsel %vm2035_vm12, %v16703_v37, 0.0  ;;  %16824 = vst [vmem:[#allocation94_spill] sm:$0xff] %v13304_v3  ;;  %v4273_v60 = vld [vmem:[#allocation4 + $0x40] sm:$0xff]  ;;  %v4274_v63 = vld [vmem:[#allocation4 + $0x48] sm:$0xff]  ;;  %v13347_v52 = vld [vmem:[#allocation2 + $0xd8] sm:$0xff] }
 0x431   : > { %v5989_v30 = vsel %vm388_vm4, %v5903_v35, 0.0  ;;  %v16825_v25 = vsub.f32 %v12521_v53, %v12372_v7  ;;  %v4400_v12 = vmul.f32 0.5, %v4272_v56  ;;  %v3965_v55 = vadd.f32 %v3964_v41, %v2300_v57  ;;  %v6744_v41 = vld [vmem:[%s12235_s20 + $0x28] sm:$0xff]  ;;  %16829 = vst [vmem:[#allocation82_spill] sm:$0xff] %v13347_v52 }
 0x432   : > { %v4462_v2 = vadd.f32 %v4398_v31, %v16822_v8  ;;  %vm5315_vm3 = vweird.f32 %v16801_v58  ;;  %v4592_v35 = vadd.f32 %v4591_v6, %v4590_v27  ;;  %3460 = vadd.xlane.f32.xlu1 %v3459_v44  ;;  %v2301_v7 = vsel %vm2036_vm13, %v16706_v9, 0.0  ;;  %v13334_v27 = vld [vmem:[#allocation2 + $0xc8] sm:$0xff] }
 0x433   : > { %v4463_v0 = vadd.f32 %v4399_v42, %v16825_v25  ;;  %v3527_v53 = vadd.f32 %v3351_v39, %v2878_v50  ;;  %v3528_v31 = vadd.f32 %v3356_v32, %v2879_v18  ;;  %v4752_v42 = vsub.f32 %v12085_v28, %v13292_v1  ;;  %v3655_v18 = vld [vmem:[#allocation4 + $0x118] sm:$0xff]  ;;  %v3863_v32 = vpop.xlane.xlu0 %3862  ;;  %vm13388_vm7 = vmor %vm5315_vm3, %vm5316_vm14 }
 0x434   : > { %v5333_v34 = vsel %vm13313_vm15, %v16790_v47, %v13258_v43  ;;  %v4593_v56 = vsel %vm388_vm4, %v4526_v22, 0.0  ;;  %v3966_v44 = vadd.f32 %v3965_v55, %v2301_v7  ;;  %v5990_v6 = vadd.f32 %v5989_v30, %v13163_v17  ;;  %v6746_v17 = vld [vmem:[%s12235_s20 + $0x30] sm:$0xff]  ;;  %v6748_v7 = vld [vmem:[%s12235_s20 + $0x38] sm:$0xff] }
 0x435   : > { %v4754_v5 = vsub.f32 %v12085_v28, %v13304_v3  ;;  %v4527_v50 = vmul.f32 %v6744_v41, %v4462_v2  ;;  %v4401_v39 = vmul.f32 0.5, %v4273_v60  ;;  %3591 = vst.msk [vmem:[#allocation3 + $0x118] sm:$0xff] %vm388_vm4, %v3527_v53  ;;  %v13340_v43 = vor.u32 1.1754944e-38, %v5321_v23 }
 0x436   : > { %v4528_v22 = vmul.f32 %v6746_v17, %v4463_v0  ;;  %v16828_v8 = vsub.f32 %v12564_v45, %v12374_v26  ;;  %3967 = vadd.xlane.f32.xlu0 %v3966_v44  ;;  %3592 = vst.msk [vmem:[#allocation3 + $0x120] sm:$0xff] %vm388_vm4, %v3528_v31  ;;  %v5338_v23 = vsel %vm13273_vm6, %v13249_v38, %v5333_v34  ;;  %v4402_v25 = vmul.f32 0.5, %v4274_v63  ;;  %v16831_v31 = vld [vmem:[#allocation27_spill] sm:$0xff]  ;;  %v4276_v63 = vld [vmem:[#allocation4 + $0x58] sm:$0xff]  ;;  %v3868_v44 = vpop.xlane.xlu2 %3867 }
 0x437   : > { %v4594_v30 = vadd.f32 %v4593_v56, %v4592_v35  ;;  %v5309_v0 = vmul.f32 %v13242_v4, %v4752_v42  ;;  %v13356_v26 = vadd.f32 %v16802_v16, %v5313_v13  ;;  %v4039_v60 = vadd.f32 %v3863_v32, %v3655_v18  ;;  %v4275_v4 = vld [vmem:[#allocation4 + $0x50] sm:$0xff]  ;;  %v6749_v18 = vld [vmem:[%s12235_s20 + $0x40] sm:$0xff]  ;;  %v2880_v42 = vld [vmem:[#allocation3 + $0x128] sm:$0xff] }
 0x438   : > { %v4464_v2 = vadd.f32 %v4400_v12, %v16828_v8  ;;  %v13360_v12 = vld [vmem:[%s12235_s20 + $0xc8] sm:$0xff]  ;;  %v13363_v55 = vadd.f32 %v13190_v24, %v5990_v6  ;;  %v13365_v48 = vmul.f32 %v5338_v23, %v4754_v5  ;;  %v4595_v61 = vsel %vm388_vm4, %v4527_v50, 0.0 }
 0x439   : > { %v16830_v38 = vsub.f32 %v12648_v51, %v12431_v46  ;;  %v4597_v13 = vsel %vm388_vm4, %v4528_v22, 0.0  ;;  %4103 = vst.msk [vmem:[#allocation4 + $0x118] sm:$0xff] %vm388_vm4, %v4039_v60  ;;  %vm2037_vm0 = vcmp.eq.f32.partialorder %v16831_v31, %v6992_v10  ;;  %vm2038_vm1 = vcmp.eq.f32.partialorder %v16831_v31, %v6994_v11  ;;  %v16832_v51 = vld [vmem:[#allocation167_spill] sm:$0xff]  ;;  %v16836_v60 = vld [vmem:[#allocation218_spill] sm:$0xff] }
 0x43a   : > { %v4529_v53 = vmul.f32 %v6748_v7, %v4464_v2  ;;  %v4596_v46 = vadd.f32 %v4595_v61, %v4594_v30  ;;  %v16833_v34 = vsub.f32 %v12579_v29, %v16832_v51  ;;  %v5905_v6 = vmul.f32 %v5309_v0, %v13360_v12  ;;  %v4277_v2 = vld [vmem:[#allocation4 + $0x60] sm:$0xff]  ;;  %v6750_v30 = vld [vmem:[%s12235_s20 + $0x48] sm:$0xff]  ;;  %v3873_v51 = vpop.xlane.xlu1 %3872 }
 0x43b   : > { %v4465_v35 = vadd.f32 %v4401_v39, %v16830_v38  ;;  %v4403_v41 = vmul.f32 0.5, %v4275_v4  ;;  %vm2039_vm2 = vcmp.eq.f32.partialorder %v16831_v31, %v7005_v15  ;;  %v2302_v29 = vsel %vm2037_vm0, %v9172_v49, 0.0  ;;  %v16837_v61 = vld [vmem:[#allocation199_spill] sm:$0xff]  ;;  %v16838_v38 = vld [vmem:[#allocation198_spill] sm:$0xff] }
 0x43c   : > { %v4466_v56 = vadd.f32 %v4402_v25, %v16833_v34  ;;  %v4598_v39 = vadd.f32 %v4597_v13, %v4596_v46  ;;  %v2303_v17 = vsel %vm2038_vm1, %v9276_v21, 0.0  ;;  %v4599_v22 = vsel %vm388_vm4, %v4529_v53, 0.0  ;;  %v3656_v53 = vld [vmem:[#allocation4 + $0x120] sm:$0xff]  ;;  %v3657_v46 = vld [vmem:[#allocation4 + $0x128] sm:$0xff] }
 0x43d   : > { %v4530_v32 = vmul.f32 %v6749_v18, %v4465_v35  ;;  %v4404_v8 = vmul.f32 0.5, %v4276_v63  ;;  %vm2040_vm5 = vcmp.eq.f32.partialorder %v16831_v31, %v7019_v20  ;;  %v3969_v23 = vadd.f32 %v2303_v17, %v2302_v29  ;;  %v16846_v50 = vld [vmem:[#allocation111_spill] sm:$0xff] }
 0x43e   : > { %v4531_v25 = vmul.f32 %v6750_v30, %v4466_v56  ;;  %v2304_v0 = vsel %vm2039_vm2, %v16703_v37, 0.0  ;;  %vm2041_vm8 = vcmp.eq.f32.partialorder %v16836_v60, %v6992_v10  ;;  %vm2042_vm10 = vcmp.eq.f32.partialorder %v16836_v60, %v6994_v11  ;;  %v13428_v30 = vld [vmem:[%s12235_s20 + $0xd8] sm:$0xff]  ;;  %v16847_v45 = vld [vmem:[#allocation39_spill] sm:$0xff] }
 0x43f   : > { %v16839_v35 = vsub.f32 %v16837_v61, %v16838_v38  ;;  %v3970_v13 = vadd.f32 %v3969_v23, %v2304_v0  ;;  %vm2043_vm11 = vcmp.eq.f32.partialorder %v16836_v60, %v7005_v15  ;;  %v2306_v7 = vsel %vm2041_vm8, %v9172_v49, 0.0  ;;  %v3361_v23 = vpop.xlane.xlu0 %3360  ;;  %16840 = vst [vmem:[#allocation103_spill] sm:$0xff] %v13428_v30 }
 0x440   : > { %v4600_v34 = vadd.f32 %v4599_v22, %v4598_v39  ;;  %v4405_v56 = vmul.f32 0.5, %v4277_v2  ;;  %v2305_v63 = vsel %vm2040_vm5, %v16706_v9, 0.0  ;;  %v4601_v29 = vsel %vm388_vm4, %v4530_v32, 0.0  ;;  %v4278_v39 = vld [vmem:[#allocation4 + $0x68] sm:$0xff]  ;;  %v16841_v22 = vld [vmem:[#allocation176_spill] sm:$0xff] }
 0x441   : > { %v4467_v4 = vadd.f32 %v4403_v41, %v16839_v35  ;;  %v2307_v41 = vsel %vm2042_vm10, %v9276_v21, 0.0  ;;  %v3971_v18 = vadd.f32 %v3970_v13, %v2305_v63  ;;  %vm2044_vm9 = vcmp.eq.f32.partialorder %v16836_v60, %v7019_v20  ;;  %v16842_v2 = vld [vmem:[#allocation119_spill] sm:$0xff]  ;;  %v16843_v35 = vld [vmem:[#allocation201_spill] sm:$0xff]  ;;  %v16844_v13 = vld [vmem:[#allocation112_spill] sm:$0xff] }
 0x442   : > { %v3974_v17 = vadd.f32 %v2307_v41, %v2306_v7  ;;  %v2308_v31 = vsel %vm2043_vm11, %v16703_v37, 0.0  ;;  %v3462_v0 = vadd.f32 %v16842_v2, %v16841_v22  ;;  %v4040_v61 = vadd.f32 %v3868_v44, %v3656_v53  ;;  %v6751_v41 = vld [vmem:[%s12235_s20 + $0x50] sm:$0xff] }
 0x443   : > { %v4041_v38 = vadd.f32 %v3873_v51, %v3657_v46  ;;  %v4603_v32 = vsel %vm388_vm4, %v4531_v25, 0.0  ;;  %v16845_v63 = vsub.f32 %v16843_v35, %v16844_v13  ;;  %v4532_v57 = vmul.f32 %v6751_v41, %v4467_v4  ;;  %3972 = vadd.xlane.f32.xlu2 %v3971_v18  ;;  %v16849_v25 = vld [vmem:[#allocation53_spill] sm:$0xff]  ;;  %v16859_v2 = vld [vmem:[#allocation179_spill] sm:$0xff]  ;;  %v16861_v13 = vld [vmem:[#allocation174_spill] sm:$0xff] }
 0x444   : > { %v3975_v47 = vadd.f32 %v3974_v17, %v2308_v31  ;;  %v4602_v24 = vadd.f32 %v4601_v29, %v4600_v34  ;;  %v16848_v3 = vsub.f32 %v16846_v50, %v16847_v45  ;;  %v2309_v44 = vsel %vm2044_vm9, %v16706_v9, 0.0  ;;  %4104 = vst.msk [vmem:[#allocation4 + $0x120] sm:$0xff] %vm388_vm4, %v4040_v61  ;;  %v16855_v17 = vld [vmem:[#allocation213_spill] sm:$0xff]  ;;  %v16863_v41 = vld [vmem:[#allocation184_spill] sm:$0xff] }
 0x445   : > { %v4468_v7 = vadd.f32 %v4404_v8, %v16845_v63  ;;  %v3463_v53 = vadd.f32 %v3462_v0, %v16849_v25  ;;  %v13450_v8 = vpop.xlane.xlu2 %3365  ;;  %v13454_v4 = vmul.f32 %v13365_v48, %v13428_v30  ;;  %v16850_v46 = vsub.f32 1.0, %v13279_v36  ;;  %4105 = vst.msk [vmem:[#allocation4 + $0x128] sm:$0xff] %vm388_vm4, %v4041_v38  ;;  %v6753_v61 = vld [vmem:[%s12235_s20 + $0x60] sm:$0xff]  ;;  %v4280_v35 = vld [vmem:[#allocation4 + $0x78] sm:$0xff] }
 0x446   : > { %v4469_v52 = vadd.f32 %v4405_v56, %v16848_v3  ;;  %vm5346_vm6 = vweird.f32 %v16820_v54  ;;  %v4279_v3 = vld [vmem:[#allocation4 + $0x70] sm:$0xff]  ;;  %v4406_v50 = vmul.f32 0.5, %v4278_v39  ;;  %v3976_v60 = vadd.f32 %v3975_v47, %v2309_v44  ;;  %v16851_v56 = vld [vmem:[#allocation149_spill] sm:$0xff]  ;;  %v16856_v39 = vld [vmem:[#allocation26_spill] sm:$0xff] }
 0x447   : > { %v5343_v45 = vmul.f32 %v16820_v54, %v16850_v46  ;;  %v13462_v51 = vsel %vm388_vm4, %v5905_v6, 0.0  ;;  %v4604_v34 = vadd.f32 %v4603_v32, %v4602_v24  ;;  %v3464_v48 = vadd.f32 %v3463_v53, %v16851_v56  ;;  %v16857_v6 = vld [vmem:[#allocation126_spill] sm:$0xff]  ;;  %v16858_v24 = vld [vmem:[#allocation133_spill] sm:$0xff]  ;;  %v16862_v63 = vld [vmem:[#allocation120_spill] sm:$0xff] }
 0x448   : > { %v3529_v29 = vadd.f32 %v3361_v23, %v2880_v42  ;;  %v16852_v36 = vand.u32 2147483647, %v16801_v58  ;;  %vm5345_vm13 = vweird.f32 %v16819_v33  ;;  %v13474_v47 = vmul.f32 %v16856_v39, %v16855_v17  ;;  %3977 = vadd.xlane.f32.xlu1 %v3976_v60  ;;  %v16860_v42 = vld [vmem:[#allocation51_spill] sm:$0xff]  ;;  %v6752_v58 = vld [vmem:[%s12235_s20 + $0x58] sm:$0xff] }
 0x449   : > { %v4605_v31 = vsel %vm388_vm4, %v4532_v57, 0.0  ;;  %v3467_v22 = vadd.f32 %v16858_v24, %v16857_v6  ;;  %v3472_v23 = vadd.f32 %v16860_v42, %v16859_v2  ;;  %v4533_v0 = vmul.f32 %v6752_v58, %v4468_v7  ;;  %3465 = vadd.xlane.f32.xlu0 %v3464_v48  ;;  %v13486_v57 = vld [vmem:[#allocation3 + $0xd0] sm:$0xff]  ;;  %v16866_v60 = vld [vmem:[#allocation141_spill] sm:$0xff]  ;;  %v3371_v2 = vpop.xlane.xlu1 %3370  ;;  %v3878_v42 = vpop.xlane.xlu0 %3877  ;;  %vm13539_vm1 = vmor %vm5345_vm13, %vm5346_vm6 }
 0x44a   : > { %vm13467_vm12 = vcmp.eq.f32.partialorder %v16852_v36, 8.507059e+37  ;;  %v4534_v38 = vmul.f32 %v6753_v61, %v4469_v52  ;;  %v4407_v32 = vmul.f32 0.5, %v4279_v3  ;;  %3593 = vst.msk [vmem:[#allocation3 + $0x128] sm:$0xff] %vm388_vm4, %v3529_v29  ;;  %vm2045_vm14 = vcmp.eq.f32.partialorder %v16861_v13, %v6992_v10  ;;  %v16865_v53 = vld [vmem:[#allocation135_spill] sm:$0xff]  ;;  %v16867_v36 = vld [vmem:[#allocation136_spill] sm:$0xff] }
 0x44b   : > { %v16864_v44 = vsub.f32 %v16862_v63, %v16863_v41  ;;  %v3468_v46 = vadd.f32 %v3467_v22, %v16865_v53  ;;  %v3473_v7 = vadd.f32 %v3472_v23, %v16866_v60  ;;  %vm2046_vm15 = vcmp.eq.f32.partialorder %v16861_v13, %v6994_v11  ;;  %v16868_v24 = vld [vmem:[#allocation71_spill] sm:$0xff]  ;;  %v2882_v61 = vld [vmem:[#allocation3 + $0x138] sm:$0xff] }
 0x44c   : > { %v4606_v52 = vadd.f32 %v4605_v31, %v4604_v34  ;;  %vm2047_vm3 = vcmp.eq.f32.partialorder %v16861_v13, %v7005_v15  ;;  %v2310_v3 = vsel %vm2045_vm14, %v9172_v49, 0.0  ;;  %v2311_v56 = vsel %vm2046_vm15, %v9276_v21, 0.0  ;;  %v2881_v58 = vld [vmem:[#allocation3 + $0x130] sm:$0xff]  ;;  %v6754_v63 = vld [vmem:[%s12235_s20 + $0x68] sm:$0xff] }
 0x44d   : > { %v4470_v25 = vadd.f32 %v4406_v50, %v16864_v44  ;;  %v5344_v48 = vadd.f32 %v16820_v54, %v5343_v45  ;;  %v4408_v29 = vmul.f32 0.5, %v4280_v35  ;;  %v4281_v50 = vld [vmem:[#allocation4 + $0x80] sm:$0xff]  ;;  %v3469_v6 = vadd.f32 %v3468_v46, %v16867_v36  ;;  %v16870_v46 = vld [vmem:[#allocation192_spill] sm:$0xff]  ;;  %v13517_v36 = vpop.xlane.xlu2 %3882 }
 0x44e   : > { %v3474_v22 = vadd.f32 %v3473_v7, %v16868_v24  ;;  %v4753_v34 = vsub.f32 %v12085_v28, %v13486_v57  ;;  %v5372_v31 = vsub.f32 1.0, %v13474_v47  ;;  %vm2048_vm0 = vcmp.eq.f32.partialorder %v16861_v13, %v7019_v20  ;;  %v16869_v47 = vld [vmem:[#allocation193_spill] sm:$0xff]  ;;  %v16878_v13 = vld [vmem:[#allocation210_spill] sm:$0xff] }
 0x44f   : > { %v3979_v23 = vadd.f32 %v2311_v56, %v2310_v3  ;;  %v4607_v45 = vsel %vm388_vm4, %v4533_v0, 0.0  ;;  %v4609_v35 = vsel %vm388_vm4, %v4534_v38, 0.0  ;;  %v4535_v41 = vmul.f32 %v6754_v63, %v4470_v25  ;;  %3470 = vadd.xlane.f32.xlu2 %v3469_v6  ;;  %v16872_v0 = vld [vmem:[#allocation58_spill] sm:$0xff]  ;;  %v16873_v24 = vld [vmem:[#allocation185_spill] sm:$0xff] }
 0x450   : > { %v2312_v44 = vsel %vm2047_vm3, %v16703_v37, 0.0  ;;  %v4608_v53 = vadd.f32 %v4607_v45, %v4606_v52  ;;  %v16871_v60 = vsub.f32 %v16869_v47, %v16870_v46  ;;  %v4409_v3 = vmul.f32 0.5, %v4281_v50  ;;  %v4282_v25 = vld [vmem:[#allocation4 + $0x88] sm:$0xff]  ;;  %3475 = vadd.xlane.f32.xlu1 %v3474_v22  ;;  %v6756_v47 = vld [vmem:[%s12235_s20 + $0x78] sm:$0xff] }
 0x451   : > { %v3980_v56 = vadd.f32 %v3979_v23, %v2312_v44  ;;  %v16874_v38 = vsub.f32 %v16872_v0, %v16873_v24  ;;  %v2313_v6 = vsel %vm2048_vm0, %v16706_v9, 0.0  ;;  %v3530_v52 = vadd.f32 %v13450_v8, %v2881_v58  ;;  %v16879_v8 = vld [vmem:[#allocation217_spill] sm:$0xff]  ;;  %v4283_v44 = vld [vmem:[#allocation4 + $0x90] sm:$0xff] }
 0x452   : > { %v4471_v7 = vadd.f32 %v4407_v32, %v16871_v60  ;;  %v3531_v45 = vadd.f32 %v3371_v2, %v2882_v61  ;;  %v16875_v32 = vsel %vm13388_vm7, %v16802_v16, %v13356_v26  ;;  %v5356_v22 = vmul.f32 %v16879_v8, %v16878_v13 }
 0x453   : > { %v4472_v30 = vadd.f32 %v4408_v29, %v16874_v38  ;;  %v5323_v50 = vsel %vm13467_vm12, %v13340_v43, %v16875_v32  ;;  %v4610_v2 = vadd.f32 %v4609_v35, %v4608_v53  ;;  %v3981_v5 = vadd.f32 %v3980_v56, %v2313_v6  ;;  %3594 = vst.msk [vmem:[#allocation3 + $0x130] sm:$0xff] %vm388_vm4, %v3530_v52  ;;  %v13571_v53 = vld [vmem:[%s12235_s20 + $0xd0] sm:$0xff]  ;;  %v16888_v6 = vld [vmem:[#allocation194_spill] sm:$0xff] }
 0x454   : > { %v5348_v16 = vsel %vm13539_vm1, %v16820_v54, %v5344_v48  ;;  %v16880_v43 = vand.u32 2147483647, %v16819_v33  ;;  %v16883_v18 = vand.u32 2147483648, %v16819_v33  ;;  %v4611_v58 = vsel %vm388_vm4, %v4535_v41, 0.0  ;;  %3595 = vst.msk [vmem:[#allocation3 + $0x138] sm:$0xff] %vm388_vm4, %v3531_v45  ;;  %v3658_v33 = vld [vmem:[#allocation4 + $0x130] sm:$0xff] }
 0x455   : > { %v13560_v61 = vadd.f32 %v13462_v51, %v13363_v55  ;;  %v5324_v54 = vmul.f32 %v5323_v50, %v4753_v34  ;;  %v4410_v48 = vmul.f32 0.5, %v4282_v25  ;;  %v16884_v35 = vsub.f32 %v13014_v62, %v12807_v40  ;;  %3982 = vadd.xlane.f32.xlu0 %v3981_v5  ;;  %16885 = vst [vmem:[#allocation95_spill] sm:$0xff] %v13571_v53  ;;  %v6755_v51 = vld [vmem:[%s12235_s20 + $0x70] sm:$0xff]  ;;  %v16887_v25 = vld [vmem:[#allocation93_spill] sm:$0xff] }
 0x456   : > { %vm13550_vm7 = vcmp.eq.f32.partialorder %v16880_v43, 8.507059e+37  ;;  %v5352_v23 = vor.u32 1.1754944e-38, %v16883_v18  ;;  %v13568_v41 = vsel %vm388_vm4, %v13454_v4, 0.0  ;;  %v5373_v55 = vmul.f32 %v16856_v39, %v5372_v31  ;;  %v16886_v31 = vld [vmem:[#allocation228_spill] sm:$0xff]  ;;  %v6757_v32 = vld [vmem:[%s12235_s20 + $0x80] sm:$0xff]  ;;  %v13610_v18 = vpop.xlane.xlu2 %3380 }
 0x457   : > { %v4473_v63 = vadd.f32 %v4409_v3, %v16884_v35  ;;  %v4536_v34 = vmul.f32 %v6755_v51, %v4471_v7  ;;  %v4537_v46 = vmul.f32 %v6756_v47, %v4472_v30  ;;  %vm5376_vm2 = vweird.f32 %v16856_v39  ;;  %v13585_v7 = vpop.xlane.xlu1 %3887  ;;  %v13587_v30 = vpop.xlane.xlu0 %3375  ;;  %v4285_v35 = vld [vmem:[#allocation4 + $0xa0] sm:$0xff]  ;;  %v6758_v51 = vld [vmem:[%s12235_s20 + $0x88] sm:$0xff] }
 0x458   : > { %v13578_v40 = vsel %vm13550_vm7, %v5352_v23, %v5348_v16  ;;  %v5357_v60 = vsub.f32 1.0, %v5356_v22  ;;  %v4612_v4 = vadd.f32 %v4611_v58, %v4610_v2  ;;  %v4411_v56 = vmul.f32 0.5, %v4283_v44  ;;  %v16890_v23 = vld [vmem:[#allocation76_spill] sm:$0xff]  ;;  %v16891_v58 = vld [vmem:[#allocation118_spill] sm:$0xff] }
 0x459   : > { %v4042_v0 = vadd.f32 %v3878_v42, %v3658_v33  ;;  %vm2049_vm5 = vcmp.eq.f32.partialorder %v16886_v31, %v6992_v10  ;;  %v5906_v24 = vmul.f32 %v5324_v54, %v13571_v53  ;;  %vm5375_vm8 = vweird.f32 %v16855_v17  ;;  %v4284_v42 = vld [vmem:[#allocation4 + $0x98] sm:$0xff] }
 0x45a   : > { %v5364_v38 = vand.u32 2147483647, %v16878_v13  ;;  %v16889_v52 = vsub.f32 %v16887_v25, %v16888_v6  ;;  %v4538_v50 = vmul.f32 %v6757_v32, %v4473_v63  ;;  %v13597_v29 = vadd.f32 %v16856_v39, %v5373_v55  ;;  %v13631_v25 = vld [vmem:[#allocation3 + $0xe0] sm:$0xff]  ;;  %v6759_v6 = vld [vmem:[%s12235_s20 + $0x90] sm:$0xff]  ;;  %vm13651_vm3 = vmor %vm5375_vm8, %vm5376_vm2 }
 0x45b   : > { %v5366_v22 = vand.u32 2147483648, %v16878_v13  ;;  %v4613_v2 = vsel %vm388_vm4, %v4536_v34, 0.0  ;;  %v4615_v5 = vsel %vm388_vm4, %v4537_v46, 0.0  ;;  %4106 = vst.msk [vmem:[#allocation4 + $0x130] sm:$0xff] %vm388_vm4, %v4042_v0  ;;  %v5358_v16 = vmul.f32 %v16879_v8, %v5357_v60  ;;  %v16893_v60 = vld [vmem:[#allocation38_spill] sm:$0xff]  ;;  %v16895_v32 = vld [vmem:[#allocation195_spill] sm:$0xff] }
 0x45c   : > { %v4474_v45 = vadd.f32 %v4410_v48, %v16889_v52  ;;  %v4614_v43 = vadd.f32 %v4613_v2, %v4612_v4  ;;  %vm2050_vm10 = vcmp.eq.f32.partialorder %v16886_v31, %v6994_v11  ;;  %v2314_v26 = vsel %vm2049_vm5, %v9172_v49, 0.0 }
 0x45d   : > { %v16892_v54 = vsub.f32 %v16890_v23, %v16891_v58  ;;  %v4412_v63 = vmul.f32 0.5, %v4284_v42  ;;  %vm2051_vm11 = vcmp.eq.f32.partialorder %v16886_v31, %v7005_v15  ;;  %v2315_v44 = vsel %vm2050_vm10, %v9276_v21, 0.0  ;;  %v16897_v58 = vld [vmem:[#allocation163_spill] sm:$0xff] }
 0x45e   : > { %v5995_v33 = vsel %vm388_vm4, %v5906_v24, 0.0  ;;  %v4616_v55 = vadd.f32 %v4615_v5, %v4614_v43  ;;  %v4539_v34 = vmul.f32 %v6758_v51, %v4474_v45  ;;  %v4617_v47 = vsel %vm388_vm4, %v4538_v50, 0.0  ;;  %v3659_v24 = vld [vmem:[#allocation4 + $0x138] sm:$0xff]  ;;  %v16894_v45 = vld [vmem:[#allocation143_spill] sm:$0xff] }
 0x45f   : > { %v4475_v48 = vadd.f32 %v4411_v56, %v16892_v54  ;;  %vm2052_vm9 = vcmp.eq.f32.partialorder %v16886_v31, %v7019_v20  ;;  %v3984_v46 = vadd.f32 %v2315_v44, %v2314_v26  ;;  %vm2053_vm6 = vcmp.eq.f32.partialorder %v16893_v60, %v6992_v10  ;;  %v4286_v43 = vld [vmem:[#allocation4 + $0xa8] sm:$0xff] }
 0x460   : > { %vm2054_vm12 = vcmp.eq.f32.partialorder %v16893_v60, %v6994_v11  ;;  %v4413_v4 = vmul.f32 0.5, %v4285_v35  ;;  %v2316_v56 = vsel %vm2051_vm11, %v16703_v37, 0.0  ;;  %vm2055_vm13 = vcmp.eq.f32.partialorder %v16893_v60, %v7005_v15  ;;  %v16898_v54 = vld [vmem:[#allocation123_spill] sm:$0xff]  ;;  %v3660_v35 = vld [vmem:[#allocation4 + $0x140] sm:$0xff] }
 0x461   : > { %v2318_v0 = vsel %vm2053_vm6, %v9172_v49, 0.0  ;;  %vm5361_vm14 = vweird.f32 %v16879_v8  ;;  %v4540_v52 = vmul.f32 %v6759_v6, %v4475_v48  ;;  %v16896_v50 = vsub.f32 %v16894_v45, %v16895_v32  ;;  %v16901_v45 = vld [vmem:[#allocation124_spill] sm:$0xff] }
 0x462   : > { %v3985_v2 = vadd.f32 %v3984_v46, %v2316_v56  ;;  %v2319_v5 = vsel %vm2054_vm12, %v9276_v21, 0.0  ;;  %v2317_v26 = vsel %vm2052_vm9, %v16706_v9, 0.0  ;;  %vm2056_vm15 = vcmp.eq.f32.partialorder %v16893_v60, %v7019_v20  ;;  %v13661_v56 = vpop.xlane.xlu1 %3385 }
 0x463   : > { %v4476_v42 = vadd.f32 %v4412_v63, %v16896_v50  ;;  %v3989_v23 = vadd.f32 %v2319_v5, %v2318_v0  ;;  %v3477_v48 = vadd.f32 %v16898_v54, %v16897_v58  ;;  %vm5360_vm0 = vweird.f32 %v16878_v13  ;;  %v13663_v0 = vpop.xlane.xlu0 %3892  ;;  %v2883_v5 = vld [vmem:[#allocation3 + $0x140] sm:$0xff]  ;;  %v16902_v58 = vld [vmem:[#allocation144_spill] sm:$0xff] }
 0x464   : > { %v4618_v31 = vadd.f32 %v4617_v47, %v4616_v55  ;;  %v3986_v44 = vadd.f32 %v3985_v2, %v2317_v26  ;;  %v2320_v51 = vsel %vm2055_vm13, %v16703_v37, 0.0  ;;  %v4043_v46 = vadd.f32 %v13517_v36, %v3659_v24  ;;  %v13681_v26 = vld [vmem:[#allocation3 + $0xf0] sm:$0xff]  ;;  %vm13733_vm8 = vmor %vm5360_vm0, %vm5361_vm14 }
 0x465   : > { %v4755_v6 = vsub.f32 %v12085_v28, %v13631_v25  ;;  %v3990_v47 = vadd.f32 %v3989_v23, %v2320_v51  ;;  %v3478_v32 = vadd.f32 %v3477_v48, %v16901_v45  ;;  %v13673_v50 = vadd.f32 %v5995_v33, %v13560_v61  ;;  %v4287_v33 = vld [vmem:[#allocation4 + $0xb0] sm:$0xff]  ;;  %v13688_v48 = vpop.xlane.xlu2 %3897  ;;  %v6760_v45 = vld [vmem:[%s12235_s20 + $0x98] sm:$0xff] }
 0x466   : > { %v4414_v2 = vmul.f32 0.5, %v4286_v43  ;;  %3987 = vadd.xlane.f32.xlu2 %v3986_v44  ;;  %v2321_v36 = vsel %vm2056_vm15, %v16706_v9, 0.0  ;;  %4107 = vst.msk [vmem:[#allocation4 + $0x138] sm:$0xff] %vm388_vm4, %v4043_v46  ;;  %v4044_v24 = vadd.f32 %v13585_v7, %v3660_v35  ;;  %v13684_v23 = vadd.f32 %v16879_v8, %v5358_v16  ;;  %v16903_v51 = vld [vmem:[#allocation99_spill] sm:$0xff] }
 0x467   : > { %v4619_v61 = vsel %vm388_vm4, %v4539_v34, 0.0  ;;  %v3991_v43 = vadd.f32 %v3990_v47, %v2321_v36  ;;  %v3479_v54 = vadd.f32 %v3478_v32, %v16902_v58  ;;  %v4621_v44 = vsel %vm388_vm4, %v4540_v52, 0.0  ;;  %v16904_v46 = vld [vmem:[#allocation127_spill] sm:$0xff]  ;;  %v16907_v47 = vld [vmem:[#allocation165_spill] sm:$0xff]  ;;  %v16908_v32 = vld [vmem:[#allocation142_spill] sm:$0xff] }
 0x468   : > { %v4620_v60 = vadd.f32 %v4619_v61, %v4618_v31  ;;  %v16905_v7 = vsub.f32 %v16903_v51, %v16904_v46  ;;  %v4541_v55 = vmul.f32 %v6760_v45, %v4476_v42  ;;  %4108 = vst.msk [vmem:[#allocation4 + $0x140] sm:$0xff] %vm388_vm4, %v4044_v24  ;;  %v5367_v16 = vor.u32 1.1754944e-38, %v5366_v22  ;;  %v16906_v31 = vld [vmem:[#allocation181_spill] sm:$0xff]  ;;  %v16912_v24 = vld [vmem:[#allocation78_spill] sm:$0xff]  ;;  %v16915_v51 = vld [vmem:[#allocation188_spill] sm:$0xff] }
 0x469   : > { %3992 = vadd.xlane.f32.xlu1 %v3991_v43  ;;  %3480 = vadd.xlane.f32.xlu0 %v3479_v54  ;;  %v3532_v34 = vadd.f32 %v13587_v30, %v2883_v5  ;;  %v3482_v52 = vadd.f32 %v16907_v47, %v16906_v31  ;;  %v16909_v36 = vld [vmem:[#allocation137_spill] sm:$0xff]  ;;  %vm13708_vm1 = vcmp.eq.f32.partialorder %v5364_v38, 8.507059e+37  ;;  %v16913_v43 = vld [vmem:[#allocation131_spill] sm:$0xff]  ;;  %v4415_v58 = vmul.f32 0.5, %v4287_v33  ;;  %v16926_v42 = vld [vmem:[#allocation214_spill] sm:$0xff] }
 0x46a   : > { %v4477_v35 = vadd.f32 %v4413_v4, %v16905_v7  ;;  %v3487_v61 = vadd.f32 %v16909_v36, %v16908_v32  ;;  %v5354_v4 = vmul.f32 %v13578_v40, %v4755_v6  ;;  %v16914_v30 = vsub.f32 %v16912_v24, %v16913_v43  ;;  %v16916_v40 = vld [vmem:[#allocation140_spill] sm:$0xff]  ;;  %v16917_v7 = vld [vmem:[#allocation178_spill] sm:$0xff]  ;;  %v16922_v43 = vld [vmem:[#allocation19_spill] sm:$0xff] }
 0x46b   : > { %v4622_v54 = vadd.f32 %v4621_v44, %v4620_v60  ;;  %3596 = vst.msk [vmem:[#allocation3 + $0x140] sm:$0xff] %vm388_vm4, %v3532_v34  ;;  %v3483_v46 = vadd.f32 %v3482_v52, %v16915_v51  ;;  %vm2057_vm7 = vcmp.eq.f32.partialorder %v16917_v7, %v6992_v10  ;;  %v13721_v38 = vld [vmem:[%s12235_s20 + $0xe0] sm:$0xff]  ;;  %v4623_v47 = vsel %vm388_vm4, %v4541_v55, 0.0  ;;  %v4288_v32 = vld [vmem:[#allocation4 + $0xb8] sm:$0xff]  ;;  %v13737_v33 = vld [vmem:[#allocation3 + $0xe8] sm:$0xff]  ;;  %v13755_v62 = vpop.xlane.xlu0 %3390 }
 0x46c   : > { %v4478_v5 = vadd.f32 %v4414_v2, %v16914_v30  ;;  %v3488_v6 = vadd.f32 %v3487_v61, %v16916_v40  ;;  %v6761_v45 = vld [vmem:[%s12235_s20 + $0xa0] sm:$0xff]  ;;  %vm2058_vm2 = vcmp.eq.f32.partialorder %v16917_v7, %v6994_v11  ;;  %vm2059_vm5 = vcmp.eq.f32.partialorder %v16917_v7, %v7005_v15  ;;  %v6762_v61 = vld [vmem:[%s12235_s20 + $0xa8] sm:$0xff] }
 0x46d   : > { %v4542_v31 = vmul.f32 %v6761_v45, %v4477_v35  ;;  %v4289_v60 = vld [vmem:[#allocation4 + $0xc0] sm:$0xff]  ;;  %v2322_v52 = vsel %vm2057_vm7, %v9172_v49, 0.0  ;;  %v2323_v36 = vsel %vm2058_vm2, %v9276_v21, 0.0  ;;  %v5363_v13 = vsel %vm13733_vm8, %v16879_v8, %v13684_v23  ;;  %v16925_v45 = vld [vmem:[#allocation212_spill] sm:$0xff] }
 0x46e   : > { %v16920_v44 = vld [vmem:[#allocation189_spill] sm:$0xff]  ;;  %v16921_v35 = vld [vmem:[#allocation122_spill] sm:$0xff]  ;;  %v4543_v24 = vmul.f32 %v6762_v61, %v4478_v5  ;;  %v4624_v3 = vadd.f32 %v4623_v47, %v4622_v54  ;;  %v4416_v53 = vmul.f32 0.5, %v4288_v32  ;;  %vm2060_vm10 = vcmp.eq.f32.partialorder %v16917_v7, %v7019_v20 }
 0x46f   : > { %v3484_v55 = vadd.f32 %v3483_v46, %v16920_v44  ;;  %v3489_v34 = vadd.f32 %v3488_v6, %v16921_v35  ;;  %v16923_v30 = vld [vmem:[#allocation98_spill] sm:$0xff]  ;;  %v5386_v46 = vmul.f32 %v16926_v42, %v16925_v45  ;;  %v2885_v6 = vld [vmem:[#allocation3 + $0x150] sm:$0xff]  ;;  %v13753_v35 = vpop.xlane.xlu1 %3902  ;;  %v3994_v8 = vadd.f32 %v2323_v36, %v2322_v52  ;;  %v13769_v52 = vpop.xlane.xlu2 %3395 }
 0x470   : > { %v16924_v51 = vsub.f32 %v16922_v43, %v16923_v30  ;;  %v2884_v44 = vld [vmem:[#allocation3 + $0x148] sm:$0xff]  ;;  %v5908_v23 = vmul.f32 %v5354_v4, %v13721_v38  ;;  %v4756_v5 = vsub.f32 %v12085_v28, %v13737_v33  ;;  %v2324_v2 = vsel %vm2059_vm5, %v16703_v37, 0.0 }
 0x471   : > { %3485 = vadd.xlane.f32.xlu2 %v3484_v55  ;;  %v4625_v61 = vsel %vm388_vm4, %v4542_v31, 0.0  ;;  %v4290_v54 = vld [vmem:[#allocation4 + $0xc8] sm:$0xff]  ;;  %3490 = vadd.xlane.f32.xlu1 %v3489_v34  ;;  %v3995_v47 = vadd.f32 %v3994_v8, %v2324_v2  ;;  %v3533_v32 = vadd.f32 %v13610_v18, %v2884_v44  ;;  %v3534_v55 = vadd.f32 %v13661_v56, %v2885_v6 }
 0x472   : > { %v4479_v40 = vadd.f32 %v4415_v58, %v16924_v51  ;;  %v4417_v58 = vmul.f32 0.5, %v4289_v60  ;;  %v4627_v4 = vsel %vm388_vm4, %v4543_v24, 0.0  ;;  %v16927_v36 = vld [vmem:[#allocation138_spill] sm:$0xff]  ;;  %v5387_v43 = vsub.f32 1.0, %v5386_v46  ;;  %v16930_v6 = vld [vmem:[#allocation15_spill] sm:$0xff] }
 0x473   : > { %v2325_v30 = vsel %vm2060_vm10, %v16706_v9, 0.0  ;;  %v5368_v31 = vsel %vm13708_vm1, %v5367_v16, %v5363_v13  ;;  %v4626_v34 = vadd.f32 %v4625_v61, %v4624_v3  ;;  %v16928_v18 = vsub.f32 %v13230_v14, %v13167_v59  ;;  %3597 = vst.msk [vmem:[#allocation3 + $0x148] sm:$0xff] %vm388_vm4, %v3533_v32  ;;  %v3661_v24 = vld [vmem:[#allocation4 + $0x148] sm:$0xff]  ;;  %v6763_v3 = vld [vmem:[#allocation2 + $0xd0] sm:$0xff]  ;;  %v13790_v59 = vld [vmem:[#allocation2 + $0xe0] sm:$0xff] }
 0x474   : > { %v4544_v60 = vmul.f32 %v4479_v40, %v16927_v36  ;;  %v3996_v51 = vadd.f32 %v3995_v47, %v2325_v30  ;;  %v16929_v40 = vand.u32 2147483648, %v16855_v17  ;;  %v5369_v44 = vmul.f32 %v5368_v31, %v4756_v5  ;;  %v16931_v7 = vld [vmem:[#allocation106_spill] sm:$0xff]  ;;  %3598 = vst.msk [vmem:[#allocation3 + $0x150] sm:$0xff] %vm388_vm4, %v3534_v55  ;;  %v4291_v36 = vld [vmem:[#allocation4 + $0xd0] sm:$0xff] }
 0x475   : > { %v4480_v56 = vadd.f32 %v4416_v53, %v16928_v18  ;;  %v16932_v8 = vsub.f32 %v16930_v6, %v16931_v7  ;;  %v4418_v22 = vmul.f32 0.5, %v4290_v54  ;;  %v4355_v16 = vsub.f32 %v6763_v3, %v13486_v57  ;;  %v13797_v13 = vld [vmem:[%s12235_s20 + $0xe8] sm:$0xff] }
 0x476   : > { %v5382_v46 = vor.u32 1.1754944e-38, %v16929_v40  ;;  %v4357_v14 = vsub.f32 %v13790_v59, %v13631_v25  ;;  %v16933_v53 = vand.u32 2147483647, %v16855_v17  ;;  %v4628_v5 = vadd.f32 %v4627_v4, %v4626_v34  ;;  %3997 = vadd.xlane.f32.xlu0 %v3996_v51  ;;  %v13809_v17 = vpop.xlane.xlu0 %3907  ;;  %v16939_v51 = vld [vmem:[#allocation215_spill] sm:$0xff] }
 0x477   : > { %v4481_v2 = vadd.f32 %v4417_v58, %v16932_v8  ;;  %v16934_v58 = vsel %vm13651_vm3, %v16856_v39, %v13597_v29  ;;  %v4629_v57 = vsel %vm388_vm4, %v4544_v60, 0.0  ;;  %v5388_v54 = vmul.f32 %v16926_v42, %v5387_v43  ;;  %v13807_v32 = vpop.xlane.xlu1 %3400  ;;  %v4292_v60 = vld [vmem:[#allocation4 + $0xd8] sm:$0xff]  ;;  %v4293_v8 = vld [vmem:[#allocation4 + $0xe0] sm:$0xff] }
 0x478   : > { %vm5380_vm11 = vcmp.eq.f32.partialorder %v16933_v53, 8.507059e+37  ;;  %v4045_v47 = vadd.f32 %v13663_v0, %v3661_v24  ;;  %v5998_v55 = vadd.f32 %v13568_v41, %v13673_v50  ;;  %v5999_v4 = vsel %vm388_vm4, %v5908_v23, 0.0  ;;  %v16936_v0 = vld [vmem:[#allocation96_spill] sm:$0xff]  ;;  %v16940_v24 = vld [vmem:[#allocation146_spill] sm:$0xff] }
 0x479   : > { %v5383_v61 = vsel %vm5380_vm11, %v5382_v46, %v16934_v58  ;;  %v16935_v63 = vsub.f32 %v12085_v28, %v13681_v26  ;;  %v4545_v29 = vmul.f32 %v4480_v56, %v13228_v19  ;;  %v13819_v43 = vmul.f32 %v5369_v44, %v13797_v13  ;;  %v16938_v41 = vld [vmem:[#allocation64_spill] sm:$0xff]  ;;  %v13832_v19 = vpop.xlane.xlu2 %3912 }
 0x47a   : > { %v4546_v30 = vmul.f32 %v4481_v2, %v16936_v0  ;;  %v16937_v31 = vsub.f32 %v13334_v27, %v13292_v1  ;;  %4109 = vst.msk [vmem:[#allocation4 + $0x148] sm:$0xff] %vm388_vm4, %v4045_v47  ;;  %vm2061_vm9 = vcmp.eq.f32.partialorder %v16938_v41, %v6992_v10  ;;  %v4630_v50 = vadd.f32 %v4629_v57, %v4628_v5  ;;  %v3662_v56 = vld [vmem:[#allocation4 + $0x150] sm:$0xff]  ;;  %v3663_v44 = vld [vmem:[#allocation4 + $0x158] sm:$0xff]  ;;  %v16944_v57 = vld [vmem:[#allocation94_spill] sm:$0xff] }
 0x47b   : > { %v5384_v39 = vmul.f32 %v5383_v61, %v16935_v63  ;;  %vm5390_vm6 = vweird.f32 %v16925_v45  ;;  %vm5391_vm12 = vweird.f32 %v16926_v42  ;;  %vm2062_vm13 = vcmp.eq.f32.partialorder %v16938_v41, %v6994_v11  ;;  %v16941_v2 = vld [vmem:[#allocation219_spill] sm:$0xff]  ;;  %v2886_v11 = vld [vmem:[#allocation3 + $0x158] sm:$0xff] }
 0x47c   : > { %v4482_v34 = vadd.f32 %v4418_v22, %v16937_v31  ;;  %v4419_v23 = vmul.f32 0.5, %v4291_v36  ;;  %v4420_v18 = vmul.f32 0.5, %v4292_v60  ;;  %v13835_v1 = vadd.f32 %v16926_v42, %v5388_v54  ;;  %v16942_v22 = vld [vmem:[#allocation221_spill] sm:$0xff]  ;;  %v13856_v58 = vld [vmem:[%s12235_s20 + $0xf0] sm:$0xff]  ;;  %vm13883_vm3 = vmor %vm5390_vm6, %vm5391_vm12 }
 0x47d   : > { %v5394_v27 = vand.u32 2147483647, %v16925_v45  ;;  %v4631_v10 = vsel %vm388_vm4, %v4545_v29, 0.0  ;;  %v5401_v40 = vmul.f32 %v16940_v24, %v16939_v51  ;;  %vm2063_vm14 = vcmp.eq.f32.partialorder %v16938_v41, %v7005_v15 }
 0x47e   : > { %v2326_v46 = vsel %vm2061_vm9, %v9172_v49, 0.0  ;;  %v4633_v6 = vsel %vm388_vm4, %v4546_v30, 0.0  ;;  %v4547_v7 = vmul.f32 %v4482_v34, %v13360_v12  ;;  %v5416_v3 = vmul.f32 %v16942_v22, %v16941_v2  ;;  %v16943_v12 = vld [vmem:[#allocation82_spill] sm:$0xff]  ;;  %v13865_v36 = vpop.xlane.xlu0 %3405 }
 0x47f   : > { %v2327_v53 = vsel %vm2062_vm13, %v9276_v21, 0.0  ;;  %v4632_v5 = vadd.f32 %v4631_v10, %v4630_v50  ;;  %vm2064_vm15 = vcmp.eq.f32.partialorder %v16938_v41, %v7019_v20  ;;  %v4046_v49 = vadd.f32 %v13688_v48, %v3662_v56  ;;  %v13863_v21 = vpop.xlane.xlu1 %3917  ;;  %v16948_v10 = vld [vmem:[#allocation95_spill] sm:$0xff] }
 0x480   : > { %v3999_v15 = vadd.f32 %v2327_v53, %v2326_v46  ;;  %v4483_v61 = vadd.f32 %v4419_v23, %v4355_v16  ;;  %v16945_v54 = vsub.f32 %v16943_v12, %v16944_v57  ;;  %v2328_v63 = vsel %vm2063_vm14, %v16703_v37, 0.0  ;;  %v4294_v46 = vld [vmem:[#allocation4 + $0xe8] sm:$0xff]  ;;  %v4232_v53 = vld [vmem:[#allocation3 + $0xf8] sm:$0xff] }
 0x481   : > { %v4047_v29 = vadd.f32 %v13753_v35, %v3663_v44  ;;  %v4634_v60 = vadd.f32 %v4633_v6, %v4632_v5  ;;  %v4421_v0 = vmul.f32 0.5, %v4293_v8  ;;  %v5396_v48 = vand.u32 2147483648, %v16925_v45  ;;  %4110 = vst.msk [vmem:[#allocation4 + $0x150] sm:$0xff] %vm388_vm4, %v4046_v49  ;;  %v6765_v35 = vld [vmem:[#allocation2 + $0xf0] sm:$0xff]  ;;  %v2887_v44 = vld [vmem:[#allocation3 + $0x160] sm:$0xff]  ;;  %v2888_v6 = vld [vmem:[#allocation3 + $0x168] sm:$0xff] }
 0x482   : > { %v4484_v47 = vadd.f32 %v4420_v18, %v16945_v54  ;;  %v4000_v30 = vadd.f32 %v3999_v15, %v2328_v63  ;;  %v4635_v16 = vsel %vm388_vm4, %v4547_v7, 0.0  ;;  %v5402_v31 = vsub.f32 1.0, %v5401_v40  ;;  %v16949_v40 = vld [vmem:[#allocation103_spill] sm:$0xff]  ;;  %v4296_v12 = vld [vmem:[#allocation4 + $0xf8] sm:$0xff] }
 0x483   : > { %v5417_v34 = vsub.f32 1.0, %v5416_v3  ;;  %v2329_v37 = vsel %vm2064_vm15, %v16706_v9, 0.0  ;;  %4111 = vst.msk [vmem:[#allocation4 + $0x158] sm:$0xff] %vm388_vm4, %v4047_v29  ;;  %v4359_v50 = vsub.f32 %v6765_v35, %v13681_v26  ;;  %v13877_v23 = vmul.f32 %v5384_v39, %v13856_v58  ;;  %v13888_v9 = vpop.xlane.xlu2 %3410  ;;  %v6766_v7 = vld [vmem:[#allocation2 + $0xe8] sm:$0xff]  ;;  %v3666_v18 = vld [vmem:[#allocation4 + $0x170] sm:$0xff] }
 0x484   : > { %v4001_v56 = vadd.f32 %v4000_v30, %v2329_v37  ;;  %v3535_v20 = vadd.f32 %v13755_v62, %v2886_v11  ;;  %v13890_v41 = vadd.f32 %v5999_v4, %v5998_v55  ;;  %v4548_v26 = vmul.f32 %v4483_v61, %v16948_v10  ;;  %v4295_v4 = vld [vmem:[#allocation4 + $0xf0] sm:$0xff] }
 0x485   : > { %v4549_v39 = vmul.f32 %v4484_v47, %v16949_v40  ;;  %v5393_v45 = vsel %vm13883_vm3, %v16926_v42, %v13835_v1  ;;  %v4358_v8 = vsub.f32 %v6766_v7, %v13737_v33  ;;  %v4636_v62 = vadd.f32 %v4635_v16, %v4634_v60 }
 0x486   : > { %v4485_v55 = vadd.f32 %v4421_v0, %v4357_v14  ;;  %v5397_v3 = vor.u32 1.1754944e-38, %v5396_v48  ;;  %4002 = vadd.xlane.f32.xlu2 %v4001_v56  ;;  %3599 = vst.msk [vmem:[#allocation3 + $0x158] sm:$0xff] %vm388_vm4, %v3535_v20  ;;  %v13905_v5 = vsel %vm388_vm4, %v13819_v43, 0.0  ;;  %vm5395_vm0 = vcmp.eq.f32.partialorder %v5394_v27, 8.507059e+37  ;;  %v13916_v27 = vpop.xlane.xlu0 %3922  ;;  %v6767_v48 = vld [vmem:[#allocation2 + $0xf8] sm:$0xff] }
 0x487   : > { %v5403_v42 = vmul.f32 %v16940_v24, %v5402_v31  ;;  %v5418_v33 = vmul.f32 %v16942_v22, %v5417_v34  ;;  %v4422_v1 = vmul.f32 0.5, %v4294_v46  ;;  %v3536_v25 = vadd.f32 %v13769_v52, %v2887_v44  ;;  %v13914_v57 = vpop.xlane.xlu1 %3415  ;;  %v3664_v52 = vld [vmem:[#allocation4 + $0x160] sm:$0xff]  ;;  %v676_v20 = vld [vmem:[%s12235_s20 + $0xf8] sm:$0xff]  ;;  %v6769_v46 = vld [vmem:[#allocation2 + $0x108] sm:$0xff] }
 0x488   : > { %v5398_v15 = vsel %vm5395_vm0, %v5397_v3, %v5393_v45  ;;  %v3537_v59 = vadd.f32 %v13807_v32, %v2888_v6  ;;  %v4637_v14 = vsel %vm388_vm4, %v4548_v26, 0.0  ;;  %v4639_v49 = vsel %vm388_vm4, %v4549_v39, 0.0  ;;  %v3665_v32 = vld [vmem:[#allocation4 + $0x168] sm:$0xff]  ;;  %v16954_v45 = vld [vmem:[#allocation216_spill] sm:$0xff] }
 0x489   : > { %v4423_v61 = vmul.f32 0.5, %v4295_v4  ;;  %v4758_v43 = vsub.f32 %v12085_v28, %v4232_v53  ;;  %v4638_v54 = vadd.f32 %v4637_v14, %v4636_v62  ;;  %v4550_v47 = vmul.f32 %v4485_v55, %v13721_v38  ;;  %3600 = vst.msk [vmem:[#allocation3 + $0x160] sm:$0xff] %vm388_vm4, %v3536_v25  ;;  %v13949_v39 = vld [vmem:[#allocation3 + $0x108] sm:$0xff]  ;;  %v2889_v25 = vld [vmem:[#allocation3 + $0x170] sm:$0xff] }
 0x48a   : > { %vm5405_vm1 = vweird.f32 %v16939_v51  ;;  %vm5406_vm7 = vweird.f32 %v16940_v24  ;;  %v5404_v63 = vadd.f32 %v16940_v24, %v5403_v42  ;;  %v5411_v29 = vand.u32 2147483648, %v16939_v51  ;;  %3601 = vst.msk [vmem:[#allocation3 + $0x168] sm:$0xff] %vm388_vm4, %v3537_v59  ;;  %v16955_v44 = vld [vmem:[#allocation170_spill] sm:$0xff]  ;;  %v13981_v59 = vld [vmem:[#allocation2 + $0x1b0] sm:$0xff] }
 0x48b   : > { %v5419_v11 = vadd.f32 %v16942_v22, %v5418_v33  ;;  %vm5421_vm2 = vweird.f32 %v16942_v22  ;;  %v4640_v38 = vadd.f32 %v4639_v49, %v4638_v54  ;;  %v4486_v60 = vadd.f32 %v4422_v1, %v4358_v8  ;;  %v13927_v16 = vpop.xlane.xlu2 %3927  ;;  %vm13937_vm5 = vmor %vm5405_vm1, %vm5406_vm7  ;;  %v4297_v1 = vld [vmem:[#allocation4 + $0x100] sm:$0xff] }
 0x48c   : > { %v4424_v0 = vmul.f32 0.5, %v4296_v12  ;;  %v4360_v30 = vsub.f32 %v6767_v48, %v4232_v53  ;;  %v4487_v31 = vadd.f32 %v4423_v61, %v4359_v50  ;;  %v5399_v34 = vmul.f32 %v5398_v15, %v4758_v43  ;;  %v13942_v50 = vld [vmem:[#allocation3 + $0x100] sm:$0xff]  ;;  %v16956_v61 = vld [vmem:[#allocation32_spill] sm:$0xff] }
 0x48d   : > { %v4048_v37 = vadd.f32 %v13809_v17, %v3664_v52  ;;  %v4049_v35 = vadd.f32 %v13832_v19, %v3665_v32  ;;  %v4641_v56 = vsel %vm388_vm4, %v4550_v47, 0.0  ;;  %v5409_v26 = vand.u32 2147483647, %v16939_v51  ;;  %v16957_v12 = vld [vmem:[#allocation224_spill] sm:$0xff]  ;;  %v677_v32 = vld [vmem:[%s12235_s20 + $0x100] sm:$0xff] }
 0x48e   : > { %vm5420_vm8 = vweird.f32 %v16941_v2  ;;  %v5426_v17 = vand.u32 2147483648, %v16941_v2  ;;  %v5408_v19 = vsel %vm13937_vm5, %v16940_v24, %v5404_v63  ;;  %v5412_v40 = vor.u32 1.1754944e-38, %v5411_v29  ;;  %v13972_v42 = vpop.xlane.xlu0 %3420  ;;  %v6768_v63 = vld [vmem:[#allocation2 + $0x100] sm:$0xff] }
 0x48f   : > { %vm13953_vm10 = vmor %vm5420_vm8, %vm5421_vm2  ;;  %v5424_v51 = vand.u32 2147483647, %v16941_v2  ;;  %v5431_v6 = vmul.f32 %v16955_v44, %v16954_v45  ;;  %4112 = vst.msk [vmem:[#allocation4 + $0x160] sm:$0xff] %vm388_vm4, %v4048_v37  ;;  %v4551_v7 = vmul.f32 %v4486_v60, %v13797_v13  ;;  %v4488_v8 = vadd.f32 %v4424_v0, %v4360_v30  ;;  %v13970_v53 = vpop.xlane.xlu1 %3932  ;;  %v16958_v0 = vld [vmem:[#allocation91_spill] sm:$0xff] }
 0x490   : > { %v5423_v24 = vsel %vm13953_vm10, %v16942_v22, %v5419_v11  ;;  %4113 = vst.msk [vmem:[#allocation4 + $0x168] sm:$0xff] %vm388_vm4, %v4049_v35  ;;  %v4050_v62 = vadd.f32 %v13863_v21, %v3666_v18  ;;  %v4642_v55 = vadd.f32 %v4641_v56, %v4640_v38  ;;  %v4552_v4 = vmul.f32 %v4487_v31, %v13856_v58  ;;  %v13999_v37 = vld [vmem:[%s12235_s20 + $0x108] sm:$0xff]  ;;  %v16960_v18 = vld [vmem:[#allocation20_spill] sm:$0xff] }
 0x491   : > { %v5911_v2 = vmul.f32 %v5399_v34, %v676_v20  ;;  %v4759_v3 = vsub.f32 %v12085_v28, %v13942_v50  ;;  %v6003_v13 = vsel %vm388_vm4, %v13877_v23, 0.0  ;;  %vm5410_vm11 = vcmp.eq.f32.partialorder %v5409_v26, 8.507059e+37 }
 0x492   : > { %v4760_v22 = vsub.f32 %v12085_v28, %v13949_v39  ;;  %v5427_v33 = vor.u32 1.1754944e-38, %v5426_v17  ;;  %4114 = vst.msk [vmem:[#allocation4 + $0x170] sm:$0xff] %vm388_vm4, %v4050_v62  ;;  %v6002_v58 = vadd.f32 %v13905_v5, %v13890_v41  ;;  %v5413_v21 = vsel %vm5410_vm11, %v5412_v40, %v5408_v19  ;;  %v2890_v17 = vld [vmem:[#allocation3 + $0x178] sm:$0xff] }
 0x493   : > { %vm5425_vm9 = vcmp.eq.f32.partialorder %v5424_v51, 8.507059e+37  ;;  %v5432_v15 = vsub.f32 1.0, %v5431_v6  ;;  %v4643_v23 = vsel %vm388_vm4, %v4551_v7, 0.0  ;;  %v4553_v14 = vmul.f32 %v4488_v8, %v676_v20  ;;  %v13986_v54 = vpop.xlane.xlu2 %3425  ;;  %v16962_v6 = vld [vmem:[#allocation169_spill] sm:$0xff]  ;;  %v16963_v7 = vld [vmem:[#allocation30_spill] sm:$0xff] }
 0x494   : > { %v5428_v49 = vsel %vm5425_vm9, %v5427_v33, %v5423_v24  ;;  %v5446_v43 = vmul.f32 %v16957_v12, %v16956_v61  ;;  %v4644_v47 = vadd.f32 %v4643_v23, %v4642_v55  ;;  %v4645_v41 = vsel %vm388_vm4, %v4552_v4, 0.0  ;;  %v2891_v24 = vld [vmem:[#allocation3 + $0x180] sm:$0xff]  ;;  %v3667_v62 = vld [vmem:[#allocation4 + $0x178] sm:$0xff] }
 0x495   : > { %v6005_v5 = vsel %vm388_vm4, %v5911_v2, 0.0  ;;  %v5414_v52 = vmul.f32 %v5413_v21, %v4759_v3  ;;  %v4361_v29 = vsub.f32 %v6768_v63, %v13942_v50  ;;  %v5429_v11 = vmul.f32 %v5428_v49, %v4760_v22  ;;  %v3668_v55 = vld [vmem:[#allocation4 + $0x180] sm:$0xff]  ;;  %v2894_v63 = vld [vmem:[#allocation3 + $0x198] sm:$0xff] }
 0x496   : > { %v4425_v38 = vmul.f32 0.5, %v4297_v1  ;;  %v3538_v60 = vadd.f32 %v13865_v36, %v2889_v25  ;;  %v16959_v48 = vsub.f32 16.0, %v16958_v0  ;;  %v4845_v31 = vsub.f32 16.0, %v13981_v59  ;;  %v4298_v36 = vld [vmem:[#allocation4 + $0x108] sm:$0xff]  ;;  %v3938_v2 = vpop.xlane.xlu0 %3937 }
 0x497   : > { %v6004_v34 = vadd.f32 %v6003_v13, %v6002_v58  ;;  %v5433_v35 = vmul.f32 %v16955_v44, %v5432_v15  ;;  %v16961_v56 = vsub.f32 16.0, %v16960_v18  ;;  %v14006_v10 = vadd.f32 %v4645_v41, %v4644_v47  ;;  %v3431_v4 = vpop.xlane.xlu1 %3430  ;;  %v3669_v58 = vld [vmem:[#allocation4 + $0x188] sm:$0xff]  ;;  %v3672_v18 = vld [vmem:[#allocation4 + $0x1a0] sm:$0xff] }
 0x498   : > { %v13995_v30 = vmax.f32 %v16959_v48, 1.0  ;;  %v14009_v26 = vsel %vm388_vm4, %v4553_v14, 0.0  ;;  %v5447_v50 = vsub.f32 1.0, %v5446_v43  ;;  %3602 = vst.msk [vmem:[#allocation3 + $0x170] sm:$0xff] %vm388_vm4, %v3538_v60  ;;  %v5912_v40 = vmul.f32 %v5414_v52, %v677_v32  ;;  %v2892_v15 = vld [vmem:[#allocation3 + $0x188] sm:$0xff]  ;;  %v2893_v43 = vld [vmem:[#allocation3 + $0x190] sm:$0xff] }
 0x499   : > { %v14004_v20 = vmax.f32 %v16961_v56, 1.0  ;;  %v14012_v19 = vadd.f32 %v6005_v5, %v6004_v34  ;;  %v4362_v51 = vsub.f32 %v6769_v46, %v13949_v39  ;;  %v5461_v8 = vmul.f32 %v16963_v7, %v16962_v6  ;;  %v4299_v5 = vld [vmem:[#allocation4 + $0x110] sm:$0xff]  ;;  %v3671_v48 = vld [vmem:[#allocation4 + $0x198] sm:$0xff]  ;;  %v2895_v46 = vld [vmem:[#allocation3 + $0x1a0] sm:$0xff] }
 0x49a   : > { %v14018_v3 = vmul.f32 %v5429_v11, %v13999_v37  ;;  %v4489_v13 = vadd.f32 %v4425_v38, %v4361_v29  ;;  %v5439_v22 = vand.u32 2147483647, %v16954_v45  ;;  %v5441_v33 = vand.u32 2147483648, %v16954_v45  ;;  %v6770_v56 = vld [vmem:[#allocation2 + $0x110] sm:$0xff] }
 0x49b   : > { %v4426_v21 = vmul.f32 0.5, %v4298_v36  ;;  %v5434_v39 = vadd.f32 %v16955_v44, %v5433_v35  ;;  %vm5436_vm6 = vweird.f32 %v16955_v44  ;;  %v3539_v1 = vadd.f32 %v13888_v9, %v2890_v17  ;;  %v3943_v47 = vpop.xlane.xlu2 %3942 }
 0x49c   : > { %v5448_v25 = vmul.f32 %v16957_v12, %v5447_v50  ;;  %v3540_v23 = vadd.f32 %v13914_v57, %v2891_v24  ;;  %v4051_v14 = vadd.f32 %v13916_v27, %v3667_v62  ;;  %v4052_v49 = vadd.f32 %v13927_v16, %v3668_v55  ;;  %v14057_v50 = vld [vmem:[#allocation3 + $0x118] sm:$0xff]  ;;  %v2896_v55 = vld [vmem:[#allocation3 + $0x1a8] sm:$0xff] }
 0x49d   : > { %v6007_v41 = vsel %vm388_vm4, %v5912_v40, 0.0  ;;  %vm5435_vm12 = vweird.f32 %v16954_v45  ;;  %v5462_v52 = vsub.f32 1.0, %v5461_v8  ;;  %3603 = vst.msk [vmem:[#allocation3 + $0x178] sm:$0xff] %vm388_vm4, %v3539_v1  ;;  %v4053_v9 = vadd.f32 %v13970_v53, %v3669_v58  ;;  %v4235_v45 = vld [vmem:[#allocation3 + $0x110] sm:$0xff] }
 0x49e   : > { %v14033_v29 = vmul.f32 %v4489_v13, %v677_v32  ;;  %vm14037_vm13 = vmor %vm5435_vm12, %vm5436_vm6  ;;  %vm14041_vm14 = vcmp.eq.f32.partialorder %v5439_v22, 8.507059e+37  ;;  %v5442_v16 = vor.u32 1.1754944e-38, %v5441_v33  ;;  %3604 = vst.msk [vmem:[#allocation3 + $0x180] sm:$0xff] %vm388_vm4, %v3540_v23  ;;  %v3541_v11 = vadd.f32 %v13972_v42, %v2892_v15  ;;  %v3670_v53 = vld [vmem:[#allocation4 + $0x190] sm:$0xff]  ;;  %v16971_v33 = vld [vmem:[#allocation29_spill] sm:$0xff] }
 0x49f   : > { %v4490_v38 = vadd.f32 %v4426_v21, %v4362_v51  ;;  %v5438_v32 = vsel %vm14037_vm13, %v16955_v44, %v5434_v39  ;;  %v5456_v60 = vand.u32 2147483648, %v16956_v61  ;;  %4115 = vst.msk [vmem:[#allocation4 + $0x178] sm:$0xff] %vm388_vm4, %v4051_v14  ;;  %v3542_v0 = vadd.f32 %v13986_v54, %v2893_v43  ;;  %v3948_v40 = vpop.xlane.xlu1 %3947  ;;  %v3436_v51 = vpop.xlane.xlu0 %3435  ;;  %v16970_v22 = vld [vmem:[#allocation148_spill] sm:$0xff] }
 0x4a0   : > { %v4427_v34 = vmul.f32 0.5, %v4299_v5  ;;  %v5449_v35 = vadd.f32 %v16957_v12, %v5448_v25  ;;  %vm5451_vm15 = vweird.f32 %v16957_v12  ;;  %4116 = vst.msk [vmem:[#allocation4 + $0x180] sm:$0xff] %vm388_vm4, %v4052_v49  ;;  %v3543_v42 = vadd.f32 %v3431_v4, %v2894_v63  ;;  %v14091_v5 = vld [vmem:[#allocation3 + $0x120] sm:$0xff]  ;;  %v4300_v63 = vld [vmem:[#allocation4 + $0x118] sm:$0xff] }
 0x4a1   : > { %v4363_v36 = vsub.f32 %v6770_v56, %v4235_v45  ;;  %v4761_v44 = vsub.f32 %v12085_v28, %v4235_v45  ;;  %v5463_v17 = vmul.f32 %v16963_v7, %v5462_v52  ;;  %4117 = vst.msk [vmem:[#allocation4 + $0x188] sm:$0xff] %vm388_vm4, %v4053_v9  ;;  %v4054_v54 = vadd.f32 %v3938_v2, %v3670_v53  ;;  %v680_v53 = vld [vmem:[%s12235_s20 + $0x118] sm:$0xff] }
 0x4a2   : > { %v5443_v8 = vsel %vm14041_vm14, %v5442_v16, %v5438_v32  ;;  %vm5450_vm3 = vweird.f32 %v16956_v61  ;;  %v5454_v24 = vand.u32 2147483647, %v16956_v61  ;;  %3605 = vst.msk [vmem:[#allocation3 + $0x188] sm:$0xff] %vm388_vm4, %v3541_v11  ;;  %v4055_v62 = vadd.f32 %v3943_v47, %v3671_v48  ;;  %v679_v47 = vld [vmem:[%s12235_s20 + $0x110] sm:$0xff] }
 0x4a3   : > { %v4555_v4 = vmul.f32 %v4490_v38, %v13999_v37  ;;  %vm14069_vm0 = vmor %vm5450_vm3, %vm5451_vm15  ;;  %v5457_v13 = vor.u32 1.1754944e-38, %v5456_v60  ;;  %v5476_v58 = vmul.f32 %v16971_v33, %v16970_v22  ;;  %3606 = vst.msk [vmem:[#allocation3 + $0x190] sm:$0xff] %vm388_vm4, %v3542_v0  ;;  %v4056_v61 = vadd.f32 %v3948_v40, %v3672_v18  ;;  %v3441_v1 = vpop.xlane.xlu2 %3440  ;;  %v6771_v38 = vld [vmem:[#allocation2 + $0x118] sm:$0xff]  ;;  %v16977_v40 = vld [vmem:[#allocation230_spill] sm:$0xff] }
 0x4a4   : > { %v5453_v21 = vsel %vm14069_vm0, %v16957_v12, %v5449_v35  ;;  %v4762_v37 = vsub.f32 %v12085_v28, %v14057_v50  ;;  %vm5466_vm1 = vweird.f32 %v16963_v7  ;;  %3607 = vst.msk [vmem:[#allocation3 + $0x198] sm:$0xff] %vm388_vm4, %v3543_v42  ;;  %v3544_v39 = vadd.f32 %v3436_v51, %v2895_v46  ;;  %v3674_v42 = vld [vmem:[#allocation4 + $0x1b0] sm:$0xff] }
 0x4a5   : > { %v4491_v15 = vadd.f32 %v4427_v34, %v4363_v36  ;;  %v5444_v25 = vmul.f32 %v5443_v8, %v4761_v44  ;;  %v5464_v23 = vadd.f32 %v16963_v7, %v5463_v17  ;;  %4118 = vst.msk [vmem:[#allocation4 + $0x190] sm:$0xff] %vm388_vm4, %v4054_v54  ;;  %v3545_v14 = vadd.f32 %v3441_v1, %v2896_v55  ;;  %v16974_v44 = vld [vmem:[#allocation34_spill] sm:$0xff] }
 0x4a6   : > { %v4648_v49 = vadd.f32 %v14009_v26, %v14006_v10  ;;  %v6008_v12 = vadd.f32 %v6007_v41, %v14012_v19  ;;  %v6009_v43 = vsel %vm388_vm4, %v14018_v3, 0.0  ;;  %vm5455_vm7 = vcmp.eq.f32.partialorder %v5454_v24, 8.507059e+37  ;;  %4119 = vst.msk [vmem:[#allocation4 + $0x198] sm:$0xff] %vm388_vm4, %v4055_v62  ;;  %v2897_v10 = vld [vmem:[#allocation3 + $0x1b0] sm:$0xff]  ;;  %v3673_v26 = vld [vmem:[#allocation4 + $0x1a8] sm:$0xff]  ;;  %v4301_v55 = vld [vmem:[#allocation4 + $0x120] sm:$0xff] }
 0x4a7   : > { %v5458_v52 = vsel %vm5455_vm7, %v5457_v13, %v5453_v21  ;;  %vm5465_vm2 = vweird.f32 %v16962_v6  ;;  %v5471_v9 = vand.u32 2147483648, %v16962_v6  ;;  %v5477_v57 = vsub.f32 1.0, %v5476_v58  ;;  %4120 = vst.msk [vmem:[#allocation4 + $0x1a0] sm:$0xff] %vm388_vm4, %v4056_v61  ;;  %v3446_v60 = vpop.xlane.xlu1 %3445  ;;  %v3953_v0 = vpop.xlane.xlu0 %3952  ;;  %v16976_v54 = vld [vmem:[#allocation222_spill] sm:$0xff] }
 0x4a8   : > { %v4649_v19 = vsel %vm388_vm4, %v14033_v29, 0.0  ;;  %v4651_v3 = vsel %vm388_vm4, %v4555_v4, 0.0  ;;  %v5459_v41 = vmul.f32 %v5458_v52, %v4762_v37  ;;  %vm14102_vm5 = vmor %vm5465_vm2, %vm5466_vm1  ;;  %v5469_v16 = vand.u32 2147483647, %v16962_v6  ;;  %3608 = vst.msk [vmem:[#allocation3 + $0x1a0] sm:$0xff] %vm388_vm4, %v3544_v39  ;;  %v681_v58 = vld [vmem:[%s12235_s20 + $0x120] sm:$0xff] }
 0x4a9   : > { %v4556_v45 = vmul.f32 %v4491_v15, %v679_v47  ;;  %v5914_v11 = vmul.f32 %v5444_v25, %v679_v47  ;;  %v4364_v32 = vsub.f32 %v6771_v38, %v14057_v50  ;;  %v5468_v29 = vsel %vm14102_vm5, %v16963_v7, %v5464_v23  ;;  %3609 = vst.msk [vmem:[#allocation3 + $0x1a8] sm:$0xff] %vm388_vm4, %v3545_v14  ;;  %v16975_v50 = vld [vmem:[#allocation229_spill] sm:$0xff]  ;;  %v16990_v38 = vld [vmem:[#allocation227_spill] sm:$0xff] }
 0x4aa   : > { %v4763_v48 = vsub.f32 %v12085_v28, %v14091_v5  ;;  %v4428_v6 = vmul.f32 0.5, %v4300_v63  ;;  %v3546_v34 = vadd.f32 %v3446_v60, %v2897_v10  ;;  %v4057_v35 = vadd.f32 %v3953_v0, %v3673_v26  ;;  %v3675_v15 = vld [vmem:[#allocation4 + $0x1b8] sm:$0xff]  ;;  %v6772_v52 = vld [vmem:[#allocation2 + $0x120] sm:$0xff]  ;;  %v4238_v63 = vld [vmem:[#allocation3 + $0x128] sm:$0xff] }
 0x4ab   : > { %v4650_v18 = vadd.f32 %v4649_v19, %v4648_v49  ;;  %v5472_v56 = vor.u32 1.1754944e-38, %v5471_v9  ;;  %v5478_v36 = vmul.f32 %v16971_v33, %v5477_v57  ;;  %v5491_v17 = vmul.f32 %v16975_v50, %v16974_v44  ;;  %v3958_v51 = vpop.xlane.xlu2 %3957  ;;  %v2898_v25 = vld [vmem:[#allocation3 + $0x1b8] sm:$0xff] }
 0x4ac   : > { %6687 = vrcp.f32 %v13995_v30  ;;  %v5915_v7 = vmul.f32 %v5459_v41, %v680_v53  ;;  %vm5470_vm8 = vcmp.eq.f32.partialorder %v5469_v16, 8.507059e+37  ;;  %v5506_v46 = vmul.f32 %v16977_v40, %v16976_v54  ;;  %3610 = vst.msk [vmem:[#allocation3 + $0x1b0] sm:$0xff] %vm388_vm4, %v3546_v34  ;;  %v4302_v41 = vld [vmem:[#allocation4 + $0x128] sm:$0xff] }
 0x4ad   : > { %v6010_v8 = vadd.f32 %v6009_v43, %v6008_v12  ;;  %v4652_v24 = vadd.f32 %v4651_v3, %v4650_v18  ;;  %v5473_v62 = vsel %vm5470_vm8, %v5472_v56, %v5468_v29  ;;  %4121 = vst.msk [vmem:[#allocation4 + $0x1a8] sm:$0xff] %vm388_vm4, %v4057_v35  ;;  %v4058_v4 = vadd.f32 %v3958_v51, %v3674_v42  ;;  %v6773_v34 = vld [vmem:[#allocation2 + $0x128] sm:$0xff]  ;;  %v16982_v42 = vld [vmem:[#allocation220_spill] sm:$0xff] }
 0x4ae   : > { %v4653_v2 = vsel %vm388_vm4, %v4556_v45, 0.0  ;;  %v6011_v13 = vsel %vm388_vm4, %v5914_v11, 0.0  ;;  %v5474_v61 = vmul.f32 %v5473_v62, %v4763_v48  ;;  %v4492_v21 = vadd.f32 %v4428_v6, %v4364_v32  ;;  %v2899_v11 = vld [vmem:[#allocation3 + $0x1c0] sm:$0xff] }
 0x4af   : > { %v5479_v37 = vadd.f32 %v16971_v33, %v5478_v36  ;;  %vm5481_vm10 = vweird.f32 %v16971_v33  ;;  %v5484_v39 = vand.u32 2147483647, %v16970_v22  ;;  %v5492_v1 = vsub.f32 1.0, %v5491_v17  ;;  %4122 = vst.msk [vmem:[#allocation4 + $0x1b0] sm:$0xff] %vm388_vm4, %v4058_v4  ;;  %v3963_v57 = vpop.xlane.xlu1 %3962  ;;  %v3451_v10 = vpop.xlane.xlu0 %3450  ;;  %v3676_v62 = vld [vmem:[#allocation4 + $0x1c0] sm:$0xff] }
 0x4b0   : > { %v6013_v23 = vsel %vm388_vm4, %v5915_v7, 0.0  ;;  %v4429_v14 = vmul.f32 0.5, %v4301_v55  ;;  %v5486_v49 = vand.u32 2147483648, %v16970_v22  ;;  %v5507_v12 = vsub.f32 1.0, %v5506_v46 }
 0x4b1   : > { %v4654_v43 = vadd.f32 %v4653_v2, %v4652_v24  ;;  %v6012_v47 = vadd.f32 %v6011_v13, %v6010_v8  ;;  %v4365_v9 = vsub.f32 %v6772_v52, %v14091_v5  ;;  %vm5480_vm11 = vweird.f32 %v16970_v22  ;;  %v2900_v24 = vld [vmem:[#allocation3 + $0x1c8] sm:$0xff]  ;;  %v14169_v2 = vld [vmem:[#allocation3 + $0x130] sm:$0xff] }
 0x4b2   : > { %v14135_v26 = vpop.eup %6687  ;;  %v5916_v19 = vmul.f32 %v5474_v61, %v681_v58  ;;  %v4557_v3 = vmul.f32 %v4492_v21, %v680_v53  ;;  %vm14139_vm9 = vmor %vm5480_vm11, %vm5481_vm10  ;;  %v4059_v16 = vadd.f32 %v3963_v57, %v3675_v15  ;;  %v3547_v45 = vadd.f32 %v3451_v10, %v2898_v25  ;;  %v682_v61 = vld [vmem:[%s12235_s20 + $0x128] sm:$0xff] }
 0x4b3   : > { %v14143_v5 = vadd.f32 %v6013_v23, %v6012_v47  ;;  %v5483_v22 = vsel %vm14139_vm9, %v16971_v33, %v5479_v37  ;;  %vm14148_vm6 = vcmp.eq.f32.partialorder %v5484_v39, 8.507059e+37  ;;  %v5493_v53 = vmul.f32 %v16975_v50, %v5492_v1  ;;  %v3456_v48 = vpop.xlane.xlu2 %3455  ;;  %v16983_v33 = vld [vmem:[#allocation147_spill] sm:$0xff]  ;;  %v14174_v37 = vld [vmem:[#allocation3 + $0x138] sm:$0xff] }
 0x4b4   : > { %v4493_v32 = vadd.f32 %v4429_v14, %v4365_v9  ;;  %v5487_v29 = vor.u32 1.1754944e-38, %v5486_v49  ;;  %v4764_v60 = vsub.f32 %v12085_v28, %v4238_v63  ;;  %v5508_v0 = vmul.f32 %v16977_v40, %v5507_v12  ;;  %4123 = vst.msk [vmem:[#allocation4 + $0x1b8] sm:$0xff] %vm388_vm4, %v4059_v16  ;;  %v16986_v14 = vld [vmem:[#allocation225_spill] sm:$0xff]  ;;  %v16987_v49 = vld [vmem:[#allocation231_spill] sm:$0xff] }
 0x4b5   : > { %v4430_v6 = vmul.f32 0.5, %v4302_v41  ;;  %v4366_v35 = vsub.f32 %v6773_v34, %v4238_v63  ;;  %v5521_v18 = vmul.f32 %v16983_v33, %v16982_v42  ;;  %3611 = vst.msk [vmem:[#allocation3 + $0x1b8] sm:$0xff] %vm388_vm4, %v3547_v45  ;;  %v3548_v56 = vadd.f32 %v3456_v48, %v2899_v11  ;;  %v4303_v11 = vld [vmem:[#allocation4 + $0x130] sm:$0xff] }
 0x4b6   : > { %v6015_v36 = vsel %vm388_vm4, %v5916_v19, 0.0  ;;  %v4655_v17 = vsel %vm388_vm4, %v4557_v3, 0.0  ;;  %v5488_v7 = vsel %vm14148_vm6, %v5487_v29, %v5483_v22  ;;  %vm5495_vm12 = vweird.f32 %v16974_v44 }
 0x4b7   : > { %v5494_v46 = vadd.f32 %v16975_v50, %v5493_v53  ;;  %vm5496_vm13 = vweird.f32 %v16975_v50  ;;  %v5499_v51 = vand.u32 2147483647, %v16974_v44  ;;  %v5501_v8 = vand.u32 2147483648, %v16974_v44  ;;  %3612 = vst.msk [vmem:[#allocation3 + $0x1c0] sm:$0xff] %vm388_vm4, %v3548_v56  ;;  %v3461_v15 = vpop.xlane.xlu1 %3460  ;;  %v3968_v25 = vpop.xlane.xlu0 %3967  ;;  %v16991_v53 = vld [vmem:[#allocation151_spill] sm:$0xff] }
 0x4b8   : > { %v4558_v55 = vmul.f32 %v4493_v32, %v681_v58  ;;  %v5489_v4 = vmul.f32 %v5488_v7, %v4764_v60  ;;  %v5509_v13 = vadd.f32 %v16977_v40, %v5508_v0  ;;  %vm5511_vm14 = vweird.f32 %v16977_v40  ;;  %vm14182_vm3 = vmor %vm5495_vm12, %vm5496_vm13  ;;  %v6774_v7 = vld [vmem:[#allocation2 + $0x130] sm:$0xff] }
 0x4b9   : > { %v4494_v21 = vadd.f32 %v4430_v6, %v4366_v35  ;;  %vm5510_vm15 = vweird.f32 %v16976_v54  ;;  %v5516_v39 = vand.u32 2147483648, %v16976_v54  ;;  %v5522_v1 = vsub.f32 1.0, %v5521_v18  ;;  %v683_v18 = vld [vmem:[%s12235_s20 + $0x130] sm:$0xff] }
 0x4ba   : > { %v5514_v23 = vand.u32 2147483647, %v16976_v54  ;;  %v5536_v12 = vmul.f32 %v16987_v49, %v16986_v14  ;;  %v3549_v47 = vadd.f32 %v3461_v15, %v2900_v24  ;;  %v4060_v52 = vadd.f32 %v3968_v25, %v3676_v62  ;;  %vm14196_vm1 = vmor %vm5510_vm15, %vm5511_vm14  ;;  %v4241_v62 = vld [vmem:[#allocation3 + $0x140] sm:$0xff]  ;;  %v6775_v15 = vld [vmem:[#allocation2 + $0x138] sm:$0xff] }
 0x4bb   : > { %v4656_v9 = vadd.f32 %v4655_v17, %v4654_v43  ;;  %v5498_v63 = vsel %vm14182_vm3, %v16975_v50, %v5494_v46  ;;  %vm5500_vm0 = vcmp.eq.f32.partialorder %v5499_v51, 8.507059e+37  ;;  %v4765_v44 = vsub.f32 %v12085_v28, %v14169_v2  ;;  %v3677_v50 = vld [vmem:[#allocation4 + $0x1c8] sm:$0xff]  ;;  %v3973_v32 = vpop.xlane.xlu2 %3972  ;;  %v3678_v17 = vld [vmem:[#allocation4 + $0x1d0] sm:$0xff]  ;;  %v14222_v51 = vld [vmem:[%s12235_s20 + $0x138] sm:$0xff] }
 0x4bc   : > { %v5917_v54 = vmul.f32 %v5489_v4, %v682_v61  ;;  %v5502_v10 = vor.u32 1.1754944e-38, %v5501_v8  ;;  %v4766_v19 = vsub.f32 %v12085_v28, %v14174_v37  ;;  %v5513_v43 = vsel %vm14196_vm1, %v16977_v40, %v5509_v13  ;;  %3613 = vst.msk [vmem:[#allocation3 + $0x1c8] sm:$0xff] %vm388_vm4, %v3549_v47  ;;  %v4304_v8 = vld [vmem:[#allocation4 + $0x138] sm:$0xff] }
 0x4bd   : > { %v4657_v3 = vsel %vm388_vm4, %v4558_v55, 0.0  ;;  %v4559_v41 = vmul.f32 %v4494_v21, %v682_v61  ;;  %v5517_v27 = vor.u32 1.1754944e-38, %v5516_v39  ;;  %v5523_v16 = vmul.f32 %v16983_v33, %v5522_v1  ;;  %4124 = vst.msk [vmem:[#allocation4 + $0x1c0] sm:$0xff] %vm388_vm4, %v4060_v52 }
 0x4be   : > { %v5503_v45 = vsel %vm5500_vm0, %v5502_v10, %v5498_v63  ;;  %vm5515_vm7 = vcmp.eq.f32.partialorder %v5514_v23, 8.507059e+37  ;;  %v5537_v22 = vsub.f32 1.0, %v5536_v12  ;;  %v5551_v40 = vmul.f32 %v16991_v53, %v16990_v38 }
 0x4bf   : > { %v14213_v29 = vmax.f32 %v4845_v31, 1.0  ;;  %v5504_v60 = vmul.f32 %v5503_v45, %v4765_v44  ;;  %v5518_v0 = vsel %vm5515_vm7, %v5517_v27, %v5513_v43  ;;  %v4061_v48 = vadd.f32 %v3973_v32, %v3677_v50  ;;  %v3466_v39 = vpop.xlane.xlu0 %3465  ;;  %v2903_v45 = vld [vmem:[#allocation3 + $0x1e0] sm:$0xff] }
 0x4c0   : > { %v6016_v6 = vadd.f32 %v6015_v36, %v14143_v5  ;;  %v14216_v34 = vadd.f32 %v4657_v3, %v4656_v9  ;;  %v6017_v35 = vsel %vm388_vm4, %v5917_v54, 0.0  ;;  %v5519_v56 = vmul.f32 %v5518_v0, %v4766_v19  ;;  %v2901_v5 = vld [vmem:[#allocation3 + $0x1d0] sm:$0xff]  ;;  %v4305_v9 = vld [vmem:[#allocation4 + $0x140] sm:$0xff]  ;;  %v2902_v54 = vld [vmem:[#allocation3 + $0x1d8] sm:$0xff] }
 0x4c1   : > { %v4367_v46 = vsub.f32 %v6774_v7, %v14169_v2  ;;  %v4431_v59 = vmul.f32 0.5, %v4303_v11  ;;  %v5524_v31 = vadd.f32 %v16983_v33, %v5523_v16  ;;  %vm5526_vm2 = vweird.f32 %v16983_v33  ;;  %4125 = vst.msk [vmem:[#allocation4 + $0x1c8] sm:$0xff] %vm388_vm4, %v4061_v48  ;;  %v3978_v2 = vpop.xlane.xlu1 %3977  ;;  %v14256_v19 = vld [vmem:[#allocation3 + $0x148] sm:$0xff]  ;;  %v6776_v3 = vld [vmem:[#allocation2 + $0x140] sm:$0xff] }
 0x4c2   : > { %v14228_v36 = vsel %vm388_vm4, %v4559_v41, 0.0  ;;  %v5531_v24 = vand.u32 2147483648, %v16982_v42  ;;  %v5538_v55 = vmul.f32 %v16987_v49, %v5537_v22  ;;  %v5552_v4 = vsub.f32 1.0, %v5551_v40  ;;  %v685_v0 = vld [vmem:[%s12235_s20 + $0x140] sm:$0xff] }
 0x4c3   : > { %v5918_v13 = vmul.f32 %v5504_v60, %v683_v18  ;;  %vm5525_vm5 = vweird.f32 %v16982_v42  ;;  %v5529_v61 = vand.u32 2147483647, %v16982_v42  ;;  %v4062_v21 = vadd.f32 %v3978_v2, %v3678_v17  ;;  %v3471_v16 = vpop.xlane.xlu2 %3470  ;;  %v16996_v7 = vld [vmem:[#allocation226_spill] sm:$0xff]  ;;  %v4244_v2 = vld [vmem:[#allocation3 + $0x158] sm:$0xff] }
 0x4c4   : > { %v6018_v1 = vadd.f32 %v6017_v35, %v6016_v6  ;;  %v4368_v25 = vsub.f32 %v6775_v15, %v14174_v37  ;;  %v14236_v58 = vmul.f32 %v5519_v56, %v14222_v51  ;;  %vm14240_vm8 = vmor %vm5525_vm5, %vm5526_vm2  ;;  %v3550_v12 = vadd.f32 %v3466_v39, %v2901_v5  ;;  %v14273_v56 = vld [vmem:[#allocation3 + $0x150] sm:$0xff]  ;;  %v686_v15 = vld [vmem:[%s12235_s20 + $0x148] sm:$0xff] }
 0x4c5   : > { %v4495_v47 = vadd.f32 %v4431_v59, %v4367_v46  ;;  %v4432_v52 = vmul.f32 0.5, %v4304_v8  ;;  %v5528_v42 = vsel %vm14240_vm8, %v16983_v33, %v5524_v31  ;;  %v4767_v63 = vsub.f32 %v12085_v28, %v4241_v62  ;;  %4126 = vst.msk [vmem:[#allocation4 + $0x1d0] sm:$0xff] %vm388_vm4, %v4062_v21  ;;  %v16997_v46 = vld [vmem:[#allocation68_spill] sm:$0xff] }
 0x4c6   : > { %v5532_v37 = vor.u32 1.1754944e-38, %v5531_v24  ;;  %v5539_v44 = vadd.f32 %v16987_v49, %v5538_v55  ;;  %vm5541_vm10 = vweird.f32 %v16987_v49  ;;  %v5553_v57 = vmul.f32 %v16991_v53, %v5552_v4  ;;  %3614 = vst.msk [vmem:[#allocation3 + $0x1d0] sm:$0xff] %vm388_vm4, %v3550_v12  ;;  %v17000_v12 = vld [vmem:[#allocation175_spill] sm:$0xff] }
 0x4c7   : > { %v6019_v10 = vsel %vm388_vm4, %v5918_v13, 0.0  ;;  %vm5530_vm11 = vcmp.eq.f32.partialorder %v5529_v61, 8.507059e+37  ;;  %vm5540_vm9 = vweird.f32 %v16986_v14  ;;  %v5546_v33 = vand.u32 2147483648, %v16986_v14 }
 0x4c8   : > { %v4433_v43 = vmul.f32 0.5, %v4305_v9  ;;  %v5533_v50 = vsel %vm5530_vm11, %v5532_v37, %v5528_v42  ;;  %v4369_v41 = vsub.f32 %v6776_v3, %v4241_v62  ;;  %v5544_v27 = vand.u32 2147483647, %v16986_v14  ;;  %vm14261_vm6 = vmor %vm5540_vm9, %vm5541_vm10  ;;  %v3983_v13 = vpop.xlane.xlu0 %3982  ;;  %v687_v3 = vld [vmem:[%s12235_s20 + $0x150] sm:$0xff] }
 0x4c9   : > { %v4560_v11 = vmul.f32 %v4495_v47, %v683_v18  ;;  %v4496_v22 = vadd.f32 %v4432_v52, %v4368_v25  ;;  %v5534_v40 = vmul.f32 %v5533_v50, %v4767_v63  ;;  %v3551_v60 = vadd.f32 %v3471_v16, %v2902_v54  ;;  %v3476_v35 = vpop.xlane.xlu1 %3475  ;;  %v17001_v47 = vld [vmem:[#allocation187_spill] sm:$0xff]  ;;  %v17002_v16 = vld [vmem:[#allocation46_spill] sm:$0xff] }
 0x4ca   : > { %v5543_v48 = vsel %vm14261_vm6, %v16987_v49, %v5539_v44  ;;  %v4768_v14 = vsub.f32 %v12085_v28, %v14256_v19  ;;  %v5554_v6 = vadd.f32 %v16991_v53, %v5553_v57  ;;  %vm5556_vm12 = vweird.f32 %v16991_v53  ;;  %v3679_v49 = vld [vmem:[#allocation4 + $0x1d8] sm:$0xff]  ;;  %v6777_v44 = vld [vmem:[#allocation2 + $0x148] sm:$0xff]  ;;  %v4307_v50 = vld [vmem:[#allocation4 + $0x150] sm:$0xff] }
 0x4cb   : > { %v5547_v18 = vor.u32 1.1754944e-38, %v5546_v33  ;;  %v5561_v17 = vand.u32 2147483648, %v16990_v38  ;;  %v5566_v59 = vmul.f32 %v16997_v46, %v16996_v7  ;;  %3615 = vst.msk [vmem:[#allocation3 + $0x1d8] sm:$0xff] %vm388_vm4, %v3551_v60  ;;  %v3552_v31 = vadd.f32 %v3476_v35, %v2903_v45  ;;  %v17003_v45 = vld [vmem:[#allocation67_spill] sm:$0xff] }
 0x4cc   : > { %v4497_v5 = vadd.f32 %v4433_v43, %v4369_v41  ;;  %vm5545_vm13 = vcmp.eq.f32.partialorder %v5544_v27, 8.507059e+37  ;;  %vm5555_vm14 = vweird.f32 %v16990_v38  ;;  %v5559_v8 = vand.u32 2147483647, %v16990_v38 }
 0x4cd   : > { %v6020_v24 = vadd.f32 %v6019_v10, %v6018_v1  ;;  %v4561_v62 = vmul.f32 %v4496_v22, %v14222_v51  ;;  %v5920_v55 = vmul.f32 %v5534_v40, %v685_v0  ;;  %v5548_v4 = vsel %vm5545_vm13, %v5547_v18, %v5543_v48  ;;  %vm14284_vm15 = vmor %vm5555_vm14, %vm5556_vm12  ;;  %3616 = vst.msk [vmem:[#allocation3 + $0x1e0] sm:$0xff] %vm388_vm4, %v3552_v31  ;;  %v4306_v51 = vld [vmem:[#allocation4 + $0x148] sm:$0xff] }
 0x4ce   : > { %v5549_v61 = vmul.f32 %v5548_v4, %v4768_v14  ;;  %v4769_v21 = vsub.f32 %v12085_v28, %v14273_v56  ;;  %v5558_v38 = vsel %vm14284_vm15, %v16991_v53, %v5554_v6  ;;  %v4063_v39 = vadd.f32 %v3983_v13, %v3679_v49  ;;  %v4193_v53 = vld [vmem:[#allocation2 + $0x1c0] sm:$0xff]  ;;  %v6778_v6 = vld [vmem:[#allocation2 + $0x150] sm:$0xff] }
 0x4cf   : > { %v4661_v1 = vsel %vm388_vm4, %v4560_v11, 0.0  ;;  %v5562_v25 = vor.u32 1.1754944e-38, %v5561_v17  ;;  %v5567_v23 = vsub.f32 1.0, %v5566_v59  ;;  %v5581_v52 = vmul.f32 %v17001_v47, %v17000_v12  ;;  %v2905_v4 = vld [vmem:[#allocation3 + $0x1f0] sm:$0xff] }
 0x4d0   : > { %v4660_v9 = vadd.f32 %v14228_v36, %v14216_v34  ;;  %v6021_v42 = vsel %vm388_vm4, %v14236_v58, 0.0  ;;  %v4562_v63 = vmul.f32 %v4497_v5, %v685_v0  ;;  %vm5560_vm3 = vcmp.eq.f32.partialorder %v5559_v8, 8.507059e+37  ;;  %4127 = vst.msk [vmem:[#allocation4 + $0x1d8] sm:$0xff] %vm388_vm4, %v4063_v39 }
 0x4d1   : > { %v4663_v37 = vsel %vm388_vm4, %v4561_v62, 0.0  ;;  %v4370_v57 = vsub.f32 %v6777_v44, %v14256_v19  ;;  %v5563_v54 = vsel %vm5560_vm3, %v5562_v25, %v5558_v38  ;;  %v4434_v10 = vmul.f32 0.5, %v4306_v51  ;;  %v3680_v51 = vld [vmem:[#allocation4 + $0x1e0] sm:$0xff] }
 0x4d2   : > { %v4662_v33 = vadd.f32 %v4661_v1, %v4660_v9  ;;  %v6023_v43 = vsel %vm388_vm4, %v5920_v55, 0.0  ;;  %v5921_v34 = vmul.f32 %v5549_v61, %v686_v15  ;;  %v5564_v36 = vmul.f32 %v5563_v54, %v4769_v21  ;;  %v4308_v55 = vld [vmem:[#allocation4 + $0x158] sm:$0xff] }
 0x4d3   : > { %v6022_v58 = vadd.f32 %v6021_v42, %v6020_v24  ;;  %v5568_v41 = vmul.f32 %v16997_v46, %v5567_v23  ;;  %v5582_v27 = vsub.f32 1.0, %v5581_v52  ;;  %v5596_v11 = vmul.f32 %v17003_v45, %v17002_v16  ;;  %v17008_v25 = vld [vmem:[#allocation45_spill] sm:$0xff]  ;;  %v17009_v23 = vld [vmem:[#allocation47_spill] sm:$0xff] }
 0x4d4   : > { %6689 = vrcp.f32 %v14004_v20  ;;  %v4847_v22 = vsub.f32 16.0, %v4193_v53  ;;  %v4664_v19 = vadd.f32 %v4663_v37, %v4662_v33  ;;  %v4665_v40 = vsel %vm388_vm4, %v4562_v63, 0.0  ;;  %v6779_v42 = vld [vmem:[#allocation2 + $0x158] sm:$0xff]  ;;  %v2904_v33 = vld [vmem:[#allocation3 + $0x1e8] sm:$0xff] }
 0x4d5   : > { %v6024_v32 = vadd.f32 %v6023_v43, %v6022_v58  ;;  %v4498_v60 = vadd.f32 %v4434_v10, %v4370_v57  ;;  %v4435_v0 = vmul.f32 0.5, %v4307_v50  ;;  %v5574_v48 = vand.u32 2147483647, %v16996_v7  ;;  %v3681_v10 = vld [vmem:[#allocation4 + $0x1e8] sm:$0xff] }
 0x4d6   : > { %v6025_v14 = vsel %vm388_vm4, %v5921_v34, 0.0  ;;  %v4371_v35 = vsub.f32 %v6778_v6, %v14273_v56  ;;  %v5922_v18 = vmul.f32 %v5564_v36, %v687_v3  ;;  %v5576_v17 = vand.u32 2147483648, %v16996_v7 }
 0x4d7   : > { %v5569_v59 = vadd.f32 %v16997_v46, %v5568_v41  ;;  %vm5571_vm0 = vweird.f32 %v16997_v46  ;;  %v5583_v31 = vmul.f32 %v17001_v47, %v5582_v27  ;;  %v5597_v49 = vsub.f32 1.0, %v5596_v11 }
 0x4d8   : > { %6691 = vrcp.f32 %v14213_v29  ;;  %v14320_v5 = vmax.f32 %v4847_v22, 1.0  ;;  %v4666_v8 = vadd.f32 %v4665_v40, %v4664_v19  ;;  %vm5570_vm1 = vweird.f32 %v16996_v7 }
 0x4d9   : > { %v6026_v24 = vadd.f32 %v6025_v14, %v6024_v32  ;;  %v4563_v62 = vmul.f32 %v4498_v60, %v686_v15  ;;  %v4499_v56 = vadd.f32 %v4435_v0, %v4371_v35  ;;  %vm14323_vm7 = vcmp.eq.f32.partialorder %v5574_v48, 8.507059e+37  ;;  %vm14332_vm2 = vmor %vm5570_vm1, %vm5571_vm0  ;;  %v3988_v37 = vpop.xlane.xlu2 %3987  ;;  %v688_v48 = vld [vmem:[%s12235_s20 + $0x158] sm:$0xff] }
 0x4da   : > { %v14327_v13 = vpop.eup %6689  ;;  %v6027_v61 = vsel %vm388_vm4, %v5922_v18, 0.0  ;;  %v5577_v7 = vor.u32 1.1754944e-38, %v5576_v17  ;;  %vm5586_vm5 = vweird.f32 %v17001_v47  ;;  %v5591_v38 = vand.u32 2147483648, %v17000_v12  ;;  %v4246_v18 = vld [vmem:[#allocation3 + $0x168] sm:$0xff] }
 0x4db   : > { %v5573_v39 = vsel %vm14332_vm2, %v16997_v46, %v5569_v59  ;;  %v5584_v1 = vadd.f32 %v17001_v47, %v5583_v31  ;;  %v5598_v15 = vmul.f32 %v17003_v45, %v5597_v49  ;;  %v5611_v52 = vmul.f32 %v17009_v23, %v17008_v25  ;;  %v4309_v49 = vld [vmem:[#allocation4 + $0x160] sm:$0xff] }
 0x4dc   : > { %v4436_v9 = vmul.f32 0.5, %v4308_v55  ;;  %v4372_v63 = vsub.f32 %v6779_v42, %v4244_v2  ;;  %v4770_v53 = vsub.f32 %v12085_v28, %v4244_v2  ;;  %vm5585_vm8 = vweird.f32 %v17000_v12  ;;  %v3993_v11 = vpop.xlane.xlu1 %3992  ;;  %v3481_v22 = vpop.xlane.xlu0 %3480 }
 0x4dd   : > { %v4667_v44 = vsel %vm388_vm4, %v4563_v62, 0.0  ;;  %v4564_v57 = vmul.f32 %v4499_v56, %v687_v3  ;;  %v5589_v46 = vand.u32 2147483647, %v17000_v12  ;;  %v4064_v54 = vadd.f32 %v3988_v37, %v3680_v51  ;;  %vm14355_vm10 = vmor %vm5585_vm8, %vm5586_vm5  ;;  %v17018_v56 = vld [vmem:[#allocation57_spill] sm:$0xff] }
 0x4de   : > { %v14349_v43 = vpop.eup %6691  ;;  %v5578_v34 = vsel %vm14323_vm7, %v5577_v7, %v5573_v39  ;;  %v5592_v50 = vor.u32 1.1754944e-38, %v5591_v38  ;;  %vm5601_vm11 = vweird.f32 %v17003_v45  ;;  %v5604_v12 = vand.u32 2147483647, %v17002_v16  ;;  %v4310_v38 = vld [vmem:[#allocation4 + $0x168] sm:$0xff]  ;;  %v6780_v51 = vld [vmem:[#allocation2 + $0x160] sm:$0xff] }
 0x4df   : > { %v5588_v58 = vsel %vm14355_vm10, %v17001_v47, %v5584_v1  ;;  %v5599_v3 = vadd.f32 %v17003_v45, %v5598_v15  ;;  %v5606_v41 = vand.u32 2147483648, %v17002_v16  ;;  %v5612_v27 = vsub.f32 1.0, %v5611_v52  ;;  %4128 = vst.msk [vmem:[#allocation4 + $0x1e0] sm:$0xff] %vm388_vm4, %v4064_v54  ;;  %v4245_v47 = vld [vmem:[#allocation3 + $0x160] sm:$0xff]  ;;  %v6781_v39 = vld [vmem:[#allocation2 + $0x168] sm:$0xff] }
 0x4e0   : > { %v4500_v19 = vadd.f32 %v4436_v9, %v4372_v63  ;;  %v5579_v40 = vmul.f32 %v5578_v34, %v4770_v53  ;;  %v4065_v32 = vadd.f32 %v3993_v11, %v3681_v10  ;;  %v3553_v60 = vadd.f32 %v3481_v22, %v2904_v33  ;;  %v2906_v9 = vld [vmem:[#allocation3 + $0x1f8] sm:$0xff]  ;;  %v689_v34 = vld [vmem:[%s12235_s20 + $0x160] sm:$0xff] }
 0x4e1   : > { %6693 = vrcp.f32 %v14320_v5  ;;  %v4669_v0 = vsel %vm388_vm4, %v4564_v57, 0.0  ;;  %vm5590_vm9 = vcmp.eq.f32.partialorder %v5589_v46, 8.507059e+37  ;;  %vm5600_vm6 = vweird.f32 %v17002_v16  ;;  %v17023_v11 = vld [vmem:[#allocation80_spill] sm:$0xff] }
 0x4e2   : > { %v14371_v14 = vadd.f32 %v6027_v61, %v6026_v24  ;;  %v4668_v6 = vadd.f32 %v4667_v44, %v4666_v8  ;;  %v5593_v35 = vsel %vm5590_vm9, %v5592_v50, %v5588_v58  ;;  %vm14375_vm12 = vmor %vm5600_vm6, %vm5601_vm11  ;;  %vm14379_vm13 = vcmp.eq.f32.partialorder %v5604_v12, 8.507059e+37  ;;  %4129 = vst.msk [vmem:[#allocation4 + $0x1e8] sm:$0xff] %vm388_vm4, %v4065_v32  ;;  %v17016_v24 = vld [vmem:[#allocation234_spill] sm:$0xff]  ;;  %v4311_v50 = vld [vmem:[#allocation4 + $0x170] sm:$0xff] }
 0x4e3   : > { %v5603_v16 = vsel %vm14375_vm12, %v17003_v45, %v5599_v3  ;;  %v5607_v31 = vor.u32 1.1754944e-38, %v5606_v41  ;;  %v5613_v8 = vmul.f32 %v17009_v23, %v5612_v27  ;;  %v17017_v62 = vsub.f32 1.0, %v17016_v24  ;;  %3617 = vst.msk [vmem:[#allocation3 + $0x1e8] sm:$0xff] %vm388_vm4, %v3553_v60  ;;  %v4247_v27 = vld [vmem:[#allocation3 + $0x170] sm:$0xff] }
 0x4e4   : > { %v14392_v2 = vadd.f32 %v4669_v0, %v4668_v6  ;;  %v4565_v61 = vmul.f32 %v4500_v19, %v688_v48  ;;  %v5923_v21 = vmul.f32 %v5579_v40, %v688_v48  ;;  %v4771_v7 = vsub.f32 %v12085_v28, %v4245_v47  ;;  %v3486_v52 = vpop.xlane.xlu2 %3485  ;;  %v3491_v54 = vpop.xlane.xlu1 %3490  ;;  %v3682_v19 = vld [vmem:[#allocation4 + $0x1f0] sm:$0xff]  ;;  %v690_v40 = vld [vmem:[%s12235_s20 + $0x168] sm:$0xff] }
 0x4e5   : > { %v5628_v55 = vmul.f32 %v17018_v56, %v17017_v62  ;;  %v4373_v45 = vsub.f32 %v6780_v51, %v4245_v47  ;;  %v4374_v1 = vsub.f32 %v6781_v39, %v4246_v18  ;;  %v4772_v15 = vsub.f32 %v12085_v28, %v4246_v18  ;;  %v17026_v47 = vld [vmem:[#allocation62_spill] sm:$0xff]  ;;  %v17027_v6 = vld [vmem:[#allocation59_spill] sm:$0xff] }
 0x4e6   : > { %17019 = vst [vmem:[#allocation72_spill] sm:$0xff] %v14392_v2  ;;  %vm5615_vm14 = vweird.f32 %v17008_v25  ;;  %v5608_v42 = vsel %vm14379_vm13, %v5607_v31, %v5603_v16  ;;  %v4437_v63 = vmul.f32 0.5, %v4309_v49  ;;  %vm5616_vm15 = vweird.f32 %v17009_v23  ;;  %v14442_v16 = vld [vmem:[#allocation3 + $0x178] sm:$0xff]  ;;  %v6782_v49 = vld [vmem:[#allocation2 + $0x170] sm:$0xff]  ;;  %v14552_v2 = vld [vmem:[#allocation3 + $0x1e0] sm:$0xff] }
 0x4e7   : > { %v3554_v53 = vadd.f32 %v3486_v52, %v2905_v4  ;;  %v14400_v37 = vpop.eup %6693  ;;  %v4438_v44 = vmul.f32 0.5, %v4310_v38  ;;  %v5614_v57 = vadd.f32 %v17009_v23, %v5613_v8  ;;  %v5629_v46 = vadd.f32 %v17018_v56, %v5628_v55  ;;  %vm14417_vm0 = vmor %vm5615_vm14, %vm5616_vm15  ;;  %17028 = vst [vmem:[#allocation104_spill] sm:$0xff] %v14442_v16  ;;  %v17029_v55 = vld [vmem:[#allocation232_spill] sm:$0xff]  ;;  %v17030_v4 = vld [vmem:[#allocation235_spill] sm:$0xff] }
 0x4e8   : > { %vm5631_vm3 = vweird.f32 %v17018_v56  ;;  %v14406_v10 = vsel %vm388_vm4, %v4565_v61, 0.0  ;;  %v14409_v33 = vsel %vm388_vm4, %v5923_v21, 0.0  ;;  %v5594_v36 = vmul.f32 %v5593_v35, %v4771_v7  ;;  %v14447_v21 = vld [vmem:[#allocation2 + $0x1c8] sm:$0xff] }
 0x4e9   : > { %17020 = vst [vmem:[#allocation84_spill] sm:$0xff] %v14406_v10  ;;  %v3555_v12 = vadd.f32 %v3491_v54, %v2906_v9  ;;  %v5609_v58 = vmul.f32 %v5608_v42, %v4772_v15  ;;  %v5621_v41 = vand.u32 2147483648, %v17008_v25  ;;  %vm5630_vm1 = vweird.f32 %v17023_v11  ;;  %v3998_v31 = vpop.xlane.xlu0 %3997  ;;  %v4312_v42 = vld [vmem:[#allocation4 + $0x178] sm:$0xff] }
 0x4ea   : > { %3618 = vst.msk [vmem:[#allocation3 + $0x1f0] sm:$0xff] %vm388_vm4, %v3554_v53  ;;  %v5636_v22 = vand.u32 2147483648, %v17023_v11  ;;  %v4501_v32 = vadd.f32 %v4437_v63, %v4373_v45  ;;  %v5619_v60 = vand.u32 2147483647, %v17008_v25  ;;  %vm14428_vm7 = vmor %vm5630_vm1, %vm5631_vm3  ;;  %v5634_v48 = vand.u32 2147483647, %v17023_v11 }
 0x4eb   : > { %3619 = vst.msk [vmem:[#allocation3 + $0x1f8] sm:$0xff] %vm388_vm4, %v3555_v12  ;;  %v5641_v35 = vmul.f32 %v17027_v6, %v17026_v47  ;;  %v4502_v18 = vadd.f32 %v4438_v44, %v4374_v1  ;;  %v4439_v17 = vmul.f32 0.5, %v4311_v50  ;;  %v5618_v59 = vsel %vm14417_vm0, %v17009_v23, %v5614_v57  ;;  %v14455_v45 = vld [vmem:[#allocation3 + $0x180] sm:$0xff]  ;;  %v14466_v57 = vld [vmem:[#allocation3 + $0x188] sm:$0xff]  ;;  %v14471_v50 = vld [vmem:[#allocation2 + $0x178] sm:$0xff] }
 0x4ec   : > { %v5633_v25 = vsel %vm14428_vm7, %v17018_v56, %v5629_v46  ;;  %v4375_v8 = vsub.f32 %v6782_v49, %v4247_v27  ;;  %v4773_v24 = vsub.f32 %v12085_v28, %v4247_v27  ;;  %v4066_v62 = vadd.f32 %v3998_v31, %v3682_v19  ;;  %17031 = vst [vmem:[#allocation114_spill] sm:$0xff] %v14447_v21  ;;  %v4313_v44 = vld [vmem:[#allocation4 + $0x180] sm:$0xff]  ;;  %v14468_v46 = vld [vmem:[#allocation3 + $0x190] sm:$0xff]  ;;  %v3683_v49 = vld [vmem:[#allocation4 + $0x1f8] sm:$0xff] }
 0x4ed   : > { %v5656_v61 = vmul.f32 %v17030_v4, %v17029_v55  ;;  %v14449_v7 = vmul.f32 %v5594_v36, %v689_v34  ;;  %v14451_v23 = vmul.f32 %v5609_v58, %v690_v40  ;;  %v5622_v38 = vor.u32 1.1754944e-38, %v5621_v41  ;;  %17032 = vst [vmem:[#allocation11_spill] sm:$0xff] %v14455_v45  ;;  %v14475_v12 = vld [vmem:[#allocation2 + $0x180] sm:$0xff]  ;;  %v14530_v58 = vld [vmem:[#allocation3 + $0x1b0] sm:$0xff]  ;;  %v14550_v10 = vld [vmem:[#allocation3 + $0x1d8] sm:$0xff] }
 0x4ee   : > { %v5637_v51 = vor.u32 1.1754944e-38, %v5636_v22  ;;  %vm5620_vm2 = vcmp.eq.f32.partialorder %v5619_v60, 8.507059e+37  ;;  %vm5635_vm5 = vcmp.eq.f32.partialorder %v5634_v48, 8.507059e+37  ;;  %v4774_v56 = vsub.f32 %v12085_v28, %v14442_v16  ;;  %4130 = vst.msk [vmem:[#allocation4 + $0x1f0] sm:$0xff] %vm388_vm4, %v4066_v62  ;;  %v17039_v19 = vld [vmem:[#allocation233_spill] sm:$0xff]  ;;  %v17060_v16 = vld [vmem:[#allocation70_spill] sm:$0xff] }
 0x4ef   : > { %v5642_v39 = vsub.f32 1.0, %v5641_v35  ;;  %v14458_v1 = vmul.f32 %v4501_v32, %v689_v34  ;;  %v14460_v15 = vmul.f32 %v4502_v18, %v690_v40  ;;  %v5623_v52 = vsel %vm5620_vm2, %v5622_v38, %v5618_v59  ;;  %17036 = vst [vmem:[#allocation150_spill] sm:$0xff] %v14468_v46  ;;  %v17040_v40 = vld [vmem:[#allocation69_spill] sm:$0xff]  ;;  %v14496_v18 = vld [vmem:[#allocation2 + $0x1d0] sm:$0xff] }
 0x4f0   : > { %v5638_v9 = vsel %vm5635_vm5, %v5637_v51, %v5633_v25  ;;  %v14462_v63 = vadd.f32 %v4439_v17, %v4375_v8  ;;  %v14464_v53 = vmul.f32 %v5623_v52, %v4773_v24  ;;  %v4848_v54 = vsub.f32 16.0, %v14447_v21  ;;  %17037 = vst [vmem:[#allocation107_spill] sm:$0xff] %v14471_v50  ;;  %v14498_v17 = vld [vmem:[#allocation2 + $0x1d8] sm:$0xff]  ;;  %v14500_v59 = vld [vmem:[#allocation2 + $0x1e0] sm:$0xff]  ;;  %v14507_v8 = vld [vmem:[#allocation2 + $0x1e8] sm:$0xff] }
 0x4f1   : > { %17033 = vst [vmem:[#allocation89_spill] sm:$0xff] %v14458_v1  ;;  %v5657_v36 = vsub.f32 1.0, %v5656_v61  ;;  %v5651_v41 = vand.u32 2147483648, %v17026_v47  ;;  %v14482_v27 = vmul.f32 %v5638_v9, %v4774_v56  ;;  %v5643_v11 = vmul.f32 %v17027_v6, %v5642_v39  ;;  %v14509_v24 = vld [vmem:[#allocation2 + $0x1f0] sm:$0xff]  ;;  %v14511_v62 = vld [vmem:[#allocation3 + $0x198] sm:$0xff]  ;;  %v14519_v9 = vld [vmem:[#allocation3 + $0x1a0] sm:$0xff] }
 0x4f2   : > { %17034 = vst [vmem:[#allocation109_spill] sm:$0xff] %v14460_v15  ;;  %v5649_v22 = vand.u32 2147483647, %v17026_v47  ;;  %v5671_v32 = vmul.f32 %v17040_v40, %v17039_v19  ;;  %v14488_v60 = vmul.f32 0.5, %v4312_v42  ;;  %v14490_v0 = vmul.f32 0.5, %v4313_v44  ;;  %v17049_v51 = vld [vmem:[#allocation81_spill] sm:$0xff] }
 0x4f3   : > { %17035 = vst [vmem:[#allocation152_spill] sm:$0xff] %v14462_v63  ;;  %v14502_v25 = vmax.f32 %v4848_v54, 1.0  ;;  %vm5645_vm8 = vweird.f32 %v17026_v47  ;;  %vm5646_vm10 = vweird.f32 %v17027_v6  ;;  %v5658_v31 = vmul.f32 %v17030_v4, %v5657_v36  ;;  %v17050_v56 = vld [vmem:[#allocation75_spill] sm:$0xff]  ;;  %v14517_v52 = vld [vmem:[#allocation2 + $0x1f8] sm:$0xff] }
 0x4f4   : > { %17038 = vst [vmem:[#allocation92_spill] sm:$0xff] %v14475_v12  ;;  %v5652_v61 = vor.u32 1.1754944e-38, %v5651_v41  ;;  %vm5660_vm11 = vweird.f32 %v17029_v55  ;;  %v5664_v38 = vand.u32 2147483647, %v17029_v55  ;;  %v5686_v39 = vmul.f32 %v17050_v56, %v17049_v51  ;;  %v14521_v42 = vld [vmem:[#allocation3 + $0x1a8] sm:$0xff]  ;;  %v14532_v34 = vld [vmem:[#allocation3 + $0x1b8] sm:$0xff]  ;;  %vm14576_vm14 = vmor %vm5645_vm8, %vm5646_vm10 }
 0x4f5   : > { %17041 = vst [vmem:[#allocation73_spill] sm:$0xff] %v14488_v60  ;;  %v5644_v44 = vadd.f32 %v17027_v6, %v5643_v11  ;;  %vm14524_vm9 = vcmp.eq.f32.partialorder %v5649_v22, 8.507059e+37  ;;  %vm5661_vm6 = vweird.f32 %v17030_v4  ;;  %v5666_v36 = vand.u32 2147483648, %v17029_v55  ;;  %v14539_v22 = vld [vmem:[#allocation3 + $0x1c0] sm:$0xff]  ;;  %v14541_v21 = vld [vmem:[#allocation3 + $0x1c8] sm:$0xff]  ;;  %v14543_v15 = vld [vmem:[#allocation3 + $0x1d0] sm:$0xff] }
 0x4f6   : > { %17042 = vst [vmem:[#allocation100_spill] sm:$0xff] %v14490_v0  ;;  %v5672_v41 = vsub.f32 1.0, %v5671_v32  ;;  %v4849_v35 = vsub.f32 16.0, %v14496_v18  ;;  %v4850_v48 = vsub.f32 16.0, %v14498_v17  ;;  %v4851_v3 = vsub.f32 16.0, %v14500_v59  ;;  %v17059_v60 = vld [vmem:[#allocation65_spill] sm:$0xff]  ;;  %vm14611_vm3 = vmor %vm5660_vm11, %vm5661_vm6 }
 0x4f7   : > { %17043 = vst [vmem:[#allocation161_spill] sm:$0xff] %v14496_v18  ;;  %vm5676_vm12 = vweird.f32 %v17040_v40  ;;  %v5681_v11 = vand.u32 2147483648, %v17039_v19  ;;  %v4852_v1 = vsub.f32 16.0, %v14507_v8  ;;  %v4853_v18 = vsub.f32 16.0, %v14509_v24  ;;  %v14592_v63 = vld [vmem:[#allocation3 + $0x1e8] sm:$0xff] }
 0x4f8   : > { %17044 = vst [vmem:[#allocation158_spill] sm:$0xff] %v14498_v17  ;;  %v5659_v17 = vadd.f32 %v17030_v4, %v5658_v31  ;;  %v4854_v12 = vsub.f32 16.0, %v14517_v52  ;;  %vm5675_vm13 = vweird.f32 %v17039_v19  ;;  %v5687_v32 = vsub.f32 1.0, %v5686_v39 }
 0x4f9   : > { %17045 = vst [vmem:[#allocation115_spill] sm:$0xff] %v14500_v59  ;;  %v4003_v59 = vpop.xlane.xlu2 %4002  ;;  %v5701_v50 = vmul.f32 %v17060_v16, %v17059_v60  ;;  %vm5690_vm15 = vweird.f32 %v17049_v51  ;;  %v14587_v0 = vmax.f32 %v4849_v35, 1.0  ;;  %v5648_v47 = vsel %vm14576_vm14, %v17027_v6, %v5644_v44  ;;  %vm14639_vm7 = vmor %vm5675_vm13, %vm5676_vm12 }
 0x4fa   : > { %17046 = vst [vmem:[#allocation16_spill] sm:$0xff] %v14507_v8  ;;  %v4067_v8 = vadd.f32 %v4003_v59, %v3683_v49  ;;  %v5673_v49 = vmul.f32 %v17040_v40, %v5672_v41  ;;  %v14596_v41 = vmax.f32 %v4851_v3, 1.0  ;;  %v5716_v39 = vmul.f32 %v14135_v26, %v13995_v30 }
 0x4fb   : > { %17047 = vst [vmem:[#allocation164_spill] sm:$0xff] %v14509_v24  ;;  %v14594_v24 = vmax.f32 %v4850_v48, 1.0  ;;  %v14601_v31 = vmax.f32 %v4852_v1, 1.0  ;;  %v14605_v35 = vmax.f32 %v4854_v12, 1.0  ;;  %v5702_v3 = vsub.f32 1.0, %v5701_v50 }
 0x4fc   : > { %17048 = vst [vmem:[#allocation172_spill] sm:$0xff] %v14511_v62  ;;  %v5653_v48 = vsel %vm14524_vm9, %v5652_v61, %v5648_v47  ;;  %v5663_v1 = vsel %vm14611_vm3, %v17030_v4, %v5659_v17  ;;  %vm5665_vm0 = vcmp.eq.f32.partialorder %v5664_v38, 8.507059e+37  ;;  %v5674_v12 = vadd.f32 %v17040_v40, %v5673_v49  ;;  %v14633_v17 = vld [vmem:[#allocation3 + $0x1f0] sm:$0xff] }
 0x4fd   : > { %17051 = vst [vmem:[#allocation171_spill] sm:$0xff] %v14517_v52  ;;  %v14603_v52 = vmax.f32 %v4853_v18, 1.0  ;;  %v17065_v55 = vsub.f32 %v12085_v28, %v14455_v45  ;;  %v5679_v50 = vand.u32 2147483647, %v17039_v19  ;;  %vm5691_vm1 = vweird.f32 %v17050_v56 }
 0x4fe   : > { %17052 = vst [vmem:[#allocation85_spill] sm:$0xff] %v14519_v9  ;;  %v5717_v54 = vsub.f32 1.0, %v5716_v39  ;;  %v5731_v4 = vmul.f32 %v14349_v43, %v14213_v29  ;;  %v5696_v49 = vand.u32 2147483648, %v17049_v51  ;;  %v5703_v47 = vmul.f32 %v17060_v16, %v5702_v3  ;;  %vm14658_vm5 = vmor %vm5690_vm15, %vm5691_vm1 }
 0x4ff   : > { %17053 = vst [vmem:[#allocation121_spill] sm:$0xff] %v14521_v42  ;;  %v14626_v44 = vmul.f32 %v5653_v48, %v17065_v55  ;;  %v17068_v39 = vsub.f32 %v12085_v28, %v14466_v57  ;;  %v5678_v6 = vsel %vm14639_vm7, %v17040_v40, %v5674_v12  ;;  %v5694_v19 = vand.u32 2147483647, %v17049_v51 }
 0x500   : > { %17056 = vst [vmem:[#allocation180_spill] sm:$0xff] %v14530_v58  ;;  %v5746_v48 = vmul.f32 %v14327_v13, %v14004_v20  ;;  %vm5680_vm2 = vcmp.eq.f32.partialorder %v5679_v50, 8.507059e+37  ;;  %vm5705_vm8 = vweird.f32 %v17059_v60  ;;  %vm5706_vm10 = vweird.f32 %v17060_v16 }
 0x501   : > { %17057 = vst [vmem:[#allocation155_spill] sm:$0xff] %v14532_v34  ;;  %v5709_v3 = vand.u32 2147483647, %v17059_v60  ;;  %v5718_v12 = vmul.f32 %v14135_v26, %v5717_v54  ;;  %v5732_v51 = vsub.f32 1.0, %v5731_v4  ;;  %v5704_v50 = vadd.f32 %v17060_v16, %v5703_v47  ;;  %v14686_v4 = vld [vmem:[#allocation3 + $0x1f8] sm:$0xff]  ;;  %vm14692_vm12 = vmor %vm5705_vm8, %vm5706_vm10 }
 0x502   : > { %17058 = vst [vmem:[#allocation134_spill] sm:$0xff] %v14539_v22  ;;  %v17071_v59 = vsub.f32 %v12085_v28, %v14468_v46  ;;  %vm5695_vm11 = vcmp.eq.f32.partialorder %v5694_v19, 8.507059e+37  ;;  %v5711_v40 = vand.u32 2147483648, %v17059_v60  ;;  %vm5721_vm6 = vweird.f32 %v14135_v26 }
 0x503   : > { %4131 = vst.msk [vmem:[#allocation4 + $0x1f8] sm:$0xff] %vm388_vm4, %v4067_v8  ;;  %v5688_v8 = vmul.f32 %v17050_v56, %v5687_v32  ;;  %v5667_v32 = vor.u32 1.1754944e-38, %v5666_v36  ;;  %v5682_v36 = vor.u32 1.1754944e-38, %v5681_v11  ;;  %v5747_v11 = vsub.f32 1.0, %v5746_v48 }
 0x504   : > { %vm14680_vm9 = vcmp.eq.f32.partialorder %v5709_v3, 8.507059e+37  ;;  %v5724_v54 = vand.u32 2147483647, %v13995_v30  ;;  %17074 = vst [vmem:[#allocation36_spill] sm:$0xff] %v14686_v4  ;;  %v5726_v47 = vand.u32 2147483648, %v13995_v30  ;;  %6695 = vrcp.f32 %v14502_v25 }
 0x505   : > { %v5689_v61 = vadd.f32 %v17050_v56, %v5688_v8  ;;  %v5668_v38 = vsel %vm5665_vm0, %v5667_v32, %v5663_v1  ;;  %v5683_v55 = vsel %vm5680_vm2, %v5682_v36, %v5678_v6  ;;  %v5697_v32 = vor.u32 1.1754944e-38, %v5696_v49 }
 0x506   : > { %v14648_v8 = vmul.f32 %v5668_v38, %v17068_v39  ;;  %v5761_v38 = vmul.f32 %v14400_v37, %v14320_v5  ;;  %v14677_v39 = vmul.f32 %v5683_v55, %v17071_v59  ;;  %v5719_v49 = vadd.f32 %v14135_v26, %v5718_v12 }
 0x507   : > { %v5693_v1 = vsel %vm14658_vm5, %v17050_v56, %v5689_v61  ;;  %v5733_v6 = vmul.f32 %v14349_v43, %v5732_v51  ;;  %v5708_v19 = vsel %vm14692_vm12, %v17060_v16, %v5704_v50  ;;  %v5739_v48 = vand.u32 2147483647, %v14213_v29 }
 0x508   : > { %v5698_v56 = vsel %vm5695_vm11, %v5697_v32, %v5693_v1  ;;  %v5762_v3 = vsub.f32 1.0, %v5761_v38  ;;  %6697 = vrcp.f32 %v14587_v0  ;;  %v5712_v60 = vor.u32 1.1754944e-38, %v5711_v40 }
 0x509   : > { %vm5720_vm13 = vweird.f32 %v13995_v30  ;;  %v5741_v1 = vand.u32 2147483648, %v14213_v29  ;;  %v5748_v12 = vmul.f32 %v14327_v13, %v5747_v11  ;;  %v17077_v55 = vsub.f32 %v12085_v28, %v14511_v62 }
 0x50a   : > { %vm14717_vm14 = vmor %vm5720_vm13, %vm5721_vm6  ;;  %vm14721_vm15 = vcmp.eq.f32.partialorder %v5724_v54, 8.507059e+37  ;;  %vm5735_vm3 = vweird.f32 %v14213_v29  ;;  %v5713_v40 = vsel %vm14680_vm9, %v5712_v60, %v5708_v19  ;;  %v5734_v38 = vadd.f32 %v14349_v43, %v5733_v6  ;;  %v14743_v36 = vpop.eup %6695 }
 0x50b   : > { %v14713_v32 = vmul.f32 %v5698_v56, %v17077_v55  ;;  %v5723_v50 = vsel %vm14717_vm14, %v14135_v26, %v5719_v49  ;;  %vm5736_vm0 = vweird.f32 %v14349_v43  ;;  %v17082_v59 = vsub.f32 %v12085_v28, %v14519_v9 }
 0x50c   : > { %v5727_v56 = vor.u32 1.1754944e-38, %v5726_v47  ;;  %vm14738_vm1 = vcmp.eq.f32.partialorder %v5739_v48, 8.507059e+37  ;;  %v5763_v61 = vmul.f32 %v14400_v37, %v5762_v3  ;;  %v5742_v19 = vor.u32 1.1754944e-38, %v5741_v1  ;;  %vm14754_vm2 = vmor %vm5735_vm3, %vm5736_vm0 }
 0x50d   : > { %v14736_v11 = vmul.f32 %v5713_v40, %v17082_v59  ;;  %v5749_v26 = vadd.f32 %v14327_v13, %v5748_v12  ;;  %vm5751_vm7 = vweird.f32 %v14327_v13  ;;  %6699 = vrcp.f32 %v14594_v24 }
 0x50e   : > { %v14748_v49 = vpop.eup %6697  ;;  %v5728_v47 = vsel %vm14721_vm15, %v5727_v56, %v5723_v50  ;;  %vm5750_vm5 = vweird.f32 %v14004_v20  ;;  %v5754_v48 = vand.u32 2147483647, %v14004_v20  ;;  %v5756_v3 = vand.u32 2147483648, %v14004_v20 }
 0x50f   : > { %v17087_v60 = vsub.f32 %v12085_v28, %v14521_v42  ;;  %v5738_v12 = vsel %vm14754_vm2, %v14349_v43, %v5734_v38  ;;  %vm5765_vm8 = vweird.f32 %v14320_v5  ;;  %v5769_v29 = vand.u32 2147483647, %v14320_v5  ;;  %vm14771_vm10 = vmor %vm5750_vm5, %vm5751_vm7 }
 0x510   : > { %v5764_v16 = vadd.f32 %v14400_v37, %v5763_v61  ;;  %vm5766_vm11 = vweird.f32 %v14400_v37  ;;  %v5771_v20 = vand.u32 2147483648, %v14320_v5  ;;  %6701 = vrcp.f32 %v14596_v41 }
 0x511   : > { %v14764_v1 = vmul.f32 %v5728_v47, %v17087_v60  ;;  %v5753_v43 = vsel %vm14771_vm10, %v14327_v13, %v5749_v26  ;;  %v5776_v30 = vmul.f32 %v14743_v36, %v14502_v25  ;;  %v5791_v40 = vmul.f32 %v14748_v49, %v14587_v0  ;;  %vm14800_vm6 = vmor %vm5765_vm8, %vm5766_vm11 }
 0x512   : > { %6703 = vrcp.f32 %v14601_v31  ;;  %v5743_v50 = vsel %vm14738_vm1, %v5742_v19, %v5738_v12  ;;  %v5757_v38 = vor.u32 1.1754944e-38, %v5756_v3  ;;  %v5786_v59 = vand.u32 2147483648, %v14502_v25 }
 0x513   : > { %6705 = vrcp.f32 %v14603_v52  ;;  %v14791_v56 = vpop.eup %6699  ;;  %v17090_v13 = vsub.f32 %v12085_v28, %v14530_v58  ;;  %vm5755_vm9 = vcmp.eq.f32.partialorder %v5754_v48, 8.507059e+37  ;;  %vm14804_vm12 = vcmp.eq.f32.partialorder %v5769_v29, 8.507059e+37 }
 0x514   : > { %v5801_v19 = vand.u32 2147483648, %v14587_v0  ;;  %v5758_v47 = vsel %vm5755_vm9, %v5757_v38, %v5753_v43  ;;  %v5768_v6 = vsel %vm14800_vm6, %v14400_v37, %v5764_v16  ;;  %v5784_v48 = vand.u32 2147483647, %v14502_v25 }
 0x515   : > { %v14796_v61 = vmul.f32 %v5743_v50, %v17090_v13  ;;  %v5816_v5 = vand.u32 2147483648, %v14594_v24  ;;  %v17095_v3 = vsub.f32 %v12085_v28, %v14532_v34  ;;  %v5772_v12 = vor.u32 1.1754944e-38, %v5771_v20  ;;  %v14831_v13 = vld [vmem:[%s12235_s20 + $0x170] sm:$0xff]  ;;  %v14866_v34 = vld [vmem:[%s12235_s20 + $0x180] sm:$0xff] }
 0x516   : > { %v5777_v29 = vsub.f32 1.0, %v5776_v30  ;;  %v5792_v55 = vsub.f32 1.0, %v5791_v40  ;;  %v14819_v50 = vpop.eup %6701  ;;  %vm5780_vm13 = vweird.f32 %v14502_v25  ;;  %v14822_v43 = vor.u32 1.1754944e-38, %v5786_v59  ;;  %17096 = vst [vmem:[#allocation200_spill] sm:$0xff] %v14831_v13 }
 0x517   : > { %v14817_v60 = vmul.f32 %v5758_v47, %v17095_v3  ;;  %v5806_v37 = vmul.f32 %v14791_v56, %v14594_v24  ;;  %v5831_v16 = vand.u32 2147483648, %v14596_v41  ;;  %6707 = vrcp.f32 %v14605_v35 }
 0x518   : > { %v14828_v38 = vpop.eup %6703  ;;  %v5773_v20 = vsel %vm14804_vm12, %v5772_v12, %v5768_v6  ;;  %vm5795_vm14 = vweird.f32 %v14587_v0  ;;  %v5799_v30 = vand.u32 2147483647, %v14587_v0  ;;  %v14837_v40 = vor.u32 1.1754944e-38, %v5801_v19  ;;  %v14852_v12 = vld [vmem:[%s12235_s20 + $0x178] sm:$0xff] }
 0x519   : > { %v5814_v59 = vand.u32 2147483647, %v14594_v24  ;;  %v14840_v26 = vpop.eup %6705  ;;  %v17097_v47 = vsub.f32 %v12085_v28, %v14539_v22  ;;  %vm5781_vm15 = vweird.f32 %v14743_v36  ;;  %v14848_v54 = vor.u32 1.1754944e-38, %v5816_v5  ;;  %17098 = vst [vmem:[#allocation129_spill] sm:$0xff] %v14852_v12 }
 0x51a   : > { %v5829_v6 = vand.u32 2147483647, %v14596_v41  ;;  %v5778_v19 = vmul.f32 %v14743_v36, %v5777_v29  ;;  %v5793_v51 = vmul.f32 %v14748_v49, %v5792_v55  ;;  %vm5796_vm3 = vweird.f32 %v14748_v49  ;;  %vm14908_vm5 = vmor %vm5780_vm13, %vm5781_vm15 }
 0x51b   : > { %v14845_v3 = vmul.f32 %v5773_v20, %v17097_v47  ;;  %v5821_v18 = vmul.f32 %v14819_v50, %v14596_v41  ;;  %v5807_v22 = vsub.f32 1.0, %v5806_v37  ;;  %v14859_v20 = vor.u32 1.1754944e-38, %v5831_v16  ;;  %vm14920_vm11 = vmor %vm5795_vm14, %vm5796_vm3 }
 0x51c   : > { %v5836_v5 = vmul.f32 %v14828_v38, %v14601_v31  ;;  %v5926_v47 = vmul.f32 %v14464_v53, %v14831_v13  ;;  %vm14868_vm0 = vcmp.eq.f32.partialorder %v5784_v48, 8.507059e+37  ;;  %v5844_v55 = vand.u32 2147483647, %v14601_v31 }
 0x51d   : > { %v5851_v37 = vmul.f32 %v14840_v26, %v14603_v52  ;;  %v6030_v16 = vadd.f32 %v14409_v33, %v14371_v14  ;;  %v6031_v58 = vsel %vm388_vm4, %v14449_v7, 0.0  ;;  %v14879_v42 = vpop.eup %6707  ;;  %vm14881_vm1 = vcmp.eq.f32.partialorder %v5799_v30, 8.507059e+37  ;;  %v14893_v33 = vld [vmem:[%s12235_s20 + $0x188] sm:$0xff] }
 0x51e   : > { %vm5810_vm7 = vweird.f32 %v14594_v24  ;;  %vm5811_vm2 = vweird.f32 %v14791_v56  ;;  %v5846_v48 = vand.u32 2147483648, %v14601_v31  ;;  %v5927_v9 = vmul.f32 %v14482_v27, %v14852_v12  ;;  %v14902_v12 = vld [vmem:[%s12235_s20 + $0x190] sm:$0xff] }
 0x51f   : > { %v6033_v14 = vsel %vm388_vm4, %v14451_v23, 0.0  ;;  %v5779_v7 = vadd.f32 %v14743_v36, %v5778_v19  ;;  %v5794_v30 = vadd.f32 %v14748_v49, %v5793_v51  ;;  %v5822_v62 = vsub.f32 1.0, %v5821_v18  ;;  %vm14980_vm15 = vmor %vm5810_vm7, %vm5811_vm2 }
 0x520   : > { %v6032_v13 = vadd.f32 %v6031_v58, %v6030_v16  ;;  %v5808_v45 = vmul.f32 %v14791_v56, %v5807_v22  ;;  %v5837_v46 = vsub.f32 1.0, %v5836_v5  ;;  %v5928_v4 = vmul.f32 %v14626_v44, %v14866_v34  ;;  %v14936_v5 = vld [vmem:[%s12235_s20 + $0x198] sm:$0xff]  ;;  %v15001_v44 = vld [vmem:[%s12235_s20 + $0x1b0] sm:$0xff] }
 0x521   : > { %v6035_v27 = vsel %vm388_vm4, %v5926_v47, 0.0  ;;  %vm5825_vm8 = vweird.f32 %v14596_v41  ;;  %vm5826_vm10 = vweird.f32 %v14819_v50  ;;  %v5852_v58 = vsub.f32 1.0, %v5851_v37 }
 0x522   : > { %v5866_v22 = vmul.f32 %v14879_v42, %v14605_v35  ;;  %v6034_v18 = vadd.f32 %v6033_v14, %v6032_v13  ;;  %vm14924_vm9 = vcmp.eq.f32.partialorder %v5814_v59, 8.507059e+37  ;;  %vm5840_vm6 = vweird.f32 %v14601_v31  ;;  %vm15013_vm7 = vmor %vm5825_vm8, %vm5826_vm10  ;;  %v6785_v31 = vld [vmem:[#allocation2 + $0x188] sm:$0xff] }
 0x523   : > { %v14929_v51 = vor.u32 1.1754944e-38, %v5846_v48  ;;  %v5859_v19 = vand.u32 2147483647, %v14603_v52  ;;  %v5929_v13 = vmul.f32 %v14648_v8, %v14893_v33  ;;  %v6037_v0 = vsel %vm388_vm4, %v5927_v9, 0.0 }
 0x524   : > { %v5783_v59 = vsel %vm14908_vm5, %v14743_v36, %v5779_v7  ;;  %v5798_v47 = vsel %vm14920_vm11, %v14748_v49, %v5794_v30  ;;  %v5823_v37 = vmul.f32 %v14819_v50, %v5822_v62  ;;  %vm5855_vm12 = vweird.f32 %v14603_v52  ;;  %v14952_v36 = vld [vmem:[%s12235_s20 + $0x1a0] sm:$0xff] }
 0x525   : > { %v6036_v16 = vadd.f32 %v6035_v27, %v6034_v18  ;;  %v5809_v8 = vadd.f32 %v14791_v56, %v5808_v45  ;;  %v5838_v9 = vmul.f32 %v14828_v38, %v5837_v46  ;;  %v5930_v48 = vmul.f32 %v14677_v39, %v14902_v12 }
 0x526   : > { %v6039_v14 = vsel %vm388_vm4, %v5928_v4, 0.0  ;;  %vm14954_vm13 = vcmp.eq.f32.partialorder %v5829_v6, 8.507059e+37  ;;  %v5853_v62 = vmul.f32 %v14840_v26, %v5852_v58  ;;  %v5861_v49 = vand.u32 2147483648, %v14603_v52  ;;  %v14968_v4 = vld [vmem:[%s12235_s20 + $0x1a8] sm:$0xff] }
 0x527   : > { %v5867_v30 = vsub.f32 1.0, %v5866_v22  ;;  %v6038_v27 = vadd.f32 %v6037_v0, %v6036_v16  ;;  %v5788_v45 = vsel %vm14868_vm0, %v14822_v43, %v5783_v59  ;;  %vm5841_vm14 = vweird.f32 %v14828_v38 }
 0x528   : > { %v5931_v46 = vmul.f32 %v14713_v32, %v14936_v5  ;;  %v6041_v39 = vsel %vm388_vm4, %v5929_v13, 0.0  ;;  %v17111_v6 = vsub.f32 %v12085_v28, %v14541_v21  ;;  %v5803_v58 = vsel %vm14881_vm1, %v14837_v40, %v5798_v47  ;;  %vm15033_vm2 = vmor %vm5840_vm6, %vm5841_vm14 }
 0x529   : > { %v5824_v32 = vadd.f32 %v14819_v50, %v5823_v37  ;;  %vm14985_vm3 = vcmp.eq.f32.partialorder %v5844_v55, 8.507059e+37  ;;  %vm14989_vm0 = vcmp.eq.f32.partialorder %v5859_v19, 8.507059e+37  ;;  %v6040_v40 = vadd.f32 %v6039_v14, %v6038_v27 }
 0x52a   : > { %v5789_v23 = vmul.f32 %v5788_v45, %v17111_v6  ;;  %v5813_v24 = vsel %vm14980_vm15, %v14791_v56, %v5809_v8  ;;  %v5839_v53 = vadd.f32 %v14828_v38, %v5838_v9  ;;  %v5932_v18 = vmul.f32 %v14736_v11, %v14952_v36  ;;  %v15021_v8 = vld [vmem:[%s12235_s20 + $0x1b8] sm:$0xff] }
 0x52b   : > { %v6043_v55 = vsel %vm388_vm4, %v5930_v48, 0.0  ;;  %v5854_v19 = vadd.f32 %v14840_v26, %v5853_v62  ;;  %vm5856_vm1 = vweird.f32 %v14840_v26  ;;  %v5868_v13 = vmul.f32 %v14879_v42, %v5867_v30  ;;  %v15054_v62 = vld [vmem:[%s12235_s20 + $0x1c0] sm:$0xff]  ;;  %v15077_v6 = vld [vmem:[%s12235_s20 + $0x1d8] sm:$0xff] }
 0x52c   : > { %v6042_v0 = vadd.f32 %v6041_v39, %v6040_v40  ;;  %v17118_v59 = vsub.f32 %v12085_v28, %v14543_v15  ;;  %v5862_v47 = vor.u32 1.1754944e-38, %v5861_v49  ;;  %v5933_v37 = vmul.f32 %v14764_v1, %v14968_v4  ;;  %vm15045_vm5 = vmor %vm5855_vm12, %vm5856_vm1  ;;  %v15074_v39 = vld [vmem:[%s12235_s20 + $0x1d0] sm:$0xff]  ;;  %v4314_v40 = vld [vmem:[#allocation4 + $0x188] sm:$0xff] }
 0x52d   : > { %v6045_v16 = vsel %vm388_vm4, %v5931_v46, 0.0  ;;  %v5818_v9 = vsel %vm14924_vm9, %v14848_v54, %v5813_v24  ;;  %v5828_v41 = vsel %vm15013_vm7, %v14819_v50, %v5824_v32  ;;  %v5876_v1 = vand.u32 2147483648, %v14605_v35 }
 0x52e   : > { %v5804_v56 = vmul.f32 %v5803_v58, %v17118_v59  ;;  %v6044_v14 = vadd.f32 %v6043_v55, %v6042_v0  ;;  %v5843_v54 = vsel %vm15033_vm2, %v14828_v38, %v5839_v53  ;;  %vm5870_vm8 = vweird.f32 %v14605_v35  ;;  %v15112_v59 = vld [vmem:[%s12235_s20 + $0x1e8] sm:$0xff] }
 0x52f   : > { %v5934_v50 = vmul.f32 %v14796_v61, %v15001_v44  ;;  %v6047_v25 = vsel %vm388_vm4, %v5932_v18, 0.0  ;;  %v5858_v38 = vsel %vm15045_vm5, %v14840_v26, %v5854_v19  ;;  %v5869_v52 = vadd.f32 %v14879_v42, %v5868_v13  ;;  %v15071_v26 = vld [vmem:[%s12235_s20 + $0x1c8] sm:$0xff]  ;;  %v15100_v19 = vld [vmem:[%s12235_s20 + $0x1e0] sm:$0xff] }
 0x530   : > { %vm5871_vm10 = vweird.f32 %v14879_v42  ;;  %v6046_v49 = vadd.f32 %v6045_v16, %v6044_v14  ;;  %v17125_v30 = vsub.f32 %v12085_v28, %v14550_v10  ;;  %v5833_v61 = vsel %vm14954_vm13, %v14859_v20, %v5828_v41  ;;  %v17132_v41 = vld [vmem:[#allocation104_spill] sm:$0xff]  ;;  %v17139_v53 = vld [vmem:[#allocation11_spill] sm:$0xff] }
 0x531   : > { %v5935_v45 = vmul.f32 %v14817_v60, %v15021_v8  ;;  %v6049_v46 = vsel %vm388_vm4, %v5933_v37, 0.0  ;;  %v17126_v58 = vsub.f32 %v12085_v28, %v14552_v2  ;;  %v5874_v20 = vand.u32 2147483647, %v14605_v35  ;;  %vm15092_vm11 = vmor %vm5870_vm8, %vm5871_vm10 }
 0x532   : > { %v5819_v27 = vmul.f32 %v5818_v9, %v17125_v30  ;;  %v5877_v7 = vor.u32 1.1754944e-38, %v5876_v1  ;;  %v6048_v32 = vadd.f32 %v6047_v25, %v6046_v49  ;;  %v5848_v60 = vsel %vm14985_vm3, %v14929_v51, %v5843_v54  ;;  %v17131_v9 = vld [vmem:[#allocation107_spill] sm:$0xff]  ;;  %v17134_v1 = vld [vmem:[#allocation73_spill] sm:$0xff] }
 0x533   : > { %v5834_v43 = vmul.f32 %v5833_v61, %v17126_v58  ;;  %v5863_v24 = vsel %vm14989_vm0, %v5862_v47, %v5858_v38  ;;  %v5936_v18 = vmul.f32 %v14845_v3, %v15054_v62  ;;  %v6051_v55 = vsel %vm388_vm4, %v5934_v50, 0.0  ;;  %v15115_v3 = vld [vmem:[%s12235_s20 + $0x1f0] sm:$0xff] }
 0x534   : > { %v17129_v51 = vsub.f32 %v12085_v28, %v14592_v63  ;;  %v17130_v22 = vsub.f32 %v12085_v28, %v14633_v17  ;;  %v5873_v35 = vsel %vm15092_vm11, %v14879_v42, %v5869_v52  ;;  %v6050_v0 = vadd.f32 %v6049_v46, %v6048_v32  ;;  %v4315_v38 = vld [vmem:[#allocation4 + $0x190] sm:$0xff]  ;;  %v4316_v46 = vld [vmem:[#allocation4 + $0x198] sm:$0xff] }
 0x535   : > { %v5937_v11 = vmul.f32 %v5789_v23, %v15071_v26  ;;  %v5938_v47 = vmul.f32 %v5804_v56, %v15074_v39  ;;  %v5939_v37 = vmul.f32 %v5819_v27, %v15077_v6  ;;  %v6053_v16 = vsel %vm388_vm4, %v5935_v45, 0.0  ;;  %v17135_v52 = vld [vmem:[#allocation36_spill] sm:$0xff] }
 0x536   : > { %v5849_v29 = vmul.f32 %v5848_v60, %v17129_v51  ;;  %v5864_v13 = vmul.f32 %v5863_v24, %v17130_v22  ;;  %v17133_v48 = vsub.f32 %v17131_v9, %v17132_v41  ;;  %v4442_v54 = vmul.f32 0.5, %v4314_v40  ;;  %v4317_v60 = vld [vmem:[#allocation4 + $0x1a0] sm:$0xff]  ;;  %v17138_v24 = vld [vmem:[#allocation92_spill] sm:$0xff] }
 0x537   : > { %vm5875_vm9 = vcmp.eq.f32.partialorder %v5874_v20, 8.507059e+37  ;;  %v6052_v42 = vadd.f32 %v6051_v55, %v6050_v0  ;;  %v4378_v50 = vsub.f32 %v6785_v31, %v14466_v57  ;;  %v5940_v23 = vmul.f32 %v5834_v43, %v15100_v19  ;;  %v6786_v20 = vld [vmem:[#allocation2 + $0x190] sm:$0xff]  ;;  %v15147_v9 = vld [vmem:[%s12235_s20 + $0x1f8] sm:$0xff] }
 0x538   : > { %v4504_v14 = vadd.f32 %v17134_v1, %v17133_v48  ;;  %v5878_v25 = vsel %vm5875_vm9, %v5877_v7, %v5873_v35  ;;  %v6055_v56 = vsel %vm388_vm4, %v5936_v18, 0.0  ;;  %v17136_v49 = vsub.f32 %v12085_v28, %v17135_v52  ;;  %v17137_v7 = vld [vmem:[#allocation150_spill] sm:$0xff]  ;;  %v17141_v55 = vld [vmem:[#allocation100_spill] sm:$0xff]  ;;  %v17146_v1 = vld [vmem:[#allocation129_spill] sm:$0xff] }
 0x539   : > { %v5941_v27 = vmul.f32 %v5849_v29, %v15112_v59  ;;  %v5942_v61 = vmul.f32 %v5864_v13, %v15115_v3  ;;  %v6054_v45 = vadd.f32 %v6053_v16, %v6052_v42  ;;  %v6057_v58 = vsel %vm388_vm4, %v5937_v11, 0.0  ;;  %v17142_v29 = vld [vmem:[#allocation200_spill] sm:$0xff]  ;;  %v4318_v48 = vld [vmem:[#allocation4 + $0x1a8] sm:$0xff]  ;;  %v17147_v31 = vld [vmem:[#allocation89_spill] sm:$0xff] }
 0x53a   : > { %v5879_v30 = vmul.f32 %v5878_v25, %v17136_v49  ;;  %v6059_v57 = vsel %vm388_vm4, %v5938_v47, 0.0  ;;  %v6061_v43 = vsel %vm388_vm4, %v5939_v37, 0.0  ;;  %v4379_v32 = vsub.f32 %v6786_v20, %v17137_v7  ;;  %v17143_v22 = vld [vmem:[#allocation152_spill] sm:$0xff] }
 0x53b   : > { %v6056_v40 = vadd.f32 %v6055_v56, %v6054_v45  ;;  %v4443_v28 = vmul.f32 0.5, %v4315_v38  ;;  %v17140_v18 = vsub.f32 %v17138_v24, %v17139_v53  ;;  %v4568_v13 = vmul.f32 %v17143_v22, %v17142_v29  ;;  %v17144_v47 = vld [vmem:[#allocation72_spill] sm:$0xff]  ;;  %v17148_v56 = vld [vmem:[#allocation109_spill] sm:$0xff] }
 0x53c   : > { %v6063_v35 = vsel %vm388_vm4, %v5940_v23, 0.0  ;;  %v4444_v0 = vmul.f32 0.5, %v4316_v46  ;;  %v4506_v11 = vadd.f32 %v4442_v54, %v4378_v50  ;;  %v17145_v37 = vld [vmem:[#allocation84_spill] sm:$0xff]  ;;  %v4569_v42 = vmul.f32 %v4504_v14, %v17146_v1  ;;  %v6788_v46 = vld [vmem:[#allocation2 + $0x1a0] sm:$0xff] }
 0x53d   : > { %v4505_v51 = vadd.f32 %v17141_v55, %v17140_v18  ;;  %v4672_v16 = vadd.f32 %v17145_v37, %v17144_v47  ;;  %v6058_v41 = vadd.f32 %v6057_v58, %v6056_v40  ;;  %v4673_v25 = vsel %vm388_vm4, %v17147_v31, 0.0  ;;  %v6787_v49 = vld [vmem:[#allocation2 + $0x198] sm:$0xff]  ;;  %v4319_v53 = vld [vmem:[#allocation4 + $0x1b0] sm:$0xff]  ;;  %v6789_v55 = vld [vmem:[#allocation2 + $0x1a8] sm:$0xff] }
 0x53e   : > { %v4675_v38 = vsel %vm388_vm4, %v17148_v56, 0.0  ;;  %v17149_v45 = vld [vmem:[#allocation172_spill] sm:$0xff]  ;;  %v17150_v54 = vld [vmem:[#allocation85_spill] sm:$0xff]  ;;  %v4445_v20 = vmul.f32 0.5, %v4317_v60  ;;  %v4507_v58 = vadd.f32 %v4443_v28, %v4379_v32  ;;  %v4677_v14 = vsel %vm388_vm4, %v4568_v13, 0.0 }
 0x53f   : > { %v4380_v23 = vsub.f32 %v6787_v49, %v17149_v45  ;;  %v4381_v50 = vsub.f32 %v6788_v46, %v17150_v54  ;;  %v4674_v7 = vadd.f32 %v4673_v25, %v4672_v16  ;;  %v6060_v24 = vadd.f32 %v6059_v57, %v6058_v41  ;;  %v17151_v29 = vld [vmem:[#allocation121_spill] sm:$0xff]  ;;  %v17152_v25 = vld [vmem:[#allocation180_spill] sm:$0xff]  ;;  %v4322_v45 = vld [vmem:[#allocation4 + $0x1c8] sm:$0xff] }
 0x540   : > { %v4570_v40 = vmul.f32 %v4505_v51, %v14866_v34  ;;  %v5943_v18 = vmul.f32 %v5879_v30, %v15147_v9  ;;  %v4382_v22 = vsub.f32 %v6789_v55, %v17151_v29  ;;  %v4446_v47 = vmul.f32 0.5, %v4318_v48  ;;  %v4320_v31 = vld [vmem:[#allocation4 + $0x1b8] sm:$0xff]  ;;  %v4321_v30 = vld [vmem:[#allocation4 + $0x1c0] sm:$0xff] }
 0x541   : > { %v4676_v37 = vadd.f32 %v4675_v38, %v4674_v7  ;;  %v6062_v1 = vadd.f32 %v6061_v43, %v6060_v24  ;;  %v4508_v56 = vadd.f32 %v4444_v0, %v4380_v23  ;;  %v4571_v60 = vmul.f32 %v4506_v11, %v14893_v33  ;;  %v6790_v43 = vld [vmem:[#allocation2 + $0x1b0] sm:$0xff]  ;;  %v6791_v38 = vld [vmem:[#allocation2 + $0x1b8] sm:$0xff]  ;;  %v17154_v54 = vld [vmem:[#allocation134_spill] sm:$0xff] }
 0x542   : > { %v4679_v57 = vsel %vm388_vm4, %v4569_v42, 0.0  ;;  %v6065_v32 = vsel %vm388_vm4, %v5941_v27, 0.0  ;;  %v6067_v34 = vsel %vm388_vm4, %v5942_v61, 0.0  ;;  %v4447_v28 = vmul.f32 0.5, %v4319_v53  ;;  %v17153_v33 = vld [vmem:[#allocation155_spill] sm:$0xff] }
 0x543   : > { %v4678_v51 = vadd.f32 %v4677_v14, %v4676_v37  ;;  %v6064_v13 = vadd.f32 %v6063_v35, %v6062_v1  ;;  %v4509_v16 = vadd.f32 %v4445_v20, %v4381_v50  ;;  %v4572_v41 = vmul.f32 %v4507_v58, %v14902_v12  ;;  %v6792_v12 = vld [vmem:[#allocation2 + $0x1c0] sm:$0xff]  ;;  %v4323_v14 = vld [vmem:[#allocation4 + $0x1d0] sm:$0xff]  ;;  %v4324_v37 = vld [vmem:[#allocation4 + $0x1d8] sm:$0xff] }
 0x544   : > { %v4681_v48 = vsel %vm388_vm4, %v4570_v40, 0.0  ;;  %v4383_v0 = vsub.f32 %v6790_v43, %v17152_v25  ;;  %v4384_v11 = vsub.f32 %v6791_v38, %v17153_v33  ;;  %v4448_v42 = vmul.f32 0.5, %v4320_v31  ;;  %v17155_v1 = vld [vmem:[#allocation114_spill] sm:$0xff]  ;;  %v4327_v33 = vld [vmem:[#allocation4 + $0x1f0] sm:$0xff] }
 0x545   : > { %v4680_v49 = vadd.f32 %v4679_v57, %v4678_v51  ;;  %v6066_v27 = vadd.f32 %v6065_v32, %v6064_v13  ;;  %v4510_v61 = vadd.f32 %v4446_v47, %v4382_v22  ;;  %v4573_v23 = vmul.f32 %v4508_v56, %v14936_v5  ;;  %v17156_v56 = vld [vmem:[#allocation161_spill] sm:$0xff] }
 0x546   : > { %v4683_v35 = vsel %vm388_vm4, %v4571_v60, 0.0  ;;  %v6069_v46 = vsel %vm388_vm4, %v5943_v18, 0.0  ;;  %v4385_v50 = vsub.f32 %v6792_v12, %v17154_v54  ;;  %v4449_v20 = vmul.f32 0.5, %v4321_v30  ;;  %v4325_v51 = vld [vmem:[#allocation4 + $0x1e0] sm:$0xff] }
 0x547   : > { %v4682_v7 = vadd.f32 %v4681_v48, %v4680_v49  ;;  %v6068_v24 = vadd.f32 %v6067_v34, %v6066_v27  ;;  %v4511_v53 = vadd.f32 %v4447_v28, %v4383_v0  ;;  %v4574_v58 = vmul.f32 %v4509_v16, %v14952_v36 }
 0x548   : > { %v4685_v40 = vsel %vm388_vm4, %v4572_v41, 0.0  ;;  %v4450_v55 = vmul.f32 0.5, %v4322_v45  ;;  %v4512_v5 = vadd.f32 %v4448_v42, %v4384_v11  ;;  %v4575_v47 = vmul.f32 %v4510_v61, %v14968_v4  ;;  %v17157_v4 = vld [vmem:[#allocation158_spill] sm:$0xff]  ;;  %v17158_v11 = vld [vmem:[#allocation115_spill] sm:$0xff] }
 0x549   : > { %v4684_v29 = vadd.f32 %v4683_v35, %v4682_v7  ;;  %v6070_v22 = vadd.f32 %v6069_v46, %v6068_v24  ;;  %v4687_v18 = vsel %vm388_vm4, %v4573_v23, 0.0  ;;  %v4386_v31 = vsub.f32 %v17155_v1, %v14541_v21  ;;  %v4328_v35 = vld [vmem:[#allocation4 + $0x1f8] sm:$0xff] }
 0x54a   : > { %v4387_v60 = vsub.f32 %v17156_v56, %v14543_v15  ;;  %v4451_v36 = vmul.f32 0.5, %v4323_v14  ;;  %v4513_v32 = vadd.f32 %v4449_v20, %v4385_v50  ;;  %v4576_v34 = vmul.f32 %v4511_v53, %v15001_v44  ;;  %v4326_v15 = vld [vmem:[#allocation4 + $0x1e8] sm:$0xff]  ;;  %v17160_v46 = vld [vmem:[#allocation164_spill] sm:$0xff] }
 0x54b   : > { %v4686_v57 = vadd.f32 %v4685_v40, %v4684_v29  ;;  %6071 = vadd.xlane.f32.xlu1 %v6070_v22  ;;  %v4689_v28 = vsel %vm388_vm4, %v4574_v58, 0.0  ;;  %v4388_v13 = vsub.f32 %v17157_v4, %v14550_v10  ;;  %v4452_v16 = vmul.f32 0.5, %v4324_v37  ;;  %v17159_v10 = vld [vmem:[#allocation16_spill] sm:$0xff]  ;;  %v17161_v40 = vld [vmem:[#allocation171_spill] sm:$0xff] }
 0x54c   : > { %v4514_v41 = vadd.f32 %v4450_v55, %v4386_v31  ;;  %v4577_v21 = vmul.f32 %v4512_v5, %v15021_v8  ;;  %v4691_v48 = vsel %vm388_vm4, %v4575_v47, 0.0  ;;  %v4453_v25 = vmul.f32 0.5, %v4325_v51 }
 0x54d   : > { %v4688_v30 = vadd.f32 %v4687_v18, %v4686_v57  ;;  %v4515_v0 = vadd.f32 %v4451_v36, %v4387_v60  ;;  %v4578_v38 = vmul.f32 %v4513_v32, %v15054_v62  ;;  %v4693_v44 = vsel %vm388_vm4, %v4576_v34, 0.0 }
 0x54e   : > { %v4389_v42 = vsub.f32 %v17158_v11, %v14552_v2  ;;  %v4390_v49 = vsub.f32 %v17159_v10, %v14592_v63  ;;  %v4454_v45 = vmul.f32 0.5, %v4326_v15  ;;  %v4516_v8 = vadd.f32 %v4452_v16, %v4388_v13 }
 0x54f   : > { %v4690_v43 = vadd.f32 %v4689_v28, %v4688_v30  ;;  %v4579_v61 = vmul.f32 %v4514_v41, %v15071_v26  ;;  %v4695_v23 = vsel %vm388_vm4, %v4577_v21, 0.0  ;;  %v4391_v62 = vsub.f32 %v17160_v46, %v14633_v17 }
 0x550   : > { %v4455_v54 = vmul.f32 0.5, %v4327_v33  ;;  %v4517_v50 = vadd.f32 %v4453_v25, %v4389_v42  ;;  %v4580_v20 = vmul.f32 %v4515_v0, %v15074_v39  ;;  %v4697_v2 = vsel %vm388_vm4, %v4578_v38, 0.0 }
 0x551   : > { %v4692_v27 = vadd.f32 %v4691_v48, %v4690_v43  ;;  %v4456_v63 = vmul.f32 0.5, %v4328_v35  ;;  %v4518_v24 = vadd.f32 %v4454_v45, %v4390_v49  ;;  %v4581_v53 = vmul.f32 %v4516_v8, %v15077_v6 }
 0x552   : > { %v4699_v26 = vsel %vm388_vm4, %v4579_v61, 0.0  ;;  %v4392_v14 = vsub.f32 %v17161_v40, %v17135_v52  ;;  %v4519_v55 = vadd.f32 %v4455_v54, %v4391_v62  ;;  %v4582_v17 = vmul.f32 %v4517_v50, %v15100_v19 }
 0x553   : > { %v4694_v12 = vadd.f32 %v4693_v44, %v4692_v27  ;;  %v4701_v29 = vsel %vm388_vm4, %v4580_v20, 0.0  ;;  %v4583_v5 = vmul.f32 %v4518_v24, %v15112_v59  ;;  %v4703_v47 = vsel %vm388_vm4, %v4581_v53, 0.0 }
 0x554   : > { %v4520_v39 = vadd.f32 %v4456_v63, %v4392_v14  ;;  %v4584_v6 = vmul.f32 %v4519_v55, %v15115_v3  ;;  %v4705_v37 = vsel %vm388_vm4, %v4582_v17, 0.0  ;;  %vm382_vm6 = vcmask 0  }
 0x555   : > { %v4696_v7 = vadd.f32 %v4695_v23, %v4694_v12  ;;  %v4707_v52 = vsel %vm388_vm4, %v4583_v5, 0.0  ;;  %v17162_v32 = vmov 0.0   ;;  %v6092_v25 = vstv %s6091_s30 }
 0x556   : > { %v4585_v31 = vmul.f32 %v4520_v39, %v15147_v9  ;;  %v4709_v19 = vsel %vm388_vm4, %v4584_v6, 0.0  ;;  %383 = vst.msk [vmem:[#allocation5] sm:$0x1] %vm382_vm6, %v17162_v32  ;;  %6709 = vrcp.f32 %v6092_v25  ;;  %v6117_v0 = vstv %s6116_s7 }
 0x557   : > { %v4698_v58 = vadd.f32 %v4697_v2, %v4696_v7  ;;  %384 = vst.msk [vmem:[#allocation6] sm:$0x1] %vm382_vm6, %v17162_v32  ;;  %6711 = vrcp.f32 %v6117_v0  ;;  %v6102_v8 = vand.u32 2147483647, %v6092_v25  ;;  %v6104_v35 = vand.u32 2147483648, %v6092_v25 }
 0x558   : > { %v4711_v57 = vsel %vm388_vm4, %v4585_v31, 0.0  ;;  %vm6098_vm4 = vweird.f32 %v6092_v25  ;;  %vm6123_vm13 = vweird.f32 %v6117_v0  ;;  %v6129_v12 = vand.u32 2147483648, %v6117_v0 }
 0x559   : > { %v4700_v22 = vadd.f32 %v4699_v26, %v4698_v58  ;;  %v6127_v2 = vand.u32 2147483647, %v6117_v0  ;;  %v6105_v63 = vor.u32 1.1754944e-38, %v6104_v35  ;;  %vm6103_vm0 = vcmp.eq.f32.partialorder %v6102_v8, 8.507059e+37 }
 0x55a   : > { %v6130_v53 = vor.u32 1.1754944e-38, %v6129_v12  ;;  %v6109_v58 = vstv %s6108_s9  ;;  %v6134_v14 = vstv %s6133_s10 }
 0x55b   : > { %v4702_v18 = vadd.f32 %v4701_v29, %v4700_v22  ;;  %vm6128_vm1 = vcmp.eq.f32.partialorder %v6127_v2, 8.507059e+37  ;;  %vm6110_vm7 = vcmp.eq.s32.totalorder %v6109_v58, 1  ;;  %vm6135_vm2 = vcmp.eq.s32.totalorder %v6134_v14, 1 }
 0x55c   : > { %v6710_v38 = vpop.eup %6709 }
 0x55d   : > { %v4704_v1 = vadd.f32 %v4703_v47, %v4702_v18  ;;  %v6712_v44 = vpop.eup %6711  ;;  %v6094_v33 = vmul.f32 %v6710_v38, %v6092_v25  ;;  %v4521_v27 = vld [vmem:[#allocation5] sm:$0x1]  ;;  %vm6099_vm12 = vweird.f32 %v6710_v38 }
 0x55e   : > { %v6119_v11 = vmul.f32 %v6712_v44, %v6117_v0  ;;  %v4919_v61 = vld [vmem:[#allocation6] sm:$0x1]  ;;  %vm6124_vm14 = vweird.f32 %v6712_v44  ;;  %vm15225_vm15 = vmor %vm6098_vm4, %vm6099_vm12 }
 0x55f   : > { %v4706_v56 = vadd.f32 %v4705_v37, %v4704_v1  ;;  %v6095_v42 = vsub.f32 1.0, %v6094_v33  ;;  %vm6125_vm3 = vmor %vm6123_vm13, %vm6124_vm14 }
 0x560   : > { %v6120_v10 = vsub.f32 1.0, %v6119_v11 }
 0x561   : > { %v4708_v60 = vadd.f32 %v4707_v52, %v4706_v56  ;;  %v6096_v49 = vmul.f32 %v6710_v38, %v6095_v42 }
 0x562   : > { %v6121_v45 = vmul.f32 %v6712_v44, %v6120_v10 }
 0x563   : > { %v4710_v36 = vadd.f32 %v4709_v19, %v4708_v60  ;;  %v6097_v62 = vadd.f32 %v6710_v38, %v6096_v49 }
 0x564   : > { %v6122_v20 = vadd.f32 %v6712_v44, %v6121_v45 }
 0x565   : > { %v4712_v59 = vadd.f32 %v4711_v57, %v4710_v36  ;;  %v6101_v24 = vsel %vm15225_vm15, %v6710_v38, %v6097_v62 }
 0x566   : > { %v6126_v26 = vsel %vm6125_vm3, %v6712_v44, %v6122_v20  ;;  %v6106_v40 = vsel %vm6103_vm0, %v6105_v63, %v6101_v24 }
 0x567   : > { %4713 = vadd.xlane.f32.xlu0 %v4712_v59  ;;  %v6131_v55 = vsel %vm6128_vm1, %v6130_v53, %v6126_v26 }
 0x5be   : > { %v6072_v3 = vpop.xlane.xlu1 %6071 }
 0x5bf   : > { %v6073_v9 = vrot.slane %v6072_v3, 4 }
 0x5c1   : > { %v6074_v34 = vadd.f32 %v6073_v9, %v6072_v3 }
 0x5c3   : > { %v6075_v28 = vrot.slane %v6074_v34, 2 }
 0x5c5   : > { %v6076_v30 = vadd.f32 %v6075_v28, %v6074_v34 }
 0x5c7   : > { %v6077_v21 = vrot.slane %v6076_v30, 1 }
 0x5c9   : > { %v6078_v43 = vadd.f32 %v6077_v21, %v6076_v30 }
 0x5da   : > { %v4714_v51 = vpop.xlane.xlu0 %4713 }
 0x5db   : > { %v4715_v4 = vrot.slane %v4714_v51, 4 }
 0x5dd   : > { %v4716_v13 = vadd.f32 %v4715_v4, %v4714_v51 }
 0x5df   : > { %v4717_v16 = vrot.slane %v4716_v13, 2 }
 0x5e1   : > { %v4718_v41 = vadd.f32 %v4717_v16, %v4716_v13 }
 0x5e3   : > { %v4719_v48 = vrot.slane %v4718_v41, 1 }
 0x5e5   : > { %v4720_v15 = vadd.f32 %v4719_v48, %v4718_v41 }
 0x5e7   : > { %6546 = vpush %v4720_v15 }
 0x5e8   : > { %6548 = vpush %v6078_v43 }
 0x618   : > { %s6547_s25 = spop %6546 }
 0x619   : > { %v4722_v23 = vstv %s6547_s25  ;;  %s6549_s8 = spop %6548 }
 0x61a   : > { %v4723_v46 = vadd.f32 %v4722_v23, %v4521_v27  ;;  %v6080_v54 = vstv %s6549_s8 }
 0x61b   : > { %v6081_v7 = vadd.f32 %v6080_v54, %v4919_v61 }
 0x61c   : > { %4725 = vst.msk [vmem:[#allocation5] sm:$0x1] %vm382_vm6, %v4723_v46 }
 0x61d   : > { %6082 = vst.msk [vmem:[#allocation6] sm:$0x1] %vm382_vm6, %v6081_v7 }
 0x623   : > { %v6090_v17 = vld [vmem:[#allocation5] sm:$0x1] }
 0x624   : > { %v6107_v29 = vmul.f32 %v6106_v40, %v6090_v17  ;;  %v6115_v22 = vld [vmem:[#allocation6] sm:$0x1] }
 0x625   : > { %v6132_v39 = vmul.f32 %v6131_v55, %v6115_v22 }
 0x626   : > { %v6111_v5 = vsel %vm6110_vm7, %v6107_v29, nan }
 0x627   : > { %6113 = vst.msk [vmem:[%s372_s13] sm:$0x1] %vm382_vm6, %v6111_v5  ;;  %v6136_v47 = vsel %vm6135_vm2, %v6132_v39, nan }
 0x628   : > { %6137 = vst.msk [vmem:[%s375_s16] sm:$0x1] %vm382_vm6, %v6136_v47 }
 0x629 PF: > { %s25_s27 = sadd.s32 1, %s6829_s27   ;;  %s17165_s25 = smov %s6825_s26 }
 0x62a   : > { %p22_p7 = scmp.ge.s32.totalorder %s25_s27, 6   ;;  %s17166_s26 = smov %s17168_s0 }
 0x62c   :  { %24 = sbr.rel (!%p22_p7) target bundleno = 8 (0x8), region = 103 }

</bundles_post_ra>
